<compile_context>
chip_gen: v6e
topology: v6e:2x2x1
jax: 0.10.0
libtpu: 0.0.40
codegen_flags: <defaults>
</compile_context>

<pallas_src>
import functools

import jax
import jax.numpy as jnp
from jax import lax
from jax.experimental import pallas as pl
from jax.experimental.pallas import tpu as pltpu


# ----------------------------- helpers -------------------------------------


def _round_up(x, m):
    return ((x + m - 1) // m) * m


def _fold_bn(gamma, beta, mean, var, cpad, eps=1e-5):
    scale = gamma / jnp.sqrt(var + eps)
    bias = beta - mean * scale
    scale = jnp.pad(scale, (0, cpad - scale.shape[0]))
    bias = jnp.pad(bias, (0, cpad - bias.shape[0]))
    return (scale.reshape(1, cpad).astype(jnp.float32),
            bias.reshape(1, cpad).astype(jnp.float32))


def _pick_row_tile(Ho):
    for th in (8, 16, 4, 2):
        if th <= Ho and Ho % th == 0:
            return th
    return Ho


# ----------------------------- Pallas kernel --------------------------------


def _make_kernel(Ho, Wo, Cin_p, Cout_p, stride, TH, has_shortcut):
    s = stride
    R = TH + 2   # conv1 rows per tile (output rows r0-1 .. r0+TH, incl. halo)
    C = Wo + 2   # conv1 cols per tile (output cols -1 .. Wo, incl. zero pad)

    def kernel(xp_ref, w1_ref, s1_ref, b1_ref, w2_ref, s2_ref, b2_ref,
               wsc_ref, ssc_ref, bsc_ref, out_ref, he_ref):
        t = pl.program_id(1)
        r0 = t * TH                     # first real output row of this tile

        # ---- conv1 (3x3, stride=s) over the halo tile + bn1 + relu ---------
        def conv1_tap(dy, dx):
            if s == 1:
                p = xp_ref[pl.ds(r0 + dy, R), pl.ds(dx, C), :]
            else:
                # TODO(synk): strided VMEM slice; a wrapper-side
                # space-to-depth phase split would make these loads
                # contiguous for stride > 1.
                p = xp_ref[pl.ds(r0 * s + dy, R, s), pl.ds(dx, C, s), :]
            return p.reshape(R * C, Cin_p)

        acc1 = jnp.zeros((R * C, Cout_p), jnp.float32)
        for dy in range(3):
            for dx in range(3):
                acc1 = acc1 + jnp.dot(conv1_tap(dy, dx), w1_ref[dy * 3 + dx],
                                      preferred_element_type=jnp.float32)
        h1 = jnp.maximum(acc1 * s1_ref[...] + b1_ref[...], 0.0)
        h1 = h1.reshape(R, C, Cout_p)

        # Zero the halo rows / pad cols that fall outside the valid image so
        # they act as conv2's zero padding.
        row_id = lax.broadcasted_iota(jnp.int32, (R, C, Cout_p), 0) + (r0 - 1)
        col_id = lax.broadcasted_iota(jnp.int32, (R, C, Cout_p), 1)
        valid = ((row_id >= 0) & (row_id < Ho) &
                 (col_id >= 1) & (col_id <= Wo))
        he_ref[...] = jnp.where(valid, h1, 0.0).astype(he_ref.dtype)

        # ---- conv2 (3x3, stride=1, pad=1 via halo tile) + bn2 --------------
        acc2 = jnp.zeros((TH * Wo, Cout_p), jnp.float32)
        for dy in range(3):
            for dx in range(3):
                p = he_ref[dy:dy + TH, dx:dx + Wo, :].reshape(TH * Wo, Cout_p)
                acc2 = acc2 + jnp.dot(p, w2_ref[dy * 3 + dx],
                                      preferred_element_type=jnp.float32)
        out2 = acc2 * s2_ref[...] + b2_ref[...]

        # ---- shortcut (identity, or 1x1 conv + bn) -------------------------
        if s == 1:
            xs = xp_ref[pl.ds(r0 + s + 1, TH), pl.ds(s + 1, Wo), :]
        else:
            xs = xp_ref[pl.ds(r0 * s + s + 1, TH, s), pl.ds(s + 1, Wo, s), :]
        xs = xs.reshape(TH * Wo, Cin_p)
        if has_shortcut:
            sc = jnp.dot(xs, wsc_ref[...], preferred_element_type=jnp.float32)
            sc = sc * ssc_ref[...] + bsc_ref[...]
        else:
            sc = xs.astype(jnp.float32)          # identity (Cin_p == Cout_p)

        # ---- residual add + relu -------------------------------------------
        out = jnp.maximum(out2 + sc, 0.0)
        out_ref[...] = out.reshape(TH, Wo, Cout_p).astype(out_ref.dtype)

    return kernel


# ----------------------------- wrapper --------------------------------------


@functools.partial(jax.jit, static_argnames=("stride",))
def basic_block_forward(x_nchw, params, stride=1):
    N, Cin, H, W = x_nchw.shape
    Cout = params["w1"].shape[0]
    has_shortcut = (stride != 1) or (Cin != Cout)
    s = stride

    Ho = (H - 1) // s + 1
    Wo = (W - 1) // s + 1
    Cin_p = _round_up(Cin, 128)
    Cout_p = _round_up(Cout, 128)
    TH = _pick_row_tile(Ho)
    T = Ho // TH

    # Padded input extents: pad of (s+1) on top/left so the conv1 halo rows /
    # cols (virtual output rows -1..Ho, cols -1..Wo) stay in bounds.
    pad_lo = s + 1
    Hp = Ho * s + s + 3
    Wp = Wo * s + s + 3
    pad_b = Hp - pad_lo - H
    pad_r = Wp - pad_lo - W

    # NCHW -> NHWC, zero pad (spatial + channels to 128), cast to bf16 for MXU.
    # TODO(synk): this transpose/pad is one extra XLA pass over the input; it
    #             could be folded into the kernel's input DMA.
    x = jnp.transpose(x_nchw, (0, 2, 3, 1)).astype(jnp.float32)
    xp = jnp.pad(x, ((0, 0), (pad_lo, pad_b), (pad_lo, pad_r),
                     (0, Cin_p - Cin))).astype(jnp.bfloat16)

    # PyTorch conv weights (Cout, Cin, 3, 3) -> (9, Cin_p, Cout_p) bf16.
    def prep_conv3(w, cinp, coutp):
        co, ci = w.shape[:2]
        w = jnp.transpose(w, (2, 3, 1, 0)).reshape(9, ci, co)
        w = jnp.pad(w, ((0, 0), (0, cinp - ci), (0, coutp - co)))
        return w.astype(jnp.bfloat16)

    w1 = prep_conv3(params["w1"], Cin_p, Cout_p)
    w2 = prep_conv3(params["w2"], Cout_p, Cout_p)

    s1, b1 = _fold_bn(params["bn1_gamma"], params["bn1_beta"],
                      params["bn1_mean"], params["bn1_var"], Cout_p)
    s2, b2 = _fold_bn(params["bn2_gamma"], params["bn2_beta"],
                      params["bn2_mean"], params["bn2_var"], Cout_p)

    if has_shortcut:
        wsc = params["wsc"].reshape(Cout, Cin).T
        wsc = jnp.pad(wsc, ((0, Cin_p - Cin),
                            (0, Cout_p - Cout))).astype(jnp.bfloat16)
        ssc, bsc = _fold_bn(params["bnsc_gamma"], params["bnsc_beta"],
                            params["bnsc_mean"], params["bnsc_var"], Cout_p)
    else:
        wsc = jnp.zeros((Cin_p, Cout_p), jnp.bfloat16)
        ssc = jnp.ones((1, Cout_p), jnp.float32)
        bsc = jnp.zeros((1, Cout_p), jnp.float32)

    kernel = _make_kernel(Ho, Wo, Cin_p, Cout_p, s, TH, has_shortcut)

    def rep(shape):    # full-array block, same block for every grid point
        nd = len(shape)
        return pl.BlockSpec(shape, lambda b, t, _nd=nd: (0,) * _nd)

    out_nhwc = pl.pallas_call(
        kernel,
        out_shape=jax.ShapeDtypeStruct((N, Ho, Wo, Cout_p), jnp.float32),
        grid=(N, T),
        in_specs=[
            # per-image padded input block (re-used across the row-tile axis)
            pl.BlockSpec((None, Hp, Wp, Cin_p), lambda b, t: (b, 0, 0, 0)),
            rep(w1.shape), rep(s1.shape), rep(b1.shape),
            rep(w2.shape), rep(s2.shape), rep(b2.shape),
            rep(wsc.shape), rep(ssc.shape), rep(bsc.shape),
        ],
        out_specs=pl.BlockSpec((None, TH, Wo, Cout_p),
                               lambda b, t: (b, t, 0, 0)),
        scratch_shapes=[pltpu.VMEM((TH + 2, Wo + 2, Cout_p), jnp.bfloat16)],
        compiler_params=pltpu.CompilerParams(
            dimension_semantics=("parallel", "arbitrary")),
    )(xp, w1, s1, b1, w2, s2, b2, wsc, ssc, bsc)

    out = out_nhwc[:, :, :, :Cout]          # drop channel padding
    return jnp.transpose(out, (0, 3, 1, 2))  # NHWC -> NCHW


# ----------------------------- pure-JAX reference ----------------------------
# Reference matches the kernel's mixed precision (bf16 conv operands, f32
# accumulation, f32 BN / ReLU / residual) so the comparison stays tight.


def _reference(x, params, stride):
    q = lambda a: a.astype(jnp.bfloat16).astype(jnp.float32)

    def conv(inp, w, s, pad):
        return lax.conv_general_dilated(
            q(inp), q(w), (s, s), ((pad, pad), (pad, pad)),
            dimension_numbers=("NCHW", "OIHW", "NCHW"),
            precision=lax.Precision.HIGHEST)

    def bn(t, g, b, m, v, eps=1e-5):
        g, b, m, v = (u[None, :, None, None] for u in (g, b, m, v))
        return (t - m) / jnp.sqrt(v + eps) * g + b

    Cout, Cin = params["w1"].shape[:2]
    has_shortcut = (stride != 1) or (Cin != Cout)

    out = jax.nn.relu(bn(conv(x, params["w1"], stride, 1),
                         params["bn1_gamma"], params["bn1_beta"],
                         params["bn1_mean"], params["bn1_var"]))
    out = bn(conv(out, params["w2"], 1, 1),
             params["bn2_gamma"], params["bn2_beta"],
             params["bn2_mean"], params["bn2_var"])
    if has_shortcut:
        sc = bn(conv(x, params["wsc"], stride, 0),
                params["bnsc_gamma"], params["bnsc_beta"],
                params["bnsc_mean"], params["bnsc_var"])
    else:
        sc = q(x)   # kernel reads the identity shortcut from the bf16 input
    return jax.nn.relu(out + sc)


# ----------------------------- main -----------------------------------------


if __name__ == "__main__":
    key = jax.random.PRNGKey(0)

    def make_params(k, in_planes, planes, with_shortcut):
        ks = jax.random.split(k, 16)
        p = {
            "w1": 0.2 * jax.random.normal(ks[0], (planes, in_planes, 3, 3), jnp.float32),
            "bn1_gamma": 1.0 + 0.1 * jax.random.normal(ks[1], (planes,), jnp.float32),
            "bn1_beta": 0.1 * jax.random.normal(ks[2], (planes,), jnp.float32),
            "bn1_mean": 0.05 * jax.random.normal(ks[3], (planes,), jnp.float32),
            "bn1_var": 1.0 + 0.1 * jnp.abs(jax.random.normal(ks[4], (planes,), jnp.float32)),
            "w2": 0.2 * jax.random.normal(ks[5], (planes, planes, 3, 3), jnp.float32),
            "bn2_gamma": 1.0 + 0.1 * jax.random.normal(ks[6], (planes,), jnp.float32),
            "bn2_beta": 0.1 * jax.random.normal(ks[7], (planes,), jnp.float32),
            "bn2_mean": 0.05 * jax.random.normal(ks[8], (planes,), jnp.float32),
            "bn2_var": 1.0 + 0.1 * jnp.abs(jax.random.normal(ks[9], (planes,), jnp.float32)),
        }
        if with_shortcut:
            p.update({
                "wsc": 0.3 * jax.random.normal(ks[10], (planes, in_planes, 1, 1), jnp.float32),
                "bnsc_gamma": 1.0 + 0.1 * jax.random.normal(ks[11], (planes,), jnp.float32),
                "bnsc_beta": 0.1 * jax.random.normal(ks[12], (planes,), jnp.float32),
                "bnsc_mean": 0.05 * jax.random.normal(ks[13], (planes,), jnp.float32),
                "bnsc_var": 1.0 + 0.1 * jnp.abs(jax.random.normal(ks[14], (planes,), jnp.float32)),
            })
        return p

    N, H, W = 2, 16, 16
    k1, k2, kx1, kx2 = jax.random.split(key, 4)

    # Config 1: default BasicBlock (stride=1, in_planes == planes -> identity shortcut).
    params1 = make_params(k1, 4, 4, with_shortcut=False)
    x1 = jax.random.normal(kx1, (N, 4, H, W), jnp.float32)
    out1 = jax.block_until_ready(basic_block_forward(x1, params1, stride=1))
    ref1 = jax.block_until_ready(_reference(x1, params1, 1))
    assert out1.shape == ref1.shape, (out1.shape, ref1.shape)
    err1 = float(jnp.max(jnp.abs(out1 - ref1)))
    assert err1 < 1e-2, f"identity-shortcut block: max abs error {err1}"

    # Config 2: channel-changing block (stride=1, 1x1-conv + BN projection shortcut).
    params2 = make_params(k2, 4, 8, with_shortcut=True)
    x2 = jax.random.normal(kx2, (N, 4, H, W), jnp.float32)
    out2 = jax.block_until_ready(basic_block_forward(x2, params2, stride=1))
    ref2 = jax.block_until_ready(_reference(x2, params2, 1))
    assert out2.shape == ref2.shape, (out2.shape, ref2.shape)
    err2 = float(jnp.max(jnp.abs(out2 - ref2)))
    assert err2 < 1e-2, f"projection-shortcut block: max abs error {err2}"

    print("KERNEL_OK")
</pallas_src>

<mosaic_0001>
module attributes {stable_mosaic.version = 11 : i64} {
  func.func @kernel(%arg0: i32, %arg1: i32, %arg2: memref<1x20x20x128xbf16, #tpu.memory_space<vmem>>, %arg3: memref<9x128x128xbf16, #tpu.memory_space<vmem>>, %arg4: memref<1x128xf32, #tpu.memory_space<vmem>>, %arg5: memref<1x128xf32, #tpu.memory_space<vmem>>, %arg6: memref<9x128x128xbf16, #tpu.memory_space<vmem>>, %arg7: memref<1x128xf32, #tpu.memory_space<vmem>>, %arg8: memref<1x128xf32, #tpu.memory_space<vmem>>, %arg9: memref<128x128xbf16, #tpu.memory_space<vmem>>, %arg10: memref<1x128xf32, #tpu.memory_space<vmem>>, %arg11: memref<1x128xf32, #tpu.memory_space<vmem>>, %arg12: memref<1x8x16x128xf32, #tpu.memory_space<vmem>>, %arg13: memref<10x18x128xbf16, #tpu.memory_space<vmem>>) attributes {dimension_semantics = [#tpu.dimension_semantics<parallel>, #tpu.dimension_semantics<arbitrary>], iteration_bounds = array<i64: 2, 2>, scalar_prefetch = 0 : i64, scratch_operands = 1 : i64, tpu.core_type = #tpu.core_type<tc>, window_params = [{transform_indices = @transform_0, window_bounds = array<i64: 1, 20, 20, 128>}, {pipeline_mode = #tpu.pipeline_mode<synchronous>, transform_indices = @transform_1, window_bounds = array<i64: 9, 128, 128>}, {pipeline_mode = #tpu.pipeline_mode<synchronous>, transform_indices = @transform_2, window_bounds = array<i64: 1, 128>}, {pipeline_mode = #tpu.pipeline_mode<synchronous>, transform_indices = @transform_3, window_bounds = array<i64: 1, 128>}, {pipeline_mode = #tpu.pipeline_mode<synchronous>, transform_indices = @transform_4, window_bounds = array<i64: 9, 128, 128>}, {pipeline_mode = #tpu.pipeline_mode<synchronous>, transform_indices = @transform_5, window_bounds = array<i64: 1, 128>}, {pipeline_mode = #tpu.pipeline_mode<synchronous>, transform_indices = @transform_6, window_bounds = array<i64: 1, 128>}, {pipeline_mode = #tpu.pipeline_mode<synchronous>, transform_indices = @transform_7, window_bounds = array<i64: 128, 128>}, {pipeline_mode = #tpu.pipeline_mode<synchronous>, transform_indices = @transform_8, window_bounds = array<i64: 1, 128>}, {pipeline_mode = #tpu.pipeline_mode<synchronous>, transform_indices = @transform_9, window_bounds = array<i64: 1, 128>}, {transform_indices = @transform_10, window_bounds = array<i64: 1, 8, 16, 128>}]} {
    %c8_i32 = arith.constant 8 : i32
    %0 = arith.muli %arg1, %c8_i32 : i32
    %cst = arith.constant 0.000000e+00 : f32
    %1 = vector.broadcast %cst : f32 to vector<180x128xf32>
    %c0_i32 = arith.constant 0 : i32
    %2 = arith.addi %0, %c0_i32 : i32
    %c0 = arith.constant 0 : index
    %3 = arith.index_cast %2 : i32 to index
    %c0_0 = arith.constant 0 : index
    %c0_1 = arith.constant 0 : index
    %4 = vector.load %arg2[%c0, %3, %c0_0, %c0_1] : memref<1x20x20x128xbf16, #tpu.memory_space<vmem>>, vector<1x10x18x128xbf16>
    %5 = vector.shape_cast %4 : vector<1x10x18x128xbf16> to vector<10x18x128xbf16>
    %6 = vector.shape_cast %5 : vector<10x18x128xbf16> to vector<180x128xbf16>
    %c0_2 = arith.constant 0 : index
    %c0_3 = arith.constant 0 : index
    %c0_4 = arith.constant 0 : index
    %7 = vector.load %arg3[%c0_2, %c0_3, %c0_4] : memref<9x128x128xbf16, #tpu.memory_space<vmem>>, vector<1x128x128xbf16>
    %8 = vector.shape_cast %7 : vector<1x128x128xbf16> to vector<128x128xbf16>
    %cst_5 = arith.constant dense<0.000000e+00> : vector<180x128xf32>
    %9 = tpu.matmul %6, %8, %cst_5 {dimension_numbers = #tpu.dot_dimension_numbers<[1], [0], [0], [1], [0, 0, 1, 1], [], []>} : vector<180x128xbf16>, vector<128x128xbf16>, vector<180x128xf32> -> vector<180x128xf32>
    %10 = arith.addf %1, %9 : vector<180x128xf32>
    %c0_i32_6 = arith.constant 0 : i32
    %11 = arith.addi %0, %c0_i32_6 : i32
    %c0_7 = arith.constant 0 : index
    %12 = arith.index_cast %11 : i32 to index
    %c1 = arith.constant 1 : index
    %c0_8 = arith.constant 0 : index
    %13 = vector.load %arg2[%c0_7, %12, %c1, %c0_8] : memref<1x20x20x128xbf16, #tpu.memory_space<vmem>>, vector<1x10x18x128xbf16>
    %14 = vector.shape_cast %13 : vector<1x10x18x128xbf16> to vector<10x18x128xbf16>
    %15 = vector.shape_cast %14 : vector<10x18x128xbf16> to vector<180x128xbf16>
    %c1_9 = arith.constant 1 : index
    %c0_10 = arith.constant 0 : index
    %c0_11 = arith.constant 0 : index
    %16 = vector.load %arg3[%c1_9, %c0_10, %c0_11] : memref<9x128x128xbf16, #tpu.memory_space<vmem>>, vector<1x128x128xbf16>
    %17 = vector.shape_cast %16 : vector<1x128x128xbf16> to vector<128x128xbf16>
    %cst_12 = arith.constant dense<0.000000e+00> : vector<180x128xf32>
    %18 = tpu.matmul %15, %17, %cst_12 {dimension_numbers = #tpu.dot_dimension_numbers<[1], [0], [0], [1], [0, 0, 1, 1], [], []>} : vector<180x128xbf16>, vector<128x128xbf16>, vector<180x128xf32> -> vector<180x128xf32>
    %19 = arith.addf %10, %18 : vector<180x128xf32>
    %c0_i32_13 = arith.constant 0 : i32
    %20 = arith.addi %0, %c0_i32_13 : i32
    %c0_14 = arith.constant 0 : index
    %21 = arith.index_cast %20 : i32 to index
    %c2 = arith.constant 2 : index
    %c0_15 = arith.constant 0 : index
    %22 = vector.load %arg2[%c0_14, %21, %c2, %c0_15] : memref<1x20x20x128xbf16, #tpu.memory_space<vmem>>, vector<1x10x18x128xbf16>
    %23 = vector.shape_cast %22 : vector<1x10x18x128xbf16> to vector<10x18x128xbf16>
    %24 = vector.shape_cast %23 : vector<10x18x128xbf16> to vector<180x128xbf16>
    %c2_16 = arith.constant 2 : index
    %c0_17 = arith.constant 0 : index
    %c0_18 = arith.constant 0 : index
    %25 = vector.load %arg3[%c2_16, %c0_17, %c0_18] : memref<9x128x128xbf16, #tpu.memory_space<vmem>>, vector<1x128x128xbf16>
    %26 = vector.shape_cast %25 : vector<1x128x128xbf16> to vector<128x128xbf16>
    %cst_19 = arith.constant dense<0.000000e+00> : vector<180x128xf32>
    %27 = tpu.matmul %24, %26, %cst_19 {dimension_numbers = #tpu.dot_dimension_numbers<[1], [0], [0], [1], [0, 0, 1, 1], [], []>} : vector<180x128xbf16>, vector<128x128xbf16>, vector<180x128xf32> -> vector<180x128xf32>
    %28 = arith.addf %19, %27 : vector<180x128xf32>
    %c1_i32 = arith.constant 1 : i32
    %29 = arith.addi %0, %c1_i32 : i32
    %c0_20 = arith.constant 0 : index
    %30 = arith.index_cast %29 : i32 to index
    %c0_21 = arith.constant 0 : index
    %c0_22 = arith.constant 0 : index
    %31 = vector.load %arg2[%c0_20, %30, %c0_21, %c0_22] : memref<1x20x20x128xbf16, #tpu.memory_space<vmem>>, vector<1x10x18x128xbf16>
    %32 = vector.shape_cast %31 : vector<1x10x18x128xbf16> to vector<10x18x128xbf16>
    %33 = vector.shape_cast %32 : vector<10x18x128xbf16> to vector<180x128xbf16>
    %c3 = arith.constant 3 : index
    %c0_23 = arith.constant 0 : index
    %c0_24 = arith.constant 0 : index
    %34 = vector.load %arg3[%c3, %c0_23, %c0_24] : memref<9x128x128xbf16, #tpu.memory_space<vmem>>, vector<1x128x128xbf16>
    %35 = vector.shape_cast %34 : vector<1x128x128xbf16> to vector<128x128xbf16>
    %cst_25 = arith.constant dense<0.000000e+00> : vector<180x128xf32>
    %36 = tpu.matmul %33, %35, %cst_25 {dimension_numbers = #tpu.dot_dimension_numbers<[1], [0], [0], [1], [0, 0, 1, 1], [], []>} : vector<180x128xbf16>, vector<128x128xbf16>, vector<180x128xf32> -> vector<180x128xf32>
    %37 = arith.addf %28, %36 : vector<180x128xf32>
    %c1_i32_26 = arith.constant 1 : i32
    %38 = arith.addi %0, %c1_i32_26 : i32
    %c0_27 = arith.constant 0 : index
    %39 = arith.index_cast %38 : i32 to index
    %c1_28 = arith.constant 1 : index
    %c0_29 = arith.constant 0 : index
    %40 = vector.load %arg2[%c0_27, %39, %c1_28, %c0_29] : memref<1x20x20x128xbf16, #tpu.memory_space<vmem>>, vector<1x10x18x128xbf16>
    %41 = vector.shape_cast %40 : vector<1x10x18x128xbf16> to vector<10x18x128xbf16>
    %42 = vector.shape_cast %41 : vector<10x18x128xbf16> to vector<180x128xbf16>
    %c4 = arith.constant 4 : index
    %c0_30 = arith.constant 0 : index
    %c0_31 = arith.constant 0 : index
    %43 = vector.load %arg3[%c4, %c0_30, %c0_31] : memref<9x128x128xbf16, #tpu.memory_space<vmem>>, vector<1x128x128xbf16>
    %44 = vector.shape_cast %43 : vector<1x128x128xbf16> to vector<128x128xbf16>
    %cst_32 = arith.constant dense<0.000000e+00> : vector<180x128xf32>
    %45 = tpu.matmul %42, %44, %cst_32 {dimension_numbers = #tpu.dot_dimension_numbers<[1], [0], [0], [1], [0, 0, 1, 1], [], []>} : vector<180x128xbf16>, vector<128x128xbf16>, vector<180x128xf32> -> vector<180x128xf32>
    %46 = arith.addf %37, %45 : vector<180x128xf32>
    %c1_i32_33 = arith.constant 1 : i32
    %47 = arith.addi %0, %c1_i32_33 : i32
    %c0_34 = arith.constant 0 : index
    %48 = arith.index_cast %47 : i32 to index
    %c2_35 = arith.constant 2 : index
    %c0_36 = arith.constant 0 : index
    %49 = vector.load %arg2[%c0_34, %48, %c2_35, %c0_36] : memref<1x20x20x128xbf16, #tpu.memory_space<vmem>>, vector<1x10x18x128xbf16>
    %50 = vector.shape_cast %49 : vector<1x10x18x128xbf16> to vector<10x18x128xbf16>
    %51 = vector.shape_cast %50 : vector<10x18x128xbf16> to vector<180x128xbf16>
    %c5 = arith.constant 5 : index
    %c0_37 = arith.constant 0 : index
    %c0_38 = arith.constant 0 : index
    %52 = vector.load %arg3[%c5, %c0_37, %c0_38] : memref<9x128x128xbf16, #tpu.memory_space<vmem>>, vector<1x128x128xbf16>
    %53 = vector.shape_cast %52 : vector<1x128x128xbf16> to vector<128x128xbf16>
    %cst_39 = arith.constant dense<0.000000e+00> : vector<180x128xf32>
    %54 = tpu.matmul %51, %53, %cst_39 {dimension_numbers = #tpu.dot_dimension_numbers<[1], [0], [0], [1], [0, 0, 1, 1], [], []>} : vector<180x128xbf16>, vector<128x128xbf16>, vector<180x128xf32> -> vector<180x128xf32>
    %55 = arith.addf %46, %54 : vector<180x128xf32>
    %c2_i32 = arith.constant 2 : i32
    %56 = arith.addi %0, %c2_i32 : i32
    %c0_40 = arith.constant 0 : index
    %57 = arith.index_cast %56 : i32 to index
    %c0_41 = arith.constant 0 : index
    %c0_42 = arith.constant 0 : index
    %58 = vector.load %arg2[%c0_40, %57, %c0_41, %c0_42] : memref<1x20x20x128xbf16, #tpu.memory_space<vmem>>, vector<1x10x18x128xbf16>
    %59 = vector.shape_cast %58 : vector<1x10x18x128xbf16> to vector<10x18x128xbf16>
    %60 = vector.shape_cast %59 : vector<10x18x128xbf16> to vector<180x128xbf16>
    %c6 = arith.constant 6 : index
    %c0_43 = arith.constant 0 : index
    %c0_44 = arith.constant 0 : index
    %61 = vector.load %arg3[%c6, %c0_43, %c0_44] : memref<9x128x128xbf16, #tpu.memory_space<vmem>>, vector<1x128x128xbf16>
    %62 = vector.shape_cast %61 : vector<1x128x128xbf16> to vector<128x128xbf16>
    %cst_45 = arith.constant dense<0.000000e+00> : vector<180x128xf32>
    %63 = tpu.matmul %60, %62, %cst_45 {dimension_numbers = #tpu.dot_dimension_numbers<[1], [0], [0], [1], [0, 0, 1, 1], [], []>} : vector<180x128xbf16>, vector<128x128xbf16>, vector<180x128xf32> -> vector<180x128xf32>
    %64 = arith.addf %55, %63 : vector<180x128xf32>
    %c2_i32_46 = arith.constant 2 : i32
    %65 = arith.addi %0, %c2_i32_46 : i32
    %c0_47 = arith.constant 0 : index
    %66 = arith.index_cast %65 : i32 to index
    %c1_48 = arith.constant 1 : index
    %c0_49 = arith.constant 0 : index
    %67 = vector.load %arg2[%c0_47, %66, %c1_48, %c0_49] : memref<1x20x20x128xbf16, #tpu.memory_space<vmem>>, vector<1x10x18x128xbf16>
    %68 = vector.shape_cast %67 : vector<1x10x18x128xbf16> to vector<10x18x128xbf16>
    %69 = vector.shape_cast %68 : vector<10x18x128xbf16> to vector<180x128xbf16>
    %c7 = arith.constant 7 : index
    %c0_50 = arith.constant 0 : index
    %c0_51 = arith.constant 0 : index
    %70 = vector.load %arg3[%c7, %c0_50, %c0_51] : memref<9x128x128xbf16, #tpu.memory_space<vmem>>, vector<1x128x128xbf16>
    %71 = vector.shape_cast %70 : vector<1x128x128xbf16> to vector<128x128xbf16>
    %cst_52 = arith.constant dense<0.000000e+00> : vector<180x128xf32>
    %72 = tpu.matmul %69, %71, %cst_52 {dimension_numbers = #tpu.dot_dimension_numbers<[1], [0], [0], [1], [0, 0, 1, 1], [], []>} : vector<180x128xbf16>, vector<128x128xbf16>, vector<180x128xf32> -> vector<180x128xf32>
    %73 = arith.addf %64, %72 : vector<180x128xf32>
    %c2_i32_53 = arith.constant 2 : i32
    %74 = arith.addi %0, %c2_i32_53 : i32
    %c0_54 = arith.constant 0 : index
    %75 = arith.index_cast %74 : i32 to index
    %c2_55 = arith.constant 2 : index
    %c0_56 = arith.constant 0 : index
    %76 = vector.load %arg2[%c0_54, %75, %c2_55, %c0_56] : memref<1x20x20x128xbf16, #tpu.memory_space<vmem>>, vector<1x10x18x128xbf16>
    %77 = vector.shape_cast %76 : vector<1x10x18x128xbf16> to vector<10x18x128xbf16>
    %78 = vector.shape_cast %77 : vector<10x18x128xbf16> to vector<180x128xbf16>
    %c8 = arith.constant 8 : index
    %c0_57 = arith.constant 0 : index
    %c0_58 = arith.constant 0 : index
    %79 = vector.load %arg3[%c8, %c0_57, %c0_58] : memref<9x128x128xbf16, #tpu.memory_space<vmem>>, vector<1x128x128xbf16>
    %80 = vector.shape_cast %79 : vector<1x128x128xbf16> to vector<128x128xbf16>
    %cst_59 = arith.constant dense<0.000000e+00> : vector<180x128xf32>
    %81 = tpu.matmul %78, %80, %cst_59 {dimension_numbers = #tpu.dot_dimension_numbers<[1], [0], [0], [1], [0, 0, 1, 1], [], []>} : vector<180x128xbf16>, vector<128x128xbf16>, vector<180x128xf32> -> vector<180x128xf32>
    %82 = arith.addf %73, %81 : vector<180x128xf32>
    %c0_60 = arith.constant 0 : index
    %c0_61 = arith.constant 0 : index
    %83 = vector.load %arg4[%c0_60, %c0_61] : memref<1x128xf32, #tpu.memory_space<vmem>>, vector<1x128xf32>
    %84 = vector.broadcast %83 : vector<1x128xf32> to vector<180x128xf32>
    %85 = arith.mulf %82, %84 : vector<180x128xf32>
    %c0_62 = arith.constant 0 : index
    %c0_63 = arith.constant 0 : index
    %86 = vector.load %arg5[%c0_62, %c0_63] : memref<1x128xf32, #tpu.memory_space<vmem>>, vector<1x128xf32>
    %87 = vector.broadcast %86 : vector<1x128xf32> to vector<180x128xf32>
    %88 = arith.addf %85, %87 : vector<180x128xf32>
    %cst_64 = arith.constant 0.000000e+00 : f32
    %89 = vector.broadcast %cst_64 : f32 to vector<180x128xf32>
    %90 = arith.maximumf %88, %89 : vector<180x128xf32>
    %91 = vector.shape_cast %90 : vector<180x128xf32> to vector<10x18x128xf32>
    %92 = tpu.iota {dimensions = array<i32: 0>} : vector<10x18x128xi32>
    %c1_i32_65 = arith.constant 1 : i32
    %93 = arith.subi %0, %c1_i32_65 : i32
    %94 = vector.broadcast %93 : i32 to vector<10x18x128xi32>
    %95 = arith.addi %92, %94 : vector<10x18x128xi32>
    %96 = tpu.iota {dimensions = array<i32: 1>} : vector<10x18x128xi32>
    %c0_i32_66 = arith.constant 0 : i32
    %97 = vector.broadcast %c0_i32_66 : i32 to vector<10x18x128xi32>
    %98 = arith.cmpi sge, %95, %97 : vector<10x18x128xi32>
    %c16_i32 = arith.constant 16 : i32
    %99 = vector.broadcast %c16_i32 : i32 to vector<10x18x128xi32>
    %100 = arith.cmpi slt, %95, %99 : vector<10x18x128xi32>
    %101 = arith.andi %98, %100 : vector<10x18x128xi1>
    %c1_i32_67 = arith.constant 1 : i32
    %102 = vector.broadcast %c1_i32_67 : i32 to vector<10x18x128xi32>
    %103 = arith.cmpi sge, %96, %102 : vector<10x18x128xi32>
    %104 = arith.andi %101, %103 : vector<10x18x128xi1>
    %c16_i32_68 = arith.constant 16 : i32
    %105 = vector.broadcast %c16_i32_68 : i32 to vector<10x18x128xi32>
    %106 = arith.cmpi sle, %96, %105 : vector<10x18x128xi32>
    %107 = arith.andi %104, %106 : vector<10x18x128xi1>
    %cst_69 = arith.constant 0.000000e+00 : f32
    %108 = vector.broadcast %cst_69 : f32 to vector<10x18x128xf32>
    %109 = arith.select %107, %91, %108 : vector<10x18x128xi1>, vector<10x18x128xf32>
    %110 = arith.truncf %109 : vector<10x18x128xf32> to vector<10x18x128xbf16>
    %c0_70 = arith.constant 0 : index
    %c0_71 = arith.constant 0 : index
    %c0_72 = arith.constant 0 : index
    %111 = vector.load %arg13[%c0_70, %c0_71, %c0_72] : memref<10x18x128xbf16, #tpu.memory_space<vmem>>, vector<10x18x128xbf16>
    tpu.vector_store %arg13[%c0_70, %c0_71, %c0_72], %110 {strides = array<i32>} : memref<10x18x128xbf16, #tpu.memory_space<vmem>>, vector<10x18x128xbf16>,
    %cst_73 = arith.constant 0.000000e+00 : f32
    %112 = vector.broadcast %cst_73 : f32 to vector<128x128xf32>
    %c0_74 = arith.constant 0 : index
    %c0_75 = arith.constant 0 : index
    %c0_76 = arith.constant 0 : index
    %113 = vector.load %arg13[%c0_74, %c0_75, %c0_76] : memref<10x18x128xbf16, #tpu.memory_space<vmem>>, vector<8x16x128xbf16>
    %114 = vector.shape_cast %113 : vector<8x16x128xbf16> to vector<128x128xbf16>
    %c0_77 = arith.constant 0 : index
    %c0_78 = arith.constant 0 : index
    %c0_79 = arith.constant 0 : index
    %115 = vector.load %arg6[%c0_77, %c0_78, %c0_79] : memref<9x128x128xbf16, #tpu.memory_space<vmem>>, vector<1x128x128xbf16>
    %116 = vector.shape_cast %115 : vector<1x128x128xbf16> to vector<128x128xbf16>
    %cst_80 = arith.constant dense<0.000000e+00> : vector<128x128xf32>
    %117 = tpu.matmul %114, %116, %cst_80 {dimension_numbers = #tpu.dot_dimension_numbers<[1], [0], [0], [1], [0, 0, 1, 1], [], []>} : vector<128x128xbf16>, vector<128x128xbf16>, vector<128x128xf32> -> vector<128x128xf32>
    %118 = arith.addf %112, %117 : vector<128x128xf32>
    %c0_81 = arith.constant 0 : index
    %c1_82 = arith.constant 1 : index
    %c0_83 = arith.constant 0 : index
    %119 = vector.load %arg13[%c0_81, %c1_82, %c0_83] : memref<10x18x128xbf16, #tpu.memory_space<vmem>>, vector<8x16x128xbf16>
    %120 = vector.shape_cast %119 : vector<8x16x128xbf16> to vector<128x128xbf16>
    %c1_84 = arith.constant 1 : index
    %c0_85 = arith.constant 0 : index
    %c0_86 = arith.constant 0 : index
    %121 = vector.load %arg6[%c1_84, %c0_85, %c0_86] : memref<9x128x128xbf16, #tpu.memory_space<vmem>>, vector<1x128x128xbf16>
    %122 = vector.shape_cast %121 : vector<1x128x128xbf16> to vector<128x128xbf16>
    %cst_87 = arith.constant dense<0.000000e+00> : vector<128x128xf32>
    %123 = tpu.matmul %120, %122, %cst_87 {dimension_numbers = #tpu.dot_dimension_numbers<[1], [0], [0], [1], [0, 0, 1, 1], [], []>} : vector<128x128xbf16>, vector<128x128xbf16>, vector<128x128xf32> -> vector<128x128xf32>
    %124 = arith.addf %118, %123 : vector<128x128xf32>
    %c0_88 = arith.constant 0 : index
    %c2_89 = arith.constant 2 : index
    %c0_90 = arith.constant 0 : index
    %125 = vector.load %arg13[%c0_88, %c2_89, %c0_90] : memref<10x18x128xbf16, #tpu.memory_space<vmem>>, vector<8x16x128xbf16>
    %126 = vector.shape_cast %125 : vector<8x16x128xbf16> to vector<128x128xbf16>
    %c2_91 = arith.constant 2 : index
    %c0_92 = arith.constant 0 : index
    %c0_93 = arith.constant 0 : index
    %127 = vector.load %arg6[%c2_91, %c0_92, %c0_93] : memref<9x128x128xbf16, #tpu.memory_space<vmem>>, vector<1x128x128xbf16>
    %128 = vector.shape_cast %127 : vector<1x128x128xbf16> to vector<128x128xbf16>
    %cst_94 = arith.constant dense<0.000000e+00> : vector<128x128xf32>
    %129 = tpu.matmul %126, %128, %cst_94 {dimension_numbers = #tpu.dot_dimension_numbers<[1], [0], [0], [1], [0, 0, 1, 1], [], []>} : vector<128x128xbf16>, vector<128x128xbf16>, vector<128x128xf32> -> vector<128x128xf32>
    %130 = arith.addf %124, %129 : vector<128x128xf32>
    %c1_95 = arith.constant 1 : index
    %c0_96 = arith.constant 0 : index
    %c0_97 = arith.constant 0 : index
    %131 = vector.load %arg13[%c1_95, %c0_96, %c0_97] : memref<10x18x128xbf16, #tpu.memory_space<vmem>>, vector<8x16x128xbf16>
    %132 = vector.shape_cast %131 : vector<8x16x128xbf16> to vector<128x128xbf16>
    %c3_98 = arith.constant 3 : index
    %c0_99 = arith.constant 0 : index
    %c0_100 = arith.constant 0 : index
    %133 = vector.load %arg6[%c3_98, %c0_99, %c0_100] : memref<9x128x128xbf16, #tpu.memory_space<vmem>>, vector<1x128x128xbf16>
    %134 = vector.shape_cast %133 : vector<1x128x128xbf16> to vector<128x128xbf16>
    %cst_101 = arith.constant dense<0.000000e+00> : vector<128x128xf32>
    %135 = tpu.matmul %132, %134, %cst_101 {dimension_numbers = #tpu.dot_dimension_numbers<[1], [0], [0], [1], [0, 0, 1, 1], [], []>} : vector<128x128xbf16>, vector<128x128xbf16>, vector<128x128xf32> -> vector<128x128xf32>
    %136 = arith.addf %130, %135 : vector<128x128xf32>
    %c1_102 = arith.constant 1 : index
    %c1_103 = arith.constant 1 : index
    %c0_104 = arith.constant 0 : index
    %137 = vector.load %arg13[%c1_102, %c1_103, %c0_104] : memref<10x18x128xbf16, #tpu.memory_space<vmem>>, vector<8x16x128xbf16>
    %138 = vector.shape_cast %137 : vector<8x16x128xbf16> to vector<128x128xbf16>
    %c4_105 = arith.constant 4 : index
    %c0_106 = arith.constant 0 : index
    %c0_107 = arith.constant 0 : index
    %139 = vector.load %arg6[%c4_105, %c0_106, %c0_107] : memref<9x128x128xbf16, #tpu.memory_space<vmem>>, vector<1x128x128xbf16>
    %140 = vector.shape_cast %139 : vector<1x128x128xbf16> to vector<128x128xbf16>
    %cst_108 = arith.constant dense<0.000000e+00> : vector<128x128xf32>
    %141 = tpu.matmul %138, %140, %cst_108 {dimension_numbers = #tpu.dot_dimension_numbers<[1], [0], [0], [1], [0, 0, 1, 1], [], []>} : vector<128x128xbf16>, vector<128x128xbf16>, vector<128x128xf32> -> vector<128x128xf32>
    %142 = arith.addf %136, %141 : vector<128x128xf32>
    %c1_109 = arith.constant 1 : index
    %c2_110 = arith.constant 2 : index
    %c0_111 = arith.constant 0 : index
    %143 = vector.load %arg13[%c1_109, %c2_110, %c0_111] : memref<10x18x128xbf16, #tpu.memory_space<vmem>>, vector<8x16x128xbf16>
    %144 = vector.shape_cast %143 : vector<8x16x128xbf16> to vector<128x128xbf16>
    %c5_112 = arith.constant 5 : index
    %c0_113 = arith.constant 0 : index
    %c0_114 = arith.constant 0 : index
    %145 = vector.load %arg6[%c5_112, %c0_113, %c0_114] : memref<9x128x128xbf16, #tpu.memory_space<vmem>>, vector<1x128x128xbf16>
    %146 = vector.shape_cast %145 : vector<1x128x128xbf16> to vector<128x128xbf16>
    %cst_115 = arith.constant dense<0.000000e+00> : vector<128x128xf32>
    %147 = tpu.matmul %144, %146, %cst_115 {dimension_numbers = #tpu.dot_dimension_numbers<[1], [0], [0], [1], [0, 0, 1, 1], [], []>} : vector<128x128xbf16>, vector<128x128xbf16>, vector<128x128xf32> -> vector<128x128xf32>
    %148 = arith.addf %142, %147 : vector<128x128xf32>
    %c2_116 = arith.constant 2 : index
    %c0_117 = arith.constant 0 : index
    %c0_118 = arith.constant 0 : index
    %149 = vector.load %arg13[%c2_116, %c0_117, %c0_118] : memref<10x18x128xbf16, #tpu.memory_space<vmem>>, vector<8x16x128xbf16>
    %150 = vector.shape_cast %149 : vector<8x16x128xbf16> to vector<128x128xbf16>
    %c6_119 = arith.constant 6 : index
    %c0_120 = arith.constant 0 : index
    %c0_121 = arith.constant 0 : index
    %151 = vector.load %arg6[%c6_119, %c0_120, %c0_121] : memref<9x128x128xbf16, #tpu.memory_space<vmem>>, vector<1x128x128xbf16>
    %152 = vector.shape_cast %151 : vector<1x128x128xbf16> to vector<128x128xbf16>
    %cst_122 = arith.constant dense<0.000000e+00> : vector<128x128xf32>
    %153 = tpu.matmul %150, %152, %cst_122 {dimension_numbers = #tpu.dot_dimension_numbers<[1], [0], [0], [1], [0, 0, 1, 1], [], []>} : vector<128x128xbf16>, vector<128x128xbf16>, vector<128x128xf32> -> vector<128x128xf32>
    %154 = arith.addf %148, %153 : vector<128x128xf32>
    %c2_123 = arith.constant 2 : index
    %c1_124 = arith.constant 1 : index
    %c0_125 = arith.constant 0 : index
    %155 = vector.load %arg13[%c2_123, %c1_124, %c0_125] : memref<10x18x128xbf16, #tpu.memory_space<vmem>>, vector<8x16x128xbf16>
    %156 = vector.shape_cast %155 : vector<8x16x128xbf16> to vector<128x128xbf16>
    %c7_126 = arith.constant 7 : index
    %c0_127 = arith.constant 0 : index
    %c0_128 = arith.constant 0 : index
    %157 = vector.load %arg6[%c7_126, %c0_127, %c0_128] : memref<9x128x128xbf16, #tpu.memory_space<vmem>>, vector<1x128x128xbf16>
    %158 = vector.shape_cast %157 : vector<1x128x128xbf16> to vector<128x128xbf16>
    %cst_129 = arith.constant dense<0.000000e+00> : vector<128x128xf32>
    %159 = tpu.matmul %156, %158, %cst_129 {dimension_numbers = #tpu.dot_dimension_numbers<[1], [0], [0], [1], [0, 0, 1, 1], [], []>} : vector<128x128xbf16>, vector<128x128xbf16>, vector<128x128xf32> -> vector<128x128xf32>
    %160 = arith.addf %154, %159 : vector<128x128xf32>
    %c2_130 = arith.constant 2 : index
    %c2_131 = arith.constant 2 : index
    %c0_132 = arith.constant 0 : index
    %161 = vector.load %arg13[%c2_130, %c2_131, %c0_132] : memref<10x18x128xbf16, #tpu.memory_space<vmem>>, vector<8x16x128xbf16>
    %162 = vector.shape_cast %161 : vector<8x16x128xbf16> to vector<128x128xbf16>
    %c8_133 = arith.constant 8 : index
    %c0_134 = arith.constant 0 : index
    %c0_135 = arith.constant 0 : index
    %163 = vector.load %arg6[%c8_133, %c0_134, %c0_135] : memref<9x128x128xbf16, #tpu.memory_space<vmem>>, vector<1x128x128xbf16>
    %164 = vector.shape_cast %163 : vector<1x128x128xbf16> to vector<128x128xbf16>
    %cst_136 = arith.constant dense<0.000000e+00> : vector<128x128xf32>
    %165 = tpu.matmul %162, %164, %cst_136 {dimension_numbers = #tpu.dot_dimension_numbers<[1], [0], [0], [1], [0, 0, 1, 1], [], []>} : vector<128x128xbf16>, vector<128x128xbf16>, vector<128x128xf32> -> vector<128x128xf32>
    %166 = arith.addf %160, %165 : vector<128x128xf32>
    %c0_137 = arith.constant 0 : index
    %c0_138 = arith.constant 0 : index
    %167 = vector.load %arg7[%c0_137, %c0_138] : memref<1x128xf32, #tpu.memory_space<vmem>>, vector<1x128xf32>
    %168 = vector.broadcast %167 : vector<1x128xf32> to vector<128x128xf32>
    %169 = arith.mulf %166, %168 : vector<128x128xf32>
    %c0_139 = arith.constant 0 : index
    %c0_140 = arith.constant 0 : index
    %170 = vector.load %arg8[%c0_139, %c0_140] : memref<1x128xf32, #tpu.memory_space<vmem>>, vector<1x128xf32>
    %171 = vector.broadcast %170 : vector<1x128xf32> to vector<128x128xf32>
    %172 = arith.addf %169, %171 : vector<128x128xf32>
    %c1_i32_141 = arith.constant 1 : i32
    %173 = arith.addi %0, %c1_i32_141 : i32
    %c1_i32_142 = arith.constant 1 : i32
    %174 = arith.addi %173, %c1_i32_142 : i32
    %c0_143 = arith.constant 0 : index
    %175 = arith.index_cast %174 : i32 to index
    %c2_144 = arith.constant 2 : index
    %c0_145 = arith.constant 0 : index
    %176 = vector.load %arg2[%c0_143, %175, %c2_144, %c0_145] : memref<1x20x20x128xbf16, #tpu.memory_space<vmem>>, vector<1x8x16x128xbf16>
    %177 = vector.shape_cast %176 : vector<1x8x16x128xbf16> to vector<8x16x128xbf16>
    %178 = vector.shape_cast %177 : vector<8x16x128xbf16> to vector<128x128xbf16>
    %179 = arith.extf %178 : vector<128x128xbf16> to vector<128x128xf32>
    %180 = arith.addf %172, %179 : vector<128x128xf32>
    %cst_146 = arith.constant 0.000000e+00 : f32
    %181 = vector.broadcast %cst_146 : f32 to vector<128x128xf32>
    %182 = arith.maximumf %180, %181 : vector<128x128xf32>
    %183 = vector.shape_cast %182 : vector<128x128xf32> to vector<8x16x128xf32>
    %c0_147 = arith.constant 0 : index
    %c0_148 = arith.constant 0 : index
    %c0_149 = arith.constant 0 : index
    %c0_150 = arith.constant 0 : index
    %184 = vector.load %arg12[%c0_147, %c0_148, %c0_149, %c0_150] : memref<1x8x16x128xf32, #tpu.memory_space<vmem>>, vector<1x8x16x128xf32>
    %185 = vector.shape_cast %184 : vector<1x8x16x128xf32> to vector<8x16x128xf32>
    %186 = vector.shape_cast %183 : vector<8x16x128xf32> to vector<1x8x16x128xf32>
    tpu.vector_store %arg12[%c0_147, %c0_148, %c0_149, %c0_150], %186 {strides = array<i32>} : memref<1x8x16x128xf32, #tpu.memory_space<vmem>>, vector<1x8x16x128xf32>,
    return
  }
  func.func @transform_0(%arg0: i32, %arg1: i32) -> (i32, i32, i32, i32) {
    %c0_i32 = arith.constant 0 : i32
    %c0_i32_0 = arith.constant 0 : i32
    %c0_i32_1 = arith.constant 0 : i32
    %c0_i32_2 = arith.constant 0 : i32
    return %arg0, %c0_i32, %c0_i32_0, %c0_i32_1 : i32, i32, i32, i32
  }
  func.func @transform_1(%arg0: i32, %arg1: i32) -> (i32, i32, i32) {
    %c0_i32 = arith.constant 0 : i32
    %c0_i32_0 = arith.constant 0 : i32
    %c0_i32_1 = arith.constant 0 : i32
    %c0_i32_2 = arith.constant 0 : i32
    return %c0_i32, %c0_i32_0, %c0_i32_1 : i32, i32, i32
  }
  func.func @transform_2(%arg0: i32, %arg1: i32) -> (i32, i32) {
    %c0_i32 = arith.constant 0 : i32
    %c0_i32_0 = arith.constant 0 : i32
    %c0_i32_1 = arith.constant 0 : i32
    return %c0_i32, %c0_i32_0 : i32, i32
  }
  func.func @transform_3(%arg0: i32, %arg1: i32) -> (i32, i32) {
    %c0_i32 = arith.constant 0 : i32
    %c0_i32_0 = arith.constant 0 : i32
    %c0_i32_1 = arith.constant 0 : i32
    return %c0_i32, %c0_i32_0 : i32, i32
  }
  func.func @transform_4(%arg0: i32, %arg1: i32) -> (i32, i32, i32) {
    %c0_i32 = arith.constant 0 : i32
    %c0_i32_0 = arith.constant 0 : i32
    %c0_i32_1 = arith.constant 0 : i32
    %c0_i32_2 = arith.constant 0 : i32
    return %c0_i32, %c0_i32_0, %c0_i32_1 : i32, i32, i32
  }
  func.func @transform_5(%arg0: i32, %arg1: i32) -> (i32, i32) {
    %c0_i32 = arith.constant 0 : i32
    %c0_i32_0 = arith.constant 0 : i32
    %c0_i32_1 = arith.constant 0 : i32
    return %c0_i32, %c0_i32_0 : i32, i32
  }
  func.func @transform_6(%arg0: i32, %arg1: i32) -> (i32, i32) {
    %c0_i32 = arith.constant 0 : i32
    %c0_i32_0 = arith.constant 0 : i32
    %c0_i32_1 = arith.constant 0 : i32
    return %c0_i32, %c0_i32_0 : i32, i32
  }
  func.func @transform_7(%arg0: i32, %arg1: i32) -> (i32, i32) {
    %c0_i32 = arith.constant 0 : i32
    %c0_i32_0 = arith.constant 0 : i32
    %c0_i32_1 = arith.constant 0 : i32
    return %c0_i32, %c0_i32_0 : i32, i32
  }
  func.func @transform_8(%arg0: i32, %arg1: i32) -> (i32, i32) {
    %c0_i32 = arith.constant 0 : i32
    %c0_i32_0 = arith.constant 0 : i32
    %c0_i32_1 = arith.constant 0 : i32
    return %c0_i32, %c0_i32_0 : i32, i32
  }
  func.func @transform_9(%arg0: i32, %arg1: i32) -> (i32, i32) {
    %c0_i32 = arith.constant 0 : i32
    %c0_i32_0 = arith.constant 0 : i32
    %c0_i32_1 = arith.constant 0 : i32
    return %c0_i32, %c0_i32_0 : i32, i32
  }
  func.func @transform_10(%arg0: i32, %arg1: i32) -> (i32, i32, i32, i32) {
    %c0_i32 = arith.constant 0 : i32
    %c0_i32_0 = arith.constant 0 : i32
    %c0_i32_1 = arith.constant 0 : i32
    return %arg0, %arg1, %c0_i32, %c0_i32_0 : i32, i32, i32, i32
  }
}

</mosaic_0001>

<bundles_post_ra>
// kernel: basic_block_forward.1
= control target key start
LH: loop header
LB: loop body
LE: loop exit
PB: predicated region body
PF: predicated region fallthrough
CT: control target
= control target key end

     0   :  { %s22786_s13 = smov 0   ;;  %s22788_s14 = smov 0   ;;  %s28159_s0 = inlined_call_operand.vmem [shape: bf16[2,20,20,128], index: 0, kind: input, shape index: {}]   ;;  %s28160_s1 = inlined_call_operand.vmem [shape: bf16[9,128,128], index: 1, kind: input, shape index: {}]   ;;  %s28161_s2 = inlined_call_operand.vmem [shape: f32[1,128], index: 2, kind: input, shape index: {}]   ;;  %s28162_s3 = inlined_call_operand.vmem [shape: f32[1,128], index: 3, kind: input, shape index: {}]   ;;  %s28163_s4 = inlined_call_operand.vmem [shape: bf16[9,128,128], index: 4, kind: input, shape index: {}]   ;;  %s28164_s5 = inlined_call_operand.vmem [shape: f32[1,128], index: 5, kind: input, shape index: {}]   ;;  %s28165_s6 = inlined_call_operand.vmem [shape: f32[1,128], index: 6, kind: input, shape index: {}]   ;;  %s28166_s7 = inlined_call_operand.vmem [shape: bf16[128,128], index: 7, kind: input, shape index: {}]   ;;  %s28167_s8 = inlined_call_operand.vmem [shape: f32[1,128], index: 8, kind: input, shape index: {}]   ;;  %s28168_s9 = inlined_call_operand.vmem [shape: f32[1,128], index: 9, kind: input, shape index: {}]   ;;  %s28169_s10 = inlined_call_operand.vmem [shape: f32[2,16,16,128], index: 10, kind: output, shape index: {}]  }
   0x1   :  { %s22790_s15 = smov 0   ;;  %s22792_s16 = smov 0  }
   0x2   :  { %s22794_s17 = smov 0  }
   0x3 LB: > { %s29_s7 = sadd.s32 1, %s22719_s15  ;;  %s32_s8 = sadd.s32 1, %s22723_s16  ;;  %s22727_s17 = sphi %s22794_s17, %s20_s17   ;;  %s22723_s16 = sphi %s22792_s16, %s28521_s16   ;;  %s22719_s15 = sphi %s22790_s15, %s28520_s15   ;;  %s22715_s14 = sphi %s22788_s14, %s28519_s14   ;;  %s22711_s13 = sphi %s22786_s13, %s28518_s13  }
   0x4   : > { %p30_p0 = scmp.ge.s32.totalorder %s29_s7, 2  ;;  %p20086_p1 = scmp.ge.s32.totalorder %s22727_s17, 1 }
   0x5   : > { %p326_p2 = scmp.lt.s32.totalorder %s22727_s17, 5 }
   0x6   : > { %s28523_s7 = smov (%p30_p0, %s29_s7), 0  ;;  %s28525_s8 = smov (!%p30_p0, %s32_s8), %s22723_s16 }
   0x7   : > { %p327_p3 = pnand %p20086_p1, %p326_p2  ;;  %p34_p4 = scmp.ge.s32.totalorder %s28525_s8, 2 }
   0x9   : > { %s28527_s8 = smov (%p34_p4, %s28525_s8), 0  ;;  %330 = sbr.rel (%p327_p3) target bundleno = 1385 (0x569), region = 60 }
   0xe   : > { %v22515_v0 = vld [vmem:[%s28160_s1 + $0x78] sm:$0xff]   ;;  %p369_p5 = scmp.lt.s32.totalorder %s22715_s14, 1  ;;  %v22517_v2 = vld [vmem:[%s28160_s1 + $0x70] sm:$0xff]   ;;  %v22519_v4 = vld [vmem:[%s28160_s1 + $0x68] sm:$0xff]   ;;  %s21424_s18 = smul.u32 96, %s22711_s13  ;;  %v461_v8 = vlaneseq }
   0xf   : > { %v22516_v1 = vld [vmem:[%s28160_s1 + $0x38] sm:$0xff]   ;;  %21808 = vmatprep.subr.bf16.mxu0 %v22515_v0  ;;  %v22518_v3 = vld [vmem:[%s28160_s1 + $0x30] sm:$0xff]   ;;  %v22520_v5 = vld [vmem:[%s28160_s1 + $0x28] sm:$0xff]   ;;  %v22729_v16 = vmov 1966171168   ;;  %s26338_s28 = sshll.u32 %s22711_s13, 3 }
  0x10   : > { %s28529_s14 = smov (!%p369_p5, %s22715_s14), 1  ;;  %21848 = vmatprep.subr.bf16.mxu1 %v22516_v1  ;;  %21809 = vmatpush3.bf16.msra.mxu0 %v22515_v0  ;;  %v22521_v6 = vld [vmem:[%s28160_s1 + $0x60] sm:$0xff]   ;;  %v22523_v9 = vld [vmem:[%s28160_s1 + $0x58] sm:$0xff]   ;;  %v22525_v11 = vld [vmem:[%s28160_s1 + $0x50] sm:$0xff]   ;;  %v22863_v13 = vshrl.u32 %v461_v8, 7  ;;  %v459_v17 = vunpack.c.l.s4 %v22729_v16  ;;  %s21061_s13 = sadd.s32 4294967295, %s26338_s28 }
  0x11   : > { %21849 = vmatpush3.bf16.msra.mxu1 %v22516_v1  ;;  %21810 = vmatprep.subr.bf16.mxu0 %v22517_v2  ;;  %s22472_s29 = smul.u32 240, %s28529_s14  ;;  %v22522_v7 = vld [vmem:[%s28160_s1 + $0x20] sm:$0xff]   ;;  %v22524_v10 = vld [vmem:[%s28160_s1 + $0x18] sm:$0xff]   ;;  %v22526_v12 = vld [vmem:[%s28160_s1 + $0x10] sm:$0xff]   ;;  %vm1326_vm0 = vsmask.f32 256 }
  0x12   : > { %21850 = vmatprep.subr.bf16.mxu1 %v22518_v3  ;;  %28173 = vst [vmem:[#allocation3_spill] sm:$0xff] %v22863_v13  ;;  %vm1327_vm1 = vsmask.f32 1284  ;;  %v460_v20 = vunpack.c.0.s8 %v459_v17  ;;  %vm1329_vm3 = vsmask.f32 2312  ;;  %v22527_v22 = vld [vmem:[%s28160_s1 + $0x48] sm:$0xff]  }
  0x13   : > { %s373_s21 = scalar_lea.vmem %s28159_s0, %s22472_s29  ;;  %vm1328_vm2 = vmor %vm1326_vm0, %vm1327_vm1  ;;  %vm1331_vm4 = vsmask.f32 3340  ;;  %v22528_v23 = vld [vmem:[%s28160_s1 + $0x8] sm:$0xff]   ;;  %vm1333_vm6 = vsmask.f32 4368  ;;  %v22529_v28 = vld [vmem:[%s28160_s1 + $0x40] sm:$0xff]  }
  0x14   : > { %21811 = vmatpush3.bf16.msra.mxu0 %v22517_v2  ;;  %s22855_s26 = scalar_lea.vmem %s373_s21, %s21424_s18  ;;  %vm1330_vm5 = vmor %vm1328_vm2, %vm1329_vm3  ;;  %vm1335_vm7 = vsmask.f32 5396  ;;  %v22877_v24 = vsub.s32 %v460_v20, %v22863_v13  ;;  %vm1337_vm9 = vsmask.f32 6424  ;;  %vm1339_vm11 = vsmask.f32 7452 }
  0x15   : > { %21851 = vmatpush3.bf16.msra.mxu1 %v22518_v3  ;;  %21812 = vmatprep.subr.bf16.mxu0 %v22519_v4  ;;  %v20095_v14 = vld.sshfl [vmem:[%s22855_s26] sm:$0x33 pattern:$0x75316420]  ;;  %vm1332_vm8 = vmor %vm1330_vm5, %vm1331_vm4  ;;  %v22943_v58 = vld [vmem:[%s28160_s1 + $0xb8] sm:$0xff]   ;;  %p377_p6 = scmp.lt.s32.totalorder %s26338_s28, 15 }
  0x16   : > { %21852 = vmatprep.subr.bf16.mxu1 %v22520_v5  ;;  %v20096_v15 = vld.sshfl [vmem:[%s22855_s26 + $0x4] sm:$0x33 pattern:$0x75316420]  ;;  %v457_v18 = vcombine.high %v20095_v14, %v20095_v14  ;;  %vm1334_vm10 = vmor %vm1332_vm8, %vm1333_vm6  ;;  %v22886_v29 = vrot.slane %v20095_v14, %v22877_v24  ;;  %v22950_v63 = vld [vmem:[%s28160_s1 + $0xf8] sm:$0xff]  }
  0x17   : > { %v22868_v19 = vld.sshfl [vmem:[%s22855_s26 + $0x8] sm:$0x11 pattern:$0x75316420]  ;;  %v481_v21 = vcombine.high %v20096_v15, %v20096_v15  ;;  %v22892_v31 = vrot.slane %v20096_v15, %v22877_v24  ;;  %vm1336_vm12 = vmor %vm1334_vm10, %vm1335_vm7  ;;  %v22530_v36 = vld [vmem:[%s28160_s1] sm:$0xff]   ;;  %s28531_s28 = smov (!%p377_p6, %s26338_s28), 15 }
  0x18   : > { %21813 = vmatpush3.bf16.msra.mxu0 %v22519_v4  ;;  %v20098_v25 = vld.sshfl [vmem:[%s22855_s26 + $0xc] sm:$0x33 pattern:$0x75316420]  ;;  %v1113_v26 = vcombine.high %v22868_v19, %v22868_v19  ;;  %v22889_v30 = vrot.slane %v457_v18, %v22877_v24  ;;  %v22900_v33 = vrot.slane %v22868_v19, %v22877_v24  ;;  %vm1338_vm13 = vmor %vm1336_vm12, %vm1337_vm9  ;;  %v472_v37 = vcombine.high %v22886_v29, %v22886_v29  ;;  %s20089_s27 = sshll.u32 %s28531_s28, 1 }
  0x19   : > { %21853 = vmatpush3.bf16.msra.mxu1 %v22520_v5  ;;  %21814 = vmatprep.subr.bf16.mxu0 %v22521_v6  ;;  %v519_v27 = vcombine.high %v20098_v25, %v20098_v25  ;;  %v22895_v32 = vrot.slane %v481_v21, %v22877_v24  ;;  %v22904_v34 = vrot.slane %v20098_v25, %v22877_v24  ;;  %vm22921_vm14 = vmor %vm1338_vm13, %vm1339_vm11  ;;  %v1342_v42 = vshrl.u32 %v22886_v29, 16  ;;  %v20999_v41 = vld.sshfl [vmem:[%s22855_s26 + $0x28] sm:$0x33 pattern:$0x75316420] }
  0x1a   : > { %21854 = vmatprep.subr.bf16.mxu1 %v22522_v7  ;;  %v473_v38 = vcombine.high %v22889_v30, %v22889_v30  ;;  %v496_v39 = vcombine.high %v22892_v31, %v22892_v31  ;;  %v1347_v43 = vshll.u32 %v22889_v30, 16  ;;  %v1350_v44 = vshrl.u32 %v22889_v30, 16 }
  0x1b   : > { %v22907_v35 = vrot.slane %v519_v27, %v22877_v24  ;;  %v497_v40 = vcombine.high %v22895_v32, %v22895_v32  ;;  %v1371_v45 = vshll.u32 %v22892_v31, 16  ;;  %v1355_v46 = vshll.u32 %v472_v37, 16 }
  0x1c   : > { %21815 = vmatpush3.bf16.msra.mxu0 %v22521_v6  ;;  %v1358_v47 = vshrl.u32 %v472_v37, 16  ;;  %v1363_v48 = vshll.u32 %v473_v38, 16  ;;  %v1366_v49 = vshrl.u32 %v473_v38, 16  ;;  %v1349_v50 = vsel %vm22921_vm14, %v1342_v42, %v1347_v43 }
  0x1d   : > { %21855 = vmatpush3.bf16.msra.mxu1 %v22522_v7  ;;  %21816 = vmatprep.subr.bf16.mxu0 %v22523_v9  ;;  %v1374_v51 = vshrl.u32 %v22892_v31, 16  ;;  %v1379_v52 = vshll.u32 %v22895_v32, 16  ;;  %v1382_v53 = vshrl.u32 %v22895_v32, 16  ;;  %v1357_v54 = vsel %vm22921_vm14, %v1350_v44, %v1355_v46 }
  0x1e   : > { %21856 = vmatprep.subr.bf16.mxu1 %v22524_v10  ;;  %v1365_v55 = vsel %vm22921_vm14, %v1358_v47, %v1363_v48  ;;  %v1373_v56 = vsel %vm22921_vm14, %v1366_v49, %v1371_v45  ;;  %v1387_v57 = vshll.u32 %v496_v39, 16  ;;  %v1390_v60 = vshrl.u32 %v496_v39, 16 }
  0x1f   : > { %v1381_v59 = vsel %vm22921_vm14, %v1374_v51, %v1379_v52  ;;  %v1395_v61 = vshll.u32 %v497_v40, 16  ;;  %v1398_v62 = vshrl.u32 %v497_v40, 16  ;;  %v1403_v1 = vshll.u32 %v22900_v33, 16 }
  0x20   : > { %21817 = vmatpush3.bf16.msra.mxu0 %v22523_v9  ;;  %v1389_v0 = vsel %vm22921_vm14, %v1382_v53, %v1387_v57  ;;  %v2088_v2 = vcombine.low %v1349_v50, %v1357_v54  ;;  %v2089_v3 = vcombine.low %v1365_v55, %v1373_v56  ;;  %v2830_v6 = vcombine.low %v22886_v29, %v22889_v30  ;;  %v20097_v54 = vld.sshfl [vmem:[%s22855_s26 + $0x8] sm:$0x1 pattern:$0x75316420] }
  0x21   : > { %21857 = vmatpush3.bf16.msra.mxu1 %v22524_v10  ;;  %21818 = vmatprep.subr.bf16.mxu0 %v22525_v11  ;;  %v1397_v4 = vsel %vm22921_vm14, %v1390_v60, %v1395_v61  ;;  %v2090_v5 = vcombine.low %v1381_v59, %v1389_v0  ;;  %v20249_v7 = vcombine.high %v22886_v29, %v22889_v30  ;;  %v1406_v39 = vshrl.u32 %v22900_v33, 16 }
  0x22   : > { %21858 = vmatprep.subr.bf16.mxu1 %v22526_v12  ;;  %v1405_v8 = vsel %vm22921_vm14, %v1398_v62, %v1403_v1  ;;  %v2098_v9 = vrot.slane %v2088_v2, %v22877_v24  ;;  %v2105_v10 = vrot.slane %v2089_v3, %v22877_v24  ;;  %v20250_v16 = vcombine.high %v22892_v31, %v22895_v32 }
  0x23   : > { %v2091_v14 = vcombine.low %v1397_v4, %v1405_v8  ;;  %v2112_v15 = vrot.slane %v2090_v5, %v22877_v24  ;;  %v2840_v17 = vrot.slane %v2830_v6, %v22877_v24  ;;  %v2847_v20 = vrot.slane %v20249_v7, %v22877_v24 }
  0x24   : > { %21819 = vmatpush3.bf16.msra.mxu0 %v22525_v11  ;;  %v2832_v11 = vcombine.low %v22892_v31, %v22895_v32  ;;  %v2120_v18 = vcombine.low %v2098_v9, %v2105_v10  ;;  %v2861_v25 = vrot.slane %v20250_v16, %v22877_v24  ;;  %v22982_v27 = vcombine.high %v22907_v35, %v22907_v35  ;;  %v20101_v9 = vld.sshfl [vmem:[%s22855_s26 + $0x18] sm:$0x33 pattern:$0x75316420] }
  0x25   : > { %21859 = vmatpush3.bf16.msra.mxu1 %v22526_v12  ;;  %21820 = vmatprep.subr.bf16.mxu0 %v22527_v22  ;;  %v20099_v12 = vld.sshfl [vmem:[%s22855_s26 + $0x10] sm:$0x33 pattern:$0x75316420]  ;;  %v2862_v30 = vcombine.low %v2840_v17, %v2847_v20  ;;  %v1127_v32 = vrot.slane %v1113_v26, %v22877_v24  ;;  %v1415_v44 = vshrl.u32 %v22904_v34, 16  ;;  %v1420_v19 = vshll.u32 %v22907_v35, 16 }
  0x26   : > { %21860 = vmatprep.subr.bf16.mxu1 %v22528_v23  ;;  %v2854_v21 = vrot.slane %v2832_v11, %v22877_v24  ;;  %v2128_v29 = vrot.slane %v2120_v18, %v22877_v24  ;;  %v550_v31 = vrot.slane %v20099_v12, %v22877_v24  ;;  %v1423_v33 = vshrl.u32 %v22907_v35, 16  ;;  %v20102_v20 = vld.sshfl [vmem:[%s22855_s26 + $0x1c] sm:$0x33 pattern:$0x75316420] }
  0x27   : > { %v2870_v40 = vrot.slane %v2862_v30, %v22877_v24  ;;  %v1411_v43 = vshll.u32 %v1127_v32, 16  ;;  %v1422_v52 = vsel %vm22921_vm14, %v1415_v44, %v1420_v19  ;;  %v1436_v53 = vshll.u32 %v22982_v27, 16 }
  0x28   : > { %21821 = vmatpush3.bf16.msra.mxu0 %v22527_v22  ;;  %v534_v22 = vcombine.high %v22904_v34, %v22904_v34  ;;  %v2863_v37 = vcombine.low %v2854_v21, %v2861_v25  ;;  %v558_v42 = vcombine.high %v550_v31, %v550_v31  ;;  %v1439_v56 = vshrl.u32 %v22982_v27, 16 }
  0x29   : > { %21861 = vmatpush3.bf16.msra.mxu1 %v22528_v23  ;;  %21822 = vmatprep.subr.bf16.mxu0 %v22529_v28  ;;  %v2119_v23 = vrot.slane %v2091_v14, %v22877_v24  ;;  %v1413_v26 = vsel %vm22921_vm14, %v1406_v39, %v1411_v43  ;;  %v1444_v57 = vshll.u32 %v550_v31, 16  ;;  %v1447_v59 = vshrl.u32 %v550_v31, 16 }
  0x2a   : > { %21862 = vmatprep.subr.bf16.mxu1 %v22530_v36  ;;  %v2877_v46 = vrot.slane %v2863_v37, %v22877_v24  ;;  %v1428_v48 = vshll.u32 %v534_v22, 16  ;;  %v1431_v49 = vshrl.u32 %v534_v22, 16  ;;  %v1460_v0 = vshll.u32 %v558_v42, 16 }
  0x2b   : > { %v1446_v1 = vsel %vm22921_vm14, %v1439_v56, %v1444_v57  ;;  %v1463_v2 = vshrl.u32 %v558_v42, 16  ;;  %v2137_v4 = vcombine.low %v1413_v26, %v1422_v52  ;;  %v511_v8 = vrot.slane %v20097_v54, %v22877_v24 }
  0x2c   : > { %21823 = vmatpush3.bf16.msra.mxu0 %v22529_v28  ;;  %v543_v28 = vcombine.high %v20099_v12, %v20099_v12  ;;  %v2878_v51 = vcombine.low %v2870_v40, %v2877_v46  ;;  %v1430_v55 = vsel %vm22921_vm14, %v1423_v33, %v1428_v48  ;;  %v1438_v60 = vsel %vm22921_vm14, %v1431_v49, %v1436_v53  ;;  %v22532_v53 = vld [vmem:[%s28160_s1 + $0xb0] sm:$0xff]  }
  0x2d   : > { %21863 = vmatpush3.bf16.msra.mxu1 %v22530_v36  ;;  %21888 = vmatprep.subr.bf16.mxu0 %v22943_v58  ;;  %v2121_v36 = vcombine.low %v2112_v15, %v2119_v23  ;;  %v2138_v7 = vcombine.low %v1430_v55, %v1438_v60  ;;  %v2147_v12 = vrot.slane %v2137_v4, %v22877_v24 }
  0x2e   : > { %21928 = vmatprep.subr.bf16.mxu1 %v22950_v63  ;;  %v557_v38 = vrot.slane %v543_v28, %v22877_v24  ;;  %21864 = vmatprep.mubr.bf16.mxu1 %v2878_v51  ;;  %v2880_v14 = vcombine.low %v22907_v35, %v534_v22  ;;  %v2879_v17 = vcombine.low %v511_v8, %v22904_v34  ;;  %v20100_v8 = vld.sshfl [vmem:[%s22855_s26 + $0x14] sm:$0x1 pattern:$0x75316420] }
  0x2f   : > { %v2135_v45 = vrot.slane %v2121_v36, %v22877_v24  ;;  %v2154_v16 = vrot.slane %v2138_v7, %v22877_v24  ;;  %v2881_v18 = vcombine.low %v22982_v27, %v550_v31  ;;  %v581_v28 = vcombine.high %v20101_v9, %v20101_v9  ;;  %v20126_v36 = vld.sshfl [vmem:[%s22855_s26 + $0x14] sm:$0x11 pattern:$0x75316420] }
  0x30   : > { %v22996_v47 = vcombine.high %v557_v38, %v557_v38  ;;  %v1452_v61 = vshll.u32 %v557_v38, 16  ;;  %v1455_v62 = vshrl.u32 %v557_v38, 16  ;;  %v2882_v23 = vcombine.low %v557_v38, %v558_v42 }
  0x31   : > { %v2136_v50 = vcombine.low %v2128_v29, %v2135_v45  ;;  %v2896_v25 = vrot.slane %v2880_v14, %v22877_v24  ;;  %v2169_v30 = vcombine.low %v2147_v12, %v2154_v16  ;;  %v2889_v35 = vrot.slane %v2879_v17, %v22877_v24  ;;  %v22533_v12 = vld [vmem:[%s28160_s1 + $0xa8] sm:$0xff]  }
  0x32   : > { %v1468_v3 = vshll.u32 %v22996_v47, 16  ;;  %v1454_v5 = vsel %vm22921_vm14, %v1447_v59, %v1452_v61  ;;  %v1462_v6 = vsel %vm22921_vm14, %v1455_v62, %v1460_v0  ;;  %v2903_v22 = vrot.slane %v2881_v18, %v22877_v24  ;;  %v22536_v62 = vld [vmem:[%s28160_s1 + $0xf0] sm:$0xff]  }
  0x33   : > { %21824 = vmatprep.mubr.bf16.mxu0 %v2136_v50  ;;  %v2139_v11 = vcombine.low %v1446_v1, %v1454_v5  ;;  %v2910_v32 = vrot.slane %v2882_v23, %v22877_v24  ;;  %v23035_v34 = vrot.slane %v20101_v9, %v22877_v24  ;;  %v23038_v27 = vrot.slane %v581_v28, %v22877_v24 }
  0x34   : > { %v1470_v10 = vsel %vm22921_vm14, %v1463_v2, %v1468_v3  ;;  %v605_v31 = vcombine.high %v20102_v20, %v20102_v20  ;;  %v2177_v38 = vrot.slane %v2169_v30, %v22877_v24  ;;  %v2911_v39 = vcombine.low %v2889_v35, %v2896_v25  ;;  %v22538_v25 = vld [vmem:[%s28160_s1 + $0xe8] sm:$0xff]  }
  0x35   : > { %v2140_v15 = vcombine.low %v1462_v6, %v1470_v10  ;;  %v2161_v21 = vrot.slane %v2139_v11, %v22877_v24  ;;  %v23043_v40 = vrot.slane %v20102_v20, %v22877_v24  ;;  %v2912_v42 = vcombine.low %v2903_v22, %v2910_v32  ;;  %v20104_v22 = vld.sshfl [vmem:[%s22855_s26 + $0x24] sm:$0x33 pattern:$0x75316420] }
  0x36   : > { %v596_v43 = vcombine.high %v23035_v34, %v23035_v34  ;;  %v597_v44 = vcombine.high %v23038_v27, %v23038_v27  ;;  %v23050_v45 = vrot.slane %v605_v31, %v22877_v24  ;;  %v2919_v19 = vrot.slane %v2911_v39, %v22877_v24 }
  0x37   : > { %v2168_v29 = vrot.slane %v2140_v15, %v22877_v24  ;;  %v23056_v26 = vcombine.high %v23043_v40, %v23043_v40  ;;  %v1135_v33 = vcombine.high %v20126_v36, %v20126_v36  ;;  %v2926_v48 = vrot.slane %v2912_v42, %v22877_v24 }
  0x38   : > { %v1142_v49 = vrot.slane %v20126_v36, %v22877_v24  ;;  %v1471_v50 = vshrl.u32 %v22996_v47, 16  ;;  %v1488_v51 = vshrl.u32 %v23035_v34, 16  ;;  %v1493_v55 = vshll.u32 %v23038_v27, 16 }
  0x39   : > { %v2170_v37 = vcombine.low %v2161_v21, %v2168_v29  ;;  %v1149_v54 = vrot.slane %v1135_v33, %v22877_v24  ;;  %v1496_v56 = vshrl.u32 %v23038_v27, 16  ;;  %v2927_v57 = vcombine.low %v2919_v19, %v2926_v48  ;;  %v22540_v33 = vld [vmem:[%s28160_s1 + $0xe0] sm:$0xff]  }
  0x3a   : > { %v1476_v59 = vshll.u32 %v1142_v49, 16  ;;  %v1479_v60 = vshrl.u32 %v1142_v49, 16  ;;  %v1501_v61 = vshll.u32 %v596_v43, 16  ;;  %v1495_v1 = vsel %vm22921_vm14, %v1488_v51, %v1493_v55 }
  0x3b   : > { %v2184_v46 = vrot.slane %v2170_v37, %v22877_v24  ;;  %v1484_v0 = vshll.u32 %v1149_v54, 16  ;;  %v1504_v2 = vshrl.u32 %v596_v43, 16  ;;  %v1509_v3 = vshll.u32 %v597_v44, 16  ;;  %21865 = vmatmul.mubr.bf16.vlgmr.msra.gmra.mxu1 %v2927_v57 }
  0x3c   : > { %v1478_v4 = vsel %vm22921_vm14, %v1471_v50, %v1476_v59  ;;  %v1503_v5 = vsel %vm22921_vm14, %v1496_v56, %v1501_v61  ;;  %v1512_v6 = vshrl.u32 %v597_v44, 16  ;;  %v1517_v7 = vshll.u32 %v23043_v40, 16  ;;  %21929 = vmatpush3.bf16.msra.mxu1 %v22950_v63  ;;  %v22534_v63 = vld [vmem:[%s28160_s1 + $0xa0] sm:$0xff]   ;;  %v22537_v56 = vld [vmem:[%s28160_s1 + $0x98] sm:$0xff]  }
  0x3d   : > { %v2185_v52 = vcombine.low %v2177_v38, %v2184_v46  ;;  %v1486_v9 = vsel %vm22921_vm14, %v1479_v60, %v1484_v0  ;;  %v1511_v10 = vsel %vm22921_vm14, %v1504_v2, %v1509_v3  ;;  %v1520_v11 = vshrl.u32 %v23043_v40, 16  ;;  %21930 = vmatprep.subr.bf16.mxu1 %v22536_v62  ;;  %v20105_v38 = vld.sshfl [vmem:[%s22855_s26 + $0x28] sm:$0x33 pattern:$0x75316420]  ;;  %v22541_v3 = vld [vmem:[%s28160_s1 + $0xd8] sm:$0xff]  }
  0x3e   : > { %v1519_v14 = vsel %vm22921_vm14, %v1512_v6, %v1517_v7  ;;  %v1528_v15 = vshrl.u32 %v23050_v45, 16  ;;  %v1533_v16 = vshll.u32 %v23056_v26, 16  ;;  %v2186_v17 = vcombine.low %v1478_v4, %v1486_v9 }
  0x3f   : > { %21825 = vmatmul.mubr.bf16.vlgmr.msra.gmra.mxu0 %v2185_v52  ;;  %v2187_v20 = vcombine.low %v1495_v1, %v1503_v5  ;;  %v2188_v21 = vcombine.low %v1511_v10, %v1519_v14  ;;  %v573_v23 = vrot.slane %v20100_v8, %v22877_v24  ;;  %v2929_v30 = vcombine.low %v23035_v34, %v23038_v27 }
  0x40   : > { %21889 = vmatpush3.bf16.msra.mxu0 %v22943_v58  ;;  %v1525_v58 = vshll.u32 %v23050_v45, 16  ;;  %v1535_v28 = vsel %vm22921_vm14, %v1528_v15, %v1533_v16  ;;  %v2196_v29 = vrot.slane %v2186_v17, %v22877_v24  ;;  %v20251_v35 = vcombine.high %v23035_v34, %v23038_v27  ;;  %v20127_v27 = vld.sshfl [vmem:[%s22855_s26 + $0x20] sm:$0x11 pattern:$0x75316420]  ;;  %21931 = vmatpush3.bf16.msra.mxu1 %v22536_v62 }
  0x41   : > { %21890 = vmatprep.subr.bf16.mxu0 %v22532_v53  ;;  %v2203_v31 = vrot.slane %v2187_v20, %v22877_v24  ;;  %v2210_v36 = vrot.slane %v2188_v21, %v22877_v24  ;;  %v2928_v37 = vcombine.low %v22996_v47, %v573_v23  ;;  %v2931_v39 = vcombine.low %v23043_v40, %v23050_v45  ;;  %v20103_v17 = vld.sshfl [vmem:[%s22855_s26 + $0x20] sm:$0x1 pattern:$0x75316420]  ;;  %v22543_v23 = vld [vmem:[%s28160_s1 + $0xd0] sm:$0xff]  }
  0x42   : > { %v1527_v18 = vsel %vm22921_vm14, %v1520_v11, %v1525_v58  ;;  %v2945_v42 = vrot.slane %v2929_v30, %v22877_v24  ;;  %v2952_v43 = vrot.slane %v20251_v35, %v22877_v24  ;;  %v621_v34 = vcombine.high %v23050_v45, %v23050_v45  ;;  %21932 = vmatprep.subr.bf16.mxu1 %v22538_v25  ;;  %v22539_v58 = vld [vmem:[%s28160_s1 + $0x90] sm:$0xff]  }
  0x43   : > { %v2189_v32 = vcombine.low %v1527_v18, %v1535_v28  ;;  %v2218_v46 = vcombine.low %v2196_v29, %v2203_v31  ;;  %v2938_v19 = vrot.slane %v2928_v37, %v22877_v24  ;;  %v643_v47 = vcombine.high %v20104_v22, %v20104_v22  ;;  %v22542_v31 = vld [vmem:[%s28160_s1 + $0x88] sm:$0xff]  }
  0x44   : > { %21891 = vmatpush3.bf16.msra.mxu0 %v22532_v53  ;;  %v2959_v48 = vrot.slane %v2931_v39, %v22877_v24  ;;  %v23129_v49 = vrot.slane %v20104_v22, %v22877_v24  ;;  %v667_v50 = vcombine.high %v20105_v38, %v20105_v38  ;;  %v23132_v51 = vrot.slane %v20105_v38, %v22877_v24 }
  0x45   : > { %21892 = vmatprep.subr.bf16.mxu0 %v22533_v12  ;;  %v2217_v44 = vrot.slane %v2189_v32, %v22877_v24  ;;  %v2226_v53 = vrot.slane %v2218_v46, %v22877_v24  ;;  %v2960_v54 = vcombine.low %v2938_v19, %v2945_v42  ;;  %v23136_v55 = vrot.slane %v643_v47, %v22877_v24  ;;  %v22545_v46 = vld [vmem:[%s28160_s1 + $0xc8] sm:$0xff]  }
  0x46   : > { %v2961_v57 = vcombine.low %v2952_v43, %v2959_v48  ;;  %v23143_v59 = vcombine.high %v23129_v49, %v23129_v49  ;;  %v23146_v60 = vrot.slane %v667_v50, %v22877_v24  ;;  %v1157_v61 = vcombine.high %v20127_v27, %v20127_v27  ;;  %21933 = vmatpush3.bf16.msra.mxu1 %v22538_v25  ;;  %v20128_v50 = vld.sshfl [vmem:[%s22855_s26 + $0x2c] sm:$0x11 pattern:$0x75316420] }
  0x47   : > { %v2219_v52 = vcombine.low %v2210_v36, %v2217_v44  ;;  %v2968_v0 = vrot.slane %v2960_v54, %v22877_v24  ;;  %v23152_v1 = vcombine.high %v23136_v55, %v23136_v55  ;;  %v1164_v2 = vrot.slane %v20127_v27, %v22877_v24  ;;  %21934 = vmatprep.subr.bf16.mxu1 %v22540_v33  ;;  %v20107_v44 = vld.sshfl [vmem:[%s22855_s26 + $0x30] sm:$0x33 pattern:$0x75316420] }
  0x48   : > { %21893 = vmatpush3.bf16.msra.mxu0 %v22533_v12  ;;  %v2975_v4 = vrot.slane %v2961_v57, %v22877_v24  ;;  %v1171_v5 = vrot.slane %v1157_v61, %v22877_v24  ;;  %v1536_v6 = vshrl.u32 %v23056_v26, 16  ;;  %v1541_v7 = vshll.u32 %v621_v34, 16 }
  0x49   : > { %21894 = vmatprep.subr.bf16.mxu0 %v22534_v63  ;;  %v2233_v62 = vrot.slane %v2219_v52, %v22877_v24  ;;  %v1544_v9 = vshrl.u32 %v621_v34, 16  ;;  %v1549_v10 = vshll.u32 %v1164_v2, 16  ;;  %v1552_v11 = vshrl.u32 %v1164_v2, 16 }
  0x4a   : > { %v2976_v12 = vcombine.low %v2968_v0, %v2975_v4  ;;  %v1543_v14 = vsel %vm22921_vm14, %v1536_v6, %v1541_v7  ;;  %v1557_v15 = vshll.u32 %v1171_v5, 16  ;;  %v1561_v16 = vshrl.u32 %v23129_v49, 16  ;;  %21935 = vmatpush3.bf16.msra.mxu1 %v22540_v33 }
  0x4b   : > { %v2234_v8 = vcombine.low %v2226_v53, %v2233_v62  ;;  %v1551_v26 = vsel %vm22921_vm14, %v1544_v9, %v1549_v10  ;;  %v1566_v18 = vshll.u32 %v23136_v55, 16  ;;  %v1569_v20 = vshrl.u32 %v23136_v55, 16  ;;  %21936 = vmatprep.subr.bf16.mxu1 %v22541_v3 }
  0x4c   : > { %21895 = vmatpush3.bf16.msra.mxu0 %v22534_v63  ;;  %v1574_v21 = vshll.u32 %v23143_v59, 16  ;;  %21868 = vmatprep.mubr.bf16.mxu1 %v2976_v12  ;;  %v1559_v63 = vsel %vm22921_vm14, %v1552_v11, %v1557_v15  ;;  %v1577_v25 = vshrl.u32 %v23143_v59, 16  ;;  %v1582_v28 = vshll.u32 %v23152_v1, 16 }
  0x4d   : > { %21896 = vmatprep.subr.bf16.mxu0 %v22537_v56  ;;  %21828 = vmatprep.mubr.bf16.mxu0 %v2234_v8  ;;  %v1585_v29 = vshrl.u32 %v23152_v1, 16  ;;  %v1568_v30 = vsel %vm22921_vm14, %v1561_v16, %v1566_v18  ;;  %v1590_v22 = vshll.u32 %v23132_v51, 16  ;;  %v1593_v32 = vshrl.u32 %v23132_v51, 16 }
  0x4e   : > { %v1576_v35 = vsel %vm22921_vm14, %v1569_v20, %v1574_v21  ;;  %v1584_v36 = vsel %vm22921_vm14, %v1577_v25, %v1582_v28  ;;  %v1598_v37 = vshll.u32 %v23146_v60, 16  ;;  %v2235_v38 = vcombine.low %v1543_v14, %v1551_v26  ;;  %21937 = vmatpush3.bf16.msra.mxu1 %v22541_v3 }
  0x4f   : > { %v2236_v39 = vcombine.low %v1559_v63, %v1568_v30  ;;  %v1592_v42 = vsel %vm22921_vm14, %v1585_v29, %v1590_v22  ;;  %v2237_v43 = vcombine.low %v1576_v35, %v1584_v36  ;;  %v635_v34 = vrot.slane %v20103_v17, %v22877_v24  ;;  %21938 = vmatprep.subr.bf16.mxu1 %v22543_v23  ;;  %v20106_v29 = vld.sshfl [vmem:[%s22855_s26 + $0x2c] sm:$0x1 pattern:$0x75316420] }
  0x50   : > { %21897 = vmatpush3.bf16.msra.mxu0 %v22537_v56  ;;  %v20252_v27 = vcombine.high %v23043_v40, %v23050_v45  ;;  %v1600_v19 = vsel %vm22921_vm14, %v1593_v32, %v1598_v37  ;;  %v2245_v47 = vrot.slane %v2235_v38, %v22877_v24  ;;  %v2979_v48 = vcombine.low %v23136_v55, %v23143_v59  ;;  %v22544_v40 = vld [vmem:[%s28160_s1 + $0x80] sm:$0xff]   ;;  %v23217_v56 = vld.sshfl [vmem:[%s22855_s26 + $0x34] sm:$0x33 pattern:$0x75316420] }
  0x51   : > { %21898 = vmatprep.subr.bf16.mxu0 %v22539_v58  ;;  %v2252_v33 = vrot.slane %v2236_v39, %v22877_v24  ;;  %v2238_v45 = vcombine.low %v1592_v42, %v1600_v19  ;;  %v2259_v52 = vrot.slane %v2237_v43, %v22877_v24  ;;  %v2978_v53 = vcombine.low %v635_v34, %v23129_v49  ;;  %v22546_v55 = vld [vmem:[%s28160_s1 + $0xc0] sm:$0xff]  }
  0x52   : > { %v2980_v54 = vcombine.low %v23152_v1, %v23132_v51  ;;  %v2987_v59 = vrot.slane %v20252_v27, %v22877_v24  ;;  %v3001_v61 = vrot.slane %v2979_v48, %v22877_v24  ;;  %v23226_v62 = vcombine.high %v23132_v51, %v23132_v51  ;;  %21939 = vmatpush3.bf16.msra.mxu1 %v22543_v23 }
  0x53   : > { %v2267_v57 = vcombine.low %v2245_v47, %v2252_v33  ;;  %v2266_v49 = vrot.slane %v2238_v45, %v22877_v24  ;;  %v2994_v0 = vrot.slane %v2978_v53, %v22877_v24  ;;  %v23233_v2 = vcombine.high %v23146_v60, %v23146_v60  ;;  %21940 = vmatprep.subr.bf16.mxu1 %v22545_v46 }
  0x54   : > { %21899 = vmatpush3.bf16.msra.mxu0 %v22539_v58  ;;  %v3008_v1 = vrot.slane %v2980_v54, %v22877_v24  ;;  %v705_v4 = vcombine.high %v20107_v44, %v20107_v44  ;;  %v23237_v5 = vrot.slane %v20107_v44, %v22877_v24  ;;  %v23241_v51 = vrot.slane %v23217_v56, %v22877_v24 }
  0x55   : > { %21900 = vmatprep.subr.bf16.mxu0 %v22542_v31  ;;  %v2275_v3 = vrot.slane %v2267_v57, %v22877_v24  ;;  %v2268_v6 = vcombine.low %v2259_v52, %v2266_v49  ;;  %v3009_v7 = vcombine.low %v2987_v59, %v2994_v0  ;;  %v1179_v9 = vcombine.high %v20128_v50, %v20128_v50  ;;  %v20110_v49 = vld.sshfl [vmem:[%s22855_s26 + $0x3c] sm:$0x33 pattern:$0x75316420] }
  0x56   : > { %v3010_v8 = vcombine.low %v3001_v61, %v3008_v1  ;;  %v23244_v10 = vrot.slane %v705_v4, %v22877_v24  ;;  %v720_v11 = vcombine.high %v23237_v5, %v23237_v5  ;;  %v1186_v58 = vrot.slane %v20128_v50, %v22877_v24  ;;  %21941 = vmatpush3.bf16.msra.mxu1 %v22545_v46 }
  0x57   : > { %v1601_v12 = vshrl.u32 %v23146_v60, 16  ;;  %v2282_v14 = vrot.slane %v2268_v6, %v22877_v24  ;;  %v3017_v15 = vrot.slane %v3009_v7, %v22877_v24  ;;  %v1193_v17 = vrot.slane %v1179_v9, %v22877_v24  ;;  %21942 = vmatprep.subr.bf16.mxu1 %v22546_v55  ;;  %v20129_v7 = vld.sshfl [vmem:[%s22855_s26 + $0x38] sm:$0x11 pattern:$0x75316420] }
  0x58   : > { %21901 = vmatpush3.bf16.msra.mxu0 %v22542_v31  ;;  %v3024_v16 = vrot.slane %v3010_v8, %v22877_v24  ;;  %v721_v26 = vcombine.high %v23244_v10, %v23244_v10  ;;  %v1606_v18 = vshll.u32 %v23226_v62, 16  ;;  %v1609_v20 = vshrl.u32 %v23226_v62, 16  ;;  %v22547_v31 = vld [vmem:[%s28160_s1 + $0x138] sm:$0xff]  }
  0x59   : > { %21902 = vmatprep.subr.bf16.mxu0 %v22544_v40  ;;  %v1614_v21 = vshll.u32 %v23233_v2, 16  ;;  %v2283_v23 = vcombine.low %v2275_v3, %v2282_v14  ;;  %v1617_v25 = vshrl.u32 %v23233_v2, 16  ;;  %v1622_v28 = vshll.u32 %v1186_v58, 16 }
  0x5a   : > { %v3025_v63 = vcombine.low %v3017_v15, %v3024_v16  ;;  %v1608_v30 = vsel %vm22921_vm14, %v1601_v12, %v1606_v18  ;;  %v1625_v22 = vshrl.u32 %v1186_v58, 16  ;;  %v1630_v32 = vshll.u32 %v1193_v17, 16  ;;  %21943 = vmatpush3.bf16.msra.mxu1 %v22546_v55 }
  0x5b   : > { %v1616_v35 = vsel %vm22921_vm14, %v1609_v20, %v1614_v21  ;;  %21829 = vmatmul.mubr.bf16.gmra.mxu0 %v2283_v23  ;;  %v1624_v36 = vsel %vm22921_vm14, %v1617_v25, %v1622_v28  ;;  %v1634_v37 = vshrl.u32 %v23237_v5, 16  ;;  %v1639_v38 = vshll.u32 %v23244_v10, 16 }
  0x5c   : > { %21903 = vmatpush3.bf16.msra.mxu0 %v22544_v40  ;;  %21869 = vmatmul.mubr.bf16.gmra.mxu1 %v3025_v63  ;;  %v1642_v39 = vshrl.u32 %v23244_v10, 16  ;;  %v1632_v42 = vsel %vm22921_vm14, %v1625_v22, %v1630_v32  ;;  %v1647_v43 = vshll.u32 %v720_v11, 16  ;;  %v1650_v34 = vshrl.u32 %v720_v11, 16 }
  0x5d   : > { %v1655_v27 = vshll.u32 %v721_v26, 16  ;;  %21968 = vmatprep.subr.bf16.mxu0 %v22547_v31  ;;  %v1641_v44 = vsel %vm22921_vm14, %v1634_v37, %v1639_v38  ;;  %v1658_v46 = vshrl.u32 %v721_v26, 16  ;;  %v1663_v19 = vshll.u32 %v23241_v51, 16 }
  0x5e   : > { %v2284_v47 = vcombine.low %v1608_v30, %v1616_v35  ;;  %v1649_v33 = vsel %vm22921_vm14, %v1642_v39, %v1647_v43  ;;  %v2285_v50 = vcombine.low %v1624_v36, %v1632_v42  ;;  %v697_v40 = vrot.slane %v20106_v29, %v22877_v24 }
  0x5f   : > { %v1657_v48 = vsel %vm22921_vm14, %v1650_v34, %v1655_v27  ;;  %v1665_v45 = vsel %vm22921_vm14, %v1658_v46, %v1663_v19  ;;  %v2286_v52 = vcombine.low %v1641_v44, %v1649_v33  ;;  %v3026_v54 = vcombine.low %v23146_v60, %v23226_v62  ;;  %v20109_v34 = vld.sshfl [vmem:[%s22855_s26 + $0x38] sm:$0x1 pattern:$0x75316420] }
  0x60   : > { %v2294_v53 = vrot.slane %v2284_v47, %v22877_v24  ;;  %v2287_v55 = vcombine.low %v1657_v48, %v1665_v45  ;;  %v2301_v57 = vrot.slane %v2285_v50, %v22877_v24  ;;  %v3027_v59 = vcombine.low %v23233_v2, %v697_v40 }
  0x61   : > { %v3028_v61 = vcombine.low %v23237_v5, %v23244_v10  ;;  %v2308_v0 = vrot.slane %v2286_v52, %v22877_v24  ;;  %v20253_v1 = vcombine.high %v23237_v5, %v23244_v10  ;;  %v3036_v3 = vrot.slane %v3026_v54, %v22877_v24  ;;  %v20111_v54 = vld.sshfl [vmem:[%s22855_s26 + $0x40] sm:$0x33 pattern:$0x75316420] }
  0x62   : > { %v729_v4 = vcombine.high %v23217_v56, %v23217_v56  ;;  %v2315_v60 = vrot.slane %v2287_v55, %v22877_v24  ;;  %v2316_v62 = vcombine.low %v2294_v53, %v2301_v57  ;;  %v3043_v6 = vrot.slane %v3027_v59, %v22877_v24 }
  0x63   : > { %v3050_v2 = vrot.slane %v3028_v61, %v22877_v24  ;;  %v3057_v8 = vrot.slane %v20253_v1, %v22877_v24  ;;  %v744_v5 = vcombine.high %v23241_v51, %v23241_v51  ;;  %v767_v10 = vcombine.high %v20110_v49, %v20110_v49 }
  0x64   : > { %v23305_v9 = vrot.slane %v729_v4, %v22877_v24  ;;  %v2317_v11 = vcombine.low %v2308_v0, %v2315_v60  ;;  %v2324_v56 = vrot.slane %v2316_v62, %v22877_v24  ;;  %v3058_v58 = vcombine.low %v3036_v3, %v3043_v6 }
  0x65   : > { %v774_v12 = vrot.slane %v20110_v49, %v22877_v24  ;;  %v3059_v14 = vcombine.low %v3050_v2, %v3057_v8  ;;  %v781_v16 = vrot.slane %v767_v10, %v22877_v24  ;;  %v1201_v17 = vcombine.high %v20129_v7, %v20129_v7  ;;  %v20113_v2 = vld.sshfl [vmem:[%s22855_s26 + $0x48] sm:$0x33 pattern:$0x75316420] }
  0x66   : > { %v745_v15 = vcombine.high %v23305_v9, %v23305_v9  ;;  %v2331_v26 = vrot.slane %v2317_v11, %v22877_v24  ;;  %v3066_v18 = vrot.slane %v3058_v58, %v22877_v24  ;;  %v1208_v21 = vrot.slane %v20129_v7, %v22877_v24 }
  0x67   : > { %v782_v20 = vcombine.high %v774_v12, %v774_v12  ;;  %v3073_v23 = vrot.slane %v3059_v14, %v22877_v24  ;;  %v23318_v63 = vcombine.high %v781_v16, %v781_v16  ;;  %v1215_v25 = vrot.slane %v1201_v17, %v22877_v24 }
  0x68   : > { %v1666_v28 = vshrl.u32 %v23241_v51, 16  ;;  %v2332_v29 = vcombine.low %v2324_v56, %v2331_v26  ;;  %v1671_v30 = vshll.u32 %v23305_v9, 16  ;;  %v1674_v35 = vshrl.u32 %v23305_v9, 16 }
  0x69   : > { %v1679_v22 = vshll.u32 %v744_v5, 16  ;;  %v3074_v32 = vcombine.low %v3066_v18, %v3073_v23  ;;  %v1682_v31 = vshrl.u32 %v744_v5, 16  ;;  %v1687_v36 = vshll.u32 %v745_v15, 16 }
  0x6a   : > { %v1690_v37 = vshrl.u32 %v745_v15, 16  ;;  %21832 = vmatprep.mubr.bf16.mxu0 %v2332_v29  ;;  %v1673_v38 = vsel %vm22921_vm14, %v1666_v28, %v1671_v30  ;;  %v1695_v42 = vshll.u32 %v1208_v21, 16  ;;  %v1698_v43 = vshrl.u32 %v1208_v21, 16 }
  0x6b   : > { %v1681_v39 = vsel %vm22921_vm14, %v1674_v35, %v1679_v22  ;;  %21872 = vmatprep.mubr.bf16.mxu1 %v3074_v32  ;;  %v1689_v27 = vsel %vm22921_vm14, %v1682_v31, %v1687_v36  ;;  %v1703_v44 = vshll.u32 %v1215_v25, 16  ;;  %v1707_v46 = vshrl.u32 %v774_v12, 16 }
  0x6c   : > { %v1712_v19 = vshll.u32 %v781_v16, 16  ;;  %v1697_v47 = vsel %vm22921_vm14, %v1690_v37, %v1695_v42  ;;  %v1715_v33 = vshrl.u32 %v781_v16, 16  ;;  %v1720_v48 = vshll.u32 %v782_v20, 16 }
  0x6d   : > { %v1723_v50 = vshrl.u32 %v782_v20, 16  ;;  %v1705_v40 = vsel %vm22921_vm14, %v1698_v43, %v1703_v44  ;;  %v1728_v52 = vshll.u32 %v23318_v63, 16  ;;  %v2333_v53 = vcombine.low %v1673_v38, %v1681_v39 }
  0x6e   : > { %v1714_v45 = vsel %vm22921_vm14, %v1707_v46, %v1712_v19  ;;  %v1722_v55 = vsel %vm22921_vm14, %v1715_v33, %v1720_v48  ;;  %v2334_v57 = vcombine.low %v1689_v27, %v1697_v47  ;;  %v759_v61 = vrot.slane %v20109_v34, %v22877_v24  ;;  %v20112_v19 = vld.sshfl [vmem:[%s22855_s26 + $0x44] sm:$0x1 pattern:$0x75316420] }
  0x6f   : > { %v2335_v59 = vcombine.low %v1705_v40, %v1714_v45  ;;  %v1730_v49 = vsel %vm22921_vm14, %v1723_v50, %v1728_v52  ;;  %v2343_v0 = vrot.slane %v2333_v53, %v22877_v24  ;;  %v3075_v1 = vcombine.low %v23241_v51, %v23305_v9 }
  0x70   : > { %v20254_v3 = vcombine.high %v23241_v51, %v23305_v9  ;;  %v2336_v4 = vcombine.low %v1722_v55, %v1730_v49  ;;  %v2350_v60 = vrot.slane %v2334_v57, %v22877_v24  ;;  %v3077_v6 = vcombine.low %v759_v61, %v774_v12  ;;  %v20130_v9 = vld.sshfl [vmem:[%s22855_s26 + $0x44] sm:$0x11 pattern:$0x75316420] }
  0x71   : > { %v2357_v62 = vrot.slane %v2335_v59, %v22877_v24  ;;  %v3078_v7 = vcombine.low %v781_v16, %v782_v20  ;;  %v3085_v8 = vrot.slane %v3075_v1, %v22877_v24  ;;  %v791_v10 = vcombine.high %v20111_v54, %v20111_v54 }
  0x72   : > { %v3092_v5 = vrot.slane %v20254_v3, %v22877_v24  ;;  %v2364_v11 = vrot.slane %v2336_v4, %v22877_v24  ;;  %v2365_v56 = vcombine.low %v2343_v0, %v2350_v60  ;;  %v3099_v58 = vrot.slane %v3077_v6, %v22877_v24  ;;  %v20114_v3 = vld.sshfl [vmem:[%s22855_s26 + $0x4c] sm:$0x33 pattern:$0x75316420] }
  0x73   : > { %v23357_v51 = vrot.slane %v20111_v54, %v22877_v24  ;;  %v3106_v14 = vrot.slane %v3078_v7, %v22877_v24  ;;  %v805_v12 = vrot.slane %v791_v10, %v22877_v24  ;;  %v829_v16 = vcombine.high %v20113_v2, %v20113_v2 }
  0x74   : > { %v3107_v15 = vcombine.low %v3085_v8, %v3092_v5  ;;  %v2366_v17 = vcombine.low %v2357_v62, %v2364_v11  ;;  %v2373_v26 = vrot.slane %v2365_v56, %v22877_v24  ;;  %v23366_v20 = vrot.slane %v20113_v2, %v22877_v24 }
  0x75   : > { %v806_v18 = vcombine.high %v23357_v51, %v23357_v51  ;;  %v3108_v21 = vcombine.low %v3099_v58, %v3106_v14  ;;  %v807_v25 = vcombine.high %v805_v12, %v805_v12  ;;  %v23370_v28 = vrot.slane %v829_v16, %v22877_v24 }
  0x76   : > { %v3115_v23 = vrot.slane %v3107_v15, %v22877_v24  ;;  %v2380_v29 = vrot.slane %v2366_v17, %v22877_v24  ;;  %v23375_v30 = vcombine.high %v23366_v20, %v23366_v20  ;;  %v1223_v35 = vcombine.high %v20130_v9, %v20130_v9 }
  0x77   : > { %v1230_v22 = vrot.slane %v20130_v9, %v22877_v24  ;;  %v3122_v32 = vrot.slane %v3108_v21, %v22877_v24  ;;  %v1731_v31 = vshrl.u32 %v23318_v63, 16  ;;  %v1736_v36 = vshll.u32 %v23357_v51, 16  ;;  %v20116_v9 = vld.sshfl [vmem:[%s22855_s26 + $0x54] sm:$0x33 pattern:$0x75316420] }
  0x78   : > { %v1739_v37 = vshrl.u32 %v23357_v51, 16  ;;  %v2381_v38 = vcombine.low %v2373_v26, %v2380_v29  ;;  %v1237_v39 = vrot.slane %v1223_v35, %v22877_v24  ;;  %v1744_v42 = vshll.u32 %v805_v12, 16 }
  0x79   : > { %v1747_v43 = vshrl.u32 %v805_v12, 16  ;;  %v3123_v34 = vcombine.low %v3115_v23, %v3122_v32  ;;  %v1738_v27 = vsel %vm22921_vm14, %v1731_v31, %v1736_v36  ;;  %v1752_v44 = vshll.u32 %v806_v18, 16 }
  0x7a   : > { %v1755_v46 = vshrl.u32 %v806_v18, 16  ;;  %21833 = vmatmul.mubr.bf16.gmra.mxu0 %v2381_v38  ;;  %v1746_v47 = vsel %vm22921_vm14, %v1739_v37, %v1744_v42  ;;  %v1760_v33 = vshll.u32 %v807_v25, 16  ;;  %v1763_v48 = vshrl.u32 %v807_v25, 16 }
  0x7b   : > { %v1768_v50 = vshll.u32 %v1230_v22, 16  ;;  %21873 = vmatmul.mubr.bf16.gmra.mxu1 %v3123_v34  ;;  %v1754_v40 = vsel %vm22921_vm14, %v1747_v43, %v1752_v44  ;;  %v1771_v45 = vshrl.u32 %v1230_v22, 16  ;;  %v1776_v52 = vshll.u32 %v1237_v39, 16 }
  0x7c   : > { %v1780_v53 = vshrl.u32 %v23366_v20, 16  ;;  %v1762_v54 = vsel %vm22921_vm14, %v1755_v46, %v1760_v33  ;;  %v1785_v57 = vshll.u32 %v23370_v28, 16  ;;  %v1788_v59 = vshrl.u32 %v23370_v28, 16 }
  0x7d   : > { %v1770_v55 = vsel %vm22921_vm14, %v1763_v48, %v1768_v50  ;;  %v1778_v61 = vsel %vm22921_vm14, %v1771_v45, %v1776_v52  ;;  %v1793_v49 = vshll.u32 %v23375_v30, 16  ;;  %v2382_v0 = vcombine.low %v1738_v27, %v1746_v47  ;;  %v20115_v45 = vld.sshfl [vmem:[%s22855_s26 + $0x50] sm:$0x1 pattern:$0x75316420] }
  0x7e   : > { %v2383_v1 = vcombine.low %v1754_v40, %v1762_v54  ;;  %v1787_v4 = vsel %vm22921_vm14, %v1780_v53, %v1785_v57  ;;  %v2384_v60 = vcombine.low %v1770_v55, %v1778_v61  ;;  %v821_v62 = vrot.slane %v20112_v19, %v22877_v24  ;;  %v22551_v57 = vld [vmem:[%s28160_s1 + $0x178] sm:$0xff]  }
  0x7f   : > { %v3124_v6 = vcombine.low %v23318_v63, %v23357_v51  ;;  %v1795_v2 = vsel %vm22921_vm14, %v1788_v59, %v1793_v49  ;;  %v2392_v7 = vrot.slane %v2382_v0, %v22877_v24  ;;  %v3125_v5 = vcombine.low %v805_v12, %v806_v18  ;;  %v20131_v18 = vld.sshfl [vmem:[%s22855_s26 + $0x50] sm:$0x11 pattern:$0x75316420]  ;;  %22008 = vmatprep.subr.bf16.mxu1 %v22551_v57 }
  0x80   : > { %v2399_v8 = vrot.slane %v2383_v1, %v22877_v24  ;;  %v2385_v10 = vcombine.low %v1787_v4, %v1795_v2  ;;  %v2406_v11 = vrot.slane %v2384_v60, %v22877_v24  ;;  %v3126_v56 = vcombine.low %v807_v25, %v821_v62 }
  0x81   : > { %v3127_v58 = vcombine.low %v23366_v20, %v23370_v28  ;;  %v3134_v63 = vrot.slane %v3124_v6, %v22877_v24  ;;  %v3141_v51 = vrot.slane %v3125_v5, %v22877_v24  ;;  %v845_v15 = vcombine.high %v23370_v28, %v23370_v28 }
  0x82   : > { %v2414_v14 = vcombine.low %v2392_v7, %v2399_v8  ;;  %v2413_v16 = vrot.slane %v2385_v10, %v22877_v24  ;;  %v3148_v12 = vrot.slane %v3126_v56, %v22877_v24  ;;  %v853_v26 = vcombine.high %v20114_v3, %v20114_v3 }
  0x83   : > { %v3155_v17 = vrot.slane %v3127_v58, %v22877_v24  ;;  %v3156_v23 = vcombine.low %v3134_v63, %v3141_v51  ;;  %v23424_v25 = vrot.slane %v20114_v3, %v22877_v24  ;;  %v891_v29 = vcombine.high %v20116_v9, %v20116_v9 }
  0x84   : > { %v2422_v21 = vrot.slane %v2414_v14, %v22877_v24  ;;  %v2415_v35 = vcombine.low %v2406_v11, %v2413_v16  ;;  %v867_v32 = vrot.slane %v853_v26, %v22877_v24  ;;  %v898_v31 = vrot.slane %v20116_v9, %v22877_v24  ;;  %v20117_v16 = vld.sshfl [vmem:[%s22855_s26 + $0x58] sm:$0x33 pattern:$0x75316420] }
  0x85   : > { %v3157_v22 = vcombine.low %v3148_v12, %v3155_v17  ;;  %v3164_v36 = vrot.slane %v3156_v23, %v22877_v24  ;;  %v868_v37 = vcombine.high %v23424_v25, %v23424_v25  ;;  %v23432_v38 = vrot.slane %v891_v29, %v22877_v24  ;;  %v20132_v29 = vld.sshfl [vmem:[%s22855_s26 + $0x5c] sm:$0x11 pattern:$0x75316420] }
  0x86   : > { %v1245_v39 = vcombine.high %v20131_v18, %v20131_v18  ;;  %v2429_v42 = vrot.slane %v2415_v35, %v22877_v24  ;;  %v869_v34 = vcombine.high %v867_v32, %v867_v32  ;;  %v1252_v27 = vrot.slane %v20131_v18, %v22877_v24 }
  0x87   : > { %v3171_v43 = vrot.slane %v3157_v22, %v22877_v24  ;;  %v1796_v46 = vshrl.u32 %v23375_v30, 16  ;;  %v1801_v19 = vshll.u32 %v845_v15, 16  ;;  %v1804_v47 = vshrl.u32 %v845_v15, 16 }
  0x88   : > { %v1259_v44 = vrot.slane %v1245_v39, %v22877_v24  ;;  %v2430_v33 = vcombine.low %v2422_v21, %v2429_v42  ;;  %v1809_v50 = vshll.u32 %v23424_v25, 16  ;;  %v1812_v40 = vshrl.u32 %v23424_v25, 16 }
  0x89   : > { %v3172_v48 = vcombine.low %v3164_v36, %v3171_v43  ;;  %v1803_v52 = vsel %vm22921_vm14, %v1796_v46, %v1801_v19  ;;  %v1817_v53 = vshll.u32 %v867_v32, 16  ;;  %v1820_v54 = vshrl.u32 %v867_v32, 16 }
  0x8a   : > { %v1825_v55 = vshll.u32 %v868_v37, 16  ;;  %21836 = vmatprep.mubr.bf16.mxu0 %v2430_v33  ;;  %v1811_v30 = vsel %vm22921_vm14, %v1804_v47, %v1809_v50  ;;  %v1828_v59 = vshrl.u32 %v868_v37, 16  ;;  %v1833_v61 = vshll.u32 %v869_v34, 16 }
  0x8b   : > { %21876 = vmatprep.mubr.bf16.mxu1 %v3172_v48  ;;  %v1836_v49 = vshrl.u32 %v869_v34, 16  ;;  %v1819_v0 = vsel %vm22921_vm14, %v1812_v40, %v1817_v53  ;;  %v1841_v3 = vshll.u32 %v1252_v27, 16  ;;  %v1844_v4 = vshrl.u32 %v1252_v27, 16 }
  0x8c   : > { %v1827_v1 = vsel %vm22921_vm14, %v1820_v54, %v1825_v55  ;;  %v1835_v60 = vsel %vm22921_vm14, %v1828_v59, %v1833_v61  ;;  %v1849_v62 = vshll.u32 %v1259_v44, 16  ;;  %v1853_v6 = vshrl.u32 %v898_v31, 16  ;;  %v20118_v61 = vld.sshfl [vmem:[%s22855_s26 + $0x5c] sm:$0x1 pattern:$0x75316420] }
  0x8d   : > { %v1858_v2 = vshll.u32 %v23432_v38, 16  ;;  %v1843_v7 = vsel %vm22921_vm14, %v1836_v49, %v1841_v3  ;;  %v2431_v8 = vcombine.low %v1803_v52, %v1811_v30  ;;  %v2432_v5 = vcombine.low %v1819_v0, %v1827_v1 }
  0x8e   : > { %v883_v10 = vrot.slane %v20115_v45, %v22877_v24  ;;  %v1851_v11 = vsel %vm22921_vm14, %v1844_v4, %v1849_v62  ;;  %v2433_v58 = vcombine.low %v1835_v60, %v1843_v7  ;;  %v20255_v9 = vcombine.high %v23366_v20, %v23370_v28 }
  0x8f   : > { %v1860_v56 = vsel %vm22921_vm14, %v1853_v6, %v1858_v2  ;;  %v2441_v63 = vrot.slane %v2431_v8, %v22877_v24  ;;  %v2448_v51 = vrot.slane %v2432_v5, %v22877_v24  ;;  %v3174_v15 = vcombine.low %v23424_v25, %v867_v32 }
  0x90   : > { %v2434_v14 = vcombine.low %v1851_v11, %v1860_v56  ;;  %v2455_v12 = vrot.slane %v2433_v58, %v22877_v24  ;;  %v20256_v17 = vcombine.high %v23424_v25, %v867_v32  ;;  %v3176_v26 = vcombine.low %v883_v10, %v898_v31 }
  0x91   : > { %v3183_v18 = vrot.slane %v20255_v9, %v22877_v24  ;;  %v2463_v23 = vcombine.low %v2441_v63, %v2448_v51  ;;  %v3190_v20 = vrot.slane %v3174_v15, %v22877_v24  ;;  %v23474_v28 = vcombine.high %v898_v31, %v898_v31  ;;  %v20119_v15 = vld.sshfl [vmem:[%s22855_s26 + $0x60] sm:$0x33 pattern:$0x75316420] }
  0x92   : > { %v2462_v21 = vrot.slane %v2434_v14, %v22877_v24  ;;  %v3197_v35 = vrot.slane %v20256_v17, %v22877_v24  ;;  %v3204_v22 = vrot.slane %v3176_v26, %v22877_v24  ;;  %v23481_v36 = vcombine.high %v23432_v38, %v23432_v38 }
  0x93   : > { %v915_v25 = vcombine.high %v20117_v16, %v20117_v16  ;;  %v2471_v37 = vrot.slane %v2463_v23, %v22877_v24  ;;  %v3205_v39 = vcombine.low %v3183_v18, %v3190_v20  ;;  %v922_v42 = vrot.slane %v20117_v16, %v22877_v24  ;;  %v20120_v18 = vld.sshfl [vmem:[%s22855_s26 + $0x64] sm:$0x33 pattern:$0x75316420] }
  0x94   : > { %v2464_v32 = vcombine.low %v2455_v12, %v2462_v21  ;;  %v3206_v43 = vcombine.low %v3197_v35, %v3204_v22  ;;  %v1267_v34 = vcombine.high %v20132_v29, %v20132_v29  ;;  %v1274_v27 = vrot.slane %v20132_v29, %v22877_v24  ;;  %v23523_v35 = vld.sshfl [vmem:[%s22855_s26 + $0x68] sm:$0x11 pattern:$0x75316420] }
  0x95   : > { %v929_v31 = vrot.slane %v915_v25, %v22877_v24  ;;  %v3213_v46 = vrot.slane %v3205_v39, %v22877_v24  ;;  %v930_v19 = vcombine.high %v922_v42, %v922_v42  ;;  %v1861_v47 = vshrl.u32 %v23432_v38, 16 }
  0x96   : > { %v2478_v44 = vrot.slane %v2464_v32, %v22877_v24  ;;  %v3220_v33 = vrot.slane %v3206_v43, %v22877_v24  ;;  %v1281_v50 = vrot.slane %v1267_v34, %v22877_v24  ;;  %v1866_v40 = vshll.u32 %v23474_v28, 16 }
  0x97   : > { %v931_v48 = vcombine.high %v929_v31, %v929_v31  ;;  %v1869_v52 = vshrl.u32 %v23474_v28, 16  ;;  %v1874_v53 = vshll.u32 %v23481_v36, 16  ;;  %v1877_v54 = vshrl.u32 %v23481_v36, 16 }
  0x98   : > { %v2479_v45 = vcombine.low %v2471_v37, %v2478_v44  ;;  %v3221_v55 = vcombine.low %v3213_v46, %v3220_v33  ;;  %v1868_v57 = vsel %vm22921_vm14, %v1861_v47, %v1866_v40  ;;  %v1882_v30 = vshll.u32 %v922_v42, 16 }
  0x99   : > { %v1885_v59 = vshrl.u32 %v922_v42, 16  ;;  %v1876_v49 = vsel %vm22921_vm14, %v1869_v52, %v1874_v53  ;;  %v1890_v0 = vshll.u32 %v929_v31, 16  ;;  %v1893_v1 = vshrl.u32 %v929_v31, 16 }
  0x9a   : > { %21837 = vmatmul.mubr.bf16.gmra.mxu0 %v2479_v45  ;;  %v1898_v3 = vshll.u32 %v930_v19, 16  ;;  %21877 = vmatmul.mubr.bf16.gmra.mxu1 %v3221_v55  ;;  %v1884_v4 = vsel %vm22921_vm14, %v1877_v54, %v1882_v30  ;;  %v1901_v60 = vshrl.u32 %v930_v19, 16  ;;  %v1906_v62 = vshll.u32 %v931_v48, 16 }
  0x9b   : > { %v1909_v6 = vshrl.u32 %v931_v48, 16  ;;  %v1892_v2 = vsel %vm22921_vm14, %v1885_v59, %v1890_v0  ;;  %v1914_v8 = vshll.u32 %v1274_v27, 16  ;;  %v1917_v5 = vshrl.u32 %v1274_v27, 16 }
  0x9c   : > { %v1900_v7 = vsel %vm22921_vm14, %v1893_v1, %v1898_v3  ;;  %v1908_v10 = vsel %vm22921_vm14, %v1901_v60, %v1906_v62  ;;  %v1922_v11 = vshll.u32 %v1281_v50, 16  ;;  %v2480_v56 = vcombine.low %v1868_v57, %v1876_v49 }
  0x9d   : > { %v2481_v58 = vcombine.low %v1884_v4, %v1892_v2  ;;  %v1916_v9 = vsel %vm22921_vm14, %v1909_v6, %v1914_v8  ;;  %v2482_v14 = vcombine.low %v1900_v7, %v1908_v10  ;;  %v945_v63 = vrot.slane %v20118_v61, %v22877_v24 }
  0x9e   : > { %v3222_v51 = vcombine.low %v23432_v38, %v23474_v28  ;;  %v1924_v16 = vsel %vm22921_vm14, %v1917_v5, %v1922_v11  ;;  %v2490_v12 = vrot.slane %v2480_v56, %v22877_v24  ;;  %v3223_v26 = vcombine.low %v23481_v36, %v922_v42 }
  0x9f   : > { %v2497_v17 = vrot.slane %v2481_v58, %v22877_v24  ;;  %v2483_v21 = vcombine.low %v1916_v9, %v1924_v16  ;;  %v2504_v23 = vrot.slane %v2482_v14, %v22877_v24  ;;  %v3224_v20 = vcombine.low %v929_v31, %v930_v19 }
  0xa0   : > { %v3225_v29 = vcombine.low %v931_v48, %v945_v63  ;;  %v3232_v38 = vrot.slane %v3222_v51, %v22877_v24  ;;  %v3239_v28 = vrot.slane %v3223_v26, %v22877_v24  ;;  %v953_v25 = vcombine.high %v20119_v15, %v20119_v15 }
  0xa1   : > { %v2512_v22 = vcombine.low %v2490_v12, %v2497_v17  ;;  %v2511_v32 = vrot.slane %v2483_v21, %v22877_v24  ;;  %v3246_v37 = vrot.slane %v3224_v20, %v22877_v24  ;;  %v960_v39 = vrot.slane %v20119_v15, %v22877_v24  ;;  %v20122_v12 = vld.sshfl [vmem:[%s22855_s26 + $0x6c] sm:$0x33 pattern:$0x75316420] }
  0xa2   : > { %v3253_v36 = vrot.slane %v3225_v29, %v22877_v24  ;;  %v3254_v43 = vcombine.low %v3232_v38, %v3239_v28  ;;  %v967_v31 = vrot.slane %v953_v25, %v22877_v24  ;;  %v977_v34 = vcombine.high %v20120_v18, %v20120_v18  ;;  %v20123_v38 = vld.sshfl [vmem:[%s22855_s26 + $0x70] sm:$0x33 pattern:$0x75316420] }
  0xa3   : > { %v2520_v42 = vrot.slane %v2512_v22, %v22877_v24  ;;  %v2513_v27 = vcombine.low %v2504_v23, %v2511_v32  ;;  %v968_v46 = vcombine.high %v960_v39, %v960_v39  ;;  %v984_v19 = vrot.slane %v20120_v18, %v22877_v24 }
  0xa4   : > { %v3255_v44 = vcombine.low %v3246_v37, %v3253_v36  ;;  %v3262_v47 = vrot.slane %v3254_v43, %v22877_v24  ;;  %v969_v33 = vcombine.high %v967_v31, %v967_v31  ;;  %v991_v48 = vrot.slane %v977_v34, %v22877_v24 }
  0xa5   : > { %v23538_v50 = vrot.slane %v23523_v35, %v22877_v24  ;;  %v2527_v40 = vrot.slane %v2513_v27, %v22877_v24  ;;  %v992_v52 = vcombine.high %v984_v19, %v984_v19  ;;  %v1926_v53 = vshrl.u32 %v960_v39, 16 }
  0xa6   : > { %v3269_v45 = vrot.slane %v3255_v44, %v22877_v24  ;;  %v993_v54 = vcombine.high %v991_v48, %v991_v48  ;;  %v1931_v55 = vshll.u32 %v967_v31, 16  ;;  %v1934_v57 = vshrl.u32 %v967_v31, 16 }
  0xa7   : > { %v1939_v30 = vshll.u32 %v968_v46, 16  ;;  %v2528_v59 = vcombine.low %v2520_v42, %v2527_v40  ;;  %v1942_v49 = vshrl.u32 %v968_v46, 16  ;;  %v1947_v0 = vshll.u32 %v969_v33, 16 }
  0xa8   : > { %v3270_v61 = vcombine.low %v3262_v47, %v3269_v45  ;;  %v1933_v1 = vsel %vm22921_vm14, %v1926_v53, %v1931_v55  ;;  %v1950_v4 = vshrl.u32 %v969_v33, 16  ;;  %v1955_v60 = vshll.u32 %v984_v19, 16 }
  0xa9   : > { %v1941_v3 = vsel %vm22921_vm14, %v1934_v57, %v1939_v30  ;;  %21840 = vmatprep.mubr.bf16.mxu0 %v2528_v59  ;;  %v1949_v62 = vsel %vm22921_vm14, %v1942_v49, %v1947_v0  ;;  %v1958_v6 = vshrl.u32 %v984_v19, 16  ;;  %v1963_v2 = vshll.u32 %v991_v48, 16 }
  0xaa   : > { %21880 = vmatprep.mubr.bf16.mxu1 %v3270_v61  ;;  %v1966_v7 = vshrl.u32 %v991_v48, 16  ;;  %v1957_v8 = vsel %vm22921_vm14, %v1950_v4, %v1955_v60  ;;  %v1971_v5 = vshll.u32 %v992_v52, 16  ;;  %v1974_v10 = vshrl.u32 %v992_v52, 16 }
  0xab   : > { %v1979_v11 = vshll.u32 %v993_v54, 16  ;;  %v1965_v56 = vsel %vm22921_vm14, %v1958_v6, %v1963_v2  ;;  %v1982_v58 = vshrl.u32 %v993_v54, 16  ;;  %v1987_v9 = vshll.u32 %v23538_v50, 16 }
  0xac   : > { %v2529_v14 = vcombine.low %v1933_v1, %v1941_v3  ;;  %v1973_v63 = vsel %vm22921_vm14, %v1966_v7, %v1971_v5  ;;  %v2530_v15 = vcombine.low %v1949_v62, %v1957_v8  ;;  %v3271_v16 = vcombine.low %v960_v39, %v967_v31  ;;  %v20121_v7 = vld.sshfl [vmem:[%s22855_s26 + $0x68] sm:$0x1 pattern:$0x75316420] }
  0xad   : > { %v1981_v51 = vsel %vm22921_vm14, %v1974_v10, %v1979_v11  ;;  %v1989_v17 = vsel %vm22921_vm14, %v1982_v58, %v1987_v9  ;;  %v2531_v26 = vcombine.low %v1965_v56, %v1973_v63  ;;  %v20257_v21 = vcombine.high %v960_v39, %v967_v31 }
  0xae   : > { %v2539_v18 = vrot.slane %v2529_v14, %v22877_v24  ;;  %v2532_v23 = vcombine.low %v1981_v51, %v1989_v17  ;;  %v2546_v20 = vrot.slane %v2530_v15, %v22877_v24  ;;  %v3273_v29 = vcombine.low %v984_v19, %v991_v48  ;;  %v20134_v15 = vld.sshfl [vmem:[%s22855_s26 + $0x74] sm:$0x11 pattern:$0x75316420] }
  0xaf   : > { %v20258_v22 = vcombine.high %v984_v19, %v991_v48  ;;  %v2553_v28 = vrot.slane %v2531_v26, %v22877_v24  ;;  %v3281_v25 = vrot.slane %v3271_v16, %v22877_v24  ;;  %v3288_v32 = vrot.slane %v20257_v21, %v22877_v24 }
  0xb0   : > { %v1015_v37 = vcombine.high %v20122_v12, %v20122_v12  ;;  %v2560_v36 = vrot.slane %v2532_v23, %v22877_v24  ;;  %v2561_v42 = vcombine.low %v2539_v18, %v2546_v20  ;;  %v3295_v43 = vrot.slane %v3273_v29, %v22877_v24  ;;  %v20124_v29 = vld.sshfl [vmem:[%s22855_s26 + $0x74] sm:$0x1 pattern:$0x75316420] }
  0xb1   : > { %v3302_v39 = vrot.slane %v20258_v22, %v22877_v24  ;;  %v3303_v31 = vcombine.low %v3281_v25, %v3288_v32  ;;  %v1022_v34 = vrot.slane %v20122_v12, %v22877_v24  ;;  %v1039_v44 = vcombine.high %v20123_v38, %v20123_v38 }
  0xb2   : > { %v1029_v27 = vrot.slane %v1015_v37, %v22877_v24  ;;  %v2562_v46 = vcombine.low %v2553_v28, %v2560_v36  ;;  %v2569_v19 = vrot.slane %v2561_v42, %v22877_v24  ;;  %v1046_v33 = vrot.slane %v20123_v38, %v22877_v24 }
  0xb3   : > { %v3304_v47 = vcombine.low %v3295_v43, %v3302_v39  ;;  %v3311_v48 = vrot.slane %v3303_v31, %v22877_v24  ;;  %v1030_v40 = vcombine.high %v1022_v34, %v1022_v34  ;;  %v1053_v52 = vrot.slane %v1039_v44, %v22877_v24  ;;  %v20267_v43 = vld.sshfl [vmem:[%s22855_s26] sm:$0x32 pattern:$0x75316420] }
  0xb4   : > { %v1031_v45 = vcombine.high %v1029_v27, %v1029_v27  ;;  %v2576_v53 = vrot.slane %v2562_v46, %v22877_v24  ;;  %v1054_v55 = vcombine.high %v1046_v33, %v1046_v33  ;;  %v1289_v57 = vcombine.high %v23523_v35, %v23523_v35 }
  0xb5   : > { %v3318_v54 = vrot.slane %v3304_v47, %v22877_v24  ;;  %v23579_v30 = vcombine.high %v1053_v52, %v1053_v52  ;;  %v1990_v59 = vshrl.u32 %v23538_v50, 16  ;;  %v1999_v61 = vshrl.u32 %v1022_v34, 16 }
  0xb6   : > { %v2004_v49 = vshll.u32 %v1029_v27, 16  ;;  %v2577_v0 = vcombine.low %v2569_v19, %v2576_v53  ;;  %v1303_v3 = vrot.slane %v1289_v57, %v22877_v24  ;;  %v2007_v4 = vshrl.u32 %v1029_v27, 16 }
  0xb7   : > { %v3319_v1 = vcombine.low %v3311_v48, %v3318_v54  ;;  %v2012_v62 = vshll.u32 %v1030_v40, 16  ;;  %v2015_v6 = vshrl.u32 %v1030_v40, 16  ;;  %v2020_v2 = vshll.u32 %v1031_v45, 16 }
  0xb8   : > { %v2006_v60 = vsel %vm22921_vm14, %v1999_v61, %v2004_v49  ;;  %21841 = vmatmul.mubr.bf16.gmra.mxu0 %v2577_v0  ;;  %v1995_v35 = vshll.u32 %v1303_v3, 16  ;;  %v2023_v8 = vshrl.u32 %v1031_v45, 16  ;;  %v2028_v50 = vshll.u32 %v1046_v33, 16 }
  0xb9   : > { %21881 = vmatmul.mubr.bf16.gmra.mxu1 %v3319_v1  ;;  %v2031_v5 = vshrl.u32 %v1046_v33, 16  ;;  %v2014_v10 = vsel %vm22921_vm14, %v2007_v4, %v2012_v62  ;;  %v2022_v11 = vsel %vm22921_vm14, %v2015_v6, %v2020_v2  ;;  %v2036_v56 = vshll.u32 %v1053_v52, 16  ;;  %v20269_v0 = vld.sshfl [vmem:[%s22855_s26 + $0x8] sm:$0x11 pattern:$0x75316420] }
  0xba   : > { %v2039_v58 = vshrl.u32 %v1053_v52, 16  ;;  %v1997_v9 = vsel %vm22921_vm14, %v1990_v59, %v1995_v35  ;;  %v2030_v14 = vsel %vm22921_vm14, %v2023_v8, %v2028_v50  ;;  %v2044_v63 = vshll.u32 %v1054_v55, 16  ;;  %v20270_v35 = vld.sshfl [vmem:[%s22855_s26 + $0xc] sm:$0x32 pattern:$0x75316420] }
  0xbb   : > { %v2047_v51 = vshrl.u32 %v1054_v55, 16  ;;  %v2038_v16 = vsel %vm22921_vm14, %v2031_v5, %v2036_v56  ;;  %v2052_v12 = vshll.u32 %v23579_v30, 16  ;;  %v2578_v17 = vcombine.low %v1997_v9, %v2006_v60 }
  0xbc   : > { %v2579_v26 = vcombine.low %v2014_v10, %v2022_v11  ;;  %v2046_v18 = vsel %vm22921_vm14, %v2039_v58, %v2044_v63  ;;  %v2580_v21 = vcombine.low %v2030_v14, %v2038_v16  ;;  %v1007_v23 = vrot.slane %v20121_v7, %v22877_v24  ;;  %v20271_v14 = vld.sshfl [vmem:[%s22855_s26 + $0x10] sm:$0x33 pattern:$0x75316420] }
  0xbd   : > { %v3321_v20 = vcombine.low %v1029_v27, %v1030_v40  ;;  %v2054_v22 = vsel %vm22921_vm14, %v2047_v51, %v2052_v12  ;;  %v2588_v38 = vrot.slane %v2578_v17, %v22877_v24  ;;  %v3322_v25 = vcombine.low %v1031_v45, %v1046_v33 }
  0xbe   : > { %v2595_v28 = vrot.slane %v2579_v26, %v22877_v24  ;;  %v2581_v32 = vcombine.low %v2046_v18, %v2054_v22  ;;  %v2602_v37 = vrot.slane %v2580_v21, %v22877_v24  ;;  %v3320_v36 = vcombine.low %v1007_v23, %v1022_v34 }
  0xbf   : > { %v3323_v42 = vcombine.low %v1053_v52, %v1054_v55  ;;  %v3337_v31 = vrot.slane %v3321_v20, %v22877_v24  ;;  %v3344_v27 = vrot.slane %v3322_v25, %v22877_v24  ;;  %v1311_v44 = vcombine.high %v20134_v15, %v20134_v15  ;;  %v20268_v52 = vld.sshfl [vmem:[%s22855_s26 + $0x4] sm:$0x33 pattern:$0x75316420] }
  0xc0   : > { %v2610_v39 = vcombine.low %v2588_v38, %v2595_v28  ;;  %v2609_v46 = vrot.slane %v2581_v32, %v22877_v24  ;;  %v3330_v19 = vrot.slane %v3320_v36, %v22877_v24  ;;  %v1318_v33 = vrot.slane %v20134_v15, %v22877_v24  ;;  %v20366_v32 = vld.sshfl [vmem:[%s22855_s26 + $0x18] sm:$0x33 pattern:$0x75316420] }
  0xc1   : > { %v3351_v47 = vrot.slane %v3323_v42, %v22877_v24  ;;  %v1325_v34 = vrot.slane %v1311_v44, %v22877_v24  ;;  %v2055_v40 = vshrl.u32 %v23579_v30, 16  ;;  %v1069_v45 = vrot.slane %v20124_v29, %v22877_v24  ;;  %v20363_v29 = vld.sshfl [vmem:[%s22855_s26 + $0xc] sm:$0x33 pattern:$0x75316420] }
  0xc2   : > { %v2618_v48 = vrot.slane %v2610_v39, %v22877_v24  ;;  %v2611_v53 = vcombine.low %v2602_v37, %v2609_v46  ;;  %v3352_v54 = vcombine.low %v3330_v19, %v3337_v31  ;;  %v2060_v57 = vshll.u32 %v1318_v33, 16  ;;  %v20365_v39 = vld.sshfl [vmem:[%s22855_s26 + $0x14] sm:$0x1 pattern:$0x75316420] }
  0xc3   : > { %v3353_v55 = vcombine.low %v3344_v27, %v3351_v47  ;;  %v2063_v59 = vshrl.u32 %v1318_v33, 16  ;;  %v2068_v61 = vshll.u32 %v1325_v34, 16  ;;  %v3369_v49 = vcombine.low %v23579_v30, %v1069_v45  ;;  %v20367_v45 = vld.sshfl [vmem:[%s22855_s26 + $0x1c] sm:$0x33 pattern:$0x75316420] }
  0xc4   : > { %v3639_v1 = vcombine.high %v20267_v43, %v20267_v43  ;;  %v2625_v3 = vrot.slane %v2611_v53, %v22877_v24  ;;  %v3360_v4 = vrot.slane %v3352_v54, %v22877_v24  ;;  %v2062_v62 = vsel %vm22921_vm14, %v2055_v40, %v2060_v57 }
  0xc5   : > { %v3367_v60 = vrot.slane %v3353_v55, %v22877_v24  ;;  %v2070_v6 = vsel %vm22921_vm14, %v2063_v59, %v2068_v61  ;;  %v3376_v2 = vrot.slane %v3369_v49, %v22877_v24  ;;  %v3646_v7 = vrot.slane %v20267_v43, %v22877_v24 }
  0xc6   : > { %v3653_v30 = vrot.slane %v3639_v1, %v22877_v24  ;;  %v2626_v8 = vcombine.low %v2618_v48, %v2625_v3  ;;  %v2627_v5 = vcombine.low %v2062_v62, %v2070_v6  ;;  %v3663_v10 = vcombine.high %v20268_v52, %v20268_v52  ;;  %v20272_v3 = vld.sshfl [vmem:[%s22855_s26 + $0x14] sm:$0x11 pattern:$0x75316420] }
  0xc7   : > { %v3368_v50 = vcombine.low %v3360_v4, %v3367_v60  ;;  %v3383_v11 = vrot.slane %v3376_v2, %v22877_v24  ;;  %v3654_v56 = vcombine.high %v3646_v7, %v3646_v7  ;;  %v3670_v9 = vrot.slane %v20268_v52, %v22877_v24 }
  0xc8   : > { %v3655_v58 = vcombine.high %v3653_v30, %v3653_v30  ;;  %21844 = vmatprep.mubr.bf16.mxu0 %v2626_v8  ;;  %v2634_v63 = vrot.slane %v2627_v5, %v22877_v24  ;;  %v3677_v51 = vrot.slane %v3663_v10, %v22877_v24  ;;  %v3687_v15 = vcombine.high %v20269_v0, %v20269_v0 }
  0xc9   : > { %21884 = vmatprep.mubr.bf16.mxu1 %v3368_v50  ;;  %v3678_v16 = vcombine.high %v3670_v9, %v3670_v9  ;;  %v3694_v12 = vrot.slane %v20269_v0, %v22877_v24  ;;  %v4349_v17 = vcombine.low %v3653_v30, %v3654_v56  ;;  %v3709_v20 = vcombine.high %v20270_v35, %v20270_v35 }
  0xca   : > { %21885 = vmatmul.mubr.bf16.gmra.mxu1 %v3383_v11  ;;  %v4350_v26 = vcombine.low %v3655_v58, %v3670_v9  ;;  %v2641_v18 = vrot.slane %v2634_v63, %v22877_v24  ;;  %v3679_v21 = vcombine.high %v3677_v51, %v3677_v51  ;;  %v3701_v23 = vrot.slane %v3687_v15, %v22877_v24 }
  0xcb   : > { %v4351_v22 = vcombine.low %v3677_v51, %v3678_v16  ;;  %v4359_v38 = vrot.slane %v4349_v17, %v22877_v24  ;;  %v3716_v25 = vrot.slane %v20270_v35, %v22877_v24  ;;  %v3723_v36 = vrot.slane %v3709_v20, %v22877_v24 }
  0xcc   : > { %v4366_v28 = vrot.slane %v4350_v26, %v22877_v24  ;;  %21845 = vmatmul.mubr.bf16.gmra.mxu0 %v2641_v18  ;;  %v4352_v37 = vcombine.low %v3679_v21, %v3694_v12  ;;  %v3733_v42 = vcombine.high %v20271_v14, %v20271_v14  ;;  %v3740_v43 = vrot.slane %v20271_v14, %v22877_v24  ;;  %v20273_v14 = vld.sshfl [vmem:[%s22855_s26 + $0x18] sm:$0x32 pattern:$0x75316420] }
  0xcd   : > { %v4373_v31 = vrot.slane %v4351_v22, %v22877_v24  ;;  %v5185_v44 = vcombine.high %v20363_v29, %v20363_v29  ;;  %v5192_v46 = vrot.slane %v20363_v29, %v22877_v24  ;;  %v4398_v33 = vcombine.low %v3701_v23, %v3723_v36  ;;  %v20275_v21 = vld.sshfl [vmem:[%s22855_s26 + $0x20] sm:$0x11 pattern:$0x75316420]  ;;  %v22548_v29 = vld [vmem:[%s28160_s1 + $0x130] sm:$0xff]  }
  0xce   : > { %v4381_v27 = vcombine.low %v4359_v38, %v4366_v28  ;;  %v4380_v19 = vrot.slane %v4352_v37, %v22877_v24  ;;  %v3747_v47 = vrot.slane %v3733_v42, %v22877_v24  ;;  %v20313_v48 = vcombine.high %v3716_v25, %v3723_v36 }
  0xcf   : > { %v5199_v40 = vrot.slane %v5185_v44, %v22877_v24  ;;  %v5239_v52 = vrot.slane %v20365_v39, %v22877_v24  ;;  %v5247_v53 = vcombine.high %v20366_v32, %v20366_v32  ;;  %v4408_v59 = vrot.slane %v4398_v33, %v22877_v24  ;;  %v20276_v39 = vld.sshfl [vmem:[%s22855_s26 + $0x24] sm:$0x32 pattern:$0x75316420] }
  0xd0   : > { %v4389_v34 = vrot.slane %v4381_v27, %v22877_v24  ;;  %v4382_v54 = vcombine.low %v4373_v31, %v4380_v19  ;;  %v4400_v55 = vcombine.low %v3740_v43, %v3747_v47  ;;  %v20314_v57 = vcombine.high %v3740_v43, %v3747_v47  ;;  %v22683_v27 = vld [vmem:[%s28160_s1 + $0x138] sm:$0xff]   ;;  %v20277_v19 = vld.sshfl [vmem:[%s22855_s26 + $0x28] sm:$0x33 pattern:$0x75316420] }
  0xd1   : > { %v4415_v61 = vrot.slane %v20313_v48, %v22877_v24  ;;  %v5815_v49 = vcombine.low %v5192_v46, %v5199_v40  ;;  %v20409_v0 = vcombine.high %v5192_v46, %v5199_v40  ;;  %v5254_v1 = vrot.slane %v20366_v32, %v22877_v24 }
  0xd2   : > { %v4396_v4 = vrot.slane %v4382_v54, %v22877_v24  ;;  %v4422_v60 = vrot.slane %v4400_v55, %v22877_v24  ;;  %v4429_v62 = vrot.slane %v20314_v57, %v22877_v24  ;;  %v5261_v6 = vrot.slane %v5247_v53, %v22877_v24  ;;  %v20368_v57 = vld.sshfl [vmem:[%s22855_s26 + $0x20] sm:$0x1 pattern:$0x75316420] }
  0xd3   : > { %v4430_v2 = vcombine.low %v4408_v59, %v4415_v61  ;;  %v5825_v7 = vrot.slane %v5815_v49, %v22877_v24  ;;  %v5832_v30 = vrot.slane %v20409_v0, %v22877_v24  ;;  %v5262_v35 = vcombine.high %v5254_v1, %v5254_v1 }
  0xd4   : > { %v4397_v8 = vcombine.low %v4389_v34, %v4396_v4  ;;  %v4431_v50 = vcombine.low %v4422_v60, %v4429_v62  ;;  %v5263_v5 = vcombine.high %v5261_v6, %v5261_v6  ;;  %v5271_v10 = vcombine.high %v20367_v45, %v20367_v45  ;;  %v20369_v62 = vld.sshfl [vmem:[%s22855_s26 + $0x24] sm:$0x33 pattern:$0x75316420] }
  0xd5   : > { %v4438_v11 = vrot.slane %v4430_v2, %v22877_v24  ;;  %v5847_v56 = vcombine.low %v5825_v7, %v5832_v30  ;;  %v5278_v58 = vrot.slane %v20367_v45, %v22877_v24  ;;  %v5864_v9 = vcombine.low %v5239_v52, %v5254_v1  ;;  %v22549_v45 = vld [vmem:[%s28160_s1 + $0x128] sm:$0xff]  }
  0xd6   : > { %21904 = vmatprep.mubr.bf16.mxu0 %v4397_v8  ;;  %v4445_v63 = vrot.slane %v4431_v50, %v22877_v24  ;;  %v5285_v51 = vrot.slane %v5271_v10, %v22877_v24  ;;  %v5865_v15 = vcombine.low %v5261_v6, %v5262_v35  ;;  %v3757_v16 = vcombine.high %v20272_v3, %v20272_v3  ;;  %v22550_v10 = vld [vmem:[%s28160_s1 + $0x120] sm:$0xff]  }
  0xd7   : > { %v5855_v12 = vrot.slane %v5847_v56, %v22877_v24  ;;  %v5286_v17 = vcombine.high %v5278_v58, %v5278_v58  ;;  %v5866_v26 = vcombine.low %v5263_v5, %v5278_v58  ;;  %v5874_v18 = vrot.slane %v5864_v9, %v22877_v24  ;;  %v20372_v5 = vld.sshfl [vmem:[%s22855_s26 + $0x30] sm:$0x33 pattern:$0x75316420] }
  0xd8   : > { %v4446_v23 = vcombine.low %v4438_v11, %v4445_v63  ;;  %v5881_v20 = vrot.slane %v5865_v15, %v22877_v24  ;;  %v3764_v22 = vrot.slane %v20272_v3, %v22877_v24  ;;  %v3771_v38 = vrot.slane %v3757_v16, %v22877_v24 }
  0xd9   : > { %v5863_v28 = vcombine.low %v5855_v12, %v4445_v63  ;;  %v5867_v25 = vcombine.low %v5285_v51, %v5286_v17  ;;  %v5888_v32 = vrot.slane %v5866_v26, %v22877_v24  ;;  %v3779_v37 = vcombine.high %v20273_v14, %v20273_v14  ;;  %v22552_v12 = vld [vmem:[%s28160_s1 + $0x170] sm:$0xff]  }
  0xda   : > { %21905 = vmatmul.mubr.bf16.vlgmr.msra.gmra.mxu0 %v4446_v23  ;;  %v5896_v36 = vcombine.low %v5874_v18, %v5881_v20  ;;  %v3786_v42 = vrot.slane %v20273_v14, %v22877_v24  ;;  %v4447_v43 = vcombine.low %v3764_v22, %v3771_v38  ;;  %v3819_v31 = vcombine.high %v5285_v51, %v5285_v51  ;;  %v20371_v14 = vld.sshfl [vmem:[%s22855_s26 + $0x2c] sm:$0x1 pattern:$0x75316420] }
  0xdb   : > { %21944 = vmatprep.mubr.bf16.mxu1 %v5863_v28  ;;  %21969 = vmatpush3.bf16.msra.mxu0 %v22683_v27  ;;  %v5895_v44 = vrot.slane %v5867_v25, %v22877_v24  ;;  %v3793_v46 = vrot.slane %v3779_v37, %v22877_v24  ;;  %v3827_v47 = vcombine.high %v20275_v21, %v20275_v21  ;;  %v20278_v27 = vld.sshfl [vmem:[%s22855_s26 + $0x2c] sm:$0x11 pattern:$0x75316420] }
  0xdc   : > { %v5904_v33 = vrot.slane %v5896_v36, %v22877_v24  ;;  %21970 = vmatprep.subr.bf16.mxu0 %v22548_v29  ;;  %v3794_v48 = vcombine.high %v3786_v42, %v3786_v42  ;;  %v4457_v34 = vrot.slane %v4447_v43, %v22877_v24  ;;  %v3834_v40 = vrot.slane %v20275_v21, %v22877_v24  ;;  %v22684_v36 = vld [vmem:[%s28160_s1 + $0x178] sm:$0xff]  }
  0xdd   : > { %v5897_v52 = vcombine.low %v5888_v32, %v5895_v44  ;;  %v3795_v53 = vcombine.high %v3793_v46, %v3793_v46  ;;  %v3841_v54 = vrot.slane %v3827_v47, %v22877_v24  ;;  %v3849_v55 = vcombine.high %v20276_v39, %v20276_v39 }
  0xde   : > { %v4448_v59 = vcombine.low %v3793_v46, %v3794_v48  ;;  %v3856_v61 = vrot.slane %v20276_v39, %v22877_v24  ;;  %v3873_v49 = vcombine.high %v20277_v19, %v20277_v19  ;;  %v23699_v0 = vrot.slane %v20277_v19, %v22877_v24 }
  0xdf   : > { %v5911_v1 = vrot.slane %v5897_v52, %v22877_v24  ;;  %v4449_v3 = vcombine.low %v3795_v53, %v5278_v58  ;;  %21971 = vmatpush3.bf16.msra.mxu0 %v22548_v29  ;;  %v3863_v4 = vrot.slane %v3849_v55, %v22877_v24  ;;  %v4496_v60 = vcombine.low %v3819_v31, %v3834_v40  ;;  %v23729_v29 = vld.sshfl [vmem:[%s22855_s26 + $0x34] sm:$0x33 pattern:$0x75316420] }
  0xe0   : > { %v4464_v6 = vrot.slane %v4448_v59, %v22877_v24  ;;  %v23706_v2 = vrot.slane %v3873_v49, %v22877_v24  ;;  %v5301_v7 = vrot.slane %v20368_v57, %v22877_v24  ;;  %21972 = vmatprep.subr.bf16.mxu0 %v22549_v45  ;;  %v5309_v9 = vcombine.high %v20369_v62, %v20369_v62  ;;  %v20279_v55 = vld.sshfl [vmem:[%s22855_s26 + $0x30] sm:$0x32 pattern:$0x75316420]  ;;  %v22554_v59 = vld [vmem:[%s28160_s1 + $0x168] sm:$0xff]  }
  0xe1   : > { %v5912_v30 = vcombine.low %v5904_v33, %v5911_v1  ;;  %v4471_v35 = vrot.slane %v4449_v3, %v22877_v24  ;;  %v4497_v8 = vcombine.low %v3841_v54, %v3863_v4  ;;  %v20315_v50 = vcombine.high %v3856_v61, %v3863_v4 }
  0xe2   : > { %v4479_v11 = vcombine.low %v4457_v34, %v4464_v6  ;;  %v4499_v56 = vcombine.low %v23699_v0, %v23706_v2  ;;  %v4506_v58 = vrot.slane %v4496_v60, %v22877_v24  ;;  %v5316_v16 = vrot.slane %v20369_v62, %v22877_v24 }
  0xe3   : > { %21945 = vmatmul.mubr.bf16.vlgmr.msra.gmra.mxu1 %v5912_v30  ;;  %v4480_v63 = vcombine.low %v4471_v35, %v5895_v44  ;;  %v4513_v51 = vrot.slane %v4497_v8, %v22877_v24  ;;  %v4520_v15 = vrot.slane %v20315_v50, %v22877_v24  ;;  %v5323_v18 = vrot.slane %v5309_v9, %v22877_v24  ;;  %v22553_v44 = vld [vmem:[%s28160_s1 + $0x118] sm:$0xff]   ;;  %v22555_v35 = vld [vmem:[%s28160_s1 + $0x110] sm:$0xff]  }
  0xe4   : > { %v4487_v17 = vrot.slane %v4479_v11, %v22877_v24  ;;  %v4527_v26 = vrot.slane %v4499_v56, %v22877_v24  ;;  %v5913_v21 = vcombine.low %v3819_v31, %v5301_v7  ;;  %21973 = vmatpush3.bf16.msra.mxu0 %v22549_v45  ;;  %v5363_v22 = vrot.slane %v20371_v14, %v22877_v24  ;;  %v22556_v11 = vld [vmem:[%s28160_s1 + $0x160] sm:$0xff]   ;;  %v20282_v14 = vld.sshfl [vmem:[%s22855_s26 + $0x3c] sm:$0x32 pattern:$0x75316420] }
  0xe5   : > { %v4494_v23 = vrot.slane %v4480_v63, %v22877_v24  ;;  %v4528_v20 = vcombine.low %v4506_v58, %v4513_v51  ;;  %v5371_v38 = vcombine.high %v20372_v5, %v20372_v5  ;;  %21974 = vmatprep.subr.bf16.mxu0 %v22550_v10  ;;  %v5914_v25 = vcombine.low %v5316_v16, %v5323_v18 }
  0xe6   : > { %v4529_v28 = vcombine.low %v4520_v15, %v4527_v26  ;;  %v20411_v32 = vcombine.high %v5316_v16, %v5323_v18  ;;  %v5923_v37 = vrot.slane %v5913_v21, %v22877_v24  ;;  %22009 = vmatpush3.bf16.msra.mxu1 %v22684_v36  ;;  %v5378_v39 = vrot.slane %v20372_v5, %v22877_v24  ;;  %v20374_v36 = vld.sshfl [vmem:[%s22855_s26 + $0x38] sm:$0x1 pattern:$0x75316420] }
  0xe7   : > { %v4495_v42 = vcombine.low %v4487_v17, %v4494_v23  ;;  %v4536_v43 = vrot.slane %v4528_v20, %v22877_v24  ;;  %v5385_v31 = vrot.slane %v5371_v38, %v22877_v24  ;;  %22010 = vmatprep.subr.bf16.mxu1 %v22552_v12  ;;  %v5930_v19 = vrot.slane %v5914_v25, %v22877_v24  ;;  %v22557_v38 = vld [vmem:[%s28160_s1 + $0x158] sm:$0xff]  }
  0xe8   : > { %v4543_v46 = vrot.slane %v4529_v28, %v22877_v24  ;;  %v5937_v47 = vrot.slane %v20411_v32, %v22877_v24  ;;  %v23748_v33 = vrot.slane %v23729_v29, %v22877_v24  ;;  %21975 = vmatpush3.bf16.msra.mxu0 %v22550_v10  ;;  %v5386_v48 = vcombine.high %v5378_v39, %v5378_v39  ;;  %v20281_v10 = vld.sshfl [vmem:[%s22855_s26 + $0x38] sm:$0x11 pattern:$0x75316420] }
  0xe9   : > { %21908 = vmatprep.mubr.bf16.mxu0 %v4495_v42  ;;  %v5387_v34 = vcombine.high %v5385_v31, %v5385_v31  ;;  %v20412_v40 = vcombine.high %v23699_v0, %v23706_v2  ;;  %v5963_v45 = vcombine.low %v5363_v22, %v5378_v39  ;;  %v5945_v53 = vcombine.low %v5923_v37, %v5930_v19  ;;  %v20375_v22 = vld.sshfl [vmem:[%s22855_s26 + $0x3c] sm:$0x33 pattern:$0x75316420]  ;;  %v22558_v42 = vld [vmem:[%s28160_s1 + $0x108] sm:$0xff]  }
  0xea   : > { %v4544_v52 = vcombine.low %v4536_v43, %v4543_v46  ;;  %v5946_v54 = vcombine.low %v5937_v47, %v4527_v26  ;;  %v3897_v57 = vcombine.high %v20278_v27, %v20278_v27  ;;  %22011 = vmatpush3.bf16.msra.mxu1 %v22552_v12  ;;  %v5964_v61 = vcombine.low %v5385_v31, %v5386_v48 }
  0xeb   : > { %v5965_v49 = vcombine.low %v5387_v34, %v23748_v33  ;;  %v5972_v1 = vrot.slane %v20412_v40, %v22877_v24  ;;  %v5979_v3 = vrot.slane %v5963_v45, %v22877_v24  ;;  %21976 = vmatprep.subr.bf16.mxu0 %v22553_v44  ;;  %v5953_v0 = vrot.slane %v5945_v53, %v22877_v24  ;;  %v20376_v40 = vld.sshfl [vmem:[%s22855_s26 + $0x40] sm:$0x33 pattern:$0x75316420]  ;;  %v22559_v45 = vld [vmem:[%s28160_s1 + $0x150] sm:$0xff]  }
  0xec   : > { %21909 = vmatmul.mubr.bf16.gmra.mxu0 %v4544_v52  ;;  %v5960_v4 = vrot.slane %v5946_v54, %v22877_v24  ;;  %v3904_v60 = vrot.slane %v20278_v27, %v22877_v24  ;;  %v3911_v62 = vrot.slane %v3897_v57, %v22877_v24  ;;  %v5986_v6 = vrot.slane %v5964_v61, %v22877_v24  ;;  %v22560_v57 = vld [vmem:[%s28160_s1 + $0x100] sm:$0xff]  }
  0xed   : > { %v5993_v2 = vrot.slane %v5965_v49, %v22877_v24  ;;  %v5994_v7 = vcombine.low %v5972_v1, %v5979_v3  ;;  %v3919_v30 = vcombine.high %v20279_v55, %v20279_v55  ;;  %21977 = vmatpush3.bf16.msra.mxu0 %v22553_v44  ;;  %v3926_v50 = vrot.slane %v20279_v55, %v22877_v24 }
  0xee   : > { %v5961_v8 = vcombine.low %v5953_v0, %v5960_v4  ;;  %v4546_v5 = vcombine.low %v3904_v60, %v3911_v62  ;;  %22012 = vmatprep.subr.bf16.mxu1 %v22554_v59  ;;  %v3943_v63 = vcombine.high %v23729_v29, %v23729_v29  ;;  %v3958_v16 = vcombine.high %v23748_v33, %v23748_v33  ;;  %v20377_v4 = vld.sshfl [vmem:[%s22855_s26 + $0x44] sm:$0x1 pattern:$0x75316420] }
  0xef   : > { %v5995_v56 = vcombine.low %v5986_v6, %v5993_v2  ;;  %v6002_v58 = vrot.slane %v5994_v7, %v22877_v24  ;;  %v3933_v9 = vrot.slane %v3919_v30, %v22877_v24  ;;  %22013 = vmatpush3.bf16.msra.mxu1 %v22554_v59  ;;  %v3934_v51 = vcombine.high %v3926_v50, %v3926_v50  ;;  %v20378_v7 = vld.sshfl [vmem:[%s22855_s26 + $0x48] sm:$0x33 pattern:$0x75316420] }
  0xf0   : > { %21948 = vmatprep.mubr.bf16.mxu1 %v5961_v8  ;;  %v4562_v15 = vrot.slane %v4546_v5, %v22877_v24  ;;  %v3957_v26 = vrot.slane %v3943_v63, %v22877_v24  ;;  %v3967_v18 = vcombine.high %v20281_v10, %v20281_v10  ;;  %21978 = vmatprep.subr.bf16.mxu0 %v22555_v35  ;;  %v22561_v30 = vld [vmem:[%s28160_s1 + $0x148] sm:$0xff]  }
  0xf1   : > { %v6009_v12 = vrot.slane %v5995_v56, %v22877_v24  ;;  %v3935_v17 = vcombine.high %v3933_v9, %v3933_v9  ;;  %v4547_v21 = vcombine.low %v3933_v9, %v3934_v51  ;;  %v3974_v20 = vrot.slane %v20281_v10, %v22877_v24  ;;  %22014 = vmatprep.subr.bf16.mxu1 %v22556_v11 }
  0xf2   : > { %v4577_v23 = vcombine.low %v5972_v1, %v4562_v15  ;;  %v3989_v29 = vcombine.high %v20282_v14, %v20282_v14  ;;  %v3959_v32 = vcombine.high %v3957_v26, %v3957_v26  ;;  %v3981_v37 = vrot.slane %v3967_v18, %v22877_v24  ;;  %21979 = vmatpush3.bf16.msra.mxu0 %v22555_v35  ;;  %v20284_v15 = vld.sshfl [vmem:[%s22855_s26 + $0x44] sm:$0x11 pattern:$0x75316420] }
  0xf3   : > { %v6010_v28 = vcombine.low %v6002_v58, %v6009_v12  ;;  %v4548_v25 = vcombine.low %v3935_v17, %v23748_v33  ;;  %v4569_v43 = vrot.slane %v4547_v21, %v22877_v24  ;;  %v3996_v31 = vrot.slane %v20282_v14, %v22877_v24  ;;  %22015 = vmatpush3.bf16.msra.mxu1 %v22556_v11  ;;  %v20285_v18 = vld.sshfl [vmem:[%s22855_s26 + $0x48] sm:$0x32 pattern:$0x75316420]  ;;  %v22562_v21 = vld [vmem:[%s28160_s1 + $0x140] sm:$0xff]  }
  0xf4   : > { %v4585_v39 = vrot.slane %v4577_v23, %v22877_v24  ;;  %v4003_v27 = vrot.slane %v3989_v29, %v22877_v24  ;;  %v4594_v46 = vcombine.low %v3957_v26, %v3958_v16  ;;  %v4595_v19 = vcombine.low %v3959_v32, %v3974_v20  ;;  %22016 = vmatprep.subr.bf16.mxu1 %v22557_v38 }
  0xf5   : > { %21949 = vmatmul.mubr.bf16.gmra.mxu1 %v6010_v28  ;;  %v4576_v44 = vrot.slane %v4548_v25, %v22877_v24  ;;  %v5425_v48 = vrot.slane %v20374_v36, %v22877_v24  ;;  %v5433_v34 = vcombine.high %v20375_v22, %v20375_v22  ;;  %v5440_v55 = vrot.slane %v20375_v22, %v22877_v24  ;;  %v20286_v36 = vld.sshfl [vmem:[%s22855_s26 + $0x4c] sm:$0x33 pattern:$0x75316420] }
  0xf6   : > { %v4596_v47 = vcombine.low %v3981_v37, %v4003_v27  ;;  %v20317_v33 = vcombine.high %v3996_v31, %v4003_v27  ;;  %v4604_v53 = vrot.slane %v4594_v46, %v22877_v24  ;;  %v4611_v54 = vrot.slane %v4595_v19, %v22877_v24  ;;  %21980 = vmatprep.subr.bf16.mxu0 %v22558_v42  ;;  %v20287_v27 = vld.sshfl [vmem:[%s22855_s26 + $0x50] sm:$0x11 pattern:$0x75316420] }
  0xf7   : > { %v4578_v52 = vcombine.low %v4569_v43, %v4576_v44  ;;  %v5447_v49 = vrot.slane %v5433_v34, %v22877_v24  ;;  %22017 = vmatpush3.bf16.msra.mxu1 %v22557_v38  ;;  %v6012_v0 = vcombine.low %v3959_v32, %v5425_v48  ;;  %v5457_v60 = vcombine.high %v20376_v40, %v20376_v40  ;;  %v23840_v38 = vld [vmem:[%s28160_s1 + $0x1b8] sm:$0xff]  }
  0xf8   : > { %v4618_v59 = vrot.slane %v4596_v47, %v22877_v24  ;;  %v4625_v61 = vrot.slane %v20317_v33, %v22877_v24  ;;  %v4626_v3 = vcombine.low %v4604_v53, %v4611_v54  ;;  %21981 = vmatpush3.bf16.msra.mxu0 %v22558_v42  ;;  %22018 = vmatprep.subr.bf16.mxu1 %v22559_v45  ;;  %v23858_v54 = vld.sshfl [vmem:[%s22855_s26 + $0x54] sm:$0x32 pattern:$0x75316420] }
  0xf9   : > { %v4592_v1 = vrot.slane %v4578_v52, %v22877_v24  ;;  %v6013_v6 = vcombine.low %v5440_v55, %v5447_v49  ;;  %v20413_v2 = vcombine.high %v5440_v55, %v5447_v49  ;;  %v6028_v50 = vrot.slane %v6012_v0, %v22877_v24  ;;  %21982 = vmatprep.subr.bf16.mxu0 %v22560_v57 }
  0xfa   : > { %v4627_v62 = vcombine.low %v4618_v59, %v4625_v61  ;;  %v4634_v8 = vrot.slane %v4626_v3, %v22877_v24  ;;  %v5464_v5 = vrot.slane %v20376_v40, %v22877_v24  ;;  %v5471_v58 = vrot.slane %v5457_v60, %v22877_v24 }
  0xfb   : > { %v4593_v35 = vcombine.low %v4585_v39, %v4592_v1  ;;  %v6035_v11 = vrot.slane %v6013_v6, %v22877_v24  ;;  %v6042_v56 = vrot.slane %v20413_v2, %v22877_v24  ;;  %22019 = vmatpush3.bf16.msra.mxu1 %v22559_v45  ;;  %v6043_v9 = vcombine.low %v4604_v53, %v6028_v50  ;;  %v20380_v1 = vld.sshfl [vmem:[%s22855_s26 + $0x50] sm:$0x1 pattern:$0x75316420] }
  0xfc   : > { %v4641_v10 = vrot.slane %v4627_v62, %v22877_v24  ;;  %v5487_v14 = vrot.slane %v20377_v4, %v22877_v24  ;;  %v5495_v63 = vcombine.high %v20378_v7, %v20378_v7  ;;  %v5502_v51 = vrot.slane %v20378_v7, %v22877_v24  ;;  %22020 = vmatprep.subr.bf16.mxu1 %v22561_v30 }
  0xfd   : > { %21912 = vmatprep.mubr.bf16.mxu0 %v4593_v35  ;;  %v6044_v12 = vcombine.low %v6035_v11, %v6042_v56  ;;  %v6060_v17 = vcombine.low %v5464_v5, %v5471_v58  ;;  %v20414_v26 = vcombine.high %v5464_v5, %v5471_v58  ;;  %v6051_v23 = vrot.slane %v6043_v9, %v22877_v24  ;;  %v20382_v9 = vld.sshfl [vmem:[%s22855_s26 + $0x58] sm:$0x33 pattern:$0x75316420] }
  0xfe   : > { %v4642_v16 = vcombine.low %v4634_v8, %v4641_v10  ;;  %v23835_v20 = vrot.slane %v5495_v63, %v22877_v24  ;;  %v5510_v29 = vcombine.high %v5502_v51, %v5502_v51  ;;  %v6062_v22 = vcombine.low %v5487_v14, %v5502_v51  ;;  %21983 = vmatpush3.bf16.msra.mxu0 %v22560_v57 }
  0xff   : > { %v6058_v28 = vrot.slane %v6044_v12, %v22877_v24  ;;  %v6070_v25 = vrot.slane %v6060_v17, %v22877_v24  ;;  %v6077_v32 = vrot.slane %v20414_v26, %v22877_v24  ;;  %v4037_v37 = vcombine.high %v20284_v15, %v20284_v15  ;;  %22021 = vmatpush3.bf16.msra.mxu1 %v22561_v30  ;;  %v20381_v30 = vld.sshfl [vmem:[%s22855_s26 + $0x54] sm:$0x33 pattern:$0x75316420] }
 0x100   : > { %21913 = vmatmul.mubr.bf16.gmra.mxu0 %v4642_v16  ;;  %v6063_v42 = vcombine.low %v23835_v20, %v5510_v29  ;;  %v6084_v43 = vrot.slane %v6062_v22, %v22877_v24  ;;  %v4044_v39 = vrot.slane %v20284_v15, %v22877_v24  ;;  %v4059_v31 = vcombine.high %v20285_v18, %v20285_v18  ;;  %v23883_v29 = vld.sshfl [vmem:[%s22855_s26 + $0x60] sm:$0x33 pattern:$0x75316420] }
 0x101   : > { %v6059_v44 = vcombine.low %v6051_v23, %v6058_v28  ;;  %v6092_v46 = vcombine.low %v6070_v25, %v6077_v32  ;;  %v4051_v19 = vrot.slane %v4037_v37, %v22877_v24  ;;  %v4066_v47 = vrot.slane %v20285_v18, %v22877_v24  ;;  %22022 = vmatprep.subr.bf16.mxu1 %v22562_v21  ;;  %v20383_v18 = vld.sshfl [vmem:[%s22855_s26 + $0x5c] sm:$0x1 pattern:$0x75316420] }
 0x102   : > { %v6091_v33 = vrot.slane %v6063_v42, %v22877_v24  ;;  %v4073_v48 = vrot.slane %v4059_v31, %v22877_v24  ;;  %v4083_v34 = vcombine.high %v20286_v36, %v20286_v36  ;;  %v4090_v40 = vrot.slane %v20286_v36, %v22877_v24  ;;  %22048 = vmatprep.subr.bf16.mxu0 %v23840_v38 }
 0x103   : > { %21952 = vmatprep.mubr.bf16.mxu1 %v6059_v44  ;;  %v6100_v45 = vrot.slane %v6092_v46, %v22877_v24  ;;  %v4074_v52 = vcombine.high %v4066_v47, %v4066_v47  ;;  %v4645_v53 = vcombine.low %v4044_v39, %v4051_v19  ;;  %v4107_v55 = vcombine.high %v20287_v27, %v20287_v27 }
 0x104   : > { %v6093_v57 = vcombine.low %v6084_v43, %v6091_v33  ;;  %v4075_v59 = vcombine.high %v4073_v48, %v4073_v48  ;;  %v4097_v61 = vrot.slane %v4083_v34, %v22877_v24  ;;  %v4098_v49 = vcombine.high %v4090_v40, %v4090_v40  ;;  %22023 = vmatpush3.bf16.msra.mxu1 %v22562_v21  ;;  %v20290_v34 = vld.sshfl [vmem:[%s22855_s26 + $0x5c] sm:$0x11 pattern:$0x75316420] }
 0x105   : > { %v4646_v3 = vcombine.low %v4073_v48, %v4074_v52  ;;  %v4667_v0 = vrot.slane %v4645_v53, %v22877_v24  ;;  %v4114_v4 = vrot.slane %v20287_v27, %v22877_v24  ;;  %v4121_v60 = vrot.slane %v4107_v55, %v22877_v24  ;;  %v20291_v55 = vld.sshfl [vmem:[%s22855_s26 + $0x60] sm:$0x32 pattern:$0x75316420] }
 0x106   : > { %v6107_v62 = vrot.slane %v6093_v57, %v22877_v24  ;;  %v4099_v6 = vcombine.high %v4097_v61, %v4097_v61  ;;  %v4129_v2 = vcombine.high %v23858_v54, %v23858_v54  ;;  %v4692_v7 = vcombine.low %v4075_v59, %v4090_v40 }
 0x107   : > { %v4674_v35 = vrot.slane %v4646_v3, %v22877_v24  ;;  %v4693_v8 = vcombine.low %v4097_v61, %v4098_v49  ;;  %v5511_v50 = vcombine.high %v23835_v20, %v23835_v20  ;;  %v5549_v5 = vrot.slane %v20380_v1, %v22877_v24  ;;  %v20292_v1 = vld.sshfl [vmem:[%s22855_s26 + $0x64] sm:$0x33 pattern:$0x75316420] }
 0x108   : > { %v6108_v10 = vcombine.low %v6100_v45, %v6107_v62  ;;  %v4143_v11 = vrot.slane %v4129_v2, %v22877_v24  ;;  %v4694_v56 = vcombine.low %v4099_v6, %v4114_v4  ;;  %v4702_v58 = vrot.slane %v4692_v7, %v22877_v24 }
 0x109   : > { %v4676_v14 = vcombine.low %v4667_v0, %v4674_v35  ;;  %v4709_v63 = vrot.slane %v4693_v8, %v22877_v24  ;;  %v5557_v51 = vcombine.high %v20381_v30, %v20381_v30  ;;  %v5564_v15 = vrot.slane %v20381_v30, %v22877_v24  ;;  %v23913_v35 = vld.sshfl [vmem:[%s22855_s26 + $0x68] sm:$0x11 pattern:$0x75316420] }
 0x10a   : > { %21953 = vmatmul.mubr.bf16.gmra.mxu1 %v6108_v10  ;;  %v4695_v16 = vcombine.low %v4121_v60, %v4143_v11  ;;  %v4716_v12 = vrot.slane %v4694_v56, %v22877_v24  ;;  %v6109_v17 = vcombine.low %v5511_v50, %v4090_v40  ;;  %v6111_v26 = vcombine.low %v4099_v6, %v5549_v5 }
 0x10b   : > { %v4690_v21 = vrot.slane %v4676_v14, %v22877_v24  ;;  %v4724_v23 = vcombine.low %v4702_v58, %v4709_v63  ;;  %v5571_v20 = vrot.slane %v5557_v51, %v22877_v24  ;;  %v5581_v22 = vcombine.high %v20382_v9, %v20382_v9 }
 0x10c   : > { %v4723_v28 = vrot.slane %v4695_v16, %v22877_v24  ;;  %v6119_v25 = vrot.slane %v6109_v17, %v22877_v24  ;;  %v6133_v32 = vrot.slane %v6111_v26, %v22877_v24  ;;  %v5588_v37 = vrot.slane %v20382_v9, %v22877_v24  ;;  %v23927_v17 = vld [vmem:[%s28160_s1 + $0x1f8] sm:$0xff]  }
 0x10d   : > { %v4691_v36 = vcombine.low %v6100_v45, %v4690_v21  ;;  %v4732_v42 = vrot.slane %v4724_v23, %v22877_v24  ;;  %v6112_v43 = vcombine.low %v5564_v15, %v5571_v20  ;;  %v5595_v39 = vrot.slane %v5581_v22, %v22877_v24  ;;  %22088 = vmatprep.subr.bf16.mxu1 %v23927_v17 }
 0x10e   : > { %v4725_v31 = vcombine.low %v4716_v12, %v4723_v28  ;;  %v6141_v27 = vcombine.low %v6119_v25, %v4709_v63  ;;  %v5611_v44 = vrot.slane %v20383_v18, %v22877_v24  ;;  %v23894_v46 = vrot.slane %v23883_v29, %v22877_v24 }
 0x10f   : > { %21916 = vmatprep.mubr.bf16.mxu0 %v4691_v36  ;;  %v6140_v19 = vrot.slane %v6112_v43, %v22877_v24  ;;  %v20415_v47 = vcombine.high %v5564_v15, %v5571_v20  ;;  %v6159_v33 = vcombine.low %v5588_v37, %v5595_v39  ;;  %v20416_v48 = vcombine.high %v5588_v37, %v5595_v39  ;;  %v20386_v20 = vld.sshfl [vmem:[%s22855_s26 + $0x68] sm:$0x1 pattern:$0x75316420] }
 0x110   : > { %v4739_v40 = vrot.slane %v4725_v31, %v22877_v24  ;;  %v6149_v45 = vrot.slane %v6141_v27, %v22877_v24  ;;  %v6161_v52 = vcombine.low %v5611_v44, %v23894_v46  ;;  %v4136_v53 = vrot.slane %v23858_v54, %v22877_v24  ;;  %v20387_v37 = vld.sshfl [vmem:[%s22855_s26 + $0x6c] sm:$0x33 pattern:$0x75316420] }
 0x111   : > { %v6142_v57 = vcombine.low %v6133_v32, %v6140_v19  ;;  %v6168_v59 = vrot.slane %v20415_v47, %v22877_v24  ;;  %v6175_v61 = vrot.slane %v6159_v33, %v22877_v24  ;;  %v6182_v49 = vrot.slane %v20416_v48, %v22877_v24  ;;  %v20388_v47 = vld.sshfl [vmem:[%s22855_s26 + $0x70] sm:$0x33 pattern:$0x75316420] }
 0x112   : > { %v4740_v3 = vcombine.low %v4732_v42, %v4739_v40  ;;  %v6189_v0 = vrot.slane %v6161_v52, %v22877_v24  ;;  %v4177_v4 = vcombine.high %v20290_v34, %v20290_v34  ;;  %v4184_v60 = vrot.slane %v20290_v34, %v22877_v24 }
 0x113   : > { %v6156_v62 = vrot.slane %v6142_v57, %v22877_v24  ;;  %v6190_v6 = vcombine.low %v6168_v59, %v6175_v61  ;;  %v20319_v54 = vcombine.high %v4136_v53, %v4143_v11  ;;  %v4199_v2 = vcombine.high %v20291_v55, %v20291_v55 }
 0x114   : > { %21917 = vmatmul.mubr.bf16.gmra.mxu0 %v4740_v3  ;;  %v6191_v7 = vcombine.low %v6182_v49, %v6189_v0  ;;  %v4191_v30 = vrot.slane %v4177_v4, %v22877_v24  ;;  %v4206_v8 = vrot.slane %v20291_v55, %v22877_v24  ;;  %v4223_v50 = vcombine.high %v20292_v1, %v20292_v1 }
 0x115   : > { %v6157_v5 = vcombine.low %v6149_v45, %v6156_v62  ;;  %v6198_v10 = vrot.slane %v6190_v6, %v22877_v24  ;;  %v4751_v56 = vrot.slane %v20319_v54, %v22877_v24  ;;  %v4213_v58 = vrot.slane %v4199_v2, %v22877_v24 }
 0x116   : > { %v6205_v11 = vrot.slane %v6191_v7, %v22877_v24  ;;  %v4744_v9 = vcombine.low %v4184_v60, %v4191_v30  ;;  %v4214_v14 = vcombine.high %v4206_v8, %v4206_v8  ;;  %v4230_v63 = vrot.slane %v20292_v1, %v22877_v24  ;;  %v20294_v7 = vld.sshfl [vmem:[%s22855_s26 + $0x6c] sm:$0x32 pattern:$0x75316420] }
 0x117   : > { %21956 = vmatprep.mubr.bf16.mxu1 %v6157_v5  ;;  %v4773_v51 = vcombine.low %v4751_v56, %v6175_v61  ;;  %v4215_v15 = vcombine.high %v4213_v58, %v4213_v58  ;;  %v4237_v16 = vrot.slane %v4223_v50, %v22877_v24  ;;  %v4254_v12 = vrot.slane %v23913_v35, %v22877_v24  ;;  %v20296_v56 = vld.sshfl [vmem:[%s22855_s26 + $0x74] sm:$0x11 pattern:$0x75316420] }
 0x118   : > { %v6206_v26 = vcombine.low %v6198_v10, %v6205_v11  ;;  %v4772_v18 = vrot.slane %v4744_v9, %v22877_v24  ;;  %v4238_v21 = vcombine.high %v4230_v63, %v4230_v63  ;;  %v4790_v23 = vcombine.low %v4213_v58, %v4214_v14 }
 0x119   : > { %v4781_v22 = vrot.slane %v4773_v51, %v22877_v24  ;;  %v4239_v28 = vcombine.high %v4237_v16, %v4237_v16  ;;  %v4791_v25 = vcombine.low %v4215_v15, %v4230_v63  ;;  %v5619_v32 = vcombine.high %v23883_v29, %v23883_v29 }
 0x11a   : > { %21957 = vmatmul.mubr.bf16.gmra.mxu1 %v6206_v26  ;;  %v4774_v36 = vcombine.low %v6182_v49, %v4772_v18  ;;  %v4792_v42 = vcombine.low %v4237_v16, %v4238_v21  ;;  %v4800_v43 = vrot.slane %v4790_v23, %v22877_v24  ;;  %v5634_v39 = vcombine.high %v23894_v46, %v23894_v46 }
 0x11b   : > { %v4793_v31 = vcombine.low %v4239_v28, %v4254_v12  ;;  %v4807_v27 = vrot.slane %v4791_v25, %v22877_v24  ;;  %v5633_v44 = vrot.slane %v5619_v32, %v22877_v24  ;;  %v5673_v19 = vrot.slane %v20386_v20, %v22877_v24  ;;  %v20390_v12 = vld.sshfl [vmem:[%s22855_s26 + $0x78] sm:$0x33 pattern:$0x75316420] }
 0x11c   : > { %v4788_v29 = vrot.slane %v4774_v36, %v22877_v24  ;;  %v4814_v33 = vrot.slane %v4792_v42, %v22877_v24  ;;  %v5681_v48 = vcombine.high %v20387_v37, %v20387_v37  ;;  %v5688_v34 = vrot.slane %v20387_v37, %v22877_v24  ;;  %v20391_v25 = vld.sshfl [vmem:[%s22855_s26 + $0x7c] sm:$0x33 pattern:$0x75316420] }
 0x11d   : > { %v4821_v40 = vrot.slane %v4793_v31, %v22877_v24  ;;  %v4822_v45 = vcombine.low %v4800_v43, %v4807_v27  ;;  %v5635_v52 = vcombine.high %v5633_v44, %v5633_v44  ;;  %v6207_v46 = vcombine.low %v5633_v44, %v5634_v39 }
 0x11e   : > { %v4789_v53 = vcombine.low %v4781_v22, %v4788_v29  ;;  %v6210_v55 = vcombine.low %v4239_v28, %v5673_v19  ;;  %v5695_v57 = vrot.slane %v5681_v48, %v22877_v24  ;;  %v5705_v59 = vcombine.high %v20388_v47, %v20388_v47  ;;  %v20392_v48 = vld.sshfl [vmem:[%s22855_s26 + $0x80] sm:$0x1 pattern:$0x75316420] }
 0x11f   : > { %v4823_v61 = vcombine.low %v4814_v33, %v4821_v40  ;;  %v4830_v49 = vrot.slane %v4822_v45, %v22877_v24  ;;  %v6208_v1 = vcombine.low %v5635_v52, %v4230_v63  ;;  %v6217_v3 = vrot.slane %v6207_v46, %v22877_v24  ;;  %v20389_v63 = vld.sshfl [vmem:[%s22855_s26 + $0x74] sm:$0x1 pattern:$0x75316420] }
 0x120   : > { %21920 = vmatprep.mubr.bf16.mxu0 %v4789_v53  ;;  %v6238_v0 = vrot.slane %v6210_v55, %v22877_v24  ;;  %v5712_v4 = vrot.slane %v20388_v47, %v22877_v24  ;;  %v5719_v60 = vrot.slane %v5705_v59, %v22877_v24  ;;  %v6256_v62 = vcombine.low %v5688_v34, %v5695_v57  ;;  %v20457_v59 = vld.sshfl [vmem:[%s22855_s26 + $0xc] sm:$0x33 pattern:$0x75316420] }
 0x121   : > { %v4837_v6 = vrot.slane %v4823_v61, %v22877_v24  ;;  %v6224_v54 = vrot.slane %v6208_v1, %v22877_v24  ;;  %v20417_v2 = vcombine.high %v5688_v34, %v5695_v57  ;;  %v4247_v30 = vcombine.high %v23913_v35, %v23913_v35 }
 0x122   : > { %v6240_v8 = vcombine.low %v4814_v33, %v6238_v0  ;;  %v6258_v50 = vcombine.low %v5712_v4, %v5719_v60  ;;  %v20418_v5 = vcombine.high %v5712_v4, %v5719_v60  ;;  %v6266_v10 = vrot.slane %v6256_v62, %v22877_v24 }
 0x123   : > { %v4838_v58 = vcombine.low %v4830_v49, %v4837_v6  ;;  %v6239_v11 = vcombine.low %v6217_v3, %v6224_v54  ;;  %v6273_v9 = vrot.slane %v20417_v2, %v22877_v24  ;;  %v4261_v14 = vrot.slane %v4247_v30, %v22877_v24  ;;  %v20458_v6 = vld.sshfl [vmem:[%s22855_s26 + $0x10] sm:$0x33 pattern:$0x75316420] }
 0x124   : > { %v6254_v51 = vrot.slane %v6240_v8, %v22877_v24  ;;  %v6280_v15 = vrot.slane %v6258_v50, %v22877_v24  ;;  %v6287_v35 = vrot.slane %v20418_v5, %v22877_v24  ;;  %v4269_v16 = vcombine.high %v20294_v7, %v20294_v7 }
 0x125   : > { %21921 = vmatmul.mubr.bf16.gmra.mxu0 %v4838_v58  ;;  %v6247_v26 = vrot.slane %v6239_v11, %v22877_v24  ;;  %v6288_v18 = vcombine.low %v6266_v10, %v6273_v9  ;;  %v4276_v21 = vrot.slane %v20294_v7, %v22877_v24  ;;  %v4317_v23 = vcombine.high %v20296_v56, %v20296_v56  ;;  %v20459_v10 = vld.sshfl [vmem:[%s22855_s26 + $0x14] sm:$0x11 pattern:$0x75316420] }
 0x126   : > { %v6289_v20 = vcombine.low %v6280_v15, %v6287_v35  ;;  %v4283_v22 = vrot.slane %v4269_v16, %v22877_v24  ;;  %v4324_v28 = vrot.slane %v20296_v56, %v22877_v24  ;;  %v5735_v32 = vrot.slane %v20389_v63, %v22877_v24 }
 0x127   : > { %v6255_v37 = vcombine.low %v6247_v26, %v6254_v51  ;;  %v6296_v36 = vrot.slane %v6288_v18, %v22877_v24  ;;  %v4331_v42 = vrot.slane %v4317_v23, %v22877_v24  ;;  %v5743_v43 = vcombine.high %v20390_v12, %v20390_v12 }
 0x128   : > { %v6303_v39 = vrot.slane %v6289_v20, %v22877_v24  ;;  %v4839_v31 = vcombine.low %v4261_v14, %v4283_v22  ;;  %v20321_v27 = vcombine.high %v4276_v21, %v4283_v22  ;;  %v5750_v44 = vrot.slane %v20390_v12, %v22877_v24 }
 0x129   : > { %21960 = vmatprep.mubr.bf16.mxu1 %v6255_v37  ;;  %v4888_v19 = vcombine.low %v4324_v28, %v4331_v42  ;;  %v5757_v47 = vrot.slane %v5743_v43, %v22877_v24  ;;  %v5767_v29 = vcombine.high %v20391_v25, %v20391_v25  ;;  %v5774_v33 = vrot.slane %v20391_v25, %v22877_v24 }
 0x12a   : > { %v6304_v34 = vcombine.low %v6296_v36, %v6303_v39  ;;  %v4849_v40 = vrot.slane %v4839_v31, %v22877_v24  ;;  %v4856_v45 = vrot.slane %v20321_v27, %v22877_v24  ;;  %v5758_v52 = vcombine.high %v5750_v44, %v5750_v44 }
 0x12b   : > { %v4895_v46 = vrot.slane %v4888_v19, %v22877_v24  ;;  %v5759_v53 = vcombine.high %v5757_v47, %v5757_v47  ;;  %v5781_v55 = vrot.slane %v5767_v29, %v22877_v24  ;;  %v5782_v57 = vcombine.high %v5774_v33, %v5774_v33 }
 0x12c   : > { %21961 = vmatmul.mubr.bf16.gmra.mxu1 %v6304_v34  ;;  %v4871_v61 = vcombine.low %v4849_v40, %v4856_v45  ;;  %v6305_v49 = vcombine.low %v5735_v32, %v5750_v44  ;;  %v6306_v1 = vcombine.low %v5757_v47, %v5758_v52  ;;  %v5797_v3 = vrot.slane %v20392_v48, %v22877_v24 }
 0x12d   : > { %v4902_v0 = vrot.slane %v4895_v46, %v22877_v24  ;;  %v6307_v4 = vcombine.low %v5759_v53, %v5774_v33  ;;  %v6308_v60 = vcombine.low %v5781_v55, %v5782_v57  ;;  %v5783_v62 = vcombine.high %v5781_v55, %v5781_v55  ;;  %v20460_v46 = vld.sshfl [vmem:[%s22855_s26 + $0x18] sm:$0x33 pattern:$0x75316420] }
 0x12e   : > { %v4879_v54 = vrot.slane %v4871_v61, %v22877_v24  ;;  %v6315_v2 = vrot.slane %v6305_v49, %v22877_v24  ;;  %v6322_v7 = vrot.slane %v6306_v1, %v22877_v24  ;;  %v6647_v30 = vcombine.high %v20457_v59, %v20457_v59 }
 0x12f   : > { %v6329_v8 = vrot.slane %v6307_v4, %v22877_v24  ;;  %v6336_v50 = vrot.slane %v6308_v60, %v22877_v24  ;;  %v6354_v5 = vcombine.low %v5783_v62, %v5797_v3  ;;  %v6654_v56 = vrot.slane %v20457_v59, %v22877_v24 }
 0x130   : > { %v4887_v58 = vcombine.low %v4879_v54, %v6303_v39  ;;  %v6337_v11 = vcombine.low %v6315_v2, %v6322_v7  ;;  %v6661_v9 = vrot.slane %v6647_v30, %v22877_v24  ;;  %v6671_v14 = vcombine.high %v20458_v6, %v20458_v6 }
 0x131   : > { %v6338_v63 = vcombine.low %v6329_v8, %v6336_v50  ;;  %v6361_v51 = vrot.slane %v6354_v5, %v22877_v24  ;;  %v6662_v15 = vcombine.high %v6654_v56, %v6654_v56  ;;  %v23998_v35 = vrot.slane %v20458_v6, %v22877_v24 }
 0x132   : > { %21924 = vmatprep.mubr.bf16.mxu0 %v4887_v58  ;;  %v6345_v16 = vrot.slane %v6337_v11, %v22877_v24  ;;  %v6663_v12 = vcombine.high %v6661_v9, %v6661_v9  ;;  %v24002_v26 = vrot.slane %v6671_v14, %v22877_v24  ;;  %v6695_v18 = vcombine.high %v20459_v10, %v20459_v10 }
 0x133   : > { %21925 = vmatmul.mubr.bf16.gmra.mxu0 %v4902_v0  ;;  %v6352_v21 = vrot.slane %v6338_v63, %v22877_v24  ;;  %v6368_v23 = vrot.slane %v6361_v51, %v22877_v24  ;;  %v24008_v20 = vcombine.high %v23998_v35, %v23998_v35  ;;  %v24011_v22 = vrot.slane %v20459_v10, %v22877_v24  ;;  %v20461_v0 = vld.sshfl [vmem:[%s22855_s26 + $0x1c] sm:$0x33 pattern:$0x75316420] }
 0x134   : > { %v24015_v28 = vcombine.high %v24002_v26, %v24002_v26  ;;  %v24018_v25 = vrot.slane %v6695_v18, %v22877_v24  ;;  %v7341_v32 = vshrl.u32 %v6654_v56, 16  ;;  %v7346_v37 = vshll.u32 %v6661_v9, 16 }
 0x135   : > { %v6353_v36 = vcombine.low %v6345_v16, %v6352_v21  ;;  %v7349_v42 = vshrl.u32 %v6661_v9, 16  ;;  %v7354_v43 = vshll.u32 %v6662_v15, 16  ;;  %v7357_v39 = vshrl.u32 %v6662_v15, 16 }
 0x136   : > { %v7348_v31 = vsel %vm22921_vm14, %v7341_v32, %v7346_v37  ;;  %v7362_v27 = vshll.u32 %v6663_v12, 16  ;;  %v7365_v44 = vshrl.u32 %v6663_v12, 16  ;;  %v7370_v19 = vshll.u32 %v23998_v35, 16 }
 0x137   : > { %21964 = vmatprep.mubr.bf16.mxu1 %v6353_v36  ;;  %v7356_v47 = vsel %vm22921_vm14, %v7349_v42, %v7354_v43  ;;  %v7373_v29 = vshrl.u32 %v23998_v35, 16  ;;  %v7378_v33 = vshll.u32 %v24002_v26, 16  ;;  %v7381_v48 = vshrl.u32 %v24002_v26, 16 }
 0x138   : > { %21965 = vmatmul.mubr.bf16.gmra.mxu1 %v6368_v23  ;;  %v7364_v34 = vsel %vm22921_vm14, %v7357_v39, %v7362_v27  ;;  %v7372_v40 = vsel %vm22921_vm14, %v7365_v44, %v7370_v19  ;;  %v7386_v45 = vshll.u32 %v24008_v20, 16  ;;  %v7389_v52 = vshrl.u32 %v24008_v20, 16 }
 0x139   : > { %v7380_v53 = vsel %vm22921_vm14, %v7373_v29, %v7378_v33  ;;  %v7394_v55 = vshll.u32 %v24015_v28, 16  ;;  %v7397_v57 = vshrl.u32 %v24015_v28, 16  ;;  %v7402_v59 = vshll.u32 %v24011_v22, 16 }
 0x13a   : > { %v7388_v61 = vsel %vm22921_vm14, %v7381_v48, %v7386_v45  ;;  %v7405_v49 = vshrl.u32 %v24011_v22, 16  ;;  %v7410_v1 = vshll.u32 %v24018_v25, 16  ;;  %v8087_v3 = vcombine.low %v7348_v31, %v7356_v47 }
 0x13b   : > { %v7396_v4 = vsel %vm22921_vm14, %v7389_v52, %v7394_v55  ;;  %v7404_v60 = vsel %vm22921_vm14, %v7397_v57, %v7402_v59  ;;  %v8088_v62 = vcombine.low %v7364_v34, %v7372_v40  ;;  %v8089_v6 = vcombine.low %v7380_v53, %v7388_v61  ;;  %v20631_v40 = vld.sshfl [vmem:[%s22855_s26 + $0xc] sm:$0x32 pattern:$0x75316420] }
 0x13c   : > { %v8090_v54 = vcombine.low %v7396_v4, %v7404_v60  ;;  %v8097_v2 = vrot.slane %v8087_v3, %v22877_v24  ;;  %v6717_v7 = vcombine.high %v20460_v46, %v20460_v46  ;;  %v6724_v30 = vrot.slane %v20460_v46, %v22877_v24  ;;  %v20634_v4 = vld.sshfl [vmem:[%s22855_s26 + $0x18] sm:$0x32 pattern:$0x75316420] }
 0x13d   : > { %v8104_v8 = vrot.slane %v8088_v62, %v22877_v24  ;;  %v8111_v50 = vrot.slane %v8089_v6, %v22877_v24  ;;  %v6741_v5 = vcombine.high %v20461_v0, %v20461_v0  ;;  %v24054_v10 = vrot.slane %v20461_v0, %v22877_v24 }
 0x13e   : > { %v8118_v56 = vrot.slane %v8090_v54, %v22877_v24  ;;  %v6731_v58 = vrot.slane %v6717_v7, %v22877_v24  ;;  %v6732_v11 = vcombine.high %v6724_v30, %v6724_v30  ;;  %v7412_v9 = vsel %vm22921_vm14, %v7405_v49, %v7410_v1 }
 0x13f   : > { %v8119_v14 = vcombine.low %v8097_v2, %v8104_v8  ;;  %v24061_v63 = vrot.slane %v6741_v5, %v22877_v24  ;;  %v6756_v51 = vcombine.high %v24054_v10, %v24054_v10  ;;  %v7414_v15 = vshrl.u32 %v6724_v30, 16 }
 0x140   : > { %v8120_v16 = vcombine.low %v8111_v50, %v8118_v56  ;;  %v6733_v12 = vcombine.high %v6731_v58, %v6731_v58  ;;  %v7419_v18 = vshll.u32 %v6731_v58, 16  ;;  %v7422_v21 = vshrl.u32 %v6731_v58, 16 }
 0x141   : > { %v8127_v23 = vrot.slane %v8119_v14, %v22877_v24  ;;  %v24068_v32 = vcombine.high %v24061_v63, %v24061_v63  ;;  %v7427_v37 = vshll.u32 %v6732_v11, 16  ;;  %v7430_v36 = vshrl.u32 %v6732_v11, 16 }
 0x142   : > { %v8134_v42 = vrot.slane %v8120_v16, %v22877_v24  ;;  %v7421_v43 = vsel %vm22921_vm14, %v7414_v15, %v7419_v18  ;;  %v7435_v39 = vshll.u32 %v6733_v12, 16  ;;  %v7438_v31 = vshrl.u32 %v6733_v12, 16  ;;  %v20462_v15 = vld.sshfl [vmem:[%s22855_s26 + $0x20] sm:$0x11 pattern:$0x75316420] }
 0x143   : > { %v7429_v27 = vsel %vm22921_vm14, %v7422_v21, %v7427_v37  ;;  %v7443_v44 = vshll.u32 %v24054_v10, 16  ;;  %v7446_v19 = vshrl.u32 %v24054_v10, 16  ;;  %v7451_v47 = vshll.u32 %v24061_v63, 16 }
 0x144   : > { %v8135_v29 = vcombine.low %v8127_v23, %v8134_v42  ;;  %v7437_v33 = vsel %vm22921_vm14, %v7430_v36, %v7435_v39  ;;  %v7454_v48 = vshrl.u32 %v24061_v63, 16  ;;  %v7459_v34 = vshll.u32 %v6756_v51, 16 }
 0x145   : > { %v7445_v45 = vsel %vm22921_vm14, %v7438_v31, %v7443_v44  ;;  %v7453_v52 = vsel %vm22921_vm14, %v7446_v19, %v7451_v47  ;;  %v7462_v46 = vshrl.u32 %v6756_v51, 16  ;;  %v7467_v53 = vshll.u32 %v24068_v32, 16 }
 0x146   : > { %21984 = vmatprep.mubr.bf16.mxu0 %v8135_v29  ;;  %v7461_v55 = vsel %vm22921_vm14, %v7454_v48, %v7459_v34  ;;  %v8136_v57 = vcombine.low %v7412_v9, %v7421_v43  ;;  %v8137_v59 = vcombine.low %v7429_v27, %v7437_v33  ;;  %v8138_v61 = vcombine.low %v7445_v45, %v7453_v52  ;;  %v20463_v43 = vld.sshfl [vmem:[%s22855_s26 + $0x24] sm:$0x33 pattern:$0x75316420] }
 0x147   : > { %v7469_v49 = vsel %vm22921_vm14, %v7462_v46, %v7467_v53  ;;  %v8919_v1 = vcombine.high %v20631_v40, %v20631_v40  ;;  %v8926_v3 = vrot.slane %v20631_v40, %v22877_v24  ;;  %v9631_v0 = vcombine.low %v24002_v26, %v24008_v20 }
 0x148   : > { %v8139_v60 = vcombine.low %v7461_v55, %v7469_v49  ;;  %v8146_v62 = vrot.slane %v8136_v57, %v22877_v24  ;;  %v8153_v6 = vrot.slane %v8137_v59, %v22877_v24  ;;  %v8160_v54 = vrot.slane %v8138_v61, %v22877_v24 }
 0x149   : > { %v8933_v2 = vrot.slane %v8919_v1, %v22877_v24  ;;  %v8934_v7 = vcombine.high %v8926_v3, %v8926_v3  ;;  %v9632_v30 = vcombine.low %v24015_v28, %v24011_v22  ;;  %v9653_v8 = vrot.slane %v9631_v0, %v22877_v24 }
 0x14a   : > { %v8167_v50 = vrot.slane %v8139_v60, %v22877_v24  ;;  %v8168_v26 = vcombine.low %v8146_v62, %v8153_v6  ;;  %v8989_v20 = vcombine.high %v20634_v4, %v20634_v4  ;;  %v8996_v5 = vrot.slane %v20634_v4, %v22877_v24 }
 0x14b   : > { %v8935_v56 = vcombine.high %v8933_v2, %v8933_v2  ;;  %v9629_v58 = vcombine.low %v8933_v2, %v8934_v7  ;;  %v9660_v11 = vrot.slane %v9632_v30, %v22877_v24  ;;  %v9680_v9 = vcombine.low %v24054_v10, %v24061_v63  ;;  %v22568_v7 = vld [vmem:[%s28160_s1 + $0x1f0] sm:$0xff]  }
 0x14c   : > { %v8169_v14 = vcombine.low %v8160_v54, %v8167_v50  ;;  %v8176_v22 = vrot.slane %v8168_v26, %v22877_v24  ;;  %v9003_v28 = vrot.slane %v8989_v20, %v22877_v24  ;;  %v20678_v51 = vcombine.high %v24054_v10, %v24061_v63  ;;  %v20464_v63 = vld.sshfl [vmem:[%s22855_s26 + $0x28] sm:$0x33 pattern:$0x75316420] }
 0x14d   : > { %v9630_v16 = vcombine.low %v8935_v56, %v23998_v35  ;;  %v9639_v12 = vrot.slane %v9629_v58, %v22877_v24  ;;  %v9662_v18 = vcombine.low %v9653_v8, %v9660_v11  ;;  %v9702_v21 = vrot.slane %v9680_v9, %v22877_v24  ;;  %v20465_v20 = vld.sshfl [vmem:[%s22855_s26 + $0x2c] sm:$0x11 pattern:$0x75316420]  ;;  %v22566_v9 = vld [vmem:[%s28160_s1 + $0x1a0] sm:$0xff]  }
 0x14e   : > { %v8183_v23 = vrot.slane %v8169_v14, %v22877_v24  ;;  %v9678_v37 = vcombine.low %v24018_v25, %v9003_v28  ;;  %v20677_v36 = vcombine.high %v8996_v5, %v9003_v28  ;;  %v9709_v42 = vrot.slane %v20678_v51, %v22877_v24  ;;  %v22564_v25 = vld [vmem:[%s28160_s1 + $0x1b0] sm:$0xff]  }
 0x14f   : > { %v9646_v39 = vrot.slane %v9630_v16, %v22877_v24  ;;  %v9676_v10 = vrot.slane %v9662_v18, %v22877_v24  ;;  %v6765_v31 = vcombine.high %v20462_v15, %v20462_v15  ;;  %v24123_v35 = vrot.slane %v20462_v15, %v22877_v24 }
 0x150   : > { %v8184_v27 = vcombine.low %v8176_v22, %v8183_v23  ;;  %v9688_v44 = vrot.slane %v9678_v37, %v22877_v24  ;;  %v9695_v19 = vrot.slane %v20677_v36, %v22877_v24  ;;  %v9711_v47 = vcombine.low %v9702_v21, %v9709_v42  ;;  %v20466_v21 = vld.sshfl [vmem:[%s22855_s26 + $0x30] sm:$0x33 pattern:$0x75316420]  ;;  %v22570_v23 = vld [vmem:[%s28160_s1 + $0x1e8] sm:$0xff]  }
 0x151   : > { %v9661_v29 = vcombine.low %v9639_v12, %v9646_v39  ;;  %v24131_v33 = vrot.slane %v6765_v31, %v22877_v24  ;;  %v6787_v48 = vcombine.high %v20463_v43, %v20463_v43  ;;  %v6794_v34 = vrot.slane %v20463_v43, %v22877_v24  ;;  %v20467_v42 = vld.sshfl [vmem:[%s22855_s26 + $0x34] sm:$0x33 pattern:$0x75316420] }
 0x152   : > { %21985 = vmatmul.mubr.bf16.vlgmr.msra.gmra.mxu0 %v8184_v27  ;;  %v9710_v40 = vcombine.low %v9688_v44, %v9695_v19  ;;  %v9725_v45 = vrot.slane %v9711_v47, %v22877_v24  ;;  %v6811_v52 = vcombine.high %v20464_v63, %v20464_v63  ;;  %v24136_v46 = vrot.slane %v20464_v63, %v22877_v24  ;;  %v22569_v27 = vld [vmem:[%s28160_s1 + $0x198] sm:$0xff]  }
 0x153   : > { %v9669_v53 = vrot.slane %v9661_v29, %v22877_v24  ;;  %22049 = vmatpush3.bf16.msra.mxu0 %v23840_v38  ;;  %v6801_v55 = vrot.slane %v6787_v48, %v22877_v24  ;;  %v6802_v57 = vcombine.high %v6794_v34, %v6794_v34  ;;  %v7470_v59 = vshrl.u32 %v24068_v32, 16  ;;  %v22565_v38 = vld [vmem:[%s28160_s1 + $0x1a8] sm:$0xff]  }
 0x154   : > { %v9718_v61 = vrot.slane %v9710_v40, %v22877_v24  ;;  %22050 = vmatprep.subr.bf16.mxu0 %v22564_v25  ;;  %v24144_v49 = vrot.slane %v6811_v52, %v22877_v24  ;;  %v24148_v1 = vcombine.high %v24136_v46, %v24136_v46  ;;  %v7475_v3 = vshll.u32 %v24123_v35, 16 }
 0x155   : > { %v9677_v0 = vcombine.low %v9669_v53, %v9676_v10  ;;  %v6803_v4 = vcombine.high %v6801_v55, %v6801_v55  ;;  %v7478_v32 = vshrl.u32 %v24123_v35, 16  ;;  %v7483_v60 = vshll.u32 %v24131_v33, 16 }
 0x156   : > { %v9726_v62 = vcombine.low %v9718_v61, %v9725_v45  ;;  %v7477_v6 = vsel %vm22921_vm14, %v7470_v59, %v7475_v3  ;;  %v7487_v54 = vshrl.u32 %v6794_v34, 16  ;;  %v7492_v2 = vshll.u32 %v6801_v55, 16  ;;  %v22572_v45 = vld [vmem:[%s28160_s1 + $0x1e0] sm:$0xff]  }
 0x157   : > { %22024 = vmatprep.mubr.bf16.mxu1 %v9677_v0  ;;  %v7485_v30 = vsel %vm22921_vm14, %v7478_v32, %v7483_v60  ;;  %v7495_v8 = vshrl.u32 %v6801_v55, 16  ;;  %v7500_v50 = vshll.u32 %v6802_v57, 16  ;;  %v7503_v26 = vshrl.u32 %v6802_v57, 16  ;;  %22051 = vmatpush3.bf16.msra.mxu0 %v22564_v25  ;;  %v22571_v0 = vld [vmem:[%s28160_s1 + $0x190] sm:$0xff]  }
 0x158   : > { %22025 = vmatmul.mubr.bf16.vlgmr.msra.gmra.mxu1 %v9726_v62  ;;  %v7494_v5 = vsel %vm22921_vm14, %v7487_v54, %v7492_v2  ;;  %v7508_v56 = vshll.u32 %v6803_v4, 16  ;;  %v7511_v58 = vshrl.u32 %v6803_v4, 16  ;;  %v7516_v11 = vshll.u32 %v24136_v46, 16  ;;  %22052 = vmatprep.subr.bf16.mxu0 %v22565_v38 }
 0x159   : > { %v7502_v14 = vsel %vm22921_vm14, %v7495_v8, %v7500_v50  ;;  %v7519_v22 = vshrl.u32 %v24136_v46, 16  ;;  %v7524_v28 = vshll.u32 %v24144_v49, 16  ;;  %v7527_v51 = vshrl.u32 %v24144_v49, 16  ;;  %22089 = vmatpush3.bf16.msra.mxu1 %v23927_v17 }
 0x15a   : > { %v7510_v15 = vsel %vm22921_vm14, %v7503_v26, %v7508_v56  ;;  %v7518_v16 = vsel %vm22921_vm14, %v7511_v58, %v7516_v11  ;;  %v7532_v12 = vshll.u32 %v24148_v1, 16  ;;  %v8185_v18 = vcombine.low %v7477_v6, %v7485_v30  ;;  %22090 = vmatprep.subr.bf16.mxu1 %v22568_v7  ;;  %v22573_v30 = vld [vmem:[%s28160_s1 + $0x1d8] sm:$0xff]  }
 0x15b   : > { %v7526_v37 = vsel %vm22921_vm14, %v7519_v22, %v7524_v28  ;;  %v8186_v36 = vcombine.low %v7494_v5, %v7502_v14  ;;  %v8187_v17 = vcombine.low %v7510_v15, %v7518_v16  ;;  %v24190_v43 = vcombine.high %v24144_v49, %v24144_v49  ;;  %22053 = vmatpush3.bf16.msra.mxu0 %v22565_v38 }
 0x15c   : > { %v7534_v39 = vsel %vm22921_vm14, %v7527_v51, %v7532_v12  ;;  %v8195_v10 = vrot.slane %v8185_v18, %v22877_v24  ;;  %v6835_v63 = vcombine.high %v20465_v20, %v20465_v20  ;;  %v24196_v31 = vrot.slane %v20465_v20, %v22877_v24  ;;  %22054 = vmatprep.subr.bf16.mxu0 %v22566_v9  ;;  %v20637_v51 = vld.sshfl [vmem:[%s22855_s26 + $0x24] sm:$0x32 pattern:$0x75316420] }
 0x15d   : > { %v8188_v44 = vcombine.low %v7526_v37, %v7534_v39  ;;  %v8202_v19 = vrot.slane %v8186_v36, %v22877_v24  ;;  %v8209_v47 = vrot.slane %v8187_v17, %v22877_v24  ;;  %v6857_v25 = vcombine.high %v20466_v21, %v20466_v21  ;;  %22091 = vmatpush3.bf16.msra.mxu1 %v22568_v7 }
 0x15e   : > { %v24204_v29 = vrot.slane %v6835_v63, %v22877_v24  ;;  %v6864_v48 = vrot.slane %v20466_v21, %v22877_v24  ;;  %v6881_v34 = vcombine.high %v20467_v42, %v20467_v42  ;;  %v24208_v40 = vrot.slane %v20467_v42, %v22877_v24  ;;  %22092 = vmatprep.subr.bf16.mxu1 %v22570_v23  ;;  %v22574_v21 = vld [vmem:[%s28160_s1 + $0x188] sm:$0xff]   ;;  %v22575_v42 = vld [vmem:[%s28160_s1 + $0x1d0] sm:$0xff]  }
 0x15f   : > { %v8216_v52 = vrot.slane %v8188_v44, %v22877_v24  ;;  %v8217_v53 = vcombine.low %v8195_v10, %v8202_v19  ;;  %v6871_v55 = vrot.slane %v6857_v25, %v22877_v24  ;;  %v7535_v57 = vshrl.u32 %v24148_v1, 16  ;;  %22055 = vmatpush3.bf16.msra.mxu0 %v22566_v9  ;;  %v20640_v44 = vld.sshfl [vmem:[%s22855_s26 + $0x30] sm:$0x32 pattern:$0x75316420] }
 0x160   : > { %v6872_v59 = vcombine.high %v6864_v48, %v6864_v48  ;;  %v24217_v61 = vrot.slane %v6881_v34, %v22877_v24  ;;  %v7540_v3 = vshll.u32 %v24190_v43, 16  ;;  %v7543_v38 = vshrl.u32 %v24190_v43, 16  ;;  %22056 = vmatprep.subr.bf16.mxu0 %v22569_v27 }
 0x161   : > { %v8218_v4 = vcombine.low %v8209_v47, %v8216_v52  ;;  %v8225_v32 = vrot.slane %v8217_v53, %v22877_v24  ;;  %v6873_v60 = vcombine.high %v6871_v55, %v6871_v55  ;;  %v7548_v62 = vshll.u32 %v24196_v31, 16  ;;  %22093 = vmatpush3.bf16.msra.mxu1 %v22570_v23 }
 0x162   : > { %v7542_v6 = vsel %vm22921_vm14, %v7535_v57, %v7540_v3  ;;  %v7551_v54 = vshrl.u32 %v24196_v31, 16  ;;  %v7556_v2 = vshll.u32 %v24204_v29, 16  ;;  %v7560_v7 = vshrl.u32 %v6864_v48, 16  ;;  %22094 = vmatprep.subr.bf16.mxu1 %v22572_v45 }
 0x163   : > { %v8232_v8 = vrot.slane %v8218_v4, %v22877_v24  ;;  %v7550_v50 = vsel %vm22921_vm14, %v7543_v38, %v7548_v62  ;;  %v7565_v26 = vshll.u32 %v6871_v55, 16  ;;  %v7568_v20 = vshrl.u32 %v6871_v55, 16  ;;  %22057 = vmatpush3.bf16.msra.mxu0 %v22569_v27  ;;  %v22577_v62 = vld [vmem:[%s28160_s1 + $0x1c8] sm:$0xff]  }
 0x164   : > { %v7558_v5 = vsel %vm22921_vm14, %v7551_v54, %v7556_v2  ;;  %v7573_v56 = vshll.u32 %v6872_v59, 16  ;;  %v7576_v58 = vshrl.u32 %v6872_v59, 16  ;;  %v7581_v11 = vshll.u32 %v6873_v60, 16  ;;  %22058 = vmatprep.subr.bf16.mxu0 %v22571_v0 }
 0x165   : > { %v8233_v9 = vcombine.low %v8225_v32, %v8232_v8  ;;  %v7567_v14 = vsel %vm22921_vm14, %v7560_v7, %v7565_v26  ;;  %v7584_v22 = vshrl.u32 %v6873_v60, 16  ;;  %v7589_v28 = vshll.u32 %v24208_v40, 16  ;;  %22095 = vmatpush3.bf16.msra.mxu1 %v22572_v45  ;;  %v20468_v60 = vld.sshfl [vmem:[%s22855_s26 + $0x38] sm:$0x11 pattern:$0x75316420] }
 0x166   : > { %v7575_v15 = vsel %vm22921_vm14, %v7568_v20, %v7573_v56  ;;  %v7583_v16 = vsel %vm22921_vm14, %v7576_v58, %v7581_v11  ;;  %v7592_v12 = vshrl.u32 %v24208_v40, 16  ;;  %v7597_v18 = vshll.u32 %v24217_v61, 16  ;;  %22096 = vmatprep.subr.bf16.mxu1 %v22573_v30 }
 0x167   : > { %21988 = vmatprep.mubr.bf16.mxu0 %v8233_v9  ;;  %v7591_v23 = vsel %vm22921_vm14, %v7584_v22, %v7589_v28  ;;  %v8234_v37 = vcombine.low %v7542_v6, %v7550_v50  ;;  %v8235_v36 = vcombine.low %v7558_v5, %v7567_v14  ;;  %v8236_v17 = vcombine.low %v7575_v15, %v7583_v16  ;;  %v20469_v50 = vld.sshfl [vmem:[%s22855_s26 + $0x3c] sm:$0x33 pattern:$0x75316420]  ;;  %v22578_v14 = vld [vmem:[%s28160_s1 + $0x1c0] sm:$0xff]  }
 0x168   : > { %v7599_v39 = vsel %vm22921_vm14, %v7592_v12, %v7597_v18  ;;  %v9059_v10 = vcombine.high %v20637_v51, %v20637_v51  ;;  %v9066_v63 = vrot.slane %v20637_v51, %v22877_v24  ;;  %v9727_v27 = vcombine.low %v24123_v35, %v24131_v33  ;;  %22059 = vmatpush3.bf16.msra.mxu0 %v22571_v0  ;;  %v20470_v51 = vld.sshfl [vmem:[%s22855_s26 + $0x40] sm:$0x33 pattern:$0x75316420] }
 0x169   : > { %v8237_v19 = vcombine.low %v7591_v23, %v7599_v39  ;;  %v8244_v47 = vrot.slane %v8234_v37, %v22877_v24  ;;  %v8251_v25 = vrot.slane %v8235_v36, %v22877_v24  ;;  %v8258_v48 = vrot.slane %v8236_v17, %v22877_v24  ;;  %22097 = vmatpush3.bf16.msra.mxu1 %v22573_v30 }
 0x16a   : > { %v9073_v34 = vrot.slane %v9059_v10, %v22877_v24  ;;  %v9074_v45 = vcombine.high %v9066_v63, %v9066_v63  ;;  %v9730_v52 = vcombine.low %v24144_v49, %v24148_v1  ;;  %v9737_v53 = vrot.slane %v9727_v27, %v22877_v24  ;;  %22060 = vmatprep.subr.bf16.mxu0 %v22574_v21 }
 0x16b   : > { %v8265_v35 = vrot.slane %v8237_v19, %v22877_v24  ;;  %v8266_v33 = vcombine.low %v8244_v47, %v8251_v25  ;;  %v9129_v55 = vcombine.high %v20640_v44, %v20640_v44  ;;  %v9136_v57 = vrot.slane %v20640_v44, %v22877_v24  ;;  %22098 = vmatprep.subr.bf16.mxu1 %v22575_v42 }
 0x16c   : > { %v9075_v59 = vcombine.high %v9073_v34, %v9073_v34  ;;  %v9728_v3 = vcombine.low %v9073_v34, %v9074_v45  ;;  %v9758_v38 = vrot.slane %v9730_v52, %v22877_v24  ;;  %v9776_v0 = vcombine.low %v24190_v43, %v24196_v31  ;;  %22061 = vmatpush3.bf16.msra.mxu0 %v22574_v21 }
 0x16d   : > { %v8267_v49 = vcombine.low %v8258_v48, %v8265_v35  ;;  %v8274_v1 = vrot.slane %v8266_v33, %v22877_v24  ;;  %v9143_v4 = vrot.slane %v9129_v55, %v22877_v24  ;;  %v9779_v32 = vcombine.low %v24208_v40, %v24217_v61  ;;  %22099 = vmatpush3.bf16.msra.mxu1 %v22575_v42 }
 0x16e   : > { %v9729_v6 = vcombine.low %v9075_v59, %v24136_v46  ;;  %v9744_v43 = vrot.slane %v9728_v3, %v22877_v24  ;;  %v9786_v31 = vrot.slane %v9776_v0, %v22877_v24  ;;  %v6896_v54 = vcombine.high %v24208_v40, %v24208_v40  ;;  %v22576_v46 = vld [vmem:[%s28160_s1 + $0x180] sm:$0xff]   ;;  %22100 = vmatprep.subr.bf16.mxu1 %v22577_v62 }
 0x16f   : > { %v8281_v2 = vrot.slane %v8267_v49, %v22877_v24  ;;  %v9777_v7 = vcombine.low %v24204_v29, %v9143_v4  ;;  %v20679_v30 = vcombine.high %v9136_v57, %v9143_v4  ;;  %v9807_v8 = vrot.slane %v9779_v32, %v22877_v24  ;;  %22062 = vmatprep.subr.bf16.mxu0 %v22576_v46  ;;  %v20471_v57 = vld.sshfl [vmem:[%s22855_s26 + $0x44] sm:$0x11 pattern:$0x75316420] }
 0x170   : > { %v9751_v26 = vrot.slane %v9729_v6, %v22877_v24  ;;  %v9759_v20 = vcombine.low %v9737_v53, %v9744_v43  ;;  %v6897_v5 = vcombine.high %v24217_v61, %v24217_v61  ;;  %v6905_v56 = vcombine.high %v20468_v60, %v20468_v60  ;;  %22063 = vmatpush3.bf16.msra.mxu0 %v22576_v46 }
 0x171   : > { %v8282_v58 = vcombine.low %v8274_v1, %v8281_v2  ;;  %v9793_v29 = vrot.slane %v9777_v7, %v22877_v24  ;;  %v9800_v11 = vrot.slane %v20679_v30, %v22877_v24  ;;  %v24300_v9 = vrot.slane %v20468_v60, %v22877_v24  ;;  %22101 = vmatpush3.bf16.msra.mxu1 %v22577_v62  ;;  %v22579_v60 = vld [vmem:[%s28160_s1 + $0x238] sm:$0xff]   ;;  %v20472_v7 = vld.sshfl [vmem:[%s22855_s26 + $0x48] sm:$0x33 pattern:$0x75316420] }
 0x172   : > { %v9760_v22 = vcombine.low %v9751_v26, %v9758_v38  ;;  %v9767_v28 = vrot.slane %v9759_v20, %v22877_v24  ;;  %v24308_v15 = vrot.slane %v6905_v56, %v22877_v24  ;;  %v6927_v16 = vcombine.high %v20469_v50, %v20469_v50  ;;  %22102 = vmatprep.subr.bf16.mxu1 %v22578_v14 }
 0x173   : > { %21989 = vmatmul.mubr.bf16.gmra.mxu0 %v8282_v58  ;;  %v9808_v12 = vcombine.low %v9786_v31, %v9793_v29  ;;  %v9809_v18 = vcombine.low %v9800_v11, %v9807_v8  ;;  %v6934_v21 = vrot.slane %v20469_v50, %v22877_v24  ;;  %v24312_v23 = vrot.slane %v20470_v51, %v22877_v24 }
 0x174   : > { %v9774_v37 = vrot.slane %v9760_v22, %v22877_v24  ;;  %v6941_v36 = vrot.slane %v6927_v16, %v22877_v24  ;;  %v7600_v17 = vshrl.u32 %v24217_v61, 16  ;;  %v7605_v42 = vshll.u32 %v6896_v54, 16  ;;  %22128 = vmatprep.subr.bf16.mxu0 %v22579_v60 }
 0x175   : > { %v9816_v39 = vrot.slane %v9808_v12, %v22877_v24  ;;  %v9823_v10 = vrot.slane %v9809_v18, %v22877_v24  ;;  %v6942_v63 = vcombine.high %v6934_v21, %v6934_v21  ;;  %v7608_v27 = vshrl.u32 %v6896_v54, 16  ;;  %22103 = vmatpush3.bf16.msra.mxu1 %v22578_v14 }
 0x176   : > { %v9775_v44 = vcombine.low %v9767_v28, %v9774_v37  ;;  %v6943_v19 = vcombine.high %v6941_v36, %v6941_v36  ;;  %v7607_v47 = vsel %vm22921_vm14, %v7600_v17, %v7605_v42  ;;  %v7613_v25 = vshll.u32 %v6897_v5, 16 }
 0x177   : > { %v9824_v48 = vcombine.low %v9816_v39, %v9823_v10  ;;  %v7616_v34 = vshrl.u32 %v6897_v5, 16  ;;  %v7621_v45 = vshll.u32 %v24300_v9, 16  ;;  %v7624_v52 = vshrl.u32 %v24300_v9, 16 }
 0x178   : > { %22028 = vmatprep.mubr.bf16.mxu1 %v9775_v44  ;;  %v7615_v53 = vsel %vm22921_vm14, %v7608_v27, %v7613_v25  ;;  %v7629_v35 = vshll.u32 %v24308_v15, 16  ;;  %v7633_v33 = vshrl.u32 %v6934_v21, 16  ;;  %v7638_v55 = vshll.u32 %v6941_v36, 16 }
 0x179   : > { %22029 = vmatmul.mubr.bf16.gmra.mxu1 %v9824_v48  ;;  %v7623_v59 = vsel %vm22921_vm14, %v7616_v34, %v7621_v45  ;;  %v7641_v3 = vshrl.u32 %v6941_v36, 16  ;;  %v7646_v38 = vshll.u32 %v6942_v63, 16  ;;  %v7649_v0 = vshrl.u32 %v6942_v63, 16 }
 0x17a   : > { %v7631_v49 = vsel %vm22921_vm14, %v7624_v52, %v7629_v35  ;;  %v7640_v1 = vsel %vm22921_vm14, %v7633_v33, %v7638_v55  ;;  %v7654_v4 = vshll.u32 %v6943_v19, 16  ;;  %v7657_v32 = vshrl.u32 %v6943_v19, 16  ;;  %v20643_v55 = vld.sshfl [vmem:[%s22855_s26 + $0x3c] sm:$0x32 pattern:$0x75316420] }
 0x17b   : > { %v7648_v62 = vsel %vm22921_vm14, %v7641_v3, %v7646_v38  ;;  %v7662_v6 = vshll.u32 %v24312_v23, 16  ;;  %v8283_v43 = vcombine.low %v7607_v47, %v7615_v53  ;;  %v8284_v31 = vcombine.low %v7623_v59, %v7631_v49 }
 0x17c   : > { %v7656_v54 = vsel %vm22921_vm14, %v7649_v0, %v7654_v4  ;;  %v8285_v2 = vcombine.low %v7640_v1, %v7648_v62  ;;  %v6951_v30 = vcombine.high %v20470_v51, %v20470_v51  ;;  %v24344_v8 = vcombine.high %v24312_v23, %v24312_v23 }
 0x17d   : > { %v7664_v50 = vsel %vm22921_vm14, %v7657_v32, %v7662_v6  ;;  %v8293_v46 = vrot.slane %v8283_v43, %v22877_v24  ;;  %v8300_v26 = vrot.slane %v8284_v31, %v22877_v24  ;;  %v6975_v20 = vcombine.high %v20471_v57, %v20471_v57  ;;  %v20646_v43 = vld.sshfl [vmem:[%s22855_s26 + $0x48] sm:$0x32 pattern:$0x75316420] }
 0x17e   : > { %v8286_v5 = vcombine.low %v7656_v54, %v7664_v50  ;;  %v8307_v56 = vrot.slane %v8285_v2, %v22877_v24  ;;  %v24352_v58 = vrot.slane %v6951_v30, %v22877_v24  ;;  %v24355_v29 = vrot.slane %v20471_v57, %v22877_v24 }
 0x17f   : > { %v8315_v11 = vcombine.low %v8293_v46, %v8300_v26  ;;  %v24358_v14 = vrot.slane %v6975_v20, %v22877_v24  ;;  %v6997_v22 = vcombine.high %v20472_v7, %v20472_v7  ;;  %v7004_v28 = vrot.slane %v20472_v7, %v22877_v24 }
 0x180   : > { %v8314_v51 = vrot.slane %v8286_v5, %v22877_v24  ;;  %v24364_v16 = vcombine.high %v24352_v58, %v24352_v58  ;;  %v7665_v12 = vshrl.u32 %v24312_v23, 16  ;;  %v7670_v18 = vshll.u32 %v24352_v58, 16 }
 0x181   : > { %v8323_v21 = vrot.slane %v8315_v11, %v22877_v24  ;;  %v7011_v37 = vrot.slane %v6997_v22, %v22877_v24  ;;  %v7012_v36 = vcombine.high %v7004_v28, %v7004_v28  ;;  %v7673_v17 = vshrl.u32 %v24352_v58, 16 }
 0x182   : > { %v8316_v42 = vcombine.low %v8307_v56, %v8314_v51  ;;  %v7672_v39 = vsel %vm22921_vm14, %v7665_v12, %v7670_v18  ;;  %v7678_v10 = vshll.u32 %v24344_v8, 16  ;;  %v7681_v63 = vshrl.u32 %v24344_v8, 16 }
 0x183   : > { %v24375_v27 = vcombine.high %v7011_v37, %v7011_v37  ;;  %v7686_v44 = vshll.u32 %v24364_v16, 16  ;;  %v7689_v19 = vshrl.u32 %v24364_v16, 16  ;;  %v7694_v47 = vshll.u32 %v24355_v29, 16 }
 0x184   : > { %v8330_v25 = vrot.slane %v8316_v42, %v22877_v24  ;;  %v7680_v48 = vsel %vm22921_vm14, %v7673_v17, %v7678_v10  ;;  %v7697_v34 = vshrl.u32 %v24355_v29, 16  ;;  %v7702_v45 = vshll.u32 %v24358_v14, 16  ;;  %v20473_v17 = vld.sshfl [vmem:[%s22855_s26 + $0x4c] sm:$0x33 pattern:$0x75316420] }
 0x185   : > { %v7688_v52 = vsel %vm22921_vm14, %v7681_v63, %v7686_v44  ;;  %v7696_v53 = vsel %vm22921_vm14, %v7689_v19, %v7694_v47  ;;  %v7706_v35 = vshrl.u32 %v7004_v28, 16  ;;  %v7711_v33 = vshll.u32 %v7011_v37, 16  ;;  %v20474_v47 = vld.sshfl [vmem:[%s22855_s26 + $0x50] sm:$0x11 pattern:$0x75316420] }
 0x186   : > { %v8331_v57 = vcombine.low %v8323_v21, %v8330_v25  ;;  %v7704_v59 = vsel %vm22921_vm14, %v7697_v34, %v7702_v45  ;;  %v7714_v3 = vshrl.u32 %v7011_v37, 16  ;;  %v7719_v38 = vshll.u32 %v7012_v36, 16  ;;  %v20475_v25 = vld.sshfl [vmem:[%s22855_s26 + $0x54] sm:$0x33 pattern:$0x75316420] }
 0x187   : > { %v7713_v0 = vsel %vm22921_vm14, %v7706_v35, %v7711_v33  ;;  %v7722_v49 = vshrl.u32 %v7012_v36, 16  ;;  %v7727_v1 = vshll.u32 %v24375_v27, 16  ;;  %v8332_v4 = vcombine.low %v7672_v39, %v7680_v48 }
 0x188   : > { %21992 = vmatprep.mubr.bf16.mxu0 %v8331_v57  ;;  %v7721_v32 = vsel %vm22921_vm14, %v7714_v3, %v7719_v38  ;;  %v8333_v60 = vcombine.low %v7688_v52, %v7696_v53  ;;  %v8334_v62 = vcombine.low %v7704_v59, %v7713_v0  ;;  %v9199_v6 = vcombine.high %v20643_v55, %v20643_v55 }
 0x189   : > { %v7729_v31 = vsel %vm22921_vm14, %v7722_v49, %v7727_v1  ;;  %v8342_v54 = vrot.slane %v8332_v4, %v22877_v24  ;;  %v9206_v2 = vrot.slane %v20643_v55, %v22877_v24  ;;  %v20680_v7 = vcombine.high %v24208_v40, %v24217_v61 }
 0x18a   : > { %v8335_v30 = vcombine.low %v7721_v32, %v7729_v31  ;;  %v8349_v50 = vrot.slane %v8333_v60, %v22877_v24  ;;  %v8356_v46 = vrot.slane %v8334_v62, %v22877_v24  ;;  %v9213_v26 = vrot.slane %v9199_v6, %v22877_v24 }
 0x18b   : > { %v9214_v20 = vcombine.high %v9206_v2, %v9206_v2  ;;  %v9826_v5 = vcombine.low %v24300_v9, %v24308_v15  ;;  %v9835_v56 = vrot.slane %v20680_v7, %v22877_v24  ;;  %v9269_v11 = vcombine.high %v20646_v43, %v20646_v43 }
 0x18c   : > { %v8363_v22 = vrot.slane %v8335_v30, %v22877_v24  ;;  %v8364_v28 = vcombine.low %v8342_v54, %v8349_v50  ;;  %v9215_v51 = vcombine.high %v9213_v26, %v9213_v26  ;;  %v9276_v40 = vrot.slane %v20646_v43, %v22877_v24 }
 0x18d   : > { %v9827_v61 = vcombine.low %v9213_v26, %v9214_v20  ;;  %v9842_v12 = vrot.slane %v9826_v5, %v22877_v24  ;;  %v9283_v18 = vrot.slane %v9269_v11, %v22877_v24  ;;  %v9874_v21 = vcombine.low %v24352_v58, %v24344_v8  ;;  %v20476_v26 = vld.sshfl [vmem:[%s22855_s26 + $0x58] sm:$0x33 pattern:$0x75316420] }
 0x18e   : > { %v8365_v37 = vcombine.low %v8356_v46, %v8363_v22  ;;  %v8372_v9 = vrot.slane %v8364_v28, %v22877_v24  ;;  %v9828_v15 = vcombine.low %v9215_v51, %v24312_v23  ;;  %v9875_v36 = vcombine.low %v24364_v16, %v24355_v29 }
 0x18f   : > { %v9849_v42 = vrot.slane %v9827_v61, %v22877_v24  ;;  %v9857_v39 = vcombine.low %v9835_v56, %v9842_v12  ;;  %v9876_v10 = vcombine.low %v24358_v14, %v9283_v18  ;;  %v20681_v63 = vcombine.high %v9276_v40, %v9283_v18 }
 0x190   : > { %v8379_v44 = vrot.slane %v8365_v37, %v22877_v24  ;;  %v9856_v8 = vrot.slane %v9828_v15, %v22877_v24  ;;  %v9884_v58 = vrot.slane %v9874_v21, %v22877_v24  ;;  %v9891_v19 = vrot.slane %v9875_v36, %v22877_v24  ;;  %v20477_v36 = vld.sshfl [vmem:[%s22855_s26 + $0x5c] sm:$0x11 pattern:$0x75316420] }
 0x191   : > { %v9865_v23 = vrot.slane %v9857_v39, %v22877_v24  ;;  %v9898_v29 = vrot.slane %v9876_v10, %v22877_v24  ;;  %v9905_v16 = vrot.slane %v20681_v63, %v22877_v24  ;;  %v7021_v48 = vcombine.high %v20473_v17, %v20473_v17  ;;  %v20478_v39 = vld.sshfl [vmem:[%s22855_s26 + $0x60] sm:$0x33 pattern:$0x75316420] }
 0x192   : > { %v8380_v34 = vcombine.low %v8372_v9, %v8379_v44  ;;  %v9858_v14 = vcombine.low %v9849_v42, %v9856_v8  ;;  %v9906_v45 = vcombine.low %v9884_v58, %v9891_v19  ;;  %v24433_v52 = vrot.slane %v20473_v17, %v22877_v24 }
 0x193   : > { %v9907_v53 = vcombine.low %v9898_v29, %v9905_v16  ;;  %v24436_v35 = vrot.slane %v7021_v48, %v22877_v24  ;;  %v7045_v33 = vcombine.high %v20474_v47, %v20474_v47  ;;  %v24439_v55 = vrot.slane %v20474_v47, %v22877_v24 }
 0x194   : > { %21993 = vmatmul.mubr.bf16.gmra.mxu0 %v8380_v34  ;;  %v9872_v57 = vrot.slane %v9858_v14, %v22877_v24  ;;  %v9914_v59 = vrot.slane %v9906_v45, %v22877_v24  ;;  %v7036_v3 = vcombine.high %v24433_v52, %v24433_v52  ;;  %v7067_v38 = vcombine.high %v20475_v25, %v20475_v25 }
 0x195   : > { %v9921_v0 = vrot.slane %v9907_v53, %v22877_v24  ;;  %v7037_v49 = vcombine.high %v24436_v35, %v24436_v35  ;;  %v24449_v1 = vrot.slane %v7045_v33, %v22877_v24  ;;  %v7074_v4 = vrot.slane %v20475_v25, %v22877_v24 }
 0x196   : > { %v9873_v32 = vcombine.low %v9865_v23, %v9872_v57  ;;  %v7081_v60 = vrot.slane %v7067_v38, %v22877_v24  ;;  %v7730_v62 = vshrl.u32 %v24375_v27, 16  ;;  %v7735_v6 = vshll.u32 %v24433_v52, 16 }
 0x197   : > { %v9922_v43 = vcombine.low %v9914_v59, %v9921_v0  ;;  %v7082_v31 = vcombine.high %v7074_v4, %v7074_v4  ;;  %v7738_v54 = vshrl.u32 %v24433_v52, 16  ;;  %v7743_v2 = vshll.u32 %v24436_v35, 16 }
 0x198   : > { %22032 = vmatprep.mubr.bf16.mxu1 %v9873_v32  ;;  %v7737_v7 = vsel %vm22921_vm14, %v7730_v62, %v7735_v6  ;;  %v7746_v30 = vshrl.u32 %v24436_v35, 16  ;;  %v7751_v50 = vshll.u32 %v7036_v3, 16  ;;  %v7754_v46 = vshrl.u32 %v7036_v3, 16 }
 0x199   : > { %22033 = vmatmul.mubr.bf16.gmra.mxu1 %v9922_v43  ;;  %v7745_v27 = vsel %vm22921_vm14, %v7738_v54, %v7743_v2  ;;  %v7759_v20 = vshll.u32 %v7037_v49, 16  ;;  %v7762_v5 = vshrl.u32 %v7037_v49, 16  ;;  %v7767_v56 = vshll.u32 %v24439_v55, 16 }
 0x19a   : > { %v7753_v11 = vsel %vm22921_vm14, %v7746_v30, %v7751_v50  ;;  %v7770_v22 = vshrl.u32 %v24439_v55, 16  ;;  %v7775_v28 = vshll.u32 %v24449_v1, 16  ;;  %v7779_v51 = vshrl.u32 %v7074_v4, 16 }
 0x19b   : > { %v7761_v40 = vsel %vm22921_vm14, %v7754_v46, %v7759_v20  ;;  %v7769_v61 = vsel %vm22921_vm14, %v7762_v5, %v7767_v56  ;;  %v7784_v12 = vshll.u32 %v7081_v60, 16  ;;  %v7787_v18 = vshrl.u32 %v7081_v60, 16  ;;  %v20649_v20 = vld.sshfl [vmem:[%s22855_s26 + $0x54] sm:$0x32 pattern:$0x75316420] }
 0x19c   : > { %v7777_v21 = vsel %vm22921_vm14, %v7770_v22, %v7775_v28  ;;  %v7792_v37 = vshll.u32 %v7082_v31, 16  ;;  %v8381_v9 = vcombine.low %v7737_v7, %v7745_v27  ;;  %v8382_v15 = vcombine.low %v7753_v11, %v7761_v40 }
 0x19d   : > { %v7786_v17 = vsel %vm22921_vm14, %v7779_v51, %v7784_v12  ;;  %v8383_v42 = vcombine.low %v7769_v61, %v7777_v21  ;;  %v7083_v10 = vcombine.high %v7081_v60, %v7081_v60  ;;  %v7091_v63 = vcombine.high %v20476_v26, %v20476_v26 }
 0x19e   : > { %v7794_v44 = vsel %vm22921_vm14, %v7787_v18, %v7792_v37  ;;  %v8391_v8 = vrot.slane %v8381_v9, %v22877_v24  ;;  %v8398_v58 = vrot.slane %v8382_v15, %v22877_v24  ;;  %v24483_v19 = vrot.slane %v20476_v26, %v22877_v24 }
 0x19f   : > { %v8384_v47 = vcombine.low %v7786_v17, %v7794_v44  ;;  %v8405_v23 = vrot.slane %v8383_v42, %v22877_v24  ;;  %v24487_v29 = vrot.slane %v7091_v63, %v22877_v24  ;;  %v7115_v16 = vcombine.high %v20477_v36, %v20477_v36  ;;  %v24547_v42 = vld.sshfl [vmem:[%s22855_s26 + $0x60] sm:$0x32 pattern:$0x75316420] }
 0x1a0   : > { %v8413_v25 = vcombine.low %v8391_v8, %v8398_v58  ;;  %v24491_v48 = vcombine.high %v24483_v19, %v24483_v19  ;;  %v24494_v34 = vrot.slane %v20477_v36, %v22877_v24  ;;  %v7137_v14 = vcombine.high %v20478_v39, %v20478_v39 }
 0x1a1   : > { %v8412_v45 = vrot.slane %v8384_v47, %v22877_v24  ;;  %v24499_v53 = vcombine.high %v24487_v29, %v24487_v29  ;;  %v24502_v33 = vrot.slane %v7115_v16, %v22877_v24  ;;  %v24505_v57 = vrot.slane %v20478_v39, %v22877_v24 }
 0x1a2   : > { %v8421_v59 = vrot.slane %v8413_v25, %v22877_v24  ;;  %v24509_v3 = vrot.slane %v7137_v14, %v22877_v24  ;;  %v7795_v38 = vshrl.u32 %v7082_v31, 16  ;;  %v7800_v0 = vshll.u32 %v7083_v10, 16 }
 0x1a3   : > { %v8414_v49 = vcombine.low %v8405_v23, %v8412_v45  ;;  %v7803_v4 = vshrl.u32 %v7083_v10, 16  ;;  %v7808_v32 = vshll.u32 %v24483_v19, 16  ;;  %v7811_v60 = vshrl.u32 %v24483_v19, 16 }
 0x1a4   : > { %v7802_v62 = vsel %vm22921_vm14, %v7795_v38, %v7800_v0  ;;  %v7816_v6 = vshll.u32 %v24487_v29, 16  ;;  %v7819_v43 = vshrl.u32 %v24487_v29, 16  ;;  %v7824_v54 = vshll.u32 %v24491_v48, 16 }
 0x1a5   : > { %v8428_v2 = vrot.slane %v8414_v49, %v22877_v24  ;;  %v7810_v31 = vsel %vm22921_vm14, %v7803_v4, %v7808_v32  ;;  %v7827_v7 = vshrl.u32 %v24491_v48, 16  ;;  %v7832_v30 = vshll.u32 %v24499_v53, 16 }
 0x1a6   : > { %v7818_v50 = vsel %vm22921_vm14, %v7811_v60, %v7816_v6  ;;  %v7826_v46 = vsel %vm22921_vm14, %v7819_v43, %v7824_v54  ;;  %v7835_v26 = vshrl.u32 %v24499_v53, 16  ;;  %v7840_v27 = vshll.u32 %v24494_v34, 16  ;;  %v20479_v6 = vld.sshfl [vmem:[%s22855_s26 + $0x64] sm:$0x33 pattern:$0x75316420] }
 0x1a7   : > { %v8429_v5 = vcombine.low %v8421_v59, %v8428_v2  ;;  %v7834_v56 = vsel %vm22921_vm14, %v7827_v7, %v7832_v30  ;;  %v7843_v11 = vshrl.u32 %v24494_v34, 16  ;;  %v7848_v22 = vshll.u32 %v24502_v33, 16  ;;  %v20480_v54 = vld.sshfl [vmem:[%s22855_s26 + $0x68] sm:$0x11 pattern:$0x75316420] }
 0x1a8   : > { %v7842_v28 = vsel %vm22921_vm14, %v7835_v26, %v7840_v27  ;;  %v7852_v51 = vshrl.u32 %v24505_v57, 16  ;;  %v7857_v40 = vshll.u32 %v24509_v3, 16  ;;  %v8430_v61 = vcombine.low %v7802_v62, %v7810_v31 }
 0x1a9   : > { %21996 = vmatprep.mubr.bf16.mxu0 %v8429_v5  ;;  %v7850_v12 = vsel %vm22921_vm14, %v7843_v11, %v7848_v22  ;;  %v8431_v18 = vcombine.low %v7818_v50, %v7826_v46  ;;  %v8432_v21 = vcombine.low %v7834_v56, %v7842_v28  ;;  %v9339_v37 = vcombine.high %v20649_v20, %v20649_v20 }
 0x1aa   : > { %v7859_v9 = vsel %vm22921_vm14, %v7852_v51, %v7857_v40  ;;  %v8440_v15 = vrot.slane %v8430_v61, %v22877_v24  ;;  %v9346_v36 = vrot.slane %v20649_v20, %v22877_v24  ;;  %v9923_v17 = vcombine.low %v24433_v52, %v24436_v35 }
 0x1ab   : > { %v8433_v39 = vcombine.low %v7850_v12, %v7859_v9  ;;  %v8447_v10 = vrot.slane %v8431_v18, %v22877_v24  ;;  %v8454_v63 = vrot.slane %v8432_v21, %v22877_v24  ;;  %v9353_v44 = vrot.slane %v9339_v37, %v22877_v24 }
 0x1ac   : > { %v9354_v8 = vcombine.high %v9346_v36, %v9346_v36  ;;  %v20682_v58 = vcombine.high %v24433_v52, %v24436_v35  ;;  %v9925_v47 = vcombine.low %v24439_v55, %v24449_v1  ;;  %v9933_v23 = vrot.slane %v9923_v17, %v22877_v24  ;;  %v20481_v36 = vld.sshfl [vmem:[%s22855_s26 + $0x6c] sm:$0x33 pattern:$0x75316420] }
 0x1ad   : > { %v8461_v16 = vrot.slane %v8433_v39, %v22877_v24  ;;  %v8462_v25 = vcombine.low %v8440_v15, %v8447_v10  ;;  %v9355_v14 = vcombine.high %v9353_v44, %v9353_v44  ;;  %v9409_v45 = vcombine.high %v24547_v42, %v24547_v42 }
 0x1ae   : > { %v9926_v59 = vcombine.low %v9353_v44, %v9354_v8  ;;  %v9940_v38 = vrot.slane %v20682_v58, %v22877_v24  ;;  %v9947_v0 = vrot.slane %v9925_v47, %v22877_v24  ;;  %v9973_v52 = vcombine.low %v24487_v29, %v24491_v48  ;;  %v20482_v44 = vld.sshfl [vmem:[%s22855_s26 + $0x70] sm:$0x33 pattern:$0x75316420] }
 0x1af   : > { %v8463_v35 = vcombine.low %v8454_v63, %v8461_v16  ;;  %v8470_v55 = vrot.slane %v8462_v25, %v22877_v24  ;;  %v24566_v1 = vrot.slane %v9409_v45, %v22877_v24  ;;  %v9972_v49 = vcombine.low %v9355_v14, %v24483_v19 }
 0x1b0   : > { %v9954_v4 = vrot.slane %v9926_v59, %v22877_v24  ;;  %v9955_v32 = vcombine.low %v9933_v23, %v9940_v38  ;;  %v9974_v60 = vcombine.low %v24499_v53, %v24494_v34  ;;  %v9989_v62 = vrot.slane %v9973_v52, %v22877_v24 }
 0x1b1   : > { %v8477_v43 = vrot.slane %v8463_v35, %v22877_v24  ;;  %v9975_v29 = vcombine.low %v24502_v33, %v24566_v1  ;;  %v9982_v48 = vrot.slane %v9972_v49, %v22877_v24  ;;  %v7152_v19 = vcombine.high %v24505_v57, %v24505_v57 }
 0x1b2   : > { %v9956_v2 = vcombine.low %v9947_v0, %v9954_v4  ;;  %v9963_v31 = vrot.slane %v9955_v32, %v22877_v24  ;;  %v9996_v7 = vrot.slane %v9974_v60, %v22877_v24  ;;  %v7153_v34 = vcombine.high %v24509_v3, %v24509_v3  ;;  %v24630_v4 = vld.sshfl [vmem:[%s22855_s26 + $0x74] sm:$0x11 pattern:$0x75316420] }
 0x1b3   : > { %v8478_v53 = vcombine.low %v8470_v55, %v8477_v43  ;;  %v10003_v30 = vrot.slane %v9975_v29, %v22877_v24  ;;  %v10004_v50 = vcombine.low %v9982_v48, %v9989_v62  ;;  %v7161_v46 = vcombine.high %v20479_v6, %v20479_v6 }
 0x1b4   : > { %v9970_v33 = vrot.slane %v9956_v2, %v22877_v24  ;;  %v24588_v26 = vrot.slane %v20479_v6, %v22877_v24  ;;  %v7185_v27 = vcombine.high %v20480_v54, %v20480_v54  ;;  %v24591_v57 = vrot.slane %v20480_v54, %v22877_v24 }
 0x1b5   : > { %21997 = vmatmul.mubr.bf16.gmra.mxu0 %v8478_v53  ;;  %v10005_v20 = vcombine.low %v9996_v7, %v10003_v30  ;;  %v10012_v5 = vrot.slane %v10004_v50, %v22877_v24  ;;  %v24595_v56 = vrot.slane %v7161_v46, %v22877_v24  ;;  %v7860_v11 = vshrl.u32 %v24509_v3, 16 }
 0x1b6   : > { %v9971_v22 = vcombine.low %v9963_v31, %v9970_v33  ;;  %v7176_v28 = vcombine.high %v24588_v26, %v24588_v26  ;;  %v24601_v51 = vrot.slane %v7185_v27, %v22877_v24  ;;  %v7865_v40 = vshll.u32 %v7152_v19, 16 }
 0x1b7   : > { %v10019_v61 = vrot.slane %v10005_v20, %v22877_v24  ;;  %v7177_v12 = vcombine.high %v24595_v56, %v24595_v56  ;;  %v7868_v18 = vshrl.u32 %v7152_v19, 16  ;;  %v7873_v21 = vshll.u32 %v7153_v34, 16 }
 0x1b8   : > { %22036 = vmatprep.mubr.bf16.mxu1 %v9971_v22  ;;  %v7867_v3 = vsel %vm22921_vm14, %v7860_v11, %v7865_v40  ;;  %v7876_v37 = vshrl.u32 %v7153_v34, 16  ;;  %v7881_v9 = vshll.u32 %v24588_v26, 16  ;;  %v7884_v15 = vshrl.u32 %v24588_v26, 16 }
 0x1b9   : > { %v10020_v17 = vcombine.low %v10012_v5, %v10019_v61  ;;  %v7875_v39 = vsel %vm22921_vm14, %v7868_v18, %v7873_v21  ;;  %v7889_v10 = vshll.u32 %v24595_v56, 16  ;;  %v7892_v63 = vshrl.u32 %v24595_v56, 16 }
 0x1ba   : > { %v7883_v8 = vsel %vm22921_vm14, %v7876_v37, %v7881_v9  ;;  %v7897_v58 = vshll.u32 %v7176_v28, 16  ;;  %v7900_v47 = vshrl.u32 %v7176_v28, 16  ;;  %v7905_v23 = vshll.u32 %v7177_v12, 16 }
 0x1bb   : > { %22037 = vmatmul.mubr.bf16.gmra.mxu1 %v10020_v17  ;;  %v7891_v16 = vsel %vm22921_vm14, %v7884_v15, %v7889_v10  ;;  %v7908_v25 = vshrl.u32 %v7177_v12, 16  ;;  %v7913_v14 = vshll.u32 %v24591_v57, 16  ;;  %v7916_v45 = vshrl.u32 %v24591_v57, 16 }
 0x1bc   : > { %v7899_v59 = vsel %vm22921_vm14, %v7892_v63, %v7897_v58  ;;  %v7907_v38 = vsel %vm22921_vm14, %v7900_v47, %v7905_v23  ;;  %v7921_v0 = vshll.u32 %v24601_v51, 16  ;;  %v8479_v52 = vcombine.low %v7867_v3, %v7875_v39 }
 0x1bd   : > { %v7915_v35 = vsel %vm22921_vm14, %v7908_v25, %v7913_v14  ;;  %v8480_v55 = vcombine.low %v7883_v8, %v7891_v16  ;;  %v8481_v49 = vcombine.low %v7899_v59, %v7907_v38  ;;  %v7207_v32 = vcombine.high %v20481_v36, %v20481_v36 }
 0x1be   : > { %v7923_v60 = vsel %vm22921_vm14, %v7916_v45, %v7921_v0  ;;  %v8489_v62 = vrot.slane %v8479_v52, %v22877_v24  ;;  %v7214_v6 = vrot.slane %v20481_v36, %v22877_v24  ;;  %v7231_v43 = vcombine.high %v20482_v44, %v20482_v44  ;;  %v20655_v0 = vld.sshfl [vmem:[%s22855_s26 + $0x6c] sm:$0x32 pattern:$0x75316420] }
 0x1bf   : > { %v8482_v29 = vcombine.low %v7915_v35, %v7923_v60  ;;  %v8496_v48 = vrot.slane %v8480_v55, %v22877_v24  ;;  %v8503_v54 = vrot.slane %v8481_v49, %v22877_v24  ;;  %v7221_v19 = vrot.slane %v7207_v32, %v22877_v24 }
 0x1c0   : > { %v7222_v2 = vcombine.high %v7214_v6, %v7214_v6  ;;  %v24640_v31 = vrot.slane %v20482_v44, %v22877_v24  ;;  %v24643_v7 = vrot.slane %v7231_v43, %v22877_v24  ;;  %v24647_v34 = vrot.slane %v24630_v4, %v22877_v24 }
 0x1c1   : > { %v8510_v53 = vrot.slane %v8482_v29, %v22877_v24  ;;  %v8511_v30 = vcombine.low %v8489_v62, %v8496_v48  ;;  %v7223_v50 = vcombine.high %v7221_v19, %v7221_v19  ;;  %v7925_v46 = vshrl.u32 %v7214_v6, 16 }
 0x1c2   : > { %v7246_v33 = vcombine.high %v24640_v31, %v24640_v31  ;;  %v7247_v27 = vcombine.high %v24643_v7, %v24643_v7  ;;  %v7930_v20 = vshll.u32 %v7221_v19, 16  ;;  %v7933_v5 = vshrl.u32 %v7221_v19, 16 }
 0x1c3   : > { %v8512_v11 = vcombine.low %v8503_v54, %v8510_v53  ;;  %v8519_v22 = vrot.slane %v8511_v30, %v22877_v24  ;;  %v7938_v28 = vshll.u32 %v7222_v2, 16  ;;  %v7941_v40 = vshrl.u32 %v7222_v2, 16 }
 0x1c4   : > { %v7932_v61 = vsel %vm22921_vm14, %v7925_v46, %v7930_v20  ;;  %v7946_v12 = vshll.u32 %v7223_v50, 16  ;;  %v7949_v18 = vshrl.u32 %v7223_v50, 16  ;;  %v7954_v21 = vshll.u32 %v24640_v31, 16 }
 0x1c5   : > { %v8526_v3 = vrot.slane %v8512_v11, %v22877_v24  ;;  %v7940_v37 = vsel %vm22921_vm14, %v7933_v5, %v7938_v28  ;;  %v7957_v9 = vshrl.u32 %v24640_v31, 16  ;;  %v7962_v15 = vshll.u32 %v24643_v7, 16  ;;  %v20484_v20 = vld.sshfl [vmem:[%s22855_s26 + $0x78] sm:$0x33 pattern:$0x75316420] }
 0x1c6   : > { %v7948_v36 = vsel %vm22921_vm14, %v7941_v40, %v7946_v12  ;;  %v7956_v17 = vsel %vm22921_vm14, %v7949_v18, %v7954_v21  ;;  %v7965_v39 = vshrl.u32 %v24643_v7, 16  ;;  %v7970_v10 = vshll.u32 %v7246_v33, 16  ;;  %v20485_v21 = vld.sshfl [vmem:[%s22855_s26 + $0x7c] sm:$0x33 pattern:$0x75316420] }
 0x1c7   : > { %v8527_v63 = vcombine.low %v8519_v22, %v8526_v3  ;;  %v7964_v44 = vsel %vm22921_vm14, %v7957_v9, %v7962_v15  ;;  %v7973_v8 = vshrl.u32 %v7246_v33, 16  ;;  %v7978_v58 = vshll.u32 %v7247_v27, 16 }
 0x1c8   : > { %v7972_v47 = vsel %vm22921_vm14, %v7965_v39, %v7970_v10  ;;  %v7981_v23 = vshrl.u32 %v7247_v27, 16  ;;  %v7986_v16 = vshll.u32 %v24647_v34, 16  ;;  %v8528_v25 = vcombine.low %v7932_v61, %v7940_v37 }
 0x1c9   : > { %22000 = vmatprep.mubr.bf16.mxu0 %v8527_v63  ;;  %v7980_v14 = vsel %vm22921_vm14, %v7973_v8, %v7978_v58  ;;  %v8529_v45 = vcombine.low %v7948_v36, %v7956_v17  ;;  %v8530_v59 = vcombine.low %v7964_v44, %v7972_v47  ;;  %v9416_v38 = vrot.slane %v24547_v42, %v22877_v24 }
 0x1ca   : > { %v7988_v52 = vsel %vm22921_vm14, %v7981_v23, %v7986_v16  ;;  %v8538_v35 = vrot.slane %v8528_v25, %v22877_v24  ;;  %v10022_v55 = vcombine.low %v24588_v26, %v24595_v56  ;;  %v20684_v49 = vcombine.high %v24588_v26, %v24595_v56 }
 0x1cb   : > { %v8531_v32 = vcombine.low %v7980_v14, %v7988_v52  ;;  %v8545_v60 = vrot.slane %v8529_v45, %v22877_v24  ;;  %v8552_v62 = vrot.slane %v8530_v59, %v22877_v24  ;;  %v20683_v6 = vcombine.high %v9416_v38, %v24566_v1 }
 0x1cc   : > { %v10024_v42 = vcombine.low %v24591_v57, %v24601_v51  ;;  %v10038_v43 = vrot.slane %v10022_v55, %v22877_v24  ;;  %v10045_v29 = vrot.slane %v20684_v49, %v22877_v24  ;;  %v9479_v48 = vcombine.high %v20655_v0, %v20655_v0 }
 0x1cd   : > { %v8559_v54 = vrot.slane %v8531_v32, %v22877_v24  ;;  %v8560_v19 = vcombine.low %v8538_v35, %v8545_v60  ;;  %v10031_v26 = vrot.slane %v20683_v6, %v22877_v24  ;;  %v9486_v56 = vrot.slane %v20655_v0, %v22877_v24 }
 0x1ce   : > { %v10052_v2 = vrot.slane %v10024_v42, %v22877_v24  ;;  %v9493_v1 = vrot.slane %v9479_v48, %v22877_v24  ;;  %v10072_v53 = vcombine.low %v24643_v7, %v7246_v33  ;;  %v10073_v57 = vcombine.low %v7247_v27, %v24647_v34 }
 0x1cf   : > { %v8561_v51 = vcombine.low %v8552_v62, %v8559_v54  ;;  %v8568_v30 = vrot.slane %v8560_v19, %v22877_v24  ;;  %v10053_v50 = vcombine.low %v10031_v26, %v10038_v43  ;;  %v9494_v46 = vcombine.high %v9486_v56, %v9486_v56  ;;  %v20486_v43 = vld.sshfl [vmem:[%s22855_s26 + $0x80] sm:$0x11 pattern:$0x75316420] }
 0x1d0   : > { %v10054_v5 = vcombine.low %v10045_v29, %v10052_v2  ;;  %v9495_v11 = vcombine.high %v9493_v1, %v9493_v1  ;;  %v10094_v22 = vrot.slane %v10072_v53, %v22877_v24  ;;  %v10101_v28 = vrot.slane %v10073_v57, %v22877_v24 }
 0x1d1   : > { %v8575_v40 = vrot.slane %v8561_v51, %v22877_v24  ;;  %v10061_v61 = vrot.slane %v10053_v50, %v22877_v24  ;;  %v10070_v7 = vcombine.low %v9493_v1, %v9494_v46  ;;  %v7255_v33 = vcombine.high %v24630_v4, %v24630_v4  ;;  %v20658_v50 = vld.sshfl [vmem:[%s22855_s26 + $0x78] sm:$0x32 pattern:$0x75316420] }
 0x1d2   : > { %v10068_v27 = vrot.slane %v10054_v5, %v22877_v24  ;;  %v10071_v12 = vcombine.low %v9495_v11, %v24640_v31  ;;  %v10103_v18 = vcombine.low %v10094_v22, %v10101_v28  ;;  %v7277_v3 = vcombine.high %v20484_v20, %v20484_v20 }
 0x1d3   : > { %v8576_v37 = vcombine.low %v8568_v30, %v8575_v40  ;;  %v10080_v9 = vrot.slane %v10070_v7, %v22877_v24  ;;  %v24712_v15 = vrot.slane %v7255_v33, %v22877_v24  ;;  %v7284_v36 = vrot.slane %v20484_v20, %v22877_v24 }
 0x1d4   : > { %v10069_v17 = vcombine.low %v10061_v61, %v10068_v27  ;;  %v10087_v39 = vrot.slane %v10071_v12, %v22877_v24  ;;  %v10117_v4 = vrot.slane %v10103_v18, %v22877_v24  ;;  %v7291_v10 = vrot.slane %v7277_v3, %v22877_v24 }
 0x1d5   : > { %22001 = vmatmul.mubr.bf16.gmra.mxu0 %v8576_v37  ;;  %v7292_v31 = vcombine.high %v7284_v36, %v7284_v36  ;;  %v7301_v63 = vcombine.high %v20485_v21, %v20485_v21  ;;  %v24719_v44 = vrot.slane %v20485_v21, %v22877_v24  ;;  %v7989_v8 = vshrl.u32 %v24647_v34, 16 }
 0x1d6   : > { %22040 = vmatprep.mubr.bf16.mxu1 %v10069_v17  ;;  %v10102_v58 = vcombine.low %v10080_v9, %v10087_v39  ;;  %v7293_v47 = vcombine.high %v7291_v10, %v7291_v10  ;;  %v7994_v23 = vshll.u32 %v24712_v15, 16  ;;  %v7998_v16 = vshrl.u32 %v7284_v36, 16 }
 0x1d7   : > { %v7315_v25 = vrot.slane %v7301_v63, %v22877_v24  ;;  %v7316_v14 = vcombine.high %v24719_v44, %v24719_v44  ;;  %v8003_v45 = vshll.u32 %v7291_v10, 16  ;;  %v8006_v59 = vshrl.u32 %v7291_v10, 16 }
 0x1d8   : > { %v10110_v38 = vrot.slane %v10102_v58, %v22877_v24  ;;  %v7996_v0 = vsel %vm22921_vm14, %v7989_v8, %v7994_v23  ;;  %v8011_v34 = vshll.u32 %v7292_v31, 16  ;;  %v8014_v52 = vshrl.u32 %v7292_v31, 16 }
 0x1d9   : > { %v7317_v35 = vcombine.high %v7315_v25, %v7315_v25  ;;  %v8005_v55 = vsel %vm22921_vm14, %v7998_v16, %v8003_v45  ;;  %v8019_v49 = vshll.u32 %v7293_v47, 16  ;;  %v8022_v32 = vshrl.u32 %v7293_v47, 16  ;;  %v20728_v45 = vld.sshfl [vmem:[%s22855_s26 + $0x1c] sm:$0x33 pattern:$0x75316420] }
 0x1da   : > { %v10118_v60 = vcombine.low %v10110_v38, %v10117_v4  ;;  %v8013_v62 = vsel %vm22921_vm14, %v8006_v59, %v8011_v34  ;;  %v8027_v6 = vshll.u32 %v24719_v44, 16  ;;  %v8030_v42 = vshrl.u32 %v24719_v44, 16  ;;  %v20727_v4 = vld.sshfl [vmem:[%s22855_s26 + $0x18] sm:$0x33 pattern:$0x75316420] }
 0x1db   : > { %v8021_v29 = vsel %vm22921_vm14, %v8014_v52, %v8019_v49  ;;  %v8035_v48 = vshll.u32 %v7315_v25, 16  ;;  %v8038_v54 = vshrl.u32 %v7315_v25, 16  ;;  %v8043_v19 = vshll.u32 %v7316_v14, 16 }
 0x1dc   : > { %22041 = vmatmul.mubr.bf16.gmra.mxu1 %v10118_v60  ;;  %v8029_v26 = vsel %vm22921_vm14, %v8022_v32, %v8027_v6  ;;  %v8046_v56 = vshrl.u32 %v7316_v14, 16  ;;  %v8051_v2 = vshll.u32 %v7317_v35, 16  ;;  %v8577_v1 = vcombine.low %v7996_v0, %v8005_v55  ;;  %v20729_v52 = vld.sshfl [vmem:[%s22855_s26 + $0x20] sm:$0x1 pattern:$0x75316420] }
 0x1dd   : > { %v8037_v53 = vsel %vm22921_vm14, %v8030_v42, %v8035_v48  ;;  %v8045_v57 = vsel %vm22921_vm14, %v8038_v54, %v8043_v19  ;;  %v8578_v51 = vcombine.low %v8013_v62, %v8021_v29  ;;  %v7325_v30 = vcombine.high %v20486_v43, %v20486_v43  ;;  %v20730_v60 = vld.sshfl [vmem:[%s22855_s26 + $0x24] sm:$0x33 pattern:$0x75316420] }
 0x1de   : > { %v8053_v46 = vsel %vm22921_vm14, %v8046_v56, %v8051_v2  ;;  %v8579_v20 = vcombine.low %v8029_v26, %v8037_v53  ;;  %v8587_v5 = vrot.slane %v8577_v1, %v22877_v24  ;;  %v7332_v11 = vrot.slane %v20486_v43, %v22877_v24  ;;  %v20731_v29 = vld.sshfl [vmem:[%s22855_s26 + $0x28] sm:$0x33 pattern:$0x75316420] }
 0x1df   : > { %v8580_v22 = vcombine.low %v8045_v57, %v8053_v46  ;;  %v8594_v28 = vrot.slane %v8578_v51, %v22877_v24  ;;  %v7339_v40 = vrot.slane %v7325_v30, %v22877_v24  ;;  %v8054_v61 = vshrl.u32 %v7317_v35, 16 }
 0x1e0   : > { %v8601_v7 = vrot.slane %v8579_v20, %v22877_v24  ;;  %v8059_v33 = vshll.u32 %v7332_v11, 16  ;;  %v8062_v27 = vshrl.u32 %v7332_v11, 16  ;;  %v9549_v12 = vcombine.high %v20658_v50, %v20658_v50 }
 0x1e1   : > { %v8608_v18 = vrot.slane %v8580_v22, %v22877_v24  ;;  %v8609_v21 = vcombine.low %v8587_v5, %v8594_v28  ;;  %v8067_v3 = vshll.u32 %v7339_v40, 16  ;;  %v9556_v37 = vrot.slane %v20658_v50, %v22877_v24 }
 0x1e2   : > { %v8061_v9 = vsel %vm22921_vm14, %v8054_v61, %v8059_v33  ;;  %v9563_v36 = vrot.slane %v9549_v12, %v22877_v24  ;;  %v10121_v17 = vcombine.low %v24719_v44, %v7315_v25  ;;  %v20686_v39 = vcombine.high %v24719_v44, %v7315_v25 }
 0x1e3   : > { %v8610_v10 = vcombine.low %v8601_v7, %v8608_v18  ;;  %v8617_v31 = vrot.slane %v8609_v21, %v22877_v24  ;;  %v8069_v63 = vsel %vm22921_vm14, %v8062_v27, %v8067_v3  ;;  %v10168_v8 = vcombine.low %v7332_v11, %v7339_v40 }
 0x1e4   : > { %v8626_v58 = vcombine.low %v8061_v9, %v8069_v63  ;;  %v10119_v47 = vcombine.low %v24712_v15, %v9563_v36  ;;  %v20685_v23 = vcombine.high %v9556_v37, %v9563_v36  ;;  %v10143_v16 = vrot.slane %v10121_v17, %v22877_v24  ;;  %v20823_v37 = vld.sshfl [vmem:[%s22855_s26 + $0x20] sm:$0x11 pattern:$0x75316420] }
 0x1e5   : > { %v8624_v14 = vrot.slane %v8610_v10, %v22877_v24  ;;  %v10150_v44 = vrot.slane %v20686_v39, %v22877_v24  ;;  %v10175_v25 = vrot.slane %v10168_v8, %v22877_v24  ;;  %v10465_v59 = vcombine.high %v20727_v4, %v20727_v4 }
 0x1e6   : > { %v8633_v38 = vrot.slane %v8626_v58, %v22877_v24  ;;  %v10129_v0 = vrot.slane %v10119_v47, %v22877_v24  ;;  %v10136_v34 = vrot.slane %v20685_v23, %v22877_v24  ;;  %v24773_v15 = vrot.slane %v20727_v4, %v22877_v24 }
 0x1e7   : > { %v8625_v35 = vcombine.low %v8617_v31, %v8624_v14  ;;  %v10152_v55 = vcombine.low %v10143_v16, %v10150_v44  ;;  %v10182_v49 = vrot.slane %v10175_v25, %v22877_v24  ;;  %v24778_v32 = vrot.slane %v10465_v59, %v22877_v24 }
 0x1e8   : > { %v8640_v62 = vrot.slane %v8633_v38, %v22877_v24  ;;  %v10151_v6 = vcombine.low %v10129_v0, %v10136_v34  ;;  %v10489_v42 = vcombine.high %v20728_v45, %v20728_v45  ;;  %v24783_v43 = vrot.slane %v20728_v45, %v22877_v24 }
 0x1e9   : > { %22004 = vmatprep.mubr.bf16.mxu0 %v8625_v35  ;;  %v10166_v48 = vrot.slane %v10152_v55, %v22877_v24  ;;  %v11095_v54 = vcombine.low %v24773_v15, %v24778_v32  ;;  %v20773_v19 = vcombine.high %v24773_v15, %v24778_v32  ;;  %v10519_v26 = vrot.slane %v20729_v52, %v22877_v24 }
 0x1ea   : > { %22005 = vmatmul.mubr.bf16.gmra.mxu0 %v8640_v62  ;;  %v10159_v56 = vrot.slane %v10151_v6, %v22877_v24  ;;  %v24794_v2 = vrot.slane %v10489_v42, %v22877_v24  ;;  %v10527_v1 = vcombine.high %v20730_v60, %v20730_v60  ;;  %v24797_v53 = vrot.slane %v20730_v60, %v22877_v24 }
 0x1eb   : > { %v11105_v57 = vrot.slane %v11095_v54, %v22877_v24  ;;  %v11112_v51 = vrot.slane %v20773_v19, %v22877_v24  ;;  %v10551_v30 = vcombine.high %v20731_v29, %v20731_v29  ;;  %v24802_v50 = vrot.slane %v20731_v29, %v22877_v24 }
 0x1ec   : > { %v10167_v46 = vcombine.low %v10159_v56, %v10166_v48  ;;  %v11097_v20 = vcombine.low %v24783_v43, %v24794_v2  ;;  %v20774_v5 = vcombine.high %v24783_v43, %v24794_v2  ;;  %v24809_v11 = vrot.slane %v10527_v1, %v22877_v24  ;;  %v22580_v1 = vld [vmem:[%s28160_s1 + $0x230] sm:$0xff]  }
 0x1ed   : > { %v11127_v22 = vcombine.low %v11105_v57, %v11112_v51  ;;  %v24813_v28 = vcombine.high %v24797_v53, %v24797_v53  ;;  %v24816_v40 = vrot.slane %v10551_v30, %v22877_v24  ;;  %v24820_v61 = vcombine.high %v24802_v50, %v24802_v50 }
 0x1ee   : > { %22044 = vmatprep.mubr.bf16.mxu1 %v10167_v46  ;;  %v11119_v7 = vrot.slane %v11097_v20, %v22877_v24  ;;  %v11126_v33 = vrot.slane %v20774_v5, %v22877_v24  ;;  %v24826_v27 = vcombine.high %v24809_v11, %v24809_v11  ;;  %v11144_v12 = vcombine.low %v10519_v26, %v24797_v53 }
 0x1ef   : > { %22045 = vmatmul.mubr.bf16.gmra.mxu1 %v10182_v49  ;;  %v11135_v18 = vrot.slane %v11127_v22, %v22877_v24  ;;  %v11145_v21 = vcombine.low %v24809_v11, %v24813_v28  ;;  %v11147_v3 = vcombine.low %v24816_v40, %v24820_v61  ;;  %v11942_v9 = vcombine.high %v24773_v15, %v24773_v15 }
 0x1f0   : > { %v11128_v36 = vcombine.low %v11119_v7, %v11126_v33  ;;  %v11146_v17 = vcombine.low %v24826_v27, %v24802_v50  ;;  %v11154_v39 = vrot.slane %v11144_v12, %v22877_v24  ;;  %v11943_v4 = vcombine.high %v24778_v32, %v24778_v32 }
 0x1f1   : > { %v11161_v10 = vrot.slane %v11145_v21, %v22877_v24  ;;  %v11175_v31 = vrot.slane %v11147_v3, %v22877_v24  ;;  %v11966_v63 = vcombine.high %v24783_v43, %v24783_v43  ;;  %v11967_v8 = vcombine.high %v24794_v2, %v24794_v2 }
 0x1f2   : > { %v11142_v58 = vrot.slane %v11128_v36, %v22877_v24  ;;  %v11168_v47 = vrot.slane %v11146_v17, %v22877_v24  ;;  %v11975_v23 = vcombine.high %v20823_v37, %v20823_v37  ;;  %v11982_v16 = vrot.slane %v20823_v37, %v22877_v24  ;;  %v22581_v36 = vld [vmem:[%s28160_s1 + $0x228] sm:$0xff]  }
 0x1f3   : > { %v11176_v14 = vcombine.low %v11154_v39, %v11161_v10  ;;  %v12621_v44 = vshrl.u32 %v24773_v15, 16  ;;  %v12626_v25 = vshll.u32 %v24778_v32, 16  ;;  %v12629_v45 = vshrl.u32 %v24778_v32, 16 }
 0x1f4   : > { %v11143_v59 = vcombine.low %v11135_v18, %v11142_v58  ;;  %v11177_v38 = vcombine.low %v11168_v47, %v11175_v31  ;;  %v11989_v0 = vrot.slane %v11975_v23, %v22877_v24  ;;  %v12634_v34 = vshll.u32 %v11942_v9, 16  ;;  %v22685_v18 = vld [vmem:[%s28160_s1 + $0x238] sm:$0xff]  }
 0x1f5   : > { %v11184_v52 = vrot.slane %v11176_v14, %v22877_v24  ;;  %v12628_v35 = vsel %vm22921_vm14, %v12621_v44, %v12626_v25  ;;  %v12637_v55 = vshrl.u32 %v11942_v9, 16  ;;  %v12642_v49 = vshll.u32 %v11943_v4, 16 }
 0x1f6   : > { %22064 = vmatprep.mubr.bf16.mxu0 %v11143_v59  ;;  %v11191_v60 = vrot.slane %v11177_v38, %v22877_v24  ;;  %v12636_v15 = vsel %vm22921_vm14, %v12629_v45, %v12634_v34  ;;  %v12645_v62 = vshrl.u32 %v11943_v4, 16  ;;  %v12650_v32 = vshll.u32 %v24783_v43, 16 }
 0x1f7   : > { %v12644_v6 = vsel %vm22921_vm14, %v12637_v55, %v12642_v49  ;;  %v12653_v42 = vshrl.u32 %v24783_v43, 16  ;;  %v12658_v29 = vshll.u32 %v24794_v2, 16  ;;  %v12661_v48 = vshrl.u32 %v24794_v2, 16 }
 0x1f8   : > { %v11192_v54 = vcombine.low %v11184_v52, %v11191_v60  ;;  %v12652_v19 = vsel %vm22921_vm14, %v12645_v62, %v12650_v32  ;;  %v12666_v26 = vshll.u32 %v11966_v63, 16  ;;  %v12669_v56 = vshrl.u32 %v11966_v63, 16  ;;  %v20732_v55 = vld.sshfl [vmem:[%s22855_s26 + $0x2c] sm:$0x1 pattern:$0x75316420] }
 0x1f9   : > { %v12660_v57 = vsel %vm22921_vm14, %v12653_v42, %v12658_v29  ;;  %v12674_v51 = vshll.u32 %v11967_v8, 16  ;;  %v12677_v30 = vshrl.u32 %v11967_v8, 16  ;;  %v12682_v43 = vshll.u32 %v11982_v16, 16 }
 0x1fa   : > { %22065 = vmatmul.mubr.bf16.vlgmr.msra.gmra.mxu0 %v11192_v54  ;;  %v12668_v2 = vsel %vm22921_vm14, %v12661_v48, %v12666_v26  ;;  %v12685_v46 = vshrl.u32 %v11982_v16, 16  ;;  %v12690_v20 = vshll.u32 %v11989_v0, 16  ;;  %v13367_v5 = vcombine.low %v12628_v35, %v12636_v15  ;;  %v20733_v0 = vld.sshfl [vmem:[%s22855_s26 + $0x30] sm:$0x33 pattern:$0x75316420] }
 0x1fb   : > { %v12676_v22 = vsel %vm22921_vm14, %v12669_v56, %v12674_v51  ;;  %v12684_v7 = vsel %vm22921_vm14, %v12677_v30, %v12682_v43  ;;  %v13368_v33 = vcombine.low %v12644_v6, %v12652_v19  ;;  %v13369_v12 = vcombine.low %v12660_v57, %v12668_v2  ;;  %22129 = vmatpush3.bf16.msra.mxu0 %v22685_v18  ;;  %v20734_v62 = vld.sshfl [vmem:[%s22855_s26 + $0x34] sm:$0x33 pattern:$0x75316420] }
 0x1fc   : > { %v13370_v21 = vcombine.low %v12676_v22, %v12684_v7  ;;  %v13377_v3 = vrot.slane %v13367_v5, %v22877_v24  ;;  %v24886_v37 = vcombine.high %v24816_v40, %v24816_v40  ;;  %v12692_v9 = vsel %vm22921_vm14, %v12685_v46, %v12690_v20  ;;  %22130 = vmatprep.subr.bf16.mxu0 %v22580_v1  ;;  %v20736_v29 = vld.sshfl [vmem:[%s22855_s26 + $0x3c] sm:$0x33 pattern:$0x75316420] }
 0x1fd   : > { %v13384_v17 = vrot.slane %v13368_v33, %v22877_v24  ;;  %v13391_v39 = vrot.slane %v13369_v12, %v22877_v24  ;;  %v12694_v4 = vshrl.u32 %v24797_v53, 16  ;;  %v12699_v10 = vshll.u32 %v24809_v11, 16  ;;  %v20735_v56 = vld.sshfl [vmem:[%s22855_s26 + $0x38] sm:$0x1 pattern:$0x75316420] }
 0x1fe   : > { %v13398_v31 = vrot.slane %v13370_v21, %v22877_v24  ;;  %v12702_v63 = vshrl.u32 %v24809_v11, 16  ;;  %v12707_v8 = vshll.u32 %v24813_v28, 16  ;;  %v12710_v58 = vshrl.u32 %v24813_v28, 16  ;;  %v22582_v28 = vld [vmem:[%s28160_s1 + $0x220] sm:$0xff]   ;;  %v22584_v12 = vld [vmem:[%s28160_s1 + $0x210] sm:$0xff]  }
 0x1ff   : > { %v13399_v47 = vcombine.low %v13377_v3, %v13384_v17  ;;  %v12701_v23 = vsel %vm22921_vm14, %v12694_v4, %v12699_v10  ;;  %v12715_v16 = vshll.u32 %v24826_v27, 16  ;;  %v12718_v14 = vshrl.u32 %v24826_v27, 16  ;;  %22131 = vmatpush3.bf16.msra.mxu0 %v22580_v1  ;;  %v24969_v4 = vld.sshfl [vmem:[%s22855_s26 + $0x40] sm:$0x33 pattern:$0x75316420] }
 0x200   : > { %v13400_v53 = vcombine.low %v13391_v39, %v13398_v31  ;;  %v12709_v44 = vsel %vm22921_vm14, %v12702_v63, %v12707_v8  ;;  %v12723_v11 = vshll.u32 %v24802_v50, 16  ;;  %v12726_v25 = vshrl.u32 %v24802_v50, 16  ;;  %22132 = vmatprep.subr.bf16.mxu0 %v22581_v36 }
 0x201   : > { %v13407_v45 = vrot.slane %v13399_v47, %v22877_v24  ;;  %v12717_v27 = vsel %vm22921_vm14, %v12710_v58, %v12715_v16  ;;  %v12731_v59 = vshll.u32 %v24816_v40, 16  ;;  %v12734_v38 = vshrl.u32 %v24816_v40, 16  ;;  %v20826_v47 = vld.sshfl [vmem:[%s22855_s26 + $0x2c] sm:$0x11 pattern:$0x75316420] }
 0x202   : > { %v13414_v34 = vrot.slane %v13400_v53, %v22877_v24  ;;  %v12725_v50 = vsel %vm22921_vm14, %v12718_v14, %v12723_v11  ;;  %v12739_v52 = vshll.u32 %v24820_v61, 16  ;;  %v12742_v35 = vshrl.u32 %v24820_v61, 16  ;;  %v22583_v61 = vld [vmem:[%s28160_s1 + $0x218] sm:$0xff]  }
 0x203   : > { %v12733_v49 = vsel %vm22921_vm14, %v12726_v25, %v12731_v59  ;;  %v12747_v60 = vshll.u32 %v24886_v37, 16  ;;  %v13416_v15 = vcombine.low %v12692_v9, %v12701_v23  ;;  %v13417_v40 = vcombine.low %v12709_v44, %v12717_v27  ;;  %22133 = vmatpush3.bf16.msra.mxu0 %v22581_v36 }
 0x204   : > { %v13415_v32 = vcombine.low %v13407_v45, %v13414_v34  ;;  %v12741_v6 = vsel %vm22921_vm14, %v12734_v38, %v12739_v52  ;;  %v13418_v42 = vcombine.low %v12725_v50, %v12733_v49  ;;  %22134 = vmatprep.subr.bf16.mxu0 %v22582_v28  ;;  %v10581_v26 = vrot.slane %v20732_v55, %v22877_v24  ;;  %v22585_v45 = vld [vmem:[%s28160_s1 + $0x208] sm:$0xff]  }
 0x205   : > { %v12749_v48 = vsel %vm22921_vm14, %v12742_v35, %v12747_v60  ;;  %v13426_v54 = vrot.slane %v13416_v15, %v22877_v24  ;;  %v13433_v19 = vrot.slane %v13417_v40, %v22877_v24  ;;  %v10589_v51 = vcombine.high %v20733_v0, %v20733_v0 }
 0x206   : > { %22104 = vmatprep.mubr.bf16.mxu1 %v13415_v32  ;;  %v13419_v1 = vcombine.low %v12741_v6, %v12749_v48  ;;  %v13440_v57 = vrot.slane %v13418_v42, %v22877_v24  ;;  %v24942_v30 = vrot.slane %v20733_v0, %v22877_v24  ;;  %v10613_v2 = vcombine.high %v20734_v62, %v20734_v62 }
 0x207   : > { %v13448_v43 = vcombine.low %v13426_v54, %v13433_v19  ;;  %v24945_v46 = vrot.slane %v20734_v62, %v22877_v24  ;;  %v11193_v20 = vcombine.low %v24886_v37, %v10581_v26  ;;  %22135 = vmatpush3.bf16.msra.mxu0 %v22582_v28  ;;  %v24950_v22 = vrot.slane %v10589_v51, %v22877_v24 }
 0x208   : > { %v13447_v5 = vrot.slane %v13419_v1, %v22877_v24  ;;  %v10643_v7 = vrot.slane %v20735_v56, %v22877_v24  ;;  %v10651_v33 = vcombine.high %v20736_v29, %v20736_v29  ;;  %22136 = vmatprep.subr.bf16.mxu0 %v22583_v61  ;;  %v24958_v21 = vrot.slane %v10613_v2, %v22877_v24 }
 0x209   : > { %v13456_v18 = vrot.slane %v13448_v43, %v22877_v24  ;;  %v11203_v3 = vrot.slane %v11193_v20, %v22877_v24  ;;  %v24962_v9 = vrot.slane %v20736_v29, %v22877_v24  ;;  %v11194_v17 = vcombine.low %v24942_v30, %v24950_v22 }
 0x20a   : > { %v13449_v36 = vcombine.low %v13440_v57, %v13447_v5  ;;  %v20775_v39 = vcombine.high %v24942_v30, %v24950_v22  ;;  %v24972_v10 = vrot.slane %v10651_v33, %v22877_v24  ;;  %v11196_v31 = vcombine.low %v24945_v46, %v24958_v21 }
 0x20b   : > { %v24978_v63 = vcombine.high %v24962_v9, %v24962_v9  ;;  %v24982_v8 = vrot.slane %v24969_v4, %v22877_v24  ;;  %v20776_v58 = vcombine.high %v24945_v46, %v24958_v21  ;;  %22137 = vmatpush3.bf16.msra.mxu0 %v22583_v61  ;;  %v11210_v16 = vrot.slane %v11194_v17, %v22877_v24  ;;  %v20829_v17 = vld.sshfl [vmem:[%s22855_s26 + $0x38] sm:$0x11 pattern:$0x75316420] }
 0x20c   : > { %v13463_v23 = vrot.slane %v13449_v36, %v22877_v24  ;;  %v11217_v14 = vrot.slane %v20775_v39, %v22877_v24  ;;  %v24992_v53 = vcombine.high %v24972_v10, %v24972_v10  ;;  %22138 = vmatprep.subr.bf16.mxu0 %v22584_v12  ;;  %v11224_v44 = vrot.slane %v11196_v31, %v22877_v24 }
 0x20d   : > { %v11243_v11 = vcombine.low %v10643_v7, %v24962_v9  ;;  %v11244_v25 = vcombine.low %v24972_v10, %v24978_v63  ;;  %v11252_v28 = vrot.slane %v20776_v58, %v22877_v24  ;;  %v11225_v59 = vcombine.low %v11203_v3, %v11210_v16 }
 0x20e   : > { %v13464_v27 = vcombine.low %v13456_v18, %v13463_v23  ;;  %v11245_v38 = vcombine.low %v24992_v53, %v24982_v8  ;;  %v12045_v0 = vcombine.high %v20826_v47, %v20826_v47  ;;  %v11226_v34 = vcombine.low %v11217_v14, %v11224_v44 }
 0x20f   : > { %v11259_v50 = vrot.slane %v11243_v11, %v22877_v24  ;;  %v11266_v52 = vrot.slane %v11244_v25, %v22877_v24  ;;  %v12052_v35 = vrot.slane %v20826_v47, %v22877_v24  ;;  %22139 = vmatpush3.bf16.msra.mxu0 %v22584_v12  ;;  %v11233_v55 = vrot.slane %v11225_v59, %v22877_v24 }
 0x210   : > { %22105 = vmatmul.mubr.bf16.vlgmr.msra.gmra.mxu1 %v13464_v27  ;;  %v11273_v49 = vrot.slane %v11245_v38, %v22877_v24  ;;  %v12059_v60 = vrot.slane %v12045_v0, %v22877_v24  ;;  %v12082_v15 = vcombine.high %v24942_v30, %v24942_v30  ;;  %v11240_v40 = vrot.slane %v11226_v34, %v22877_v24 }
 0x211   : > { %v11274_v62 = vcombine.low %v11252_v28, %v11259_v50  ;;  %v12083_v32 = vcombine.high %v24950_v22, %v24950_v22  ;;  %v12106_v6 = vcombine.high %v24945_v46, %v24945_v46  ;;  %22140 = vmatprep.subr.bf16.mxu0 %v22585_v45  ;;  %v12750_v29 = vshrl.u32 %v24886_v37, 16 }
 0x212   : > { %v11275_v42 = vcombine.low %v11266_v52, %v11273_v49  ;;  %v12755_v61 = vshll.u32 %v12052_v35, 16  ;;  %v12758_v48 = vshrl.u32 %v12052_v35, 16  ;;  %v11241_v54 = vcombine.low %v11233_v55, %v11240_v40 }
 0x213   : > { %v11282_v19 = vrot.slane %v11274_v62, %v22877_v24  ;;  %v12763_v26 = vshll.u32 %v12059_v60, 16  ;;  %v12767_v56 = vshrl.u32 %v24942_v30, 16  ;;  %22141 = vmatpush3.bf16.msra.mxu0 %v22585_v45  ;;  %v12772_v51 = vshll.u32 %v24950_v22, 16 }
 0x214   : > { %v11289_v1 = vrot.slane %v11275_v42, %v22877_v24  ;;  %v12757_v57 = vsel %vm22921_vm14, %v12750_v29, %v12755_v61  ;;  %v12775_v43 = vshrl.u32 %v24950_v22, 16  ;;  %22068 = vmatprep.mubr.bf16.mxu0 %v11241_v54  ;;  %v12780_v2 = vshll.u32 %v12082_v15, 16 }
 0x215   : > { %v12765_v37 = vsel %vm22921_vm14, %v12758_v48, %v12763_v26  ;;  %v12783_v20 = vshrl.u32 %v12082_v15, 16  ;;  %v12788_v5 = vshll.u32 %v12083_v32, 16  ;;  %v12774_v30 = vsel %vm22921_vm14, %v12767_v56, %v12772_v51 }
 0x216   : > { %v11290_v7 = vcombine.low %v11282_v19, %v11289_v1  ;;  %v12791_v33 = vshrl.u32 %v12083_v32, 16  ;;  %v12796_v12 = vshll.u32 %v24945_v46, 16  ;;  %v12782_v18 = vsel %vm22921_vm14, %v12775_v43, %v12780_v2 }
 0x217   : > { %v12790_v22 = vsel %vm22921_vm14, %v12783_v20, %v12788_v5  ;;  %v12799_v3 = vshrl.u32 %v24945_v46, 16  ;;  %v12804_v36 = vshll.u32 %v24958_v21, 16  ;;  %v12807_v31 = vshrl.u32 %v24958_v21, 16 }
 0x218   : > { %22069 = vmatmul.mubr.bf16.gmra.mxu0 %v11290_v7  ;;  %v12798_v39 = vsel %vm22921_vm14, %v12791_v33, %v12796_v12  ;;  %v12812_v58 = vshll.u32 %v12106_v6, 16  ;;  %v13465_v47 = vcombine.low %v12757_v57, %v12765_v37  ;;  %v13466_v16 = vcombine.low %v12774_v30, %v12782_v18  ;;  %v20739_v57 = vld.sshfl [vmem:[%s22855_s26 + $0x48] sm:$0x33 pattern:$0x75316420] }
 0x219   : > { %v12806_v23 = vsel %vm22921_vm14, %v12799_v3, %v12804_v36  ;;  %v13467_v14 = vcombine.low %v12790_v22, %v12798_v39  ;;  %v12107_v44 = vcombine.high %v24958_v21, %v24958_v21  ;;  %v12115_v25 = vcombine.high %v20829_v17, %v20829_v17  ;;  %v20740_v18 = vld.sshfl [vmem:[%s22855_s26 + $0x4c] sm:$0x33 pattern:$0x75316420] }
 0x21a   : > { %v12814_v46 = vsel %vm22921_vm14, %v12807_v31, %v12812_v58  ;;  %v13475_v11 = vrot.slane %v13465_v47, %v22877_v24  ;;  %v12122_v28 = vrot.slane %v20829_v17, %v22877_v24  ;;  %v13482_v27 = vrot.slane %v13466_v16, %v22877_v24  ;;  %v20741_v39 = vld.sshfl [vmem:[%s22855_s26 + $0x50] sm:$0x1 pattern:$0x75316420] }
 0x21b   : > { %v13468_v45 = vcombine.low %v12806_v23, %v12814_v46  ;;  %v13489_v59 = vrot.slane %v13467_v14, %v22877_v24  ;;  %v12161_v38 = vcombine.high %v24969_v4, %v24969_v4  ;;  %v12129_v0 = vrot.slane %v12115_v25, %v22877_v24 }
 0x21c   : > { %v12815_v34 = vshrl.u32 %v12106_v6, 16  ;;  %v12820_v21 = vshll.u32 %v12107_v44, 16  ;;  %v12823_v50 = vshrl.u32 %v12107_v44, 16  ;;  %v13497_v35 = vcombine.low %v13475_v11, %v13482_v27  ;;  %v25119_v27 = vpop.f32.mrf.mxu0 }
 0x21d   : > { %v13496_v52 = vrot.slane %v13468_v45, %v22877_v24  ;;  %v25055_v55 = vrot.slane %v12161_v38, %v22877_v24  ;;  %v12828_v49 = vshll.u32 %v12122_v28, 16  ;;  %v12831_v15 = vshrl.u32 %v12122_v28, 16  ;;  %v20742_v44 = vld.sshfl [vmem:[%s22855_s26 + $0x54] sm:$0x33 pattern:$0x75316420] }
 0x21e   : > { %v12822_v60 = vsel %vm22921_vm14, %v12815_v34, %v12820_v21  ;;  %v12836_v40 = vshll.u32 %v12129_v0, 16  ;;  %v12840_v4 = vshrl.u32 %v24962_v9, 16  ;;  %v13505_v32 = vrot.slane %v13497_v35, %v22877_v24  ;;  %v22586_v9 = vld [vmem:[%s28160_s1 + $0x200] sm:$0xff]   ;;  %28176 = vst [vmem:[#allocation4_spill] sm:$0xff] %v25119_v27 }
 0x21f   : > { %v13498_v62 = vcombine.low %v13489_v59, %v13496_v52  ;;  %v12830_v6 = vsel %vm22921_vm14, %v12823_v50, %v12828_v49  ;;  %v12845_v42 = vshll.u32 %v24972_v10, 16  ;;  %v12848_v61 = vshrl.u32 %v24972_v10, 16  ;;  %22142 = vmatprep.subr.bf16.mxu0 %v22586_v9  ;;  %v25121_v59 = vpop.f32.mrf.mxu1 }
 0x220   : > { %v12838_v29 = vsel %vm22921_vm14, %v12831_v15, %v12836_v40  ;;  %v12853_v48 = vshll.u32 %v24978_v63, 16  ;;  %v12856_v54 = vshrl.u32 %v24978_v63, 16  ;;  %v12861_v56 = vshll.u32 %v24992_v53, 16  ;;  %22143 = vmatpush3.bf16.msra.mxu0 %v22586_v9  ;;  %28177 = vst [vmem:[#allocation5_spill] sm:$0xff] %v25121_v59 }
 0x221   : > { %v13512_v19 = vrot.slane %v13498_v62, %v22877_v24  ;;  %v12847_v26 = vsel %vm22921_vm14, %v12840_v4, %v12845_v42  ;;  %v12864_v1 = vshrl.u32 %v24992_v53, 16  ;;  %v12869_v63 = vshll.u32 %v24982_v8, 16  ;;  %v20738_v53 = vld.sshfl [vmem:[%s22855_s26 + $0x44] sm:$0x1 pattern:$0x75316420] }
 0x222   : > { %v12855_v10 = vsel %vm22921_vm14, %v12848_v61, %v12853_v48  ;;  %v12872_v51 = vshrl.u32 %v24982_v8, 16  ;;  %v12877_v43 = vshll.u32 %v25055_v55, 16  ;;  %v12863_v2 = vsel %vm22921_vm14, %v12856_v54, %v12861_v56  ;;  %v25147_v61 = vpop.f32.mrf.mxu0  ;;  %v25149_v48 = vpop.f32.mrf.mxu1 }
 0x223   : > { %v13513_v37 = vcombine.low %v13505_v32, %v13512_v19  ;;  %v13514_v20 = vcombine.low %v12822_v60, %v12830_v6  ;;  %v13515_v5 = vcombine.low %v12838_v29, %v12847_v26  ;;  %v12871_v7 = vsel %vm22921_vm14, %v12864_v1, %v12869_v63  ;;  %v20832_v29 = vld.sshfl [vmem:[%s22855_s26 + $0x44] sm:$0x11 pattern:$0x75316420]  ;;  %28178 = vst [vmem:[#allocation6_spill] sm:$0xff] %v25147_v61 }
 0x224   : > { %v12879_v30 = vsel %vm22921_vm14, %v12872_v51, %v12877_v43  ;;  %v13516_v33 = vcombine.low %v12855_v10, %v12863_v2  ;;  %v25092_v12 = vcombine.high %v24982_v8, %v24982_v8  ;;  %v25099_v17 = vcombine.high %v25055_v55, %v25055_v55  ;;  %28179 = vst [vmem:[#allocation7_spill] sm:$0xff] %v25149_v48  ;;  %v25159_v10 = vpop.f32.mrf.mxu0  ;;  %v25161_v63 = vpop.f32.mrf.mxu1 }
 0x225   : > { %22108 = vmatprep.mubr.bf16.mxu1 %v13513_v37  ;;  %v13517_v22 = vcombine.low %v12871_v7, %v12879_v30  ;;  %v13524_v3 = vrot.slane %v13514_v20, %v22877_v24  ;;  %v13531_v36 = vrot.slane %v13515_v5, %v22877_v24  ;;  %v10705_v58 = vrot.slane %v20738_v53, %v22877_v24 }
 0x226   : > { %v13538_v31 = vrot.slane %v13516_v33, %v22877_v24  ;;  %v10713_v47 = vcombine.high %v20739_v57, %v20739_v57  ;;  %v25105_v8 = vrot.slane %v20739_v57, %v22877_v24  ;;  %v11291_v14 = vcombine.low %v25055_v55, %v25092_v12  ;;  %28180 = vst [vmem:[#allocation8_spill] sm:$0xff] %v25159_v10 }
 0x227   : > { %v13545_v23 = vrot.slane %v13517_v22, %v22877_v24  ;;  %v13546_v16 = vcombine.low %v13524_v3, %v13531_v36  ;;  %v10737_v46 = vcombine.high %v20740_v18, %v20740_v18  ;;  %v11292_v25 = vcombine.low %v25099_v17, %v10705_v58  ;;  %28181 = vst [vmem:[#allocation9_spill] sm:$0xff] %v25161_v63  ;;  %v25176_v3 = vpop.f32.mrf.mxu0  ;;  %v25178_v36 = vpop.f32.mrf.mxu1 }
 0x228   : > { %v25112_v11 = vrot.slane %v10713_v47, %v22877_v24  ;;  %v25116_v28 = vrot.slane %v20740_v18, %v22877_v24  ;;  %v10767_v45 = vrot.slane %v20741_v39, %v22877_v24  ;;  %v11301_v34 = vrot.slane %v11291_v14, %v22877_v24  ;;  %28182 = vst [vmem:[#allocation10_spill] sm:$0xff] %v25176_v3 }
 0x229   : > { %v13547_v38 = vcombine.low %v13538_v31, %v13545_v23  ;;  %v13554_v0 = vrot.slane %v13546_v16, %v22877_v24  ;;  %v25126_v21 = vrot.slane %v10737_v46, %v22877_v24  ;;  %v11308_v35 = vrot.slane %v11292_v25, %v22877_v24  ;;  %28183 = vst [vmem:[#allocation11_spill] sm:$0xff] %v25178_v36 }
 0x22a   : > { %v11293_v50 = vcombine.low %v25105_v8, %v25112_v11  ;;  %v20777_v52 = vcombine.high %v25105_v8, %v25112_v11  ;;  %v10775_v49 = vcombine.high %v20742_v44, %v20742_v44  ;;  %v25135_v15 = vrot.slane %v20742_v44, %v22877_v24 }
 0x22b   : > { %v13561_v60 = vrot.slane %v13547_v38, %v22877_v24  ;;  %v11340_v40 = vcombine.low %v25116_v28, %v25126_v21  ;;  %v20778_v4 = vcombine.high %v25116_v28, %v25126_v21  ;;  %v11323_v6 = vcombine.low %v11301_v34, %v11308_v35 }
 0x22c   : > { %v11315_v62 = vrot.slane %v11293_v50, %v22877_v24  ;;  %v11322_v32 = vrot.slane %v20777_v52, %v22877_v24  ;;  %v25144_v42 = vrot.slane %v10775_v49, %v22877_v24  ;;  %v25153_v9 = vcombine.high %v25135_v15, %v25135_v15  ;;  %v25196_v50 = vpop.f32.mrf.mxu1 }
 0x22d   : > { %v13562_v54 = vcombine.low %v13554_v0, %v13561_v60  ;;  %v11342_v19 = vcombine.low %v10767_v45, %v25135_v15  ;;  %v11350_v26 = vrot.slane %v11340_v40, %v22877_v24  ;;  %v11331_v1 = vrot.slane %v11323_v6, %v22877_v24  ;;  %28185 = vst [vmem:[#allocation13_spill] sm:$0xff] %v25196_v50 }
 0x22e   : > { %v11324_v56 = vcombine.low %v11315_v62, %v11322_v32  ;;  %v11357_v57 = vrot.slane %v20778_v4, %v22877_v24  ;;  %v11343_v51 = vcombine.low %v25144_v42, %v25153_v9  ;;  %v12185_v37 = vcombine.high %v20832_v29, %v20832_v29  ;;  %v20835_v32 = vld.sshfl [vmem:[%s22855_s26 + $0x50] sm:$0x11 pattern:$0x75316420] }
 0x22f   : > { %22109 = vmatmul.mubr.bf16.gmra.mxu1 %v13562_v54  ;;  %v11364_v43 = vrot.slane %v11342_v19, %v22877_v24  ;;  %v12192_v2 = vrot.slane %v20832_v29, %v22877_v24  ;;  %v12222_v53 = vcombine.high %v25105_v8, %v25105_v8  ;;  %v12223_v7 = vcombine.high %v25112_v11, %v25112_v11 }
 0x230   : > { %v11338_v20 = vrot.slane %v11324_v56, %v22877_v24  ;;  %v11372_v5 = vcombine.low %v11350_v26, %v11357_v57  ;;  %v11371_v30 = vrot.slane %v11343_v51, %v22877_v24  ;;  %v12199_v33 = vrot.slane %v12185_v37, %v22877_v24  ;;  %v25216_v51 = vpop.f32.mrf.mxu1 }
 0x231   : > { %v12880_v18 = vshrl.u32 %v25055_v55, 16  ;;  %v12885_v22 = vshll.u32 %v25092_v12, 16  ;;  %v12888_v58 = vshrl.u32 %v25092_v12, 16  ;;  %v12893_v47 = vshll.u32 %v25099_v17, 16  ;;  %28187 = vst [vmem:[#allocation15_spill] sm:$0xff] %v25216_v51 }
 0x232   : > { %v11339_v39 = vcombine.low %v11331_v1, %v11338_v20  ;;  %v11380_v31 = vrot.slane %v11372_v5, %v22877_v24  ;;  %v11373_v23 = vcombine.low %v11364_v43, %v11371_v30  ;;  %v12896_v14 = vshrl.u32 %v25099_v17, 16  ;;  %v25194_v17 = vpop.f32.mrf.mxu0 }
 0x233   : > { %v12887_v16 = vsel %vm22921_vm14, %v12880_v18, %v12885_v22  ;;  %v12901_v55 = vshll.u32 %v12192_v2, 16  ;;  %v12895_v44 = vsel %vm22921_vm14, %v12888_v58, %v12893_v47  ;;  %v12904_v46 = vshrl.u32 %v12192_v2, 16  ;;  %28184 = vst [vmem:[#allocation12_spill] sm:$0xff] %v25194_v17  ;;  %v25229_v18 = vpop.f32.mrf.mxu1 }
 0x234   : > { %22072 = vmatprep.mubr.bf16.mxu0 %v11339_v39  ;;  %v12909_v25 = vshll.u32 %v12199_v33, 16  ;;  %v12913_v45 = vshrl.u32 %v25105_v8, 16  ;;  %v11387_v12 = vrot.slane %v11373_v23, %v22877_v24  ;;  %v12918_v0 = vshll.u32 %v25112_v11, 16  ;;  %v25214_v57 = vpop.f32.mrf.mxu0 }
 0x235   : > { %v12903_v38 = vsel %vm22921_vm14, %v12896_v14, %v12901_v55  ;;  %v12921_v34 = vshrl.u32 %v25112_v11, 16  ;;  %v12926_v35 = vshll.u32 %v12222_v53, 16  ;;  %v12929_v49 = vshrl.u32 %v12222_v53, 16  ;;  %28186 = vst [vmem:[#allocation14_spill] sm:$0xff] %v25214_v57 }
 0x236   : > { %v12911_v52 = vsel %vm22921_vm14, %v12904_v46, %v12909_v25  ;;  %v12934_v60 = vshll.u32 %v12223_v7, 16  ;;  %v11388_v8 = vcombine.low %v11380_v31, %v11387_v12  ;;  %v12920_v40 = vsel %vm22921_vm14, %v12913_v45, %v12918_v0  ;;  %v25227_v33 = vpop.f32.mrf.mxu0  ;;  %v25240_v45 = vpop.f32.mrf.mxu1 }
 0x237   : > { %v12937_v4 = vshrl.u32 %v12223_v7, 16  ;;  %v12942_v62 = vshll.u32 %v25116_v28, 16  ;;  %v12928_v11 = vsel %vm22921_vm14, %v12921_v34, %v12926_v35  ;;  %v13563_v29 = vcombine.low %v12887_v16, %v12895_v44  ;;  %28189 = vst [vmem:[#allocation17_spill] sm:$0xff] %v25240_v45 }
 0x238   : > { %v12936_v6 = vsel %vm22921_vm14, %v12929_v49, %v12934_v60  ;;  %v13564_v54 = vcombine.low %v12903_v38, %v12911_v52  ;;  %22073 = vmatmul.mubr.bf16.gmra.mxu0 %v11388_v8  ;;  %v13565_v26 = vcombine.low %v12920_v40, %v12928_v11  ;;  %v12246_v56 = vcombine.high %v25116_v28, %v25116_v28  ;;  %v25238_v25 = vpop.f32.mrf.mxu0  ;;  %v20743_v34 = vld.sshfl [vmem:[%s22855_s26 + $0x58] sm:$0x33 pattern:$0x75316420] }
 0x239   : > { %v12944_v19 = vsel %vm22921_vm14, %v12937_v4, %v12942_v62  ;;  %v12247_v1 = vcombine.high %v25126_v21, %v25126_v21  ;;  %v13573_v37 = vrot.slane %v13563_v29, %v22877_v24  ;;  %v12255_v20 = vcombine.high %v20835_v32, %v20835_v32  ;;  %28188 = vst [vmem:[#allocation16_spill] sm:$0xff] %v25238_v25  ;;  %v20745_v29 = vld.sshfl [vmem:[%s22855_s26 + $0x60] sm:$0x33 pattern:$0x75316420] }
 0x23a   : > { %v13566_v43 = vcombine.low %v12936_v6, %v12944_v19  ;;  %v13580_v2 = vrot.slane %v13564_v54, %v22877_v24  ;;  %v13587_v5 = vrot.slane %v13565_v26, %v22877_v24  ;;  %v12262_v53 = vrot.slane %v20835_v32, %v22877_v24  ;;  %v25261_v54 = vpop.f32.mrf.mxu0  ;;  %v25263_v19 = vpop.f32.mrf.mxu1  ;;  %v20751_v45 = vld.sshfl [vmem:[%s22855_s26 + $0x78] sm:$0x33 pattern:$0x75316420] }
 0x23b   : > { %v25224_v7 = vcombine.high %v25144_v42, %v25144_v42  ;;  %v12945_v30 = vshrl.u32 %v25116_v28, 16  ;;  %v12269_v31 = vrot.slane %v12255_v20, %v22877_v24  ;;  %v12950_v58 = vshll.u32 %v25126_v21, 16 }
 0x23c   : > { %v13594_v22 = vrot.slane %v13566_v43, %v22877_v24  ;;  %v13595_v39 = vcombine.low %v13573_v37, %v13580_v2  ;;  %v12953_v47 = vshrl.u32 %v25126_v21, 16  ;;  %v12958_v23 = vshll.u32 %v12246_v56, 16 }
 0x23d   : > { %v12961_v16 = vshrl.u32 %v12246_v56, 16  ;;  %v12966_v14 = vshll.u32 %v12247_v1, 16  ;;  %v12952_v44 = vsel %vm22921_vm14, %v12945_v30, %v12950_v58  ;;  %v12969_v46 = vshrl.u32 %v12247_v1, 16 }
 0x23e   : > { %v13596_v55 = vcombine.low %v13587_v5, %v13594_v22  ;;  %v13603_v28 = vrot.slane %v13595_v39, %v22877_v24  ;;  %v12960_v12 = vsel %vm22921_vm14, %v12953_v47, %v12958_v23  ;;  %v12974_v38 = vshll.u32 %v12262_v53, 16  ;;  %v20744_v1 = vld.sshfl [vmem:[%s22855_s26 + $0x5c] sm:$0x1 pattern:$0x75316420]  ;;  %v25285_v23 = vpop.f32.mrf.mxu0 }
 0x23f   : > { %v12968_v21 = vsel %vm22921_vm14, %v12961_v16, %v12966_v14  ;;  %v12977_v0 = vshrl.u32 %v12262_v53, 16  ;;  %v12982_v35 = vshll.u32 %v12269_v31, 16  ;;  %v12986_v49 = vshrl.u32 %v25135_v15, 16  ;;  %v25287_v16 = vpop.f32.mrf.mxu1 }
 0x240   : > { %v13610_v52 = vrot.slane %v13596_v55, %v22877_v24  ;;  %v12991_v60 = vshll.u32 %v25144_v42, 16  ;;  %v12976_v8 = vsel %vm22921_vm14, %v12969_v46, %v12974_v38  ;;  %v12994_v40 = vshrl.u32 %v25144_v42, 16  ;;  %v20746_v22 = vld.sshfl [vmem:[%s22855_s26 + $0x64] sm:$0x33 pattern:$0x75316420] }
 0x241   : > { %v12999_v4 = vshll.u32 %v25153_v9, 16  ;;  %v13002_v62 = vshrl.u32 %v25153_v9, 16  ;;  %v12984_v11 = vsel %vm22921_vm14, %v12977_v0, %v12982_v35  ;;  %v13007_v15 = vshll.u32 %v25224_v7, 16 }
 0x242   : > { %v13611_v32 = vcombine.low %v13603_v28, %v13610_v52  ;;  %v12993_v6 = vsel %vm22921_vm14, %v12986_v49, %v12991_v60  ;;  %v13612_v26 = vcombine.low %v12952_v44, %v12960_v12  ;;  %v13613_v9 = vcombine.low %v12968_v21, %v12976_v8  ;;  %v20747_v38 = vld.sshfl [vmem:[%s22855_s26 + $0x68] sm:$0x1 pattern:$0x75316420]  ;;  %v25307_v52 = vpop.f32.mrf.mxu1 }
 0x243   : > { %v13001_v42 = vsel %vm22921_vm14, %v12994_v40, %v12999_v4  ;;  %v13614_v56 = vcombine.low %v12984_v11, %v12993_v6  ;;  %v13009_v43 = vsel %vm22921_vm14, %v13002_v62, %v13007_v15  ;;  %v10799_v37 = vcombine.high %v20743_v34, %v20743_v34 }
 0x244   : > { %22112 = vmatprep.mubr.bf16.mxu1 %v13611_v32  ;;  %v25271_v2 = vrot.slane %v20743_v34, %v22877_v24  ;;  %v13615_v20 = vcombine.low %v13001_v42, %v13009_v43  ;;  %v13622_v5 = vrot.slane %v13612_v26, %v22877_v24  ;;  %v13629_v53 = vrot.slane %v13613_v9, %v22877_v24  ;;  %v25305_v34 = vpop.f32.mrf.mxu0  ;;  %v25319_v32 = vld.sshfl [vmem:[%s22855_s26 + $0x6c] sm:$0x33 pattern:$0x75316420]  ;;  %v25326_v15 = vpop.f32.mrf.mxu1 }
 0x245   : > { %v13636_v30 = vrot.slane %v13614_v56, %v22877_v24  ;;  %v25278_v39 = vrot.slane %v10799_v37, %v22877_v24  ;;  %v10829_v58 = vrot.slane %v20744_v1, %v22877_v24  ;;  %v10837_v47 = vcombine.high %v20745_v29, %v20745_v29  ;;  %28191 = vst [vmem:[#allocation19_spill] sm:$0xff] %v25326_v15  ;;  %v20838_v56 = vld.sshfl [vmem:[%s22855_s26 + $0x5c] sm:$0x11 pattern:$0x75316420] }
 0x246   : > { %v25282_v31 = vcombine.high %v25271_v2, %v25271_v2  ;;  %v13643_v14 = vrot.slane %v13615_v20, %v22877_v24  ;;  %v13644_v55 = vcombine.low %v13622_v5, %v13629_v53  ;;  %v25291_v28 = vrot.slane %v20745_v29, %v22877_v24  ;;  %v25324_v6 = vpop.f32.mrf.mxu0 }
 0x247   : > { %v11389_v44 = vcombine.low %v25224_v7, %v25271_v2  ;;  %v25297_v46 = vcombine.high %v25278_v39, %v25278_v39  ;;  %v25300_v12 = vrot.slane %v10837_v47, %v22877_v24  ;;  %v10861_v0 = vcombine.high %v20746_v22, %v20746_v22  ;;  %28190 = vst [vmem:[#allocation18_spill] sm:$0xff] %v25324_v6 }
 0x248   : > { %v11390_v21 = vcombine.low %v25278_v39, %v25282_v31  ;;  %v13645_v35 = vcombine.low %v13636_v30, %v13643_v14  ;;  %v13652_v49 = vrot.slane %v13644_v55, %v22877_v24  ;;  %v25312_v8 = vrot.slane %v20746_v22, %v22877_v24 }
 0x249   : > { %v11399_v60 = vrot.slane %v11389_v44, %v22877_v24  ;;  %v11391_v40 = vcombine.low %v25297_v46, %v10829_v58  ;;  %v11392_v4 = vcombine.low %v25291_v28, %v25300_v12  ;;  %v25322_v11 = vrot.slane %v10861_v0, %v22877_v24  ;;  %v25347_v44 = vpop.f32.mrf.mxu0 }
 0x24a   : > { %v11406_v62 = vrot.slane %v11390_v21, %v22877_v24  ;;  %v13659_v29 = vrot.slane %v13645_v35, %v22877_v24  ;;  %v10891_v42 = vrot.slane %v20747_v38, %v22877_v24  ;;  %v25332_v26 = vrot.slane %v25319_v32, %v22877_v24  ;;  %v25349_v21 = vpop.f32.mrf.mxu1 }
 0x24b   : > { %v20779_v9 = vcombine.high %v25291_v28, %v25300_v12  ;;  %v11413_v1 = vrot.slane %v11391_v40, %v22877_v24  ;;  %v11420_v43 = vrot.slane %v11392_v4, %v22877_v24  ;;  %v11439_v20 = vcombine.low %v25312_v8, %v25322_v11 }
 0x24c   : > { %v11421_v37 = vcombine.low %v11399_v60, %v11406_v62  ;;  %v13660_v5 = vcombine.low %v13652_v49, %v13659_v29  ;;  %v20780_v53 = vcombine.high %v25312_v8, %v25322_v11  ;;  %v11441_v30 = vcombine.low %v10891_v42, %v25332_v26 }
 0x24d   : > { %v11448_v22 = vrot.slane %v20779_v9, %v22877_v24  ;;  %v11422_v58 = vcombine.low %v11413_v1, %v11420_v43  ;;  %v11455_v14 = vrot.slane %v11439_v20, %v22877_v24  ;;  %v12325_v55 = vcombine.high %v20838_v56, %v20838_v56 }
 0x24e   : > { %v11429_v47 = vrot.slane %v11421_v37, %v22877_v24  ;;  %22113 = vmatmul.mubr.bf16.gmra.mxu1 %v13660_v5  ;;  %v11462_v38 = vrot.slane %v20780_v53, %v22877_v24  ;;  %v11469_v0 = vrot.slane %v11441_v30, %v22877_v24  ;;  %v12332_v35 = vrot.slane %v20838_v56, %v22877_v24  ;;  %v25367_v5 = vpop.f32.mrf.mxu0  ;;  %v25369_v53 = vpop.f32.mrf.mxu1 }
 0x24f   : > { %v25356_v49 = vcombine.high %v25291_v28, %v25291_v28  ;;  %v11436_v60 = vrot.slane %v11422_v58, %v22877_v24  ;;  %v11470_v40 = vcombine.low %v11448_v22, %v11455_v14  ;;  %v12339_v4 = vrot.slane %v12325_v55, %v22877_v24 }
 0x250   : > { %v13010_v62 = vshrl.u32 %v25224_v7, 16  ;;  %v11471_v29 = vcombine.low %v11462_v38, %v11469_v0  ;;  %v13015_v42 = vshll.u32 %v25271_v2, 16  ;;  %v13018_v9 = vshrl.u32 %v25271_v2, 16  ;;  %v25381_v55 = vpop.f32.mrf.mxu0  ;;  %v25383_v38 = vpop.f32.mrf.mxu1 }
 0x251   : > { %v13023_v1 = vshll.u32 %v25278_v39, 16  ;;  %v11437_v43 = vcombine.low %v11429_v47, %v11436_v60  ;;  %v11478_v56 = vrot.slane %v11470_v40, %v22877_v24  ;;  %v13026_v37 = vshrl.u32 %v25278_v39, 16 }
 0x252   : > { %v13031_v20 = vshll.u32 %v25282_v31, 16  ;;  %v11485_v7 = vrot.slane %v11471_v29, %v22877_v24  ;;  %v13017_v30 = vsel %vm22921_vm14, %v13010_v62, %v13015_v42  ;;  %v13034_v22 = vshrl.u32 %v25282_v31, 16 }
 0x253   : > { %v13025_v2 = vsel %vm22921_vm14, %v13018_v9, %v13023_v1  ;;  %22076 = vmatprep.mubr.bf16.mxu0 %v11437_v43  ;;  %v13039_v58 = vshll.u32 %v25297_v46, 16  ;;  %v13042_v47 = vshrl.u32 %v25297_v46, 16  ;;  %v13047_v14 = vshll.u32 %v12332_v35, 16  ;;  %v25392_v9 = vpop.f32.mrf.mxu0  ;;  %v25394_v1 = vpop.f32.mrf.mxu1 }
 0x254   : > { %v13033_v39 = vsel %vm22921_vm14, %v13026_v37, %v13031_v20  ;;  %v11486_v0 = vcombine.low %v11478_v56, %v11485_v7  ;;  %v13050_v60 = vshrl.u32 %v12332_v35, 16  ;;  %v13055_v40 = vshll.u32 %v12339_v4, 16  ;;  %28192 = vst [vmem:[#allocation20_spill] sm:$0xff] %v25392_v9  ;;  %28193 = vst [vmem:[#allocation21_spill] sm:$0xff] %v25394_v1 }
 0x255   : > { %v13059_v62 = vshrl.u32 %v25291_v28, 16  ;;  %v13041_v31 = vsel %vm22921_vm14, %v13034_v22, %v13039_v58  ;;  %v13049_v29 = vsel %vm22921_vm14, %v13042_v47, %v13047_v14  ;;  %v13064_v42 = vshll.u32 %v25300_v12, 16  ;;  %v20841_v56 = vld.sshfl [vmem:[%s22855_s26 + $0x68] sm:$0x11 pattern:$0x75316420] }
 0x256   : > { %v13067_v46 = vshrl.u32 %v25300_v12, 16  ;;  %22077 = vmatmul.mubr.bf16.gmra.mxu0 %v11486_v0  ;;  %v13057_v35 = vsel %vm22921_vm14, %v13050_v60, %v13055_v40  ;;  %v13072_v28 = vshll.u32 %v25356_v49, 16  ;;  %v13661_v4 = vcombine.low %v13017_v30, %v13025_v2  ;;  %v25416_v40 = vpop.f32.mrf.mxu1 }
 0x257   : > { %v13662_v43 = vcombine.low %v13033_v39, %v13041_v31  ;;  %v13066_v37 = vsel %vm22921_vm14, %v13059_v62, %v13064_v42  ;;  %v13663_v20 = vcombine.low %v13049_v29, %v13057_v35  ;;  %v12363_v7 = vcombine.high %v25300_v12, %v25300_v12  ;;  %v25414_v12 = vpop.f32.mrf.mxu0 }
 0x258   : > { %v12386_v22 = vcombine.high %v25312_v8, %v25312_v8  ;;  %v13074_v58 = vsel %vm22921_vm14, %v13067_v46, %v13072_v28  ;;  %v13671_v47 = vrot.slane %v13661_v4, %v22877_v24  ;;  %v12387_v30 = vcombine.high %v25322_v11, %v25322_v11 }
 0x259   : > { %v13678_v14 = vrot.slane %v13662_v43, %v22877_v24  ;;  %v13664_v2 = vcombine.low %v13066_v37, %v13074_v58  ;;  %v13685_v39 = vrot.slane %v13663_v20, %v22877_v24  ;;  %v12395_v0 = vcombine.high %v20841_v56, %v20841_v56 }
 0x25a   : > { %v12402_v60 = vrot.slane %v20841_v56, %v22877_v24  ;;  %v12417_v31 = vcombine.high %v25319_v32, %v25319_v32  ;;  %v13075_v29 = vshrl.u32 %v25356_v49, 16  ;;  %v13080_v42 = vshll.u32 %v12363_v7, 16 }
 0x25b   : > { %v13693_v62 = vcombine.low %v13671_v47, %v13678_v14  ;;  %v13692_v46 = vrot.slane %v13664_v2, %v22877_v24  ;;  %v12409_v35 = vrot.slane %v12395_v0, %v22877_v24  ;;  %v13083_v28 = vshrl.u32 %v12363_v7, 16  ;;  %v25435_v47 = vpop.f32.mrf.mxu0  ;;  %v25437_v14 = vpop.f32.mrf.mxu1 }
 0x25c   : > { %v13088_v4 = vshll.u32 %v25312_v8, 16  ;;  %v25426_v56 = vrot.slane %v12417_v31, %v22877_v24  ;;  %v13082_v37 = vsel %vm22921_vm14, %v13075_v29, %v13080_v42  ;;  %v13091_v32 = vshrl.u32 %v25312_v8, 16 }
 0x25d   : > { %v13701_v43 = vrot.slane %v13693_v62, %v22877_v24  ;;  %v13694_v20 = vcombine.low %v13685_v39, %v13692_v46  ;;  %v13096_v58 = vshll.u32 %v25322_v11, 16  ;;  %v13099_v7 = vshrl.u32 %v25322_v11, 16  ;;  %v25442_v46 = vpop.f32.mrf.mxu0  ;;  %v25444_v11 = vpop.f32.mrf.mxu1 }
 0x25e   : > { %v13090_v49 = vsel %vm22921_vm14, %v13083_v28, %v13088_v4  ;;  %v13104_v2 = vshll.u32 %v12386_v22, 16  ;;  %v13107_v0 = vshrl.u32 %v12386_v22, 16  ;;  %v13112_v62 = vshll.u32 %v12387_v30, 16 }
 0x25f   : > { %v13115_v31 = vshrl.u32 %v12387_v30, 16  ;;  %v13708_v8 = vrot.slane %v13694_v20, %v22877_v24  ;;  %v13098_v39 = vsel %vm22921_vm14, %v13091_v32, %v13096_v58  ;;  %v13120_v29 = vshll.u32 %v12402_v60, 16  ;;  %v20749_v20 = vld.sshfl [vmem:[%s22855_s26 + $0x70] sm:$0x33 pattern:$0x75316420]  ;;  %v25456_v25 = vpop.f32.mrf.mxu0  ;;  %v25458_v51 = vpop.f32.mrf.mxu1 }
 0x260   : > { %v13123_v42 = vshrl.u32 %v12402_v60, 16  ;;  %v13106_v28 = vsel %vm22921_vm14, %v13099_v7, %v13104_v2  ;;  %v13114_v22 = vsel %vm22921_vm14, %v13107_v0, %v13112_v62  ;;  %v13128_v30 = vshll.u32 %v12409_v35, 16  ;;  %28194 = vst [vmem:[#allocation22_spill] sm:$0xff] %v25456_v25  ;;  %28195 = vst [vmem:[#allocation23_spill] sm:$0xff] %v25458_v51 }
 0x261   : > { %v13132_v4 = vshrl.u32 %v25332_v26, 16  ;;  %v13709_v13 = vcombine.low %v13701_v43, %v13708_v8  ;;  %v13122_v32 = vsel %vm22921_vm14, %v13115_v31, %v13120_v29  ;;  %v13137_v60 = vshll.u32 %v25426_v56, 16  ;;  %v20750_v0 = vld.sshfl [vmem:[%s22855_s26 + $0x74] sm:$0x1 pattern:$0x75316420]  ;;  %v25474_v8 = vpop.f32.mrf.mxu0 }
 0x262   : > { %v13710_v58 = vcombine.low %v13082_v37, %v13090_v49  ;;  %v13130_v7 = vsel %vm22921_vm14, %v13123_v42, %v13128_v30  ;;  %v13711_v2 = vcombine.low %v13098_v39, %v13106_v28  ;;  %v13712_v35 = vcombine.low %v13114_v22, %v13122_v32  ;;  %v25476_v39 = vpop.f32.mrf.mxu1 }
 0x263   : > { %v25465_v43 = vcombine.high %v25332_v26, %v25332_v26  ;;  %22116 = vmatprep.mubr.bf16.mxu1 %v13709_v13  ;;  %v13139_v62 = vsel %vm22921_vm14, %v13132_v4, %v13137_v60  ;;  %v25472_v49 = vcombine.high %v25426_v56, %v25426_v56  ;;  %v10923_v31 = vcombine.high %v20749_v20, %v20749_v20  ;;  %v25489_v32 = vpop.f32.mrf.mxu0 }
 0x264   : > { %v13720_v37 = vrot.slane %v13710_v58, %v22877_v24  ;;  %v13713_v29 = vcombine.low %v13130_v7, %v13139_v62  ;;  %v13727_v26 = vrot.slane %v13711_v2, %v22877_v24  ;;  %v13734_v13 = vrot.slane %v13712_v35, %v22877_v24  ;;  %v25491_v60 = vpop.f32.mrf.mxu1  ;;  %v20752_v35 = vld.sshfl [vmem:[%s22855_s26 + $0x7c] sm:$0x33 pattern:$0x75316420] }
 0x265   : > { %v25481_v42 = vrot.slane %v20749_v20, %v22877_v24  ;;  %v25484_v28 = vrot.slane %v10923_v31, %v22877_v24  ;;  %v10953_v22 = vrot.slane %v20750_v0, %v22877_v24  ;;  %v11487_v30 = vcombine.low %v25426_v56, %v25465_v43  ;;  %28196 = vst [vmem:[#allocation24_spill] sm:$0xff] %v25491_v60 }
 0x266   : > { %v10961_v4 = vcombine.high %v20751_v45, %v20751_v45  ;;  %v13741_v58 = vrot.slane %v13713_v29, %v22877_v24  ;;  %v13742_v7 = vcombine.low %v13720_v37, %v13727_v26  ;;  %v25507_v31 = vrot.slane %v20751_v45, %v22877_v24  ;;  %v21847_v29 = vpop.f32.mrf.mxu0  ;;  %v21887_v26 = vpop.f32.mrf.mxu1 }
 0x267   : > { %v25496_v20 = vcombine.high %v25481_v42, %v25481_v42  ;;  %v11488_v2 = vcombine.low %v25472_v49, %v25481_v42  ;;  %v25503_v0 = vcombine.high %v25484_v28, %v25484_v28  ;;  %v11497_v62 = vrot.slane %v11487_v30, %v22877_v24 }
 0x268   : > { %v25510_v37 = vrot.slane %v10961_v4, %v22877_v24  ;;  %v13743_v57 = vcombine.low %v13734_v13, %v13741_v58  ;;  %v13750_v50 = vrot.slane %v13742_v7, %v22877_v24  ;;  %v10985_v63 = vcombine.high %v20752_v35, %v20752_v35  ;;  %v20844_v4 = vld.sshfl [vmem:[%s22855_s26 + $0x74] sm:$0x11 pattern:$0x75316420]  ;;  %v25523_v29 = vpop.f32.mrf.mxu0  ;;  %v25525_v13 = vpop.f32.mrf.mxu1 }
 0x269   : > { %v11489_v17 = vcombine.low %v25484_v28, %v25496_v20  ;;  %v11504_v36 = vrot.slane %v11488_v2, %v22877_v24  ;;  %v11490_v3 = vcombine.low %v25503_v0, %v10953_v22  ;;  %v25518_v30 = vrot.slane %v20752_v35, %v22877_v24  ;;  %28197 = vst [vmem:[#allocation25_spill] sm:$0xff] %v25523_v29 }
 0x26a   : > { %v11536_v45 = vcombine.low %v25507_v31, %v25510_v37  ;;  %28198 = vst [vmem:[#allocation26_spill] sm:$0xff] %v25525_v13  ;;  %v13757_v58 = vrot.slane %v13743_v57, %v22877_v24  ;;  %v20781_v22 = vcombine.high %v25507_v31, %v25510_v37  ;;  %v25533_v35 = vrot.slane %v10985_v63, %v22877_v24  ;;  %v25536_v48 = vpop.f32.mrf.mxu0  ;;  %v25538_v61 = vpop.f32.mrf.mxu1 }
 0x26b   : > { %v11511_v7 = vrot.slane %v11489_v17, %v22877_v24  ;;  %v11519_v26 = vcombine.low %v11497_v62, %v11504_v36  ;;  %v11518_v2 = vrot.slane %v11490_v3, %v22877_v24  ;;  %28199 = vst [vmem:[#allocation27_spill] sm:$0xff] %v25536_v48  ;;  %28200 = vst [vmem:[#allocation28_spill] sm:$0xff] %v25538_v61  ;;  %v13148_v61 = vshrl.u32 %v25465_v43, 16 }
 0x26c   : > { %v11546_v10 = vrot.slane %v11536_v45, %v22877_v24  ;;  %v13758_v59 = vcombine.low %v13750_v50, %v13757_v58  ;;  %v11553_v17 = vrot.slane %v20781_v22, %v22877_v24  ;;  %v12465_v36 = vcombine.high %v20844_v4, %v20844_v4  ;;  %v25549_v45 = vpop.f32.mrf.mxu0  ;;  %v25551_v48 = vpop.f32.mrf.mxu1 }
 0x26d   : > { %v11527_v57 = vrot.slane %v11519_v26, %v22877_v24  ;;  %v11520_v62 = vcombine.low %v11511_v7, %v11518_v2  ;;  %v11538_v27 = vcombine.low %v25518_v30, %v25533_v35  ;;  %v20782_v63 = vcombine.high %v25518_v30, %v25533_v35  ;;  %28201 = vst [vmem:[#allocation29_spill] sm:$0xff] %v25549_v45 }
 0x26e   : > { %v25547_v3 = vrot.slane %v20844_v4, %v22877_v24  ;;  %28202 = vst [vmem:[#allocation30_spill] sm:$0xff] %v25551_v48  ;;  %22117 = vmatmul.mubr.bf16.gmra.mxu1 %v13758_v59  ;;  %v11568_v50 = vcombine.low %v11546_v10, %v11553_v17  ;;  %v25554_v58 = vrot.slane %v12465_v36, %v22877_v24  ;;  %v13140_v7 = vshrl.u32 %v25426_v56, 16  ;;  %v25562_v45 = vpop.f32.mrf.mxu0  ;;  %v25564_v48 = vpop.f32.mrf.mxu1 }
 0x26f   : > { %v13145_v26 = vshll.u32 %v25465_v43, 16  ;;  %v11534_v22 = vrot.slane %v11520_v62, %v22877_v24  ;;  %v11560_v2 = vrot.slane %v11538_v27, %v22877_v24  ;;  %v11567_v4 = vrot.slane %v20782_v63, %v22877_v24  ;;  %28203 = vst [vmem:[#allocation31_spill] sm:$0xff] %v25562_v45  ;;  %28204 = vst [vmem:[#allocation32_spill] sm:$0xff] %v25564_v48 }
 0x270   : > { %v11576_v59 = vrot.slane %v11568_v50, %v22877_v24  ;;  %v13153_v56 = vshll.u32 %v25472_v49, 16  ;;  %v13156_v17 = vshrl.u32 %v25472_v49, 16  ;;  %v13161_v27 = vshll.u32 %v25481_v42, 16  ;;  %v25573_v43 = vpop.f32.mrf.mxu0  ;;  %v25575_v45 = vpop.f32.mrf.mxu1 }
 0x271   : > { %v13147_v10 = vsel %vm22921_vm14, %v13140_v7, %v13145_v26  ;;  %v11535_v36 = vcombine.low %v11527_v57, %v11534_v22  ;;  %v11569_v62 = vcombine.low %v11560_v2, %v11567_v4  ;;  %v13164_v63 = vshrl.u32 %v25481_v42, 16  ;;  %28205 = vst [vmem:[#allocation33_spill] sm:$0xff] %v25573_v43  ;;  %28206 = vst [vmem:[#allocation34_spill] sm:$0xff] %v25575_v45 }
 0x272   : > { %v13155_v50 = vsel %vm22921_vm14, %v13148_v61, %v13153_v56  ;;  %v13169_v48 = vshll.u32 %v25484_v28, 16  ;;  %v13172_v7 = vshrl.u32 %v25484_v28, 16  ;;  %v13177_v26 = vshll.u32 %v25496_v20, 16  ;;  %v25587_v2 = vpop.f32.mrf.mxu0  ;;  %v25589_v61 = vpop.f32.mrf.mxu1 }
 0x273   : > { %22080 = vmatprep.mubr.bf16.mxu0 %v11535_v36  ;;  %v11583_v49 = vrot.slane %v11569_v62, %v22877_v24  ;;  %v13163_v57 = vsel %vm22921_vm14, %v13156_v17, %v13161_v27  ;;  %v13180_v42 = vshrl.u32 %v25496_v20, 16  ;;  %v13185_v22 = vshll.u32 %v25503_v0, 16  ;;  %28207 = vst [vmem:[#allocation35_spill] sm:$0xff] %v25587_v2  ;;  %28208 = vst [vmem:[#allocation36_spill] sm:$0xff] %v25589_v61 }
 0x274   : > { %v13171_v28 = vsel %vm22921_vm14, %v13164_v63, %v13169_v48  ;;  %v13179_v4 = vsel %vm22921_vm14, %v13172_v7, %v13177_v26  ;;  %v13188_v56 = vshrl.u32 %v25503_v0, 16  ;;  %v13193_v36 = vshll.u32 %v25547_v3, 16  ;;  %v25601_v45 = vpop.f32.mrf.mxu0  ;;  %v25603_v61 = vpop.f32.mrf.mxu1  ;;  %v25608_v26 = vld.sshfl [vmem:[%s22855_s26 + $0x80] sm:$0x11 pattern:$0x75316420] }
 0x275   : > { %v11584_v17 = vcombine.low %v11576_v59, %v11583_v49  ;;  %v13187_v20 = vsel %vm22921_vm14, %v13180_v42, %v13185_v22  ;;  %v13196_v62 = vshrl.u32 %v25547_v3, 16  ;;  %v13201_v27 = vshll.u32 %v25554_v58, 16  ;;  %28209 = vst [vmem:[#allocation37_spill] sm:$0xff] %v25601_v45  ;;  %28210 = vst [vmem:[#allocation38_spill] sm:$0xff] %v25603_v61 }
 0x276   : > { %v13195_v48 = vsel %vm22921_vm14, %v13188_v56, %v13193_v36  ;;  %v13759_v63 = vcombine.low %v13147_v10, %v13155_v50  ;;  %v13760_v7 = vcombine.low %v13163_v57, %v13171_v28  ;;  %v13761_v0 = vcombine.low %v13179_v4, %v13187_v20  ;;  %v25618_v61 = vpop.f32.mrf.mxu0  ;;  %v25620_v10 = vpop.f32.mrf.mxu1 }
 0x277   : > { %22081 = vmatmul.mubr.bf16.gmra.mxu0 %v11584_v17  ;;  %v13203_v59 = vsel %vm22921_vm14, %v13196_v62, %v13201_v27  ;;  %v12502_v49 = vcombine.high %v25507_v31, %v25507_v31  ;;  %v12503_v42 = vcombine.high %v25510_v37, %v25510_v37  ;;  %v12526_v22 = vcombine.high %v25518_v30, %v25518_v30 }
 0x278   : > { %28211 = vst [vmem:[#allocation39_spill] sm:$0xff] %v25620_v10  ;;  %v13762_v50 = vcombine.low %v13195_v48, %v13203_v59  ;;  %v13769_v57 = vrot.slane %v13759_v63, %v22877_v24  ;;  %v13776_v28 = vrot.slane %v13760_v7, %v22877_v24  ;;  %v13783_v4 = vrot.slane %v13761_v0, %v22877_v24  ;;  %v25633_v62 = vpop.f32.mrf.mxu0  ;;  %v25635_v27 = vpop.f32.mrf.mxu1 }
 0x279   : > { %v12527_v56 = vcombine.high %v25533_v35, %v25533_v35  ;;  %v25629_v36 = vrot.slane %v25608_v26, %v22877_v24  ;;  %v13205_v17 = vshrl.u32 %v25507_v31, 16  ;;  %v13210_v20 = vshll.u32 %v25510_v37, 16  ;;  %28212 = vst [vmem:[#allocation40_spill] sm:$0xff] %v25633_v62  ;;  %28213 = vst [vmem:[#allocation41_spill] sm:$0xff] %v25635_v27 }
 0x27a   : > { %v13790_v48 = vrot.slane %v13762_v50, %v22877_v24  ;;  %v13791_v63 = vcombine.low %v13769_v57, %v13776_v28  ;;  %v13213_v7 = vshrl.u32 %v25510_v37, 16  ;;  %v13218_v0 = vshll.u32 %v12502_v49, 16  ;;  %v25641_v31 = vpop.f32.mrf.mxu0  ;;  %v25643_v51 = vpop.f32.mrf.mxu1 }
 0x27b   : > { %v13212_v59 = vsel %vm22921_vm14, %v13205_v17, %v13210_v20  ;;  %v13221_v45 = vshrl.u32 %v12502_v49, 16  ;;  %v13226_v2 = vshll.u32 %v12503_v42, 16  ;;  %v13229_v43 = vshrl.u32 %v12503_v42, 16  ;;  %28214 = vst [vmem:[#allocation42_spill] sm:$0xff] %v25643_v51 }
 0x27c   : > { %v13792_v62 = vcombine.low %v13783_v4, %v13790_v48  ;;  %v13799_v27 = vrot.slane %v13791_v63, %v22877_v24  ;;  %v13220_v50 = vsel %vm22921_vm14, %v13213_v7, %v13218_v0  ;;  %v13234_v37 = vshll.u32 %v25518_v30, 16  ;;  %v20754_v17 = vld.sshfl [vmem:[%s22855_s26 + $0x84] sm:$0x33 pattern:$0x75316420]  ;;  %v25655_v20 = vpop.f32.mrf.mxu0  ;;  %v25657_v4 = vpop.f32.mrf.mxu1 }
 0x27d   : > { %v13228_v57 = vsel %vm22921_vm14, %v13221_v45, %v13226_v2  ;;  %v13237_v49 = vshrl.u32 %v25518_v30, 16  ;;  %v13242_v42 = vshll.u32 %v25533_v35, 16  ;;  %v13245_v28 = vshrl.u32 %v25533_v35, 16  ;;  %28215 = vst [vmem:[#allocation43_spill] sm:$0xff] %v25657_v4 }
 0x27e   : > { %v13806_v48 = vrot.slane %v13792_v62, %v22877_v24  ;;  %v13236_v63 = vsel %vm22921_vm14, %v13229_v43, %v13234_v37  ;;  %v13250_v7 = vshll.u32 %v12526_v22, 16  ;;  %v13253_v0 = vshrl.u32 %v12526_v22, 16  ;;  %v20753_v45 = vld.sshfl [vmem:[%s22855_s26 + $0x80] sm:$0x1 pattern:$0x75316420]  ;;  %v25666_v1 = vpop.f32.mrf.mxu0  ;;  %v25668_v9 = vpop.f32.mrf.mxu1 }
 0x27f   : > { %v13244_v30 = vsel %vm22921_vm14, %v13237_v49, %v13242_v42  ;;  %v13258_v2 = vshll.u32 %v12527_v56, 16  ;;  %v13261_v35 = vshrl.u32 %v12527_v56, 16  ;;  %v13266_v25 = vshll.u32 %v25629_v36, 16  ;;  %28216 = vst [vmem:[#allocation44_spill] sm:$0xff] %v25668_v9 }
 0x280   : > { %v13807_v15 = vcombine.low %v13799_v27, %v13806_v48  ;;  %v13252_v62 = vsel %vm22921_vm14, %v13245_v28, %v13250_v7  ;;  %v13808_v43 = vcombine.low %v13212_v59, %v13220_v50  ;;  %v13809_v37 = vcombine.low %v13228_v57, %v13236_v63  ;;  %v20755_v22 = vld.sshfl [vmem:[%s22855_s26 + $0x88] sm:$0x33 pattern:$0x75316420]  ;;  %v25679_v51 = vpop.f32.mrf.mxu0  ;;  %v25681_v9 = vpop.f32.mrf.mxu1 }
 0x281   : > { %v13260_v6 = vsel %vm22921_vm14, %v13253_v0, %v13258_v2  ;;  %v13268_v49 = vsel %vm22921_vm14, %v13261_v35, %v13266_v25  ;;  %v13810_v56 = vcombine.low %v13244_v30, %v13252_v62  ;;  %v11015_v42 = vrot.slane %v20753_v45, %v22877_v24  ;;  %v20756_v4 = vld.sshfl [vmem:[%s22855_s26 + $0x8c] sm:$0x1 pattern:$0x75316420]  ;;  %28217 = vst [vmem:[#allocation45_spill] sm:$0xff] %v25679_v51 }
 0x282   : > { %28218 = vst [vmem:[#allocation46_spill] sm:$0xff] %v25681_v9  ;;  %22120 = vmatprep.mubr.bf16.mxu1 %v13807_v15  ;;  %v13811_v27 = vcombine.low %v13260_v6, %v13268_v49  ;;  %v13818_v59 = vrot.slane %v13808_v43, %v22877_v24  ;;  %v13825_v50 = vrot.slane %v13809_v37, %v22877_v24  ;;  %v25690_v7 = vpop.f32.mrf.mxu0  ;;  %v25692_v0 = vpop.f32.mrf.mxu1 }
 0x283   : > { %v11023_v57 = vcombine.high %v20754_v17, %v20754_v17  ;;  %v13832_v28 = vrot.slane %v13810_v56, %v22877_v24  ;;  %v11030_v48 = vrot.slane %v20754_v17, %v22877_v24  ;;  %v11047_v25 = vcombine.high %v20755_v22, %v20755_v22  ;;  %28219 = vst [vmem:[#allocation47_spill] sm:$0xff] %v25692_v0 }
 0x284   : > { %v25688_v63 = vrot.slane %v20755_v22, %v22877_v24  ;;  %v13839_v15 = vrot.slane %v13811_v27, %v22877_v24  ;;  %v13840_v6 = vcombine.low %v13818_v59, %v13825_v50  ;;  %v11077_v30 = vrot.slane %v20756_v4, %v22877_v24  ;;  %v25704_v43 = vpop.f32.mrf.mxu0  ;;  %v25706_v37 = vpop.f32.mrf.mxu1 }
 0x285   : > { %v11037_v45 = vrot.slane %v11023_v57, %v22877_v24  ;;  %v11038_v2 = vcombine.high %v11030_v48, %v11030_v48  ;;  %v25698_v35 = vrot.slane %v11047_v25, %v22877_v24  ;;  %v11585_v62 = vcombine.low %v11015_v42, %v11030_v48  ;;  %28220 = vst [vmem:[#allocation48_spill] sm:$0xff] %v25706_v37 }
 0x286   : > { %v25702_v17 = vcombine.high %v25688_v63, %v25688_v63  ;;  %v13841_v22 = vcombine.low %v13832_v28, %v13839_v15  ;;  %v13848_v49 = vrot.slane %v13840_v6, %v22877_v24  ;;  %v12535_v4 = vcombine.high %v25608_v26, %v25608_v26  ;;  %v25718_v57 = vpop.f32.mrf.mxu0  ;;  %v25720_v25 = vpop.f32.mrf.mxu1 }
 0x287   : > { %v11039_v56 = vcombine.high %v11037_v45, %v11037_v45  ;;  %v11586_v27 = vcombine.low %v11037_v45, %v11038_v2  ;;  %v11595_v50 = vrot.slane %v11585_v62, %v22877_v24  ;;  %v25716_v42 = vcombine.high %v25698_v35, %v25698_v35  ;;  %28221 = vst [vmem:[#allocation49_spill] sm:$0xff] %v25718_v57 }
 0x288   : > { %v11588_v59 = vcombine.low %v25698_v35, %v25702_v17  ;;  %28222 = vst [vmem:[#allocation50_spill] sm:$0xff] %v25720_v25  ;;  %v13855_v28 = vrot.slane %v13841_v22, %v22877_v24  ;;  %v25725_v26 = vrot.slane %v12535_v4, %v22877_v24  ;;  %v13269_v6 = vshrl.u32 %v25629_v36, 16  ;;  %v25731_v0 = vpop.f32.mrf.mxu0  ;;  %v25733_v10 = vpop.f32.mrf.mxu1 }
 0x289   : > { %v11587_v15 = vcombine.low %v11039_v56, %v25688_v63  ;;  %v11602_v9 = vrot.slane %v11586_v27, %v22877_v24  ;;  %v11634_v51 = vcombine.low %v25716_v42, %v11077_v30  ;;  %v13278_v37 = vshrl.u32 %v11030_v48, 16  ;;  %28223 = vst [vmem:[#allocation51_spill] sm:$0xff] %v25731_v0  ;;  %28224 = vst [vmem:[#allocation52_spill] sm:$0xff] %v25733_v10 }
 0x28a   : > { %v11616_v62 = vrot.slane %v11588_v59, %v22877_v24  ;;  %v13856_v25 = vcombine.low %v13848_v49, %v13855_v28  ;;  %v13274_v13 = vshll.u32 %v25725_v26, 16  ;;  %v13283_v4 = vshll.u32 %v11037_v45, 16  ;;  %v25738_v59 = vpop.f32.mrf.mxu0  ;;  %v25740_v30 = vpop.f32.mrf.mxu1 }
 0x28b   : > { %v11609_v22 = vrot.slane %v11587_v15, %v22877_v24  ;;  %v11617_v29 = vcombine.low %v11595_v50, %v11602_v9  ;;  %v11641_v57 = vrot.slane %v11634_v51, %v22877_v24  ;;  %v13286_v27 = vshrl.u32 %v11037_v45, 16  ;;  %28225 = vst [vmem:[#allocation53_spill] sm:$0xff] %v25738_v59  ;;  %28226 = vst [vmem:[#allocation54_spill] sm:$0xff] %v25740_v30 }
 0x28c   : > { %v13291_v60 = vshll.u32 %v11038_v2, 16  ;;  %22121 = vmatmul.mubr.bf16.gmra.mxu1 %v13856_v25  ;;  %v13276_v49 = vsel %vm22921_vm14, %v13269_v6, %v13274_v13  ;;  %v13285_v28 = vsel %vm22921_vm14, %v13278_v37, %v13283_v4  ;;  %v13294_v15 = vshrl.u32 %v11038_v2, 16  ;;  %v20850_v50 = vld.sshfl [vmem:[%s22855_s26 + $0x8c] sm:$0x11 pattern:$0x75316420]  ;;  %v25751_v0 = vpop.f32.mrf.mxu0  ;;  %v25753_v25 = vpop.f32.mrf.mxu1 }
 0x28d   : > { %v11618_v48 = vcombine.low %v11609_v22, %v11616_v62  ;;  %v11625_v10 = vrot.slane %v11617_v29, %v22877_v24  ;;  %v11648_v9 = vrot.slane %v11641_v57, %v22877_v24  ;;  %v13299_v45 = vshll.u32 %v11039_v56, 16  ;;  %28227 = vst [vmem:[#allocation55_spill] sm:$0xff] %v25751_v0  ;;  %28228 = vst [vmem:[#allocation56_spill] sm:$0xff] %v25753_v25 }
 0x28e   : > { %v13293_v51 = vsel %vm22921_vm14, %v13286_v27, %v13291_v60  ;;  %v13302_v13 = vshrl.u32 %v11039_v56, 16  ;;  %v13307_v6 = vshll.u32 %v25688_v63, 16  ;;  %v13310_v2 = vshrl.u32 %v25688_v63, 16  ;;  %v25763_v22 = vpop.f32.mrf.mxu0  ;;  %v25765_v4 = vpop.f32.mrf.mxu1 }
 0x28f   : > { %v11632_v62 = vrot.slane %v11618_v48, %v22877_v24  ;;  %v13301_v29 = vsel %vm22921_vm14, %v13294_v15, %v13299_v45  ;;  %v13315_v37 = vshll.u32 %v25698_v35, 16  ;;  %v13318_v60 = vshrl.u32 %v25698_v35, 16  ;;  %28229 = vst [vmem:[#allocation57_spill] sm:$0xff] %v25763_v22  ;;  %28230 = vst [vmem:[#allocation58_spill] sm:$0xff] %v25765_v4 }
 0x290   : > { %v13323_v57 = vshll.u32 %v25702_v17, 16  ;;  %v13309_v56 = vsel %vm22921_vm14, %v13302_v13, %v13307_v6  ;;  %v13326_v48 = vshrl.u32 %v25702_v17, 16  ;;  %v13331_v25 = vshll.u32 %v25716_v42, 16  ;;  %v25775_v0 = vpop.f32.mrf.mxu0  ;;  %v25777_v4 = vpop.f32.mrf.mxu1 }
 0x291   : > { %v11633_v27 = vcombine.low %v11625_v10, %v11632_v62  ;;  %v13317_v15 = vsel %vm22921_vm14, %v13310_v2, %v13315_v37  ;;  %v13857_v30 = vcombine.low %v13276_v49, %v13285_v28  ;;  %v13858_v22 = vcombine.low %v13293_v51, %v13301_v29  ;;  %28231 = vst [vmem:[#allocation59_spill] sm:$0xff] %v25775_v0  ;;  %v20995_v6 = vld.sshfl [vmem:[%s22855_s26 + $0x18] sm:$0x32 pattern:$0x75316420] }
 0x292   : > { %v13325_v45 = vsel %vm22921_vm14, %v13318_v60, %v13323_v57  ;;  %28232 = vst [vmem:[#allocation60_spill] sm:$0xff] %v25777_v4  ;;  %v13333_v10 = vsel %vm22921_vm14, %v13326_v48, %v13331_v25  ;;  %v13859_v17 = vcombine.low %v13309_v56, %v13317_v15  ;;  %v12605_v62 = vcombine.high %v20850_v50, %v20850_v50  ;;  %v20996_v29 = vld.sshfl [vmem:[%s22855_s26 + $0x1c] sm:$0x33 pattern:$0x75316420]  ;;  %v25789_v37 = vpop.f32.mrf.mxu0  ;;  %v25791_v60 = vpop.f32.mrf.mxu1 }
 0x293   : > { %22084 = vmatprep.mubr.bf16.mxu0 %v11633_v27  ;;  %v25782_v13 = vrot.slane %v20850_v50, %v22877_v24  ;;  %v13860_v2 = vcombine.low %v13325_v45, %v13333_v10  ;;  %v13867_v49 = vrot.slane %v13857_v30, %v22877_v24  ;;  %v13874_v28 = vrot.slane %v13858_v22, %v22877_v24  ;;  %v20997_v22 = vld.sshfl [vmem:[%s22855_s26 + $0x20] sm:$0x11 pattern:$0x75316420] }
 0x294   : > { %22085 = vmatmul.mubr.bf16.gmra.mxu0 %v11648_v9  ;;  %v13334_v51 = vshrl.u32 %v25716_v42, 16  ;;  %28233 = vst [vmem:[#allocation61_spill] sm:$0xff] %v25789_v37  ;;  %28234 = vst [vmem:[#allocation62_spill] sm:$0xff] %v25791_v60  ;;  %v13881_v25 = vrot.slane %v13859_v17, %v22877_v24  ;;  %v25795_v50 = vrot.slane %v12605_v62, %v22877_v24  ;;  %v25802_v48 = vpop.f32.mrf.mxu0  ;;  %v25804_v15 = vpop.f32.mrf.mxu1 }
 0x295   : > { %v13339_v57 = vshll.u32 %v25782_v13, 16  ;;  %v13342_v9 = vshrl.u32 %v25782_v13, 16  ;;  %v13888_v30 = vrot.slane %v13860_v2, %v22877_v24  ;;  %v13889_v27 = vcombine.low %v13867_v49, %v13874_v28  ;;  %28235 = vst [vmem:[#allocation63_spill] sm:$0xff] %v25802_v48  ;;  %28236 = vst [vmem:[#allocation64_spill] sm:$0xff] %v25804_v15 }
 0x296   : > { %v14199_v56 = vcombine.high %v20995_v6, %v20995_v6  ;;  %v14206_v42 = vrot.slane %v20995_v6, %v22877_v24  ;;  %v13347_v10 = vshll.u32 %v25795_v50, 16  ;;  %v14223_v17 = vcombine.high %v20996_v29, %v20996_v29  ;;  %v21927_v6 = vpop.f32.mrf.mxu0  ;;  %v21967_v0 = vpop.f32.mrf.mxu1 }
 0x297   : > { %v13341_v45 = vsel %vm22921_vm14, %v13334_v51, %v13339_v57  ;;  %v14230_v62 = vrot.slane %v20996_v29, %v22877_v24  ;;  %v13890_v4 = vcombine.low %v13881_v25, %v13888_v30  ;;  %v13897_v2 = vrot.slane %v13889_v27, %v22877_v24  ;;  %v20998_v30 = vld.sshfl [vmem:[%s22855_s26 + $0x24] sm:$0x32 pattern:$0x75316420] }
 0x298   : > { %v14213_v49 = vrot.slane %v14199_v56, %v22877_v24  ;;  %v14214_v28 = vcombine.high %v14206_v42, %v14206_v42  ;;  %v13349_v15 = vsel %vm22921_vm14, %v13342_v9, %v13347_v10  ;;  %v14237_v51 = vrot.slane %v14223_v17, %v22877_v24  ;;  %v25818_v27 = vpop.f32.mrf.mxu0  ;;  %v25820_v56 = vpop.f32.mrf.mxu1 }
 0x299   : > { %v14238_v57 = vcombine.high %v14230_v62, %v14230_v62  ;;  %v14247_v60 = vcombine.high %v20997_v22, %v20997_v22  ;;  %v13904_v48 = vrot.slane %v13890_v4, %v22877_v24  ;;  %v13906_v37 = vcombine.low %v13341_v45, %v13349_v15  ;;  %28237 = vst [vmem:[#allocation65_spill] sm:$0xff] %v25818_v27 }
 0x29a   : > { %v14215_v29 = vcombine.high %v14213_v49, %v14213_v49  ;;  %v14254_v25 = vrot.slane %v20997_v22, %v22877_v24  ;;  %28238 = vst [vmem:[#allocation66_spill] sm:$0xff] %v25820_v56  ;;  %v14239_v42 = vcombine.high %v14237_v51, %v14237_v51  ;;  %v14909_v0 = vcombine.low %v14213_v49, %v14214_v28  ;;  %v25825_v15 = vpop.f32.mrf.mxu0  ;;  %v25827_v45 = vpop.f32.mrf.mxu1 }
 0x29b   : > { %v14911_v6 = vcombine.low %v14237_v51, %v14238_v57  ;;  %v13905_v9 = vcombine.low %v13897_v2, %v13904_v48  ;;  %v13913_v10 = vrot.slane %v13906_v37, %v22877_v24  ;;  %v14261_v17 = vrot.slane %v14247_v60, %v22877_v24  ;;  %28239 = vst [vmem:[#allocation67_spill] sm:$0xff] %v25825_v15 }
 0x29c   : > { %v14910_v4 = vcombine.low %v14215_v29, %v14230_v62  ;;  %28240 = vst [vmem:[#allocation68_spill] sm:$0xff] %v25827_v45  ;;  %v14912_v22 = vcombine.low %v14239_v42, %v14254_v25  ;;  %v14919_v27 = vrot.slane %v14909_v0, %v22877_v24  ;;  %v14269_v59 = vcombine.high %v20998_v30, %v20998_v30  ;;  %v21000_v62 = vld.sshfl [vmem:[%s22855_s26 + $0x2c] sm:$0x11 pattern:$0x75316420]  ;;  %v25835_v2 = vpop.f32.mrf.mxu0  ;;  %v25837_v28 = vpop.f32.mrf.mxu1 }
 0x29d   : > { %v14933_v56 = vrot.slane %v14911_v6, %v22877_v24  ;;  %22124 = vmatprep.mubr.bf16.mxu1 %v13905_v9  ;;  %v13920_v49 = vrot.slane %v13913_v10, %v22877_v24  ;;  %v14276_v37 = vrot.slane %v20998_v30, %v22877_v24  ;;  %v14293_v60 = vcombine.high %v20999_v41, %v20999_v41 }
 0x29e   : > { %v14926_v48 = vrot.slane %v14910_v4, %v22877_v24  ;;  %28241 = vst [vmem:[#allocation69_spill] sm:$0xff] %v25835_v2  ;;  %28242 = vst [vmem:[#allocation70_spill] sm:$0xff] %v25837_v28  ;;  %v14940_v51 = vrot.slane %v14912_v22, %v22877_v24  ;;  %v14283_v57 = vrot.slane %v14269_v59, %v22877_v24  ;;  %v25843_v0 = vpop.f32.mrf.mxu0  ;;  %v25845_v30 = vpop.f32.mrf.mxu1  ;;  %v21001_v4 = vld.sshfl [vmem:[%s22855_s26 + $0x30] sm:$0x32 pattern:$0x75316420] }
 0x29f   : > { %v14300_v29 = vrot.slane %v20999_v41, %v22877_v24  ;;  %22125 = vmatmul.mubr.bf16.gmra.mxu1 %v13920_v49  ;;  %v14307_v42 = vrot.slane %v14293_v60, %v22877_v24  ;;  %28243 = vst [vmem:[#allocation71_spill] sm:$0xff] %v25843_v0  ;;  %28244 = vst [vmem:[#allocation72_spill] sm:$0xff] %v25845_v30  ;;  %v14317_v28 = vcombine.high %v21000_v62, %v21000_v62  ;;  %v21002_v59 = vld.sshfl [vmem:[%s22855_s26 + $0x34] sm:$0x33 pattern:$0x75316420] }
 0x2a0   : > { %v14941_v25 = vcombine.low %v14919_v27, %v14926_v48  ;;  %v14942_v6 = vcombine.low %v14933_v56, %v14940_v51  ;;  %v14958_v9 = vcombine.low %v14261_v17, %v14283_v57  ;;  %v21041_v10 = vcombine.high %v14276_v37, %v14283_v57  ;;  %v25851_v49 = vpop.f32.mrf.mxu0  ;;  %v25853_v27 = vpop.f32.mrf.mxu1 }
 0x2a1   : > { %v14960_v45 = vcombine.low %v14300_v29, %v14307_v42  ;;  %v21042_v2 = vcombine.high %v14300_v29, %v14307_v42  ;;  %v14324_v41 = vrot.slane %v21000_v62, %v22877_v24  ;;  %28245 = vst [vmem:[#allocation73_spill] sm:$0xff] %v25851_v49  ;;  %28246 = vst [vmem:[#allocation74_spill] sm:$0xff] %v25853_v27 }
 0x2a2   : > { %v14949_v22 = vrot.slane %v14941_v25, %v22877_v24  ;;  %v14956_v48 = vrot.slane %v14942_v6, %v22877_v24  ;;  %v14968_v60 = vrot.slane %v14958_v9, %v22877_v24  ;;  %v14975_v56 = vrot.slane %v21041_v10, %v22877_v24  ;;  %v25862_v29 = vpop.f32.mrf.mxu0  ;;  %v25864_v25 = vpop.f32.mrf.mxu1 }
 0x2a3   : > { %v14331_v17 = vrot.slane %v14317_v28, %v22877_v24  ;;  %v14982_v37 = vrot.slane %v14960_v45, %v22877_v24  ;;  %v14989_v51 = vrot.slane %v21042_v2, %v22877_v24  ;;  %v14339_v57 = vcombine.high %v21001_v4, %v21001_v4  ;;  %28247 = vst [vmem:[#allocation75_spill] sm:$0xff] %v25862_v29  ;;  %v21003_v2 = vld.sshfl [vmem:[%s22855_s26 + $0x38] sm:$0x11 pattern:$0x75316420] }
 0x2a4   : > { %v14346_v62 = vrot.slane %v21001_v4, %v22877_v24  ;;  %28248 = vst [vmem:[#allocation76_spill] sm:$0xff] %v25864_v25  ;;  %v14957_v42 = vcombine.low %v14949_v22, %v14956_v48  ;;  %v14990_v6 = vcombine.low %v14968_v60, %v14975_v56  ;;  %v14363_v9 = vcombine.high %v21002_v59, %v21002_v59  ;;  %v25869_v49 = vpop.f32.mrf.mxu0  ;;  %v25871_v4 = vpop.f32.mrf.mxu1  ;;  %v21004_v60 = vld.sshfl [vmem:[%s22855_s26 + $0x3c] sm:$0x32 pattern:$0x75316420] }
 0x2a5   : > { %v14370_v10 = vrot.slane %v21002_v59, %v22877_v24  ;;  %v14991_v27 = vcombine.low %v14982_v37, %v14989_v51  ;;  %v14353_v28 = vrot.slane %v14339_v57, %v22877_v24  ;;  %v15007_v30 = vcombine.low %v14324_v41, %v14331_v17  ;;  %28249 = vst [vmem:[#allocation77_spill] sm:$0xff] %v25869_v49  ;;  %v21005_v57 = vld.sshfl [vmem:[%s22855_s26 + $0x40] sm:$0x33 pattern:$0x75316420] }
 0x2a6   : > { %v14354_v45 = vcombine.high %v14346_v62, %v14346_v62  ;;  %28250 = vst [vmem:[#allocation78_spill] sm:$0xff] %v25871_v4  ;;  %22144 = vmatprep.mubr.bf16.mxu0 %v14957_v42  ;;  %v14998_v25 = vrot.slane %v14990_v6, %v22877_v24  ;;  %v14377_v22 = vrot.slane %v14363_v9, %v22877_v24  ;;  %v25879_v41 = vpop.f32.mrf.mxu0  ;;  %v25881_v17 = vpop.f32.mrf.mxu1 }
 0x2a7   : > { %v14378_v48 = vcombine.high %v14370_v10, %v14370_v10  ;;  %v15005_v59 = vrot.slane %v14991_v27, %v22877_v24  ;;  %v14355_v56 = vcombine.high %v14353_v28, %v14353_v28  ;;  %v15017_v51 = vrot.slane %v15007_v30, %v22877_v24  ;;  %28251 = vst [vmem:[#allocation79_spill] sm:$0xff] %v25879_v41 }
 0x2a8   : > { %v15008_v37 = vcombine.low %v14353_v28, %v14354_v45  ;;  %28252 = vst [vmem:[#allocation80_spill] sm:$0xff] %v25881_v17  ;;  %v14379_v4 = vcombine.high %v14377_v22, %v14377_v22  ;;  %v14387_v42 = vcombine.high %v21003_v2, %v21003_v2  ;;  %v14394_v6 = vrot.slane %v21003_v2, %v22877_v24  ;;  %v25885_v0 = vpop.f32.mrf.mxu0  ;;  %v25887_v28 = vpop.f32.mrf.mxu1 }
 0x2a9   : > { %v15010_v62 = vcombine.low %v14377_v22, %v14378_v48  ;;  %v15006_v9 = vcombine.low %v14998_v25, %v15005_v59  ;;  %v15009_v49 = vcombine.low %v14355_v56, %v14370_v10  ;;  %v14409_v27 = vcombine.high %v21004_v60, %v21004_v60  ;;  %28253 = vst [vmem:[#allocation81_spill] sm:$0xff] %v25885_v0  ;;  %v21006_v56 = vld.sshfl [vmem:[%s22855_s26 + $0x44] sm:$0x11 pattern:$0x75316420] }
 0x2aa   : > { %v15024_v29 = vrot.slane %v15008_v37, %v22877_v24  ;;  %28254 = vst [vmem:[#allocation82_spill] sm:$0xff] %v25887_v28  ;;  %v14401_v45 = vrot.slane %v14387_v42, %v22877_v24  ;;  %v14416_v48 = vrot.slane %v21004_v60, %v22877_v24  ;;  %v14433_v22 = vcombine.high %v21005_v57, %v21005_v57  ;;  %v25896_v37 = vpop.f32.mrf.mxu0  ;;  %v25898_v28 = vpop.f32.mrf.mxu1 }
 0x2ab   : > { %v15038_v30 = vrot.slane %v15010_v62, %v22877_v24  ;;  %22145 = vmatmul.mubr.bf16.vlgmr.msra.gmra.mxu0 %v15006_v9  ;;  %v15031_v2 = vrot.slane %v15009_v49, %v22877_v24  ;;  %v14423_v10 = vrot.slane %v14409_v27, %v22877_v24  ;;  %v14440_v59 = vrot.slane %v21005_v57, %v22877_v24  ;;  %v21007_v49 = vld.sshfl [vmem:[%s22855_s26 + $0x48] sm:$0x32 pattern:$0x75316420] }
 0x2ac   : > { %v15039_v25 = vcombine.low %v15017_v51, %v15024_v29  ;;  %28255 = vst [vmem:[#allocation83_spill] sm:$0xff] %v25896_v37  ;;  %28256 = vst [vmem:[#allocation84_spill] sm:$0xff] %v25898_v28  ;;  %v14447_v62 = vrot.slane %v14433_v22, %v22877_v24  ;;  %v15056_v42 = vcombine.low %v14379_v4, %v14394_v6  ;;  %v25903_v29 = vpop.f32.mrf.mxu0  ;;  %v25905_v51 = vpop.f32.mrf.mxu1  ;;  %v21009_v37 = vld.sshfl [vmem:[%s22855_s26 + $0x50] sm:$0x11 pattern:$0x75316420] }
 0x2ad   : > { %v15040_v0 = vcombine.low %v15031_v2, %v15038_v30  ;;  %v15057_v9 = vcombine.low %v14401_v45, %v14423_v10  ;;  %v21043_v15 = vcombine.high %v14416_v48, %v14423_v10  ;;  %28257 = vst [vmem:[#allocation85_spill] sm:$0xff] %v25903_v29  ;;  %28258 = vst [vmem:[#allocation86_spill] sm:$0xff] %v25905_v51  ;;  %v21008_v2 = vld.sshfl [vmem:[%s22855_s26 + $0x4c] sm:$0x33 pattern:$0x75316420] }
 0x2ae   : > { %v15047_v60 = vrot.slane %v15039_v25, %v22877_v24  ;;  %v15059_v57 = vcombine.low %v14440_v59, %v14447_v62  ;;  %v15066_v27 = vrot.slane %v15056_v42, %v22877_v24  ;;  %v14457_v17 = vcombine.high %v21006_v56, %v21006_v56  ;;  %v25912_v30 = vpop.f32.mrf.mxu0  ;;  %v25914_v45 = vpop.f32.mrf.mxu1 }
 0x2af   : > { %v15054_v41 = vrot.slane %v15040_v0, %v22877_v24  ;;  %v15073_v22 = vrot.slane %v15057_v9, %v22877_v24  ;;  %v15080_v4 = vrot.slane %v21043_v15, %v22877_v24  ;;  %v14464_v6 = vrot.slane %v21006_v56, %v22877_v24  ;;  %28259 = vst [vmem:[#allocation87_spill] sm:$0xff] %v25912_v30 }
 0x2b0   : > { %28260 = vst [vmem:[#allocation88_spill] sm:$0xff] %v25914_v45  ;;  %v15087_v48 = vrot.slane %v15059_v57, %v22877_v24  ;;  %v14471_v25 = vrot.slane %v14457_v17, %v22877_v24  ;;  %v14479_v10 = vcombine.high %v21007_v49, %v21007_v49  ;;  %v14486_v42 = vrot.slane %v21007_v49, %v22877_v24  ;;  %v25921_v28 = vpop.f32.mrf.mxu0  ;;  %v25923_v56 = vpop.f32.mrf.mxu1 }
 0x2b1   : > { %v15055_v0 = vcombine.low %v15047_v60, %v15054_v41  ;;  %v15088_v51 = vcombine.low %v15066_v27, %v15073_v22  ;;  %v14510_v9 = vrot.slane %v21008_v2, %v22877_v24  ;;  %v21044_v15 = vcombine.high %v14440_v59, %v14447_v62  ;;  %28261 = vst [vmem:[#allocation89_spill] sm:$0xff] %v25921_v28  ;;  %v21011_v28 = vld.sshfl [vmem:[%s22855_s26 + $0x58] sm:$0x33 pattern:$0x75316420] }
 0x2b2   : > { %28262 = vst [vmem:[#allocation90_spill] sm:$0xff] %v25923_v56  ;;  %v15089_v45 = vcombine.low %v15080_v4, %v15087_v48  ;;  %v14493_v30 = vrot.slane %v14479_v10, %v22877_v24  ;;  %v14494_v57 = vcombine.high %v14486_v42, %v14486_v42  ;;  %v15106_v29 = vcombine.low %v14464_v6, %v14471_v25  ;;  %v25929_v49 = vpop.f32.mrf.mxu0  ;;  %v25931_v59 = vpop.f32.mrf.mxu1  ;;  %v21010_v48 = vld.sshfl [vmem:[%s22855_s26 + $0x54] sm:$0x32 pattern:$0x75316420] }
 0x2b3   : > { %22148 = vmatprep.mubr.bf16.mxu0 %v15055_v0  ;;  %v15096_v17 = vrot.slane %v15088_v51, %v22877_v24  ;;  %v15115_v41 = vrot.slane %v21044_v15, %v22877_v24  ;;  %v14503_v60 = vcombine.high %v21008_v2, %v21008_v2  ;;  %28263 = vst [vmem:[#allocation91_spill] sm:$0xff] %v25931_v59 }
 0x2b4   : > { %v15103_v62 = vrot.slane %v15089_v45, %v22877_v24  ;;  %v14495_v27 = vcombine.high %v14493_v30, %v14493_v30  ;;  %v15107_v22 = vcombine.low %v14493_v30, %v14494_v57  ;;  %v15122_v4 = vrot.slane %v15106_v29, %v22877_v24  ;;  %v25938_v42 = vpop.f32.mrf.mxu0  ;;  %v25940_v2 = vpop.f32.mrf.mxu1 }
 0x2b5   : > { %v14517_v6 = vrot.slane %v14503_v60, %v22877_v24  ;;  %v14518_v25 = vcombine.high %v14510_v9, %v14510_v9  ;;  %v14527_v10 = vcombine.high %v21009_v37, %v21009_v37  ;;  %v14534_v51 = vrot.slane %v21009_v37, %v22877_v24  ;;  %28264 = vst [vmem:[#allocation92_spill] sm:$0xff] %v25938_v42 }
 0x2b6   : > { %28265 = vst [vmem:[#allocation93_spill] sm:$0xff] %v25940_v2  ;;  %v15104_v0 = vcombine.low %v15096_v17, %v15103_v62  ;;  %v15108_v15 = vcombine.low %v14495_v27, %v14510_v9  ;;  %v15129_v45 = vrot.slane %v15107_v22, %v22877_v24  ;;  %v15137_v30 = vcombine.low %v15115_v41, %v15122_v4  ;;  %v25946_v59 = vpop.f32.mrf.mxu0  ;;  %v25948_v37 = vpop.f32.mrf.mxu1  ;;  %v21012_v9 = vld.sshfl [vmem:[%s22855_s26 + $0x5c] sm:$0x11 pattern:$0x75316420] }
 0x2b7   : > { %v14519_v29 = vcombine.high %v14517_v6, %v14517_v6  ;;  %v14541_v57 = vrot.slane %v14527_v10, %v22877_v24  ;;  %v14549_v56 = vcombine.high %v21010_v48, %v21010_v48  ;;  %v14556_v60 = vrot.slane %v21010_v48, %v22877_v24  ;;  %28266 = vst [vmem:[#allocation94_spill] sm:$0xff] %v25946_v59  ;;  %v21013_v22 = vld.sshfl [vmem:[%s22855_s26 + $0x60] sm:$0x32 pattern:$0x75316420] }
 0x2b8   : > { %28267 = vst [vmem:[#allocation95_spill] sm:$0xff] %v25948_v37  ;;  %22149 = vmatmul.mubr.bf16.gmra.mxu0 %v15104_v0  ;;  %v15136_v2 = vrot.slane %v15108_v15, %v22877_v24  ;;  %v15154_v17 = vcombine.low %v14517_v6, %v14518_v25  ;;  %v15145_v62 = vrot.slane %v15137_v30, %v22877_v24  ;;  %v25955_v4 = vpop.f32.mrf.mxu0  ;;  %v25957_v10 = vpop.f32.mrf.mxu1 }
 0x2b9   : > { %v14563_v41 = vrot.slane %v14549_v56, %v22877_v24  ;;  %v15155_v27 = vcombine.low %v14519_v29, %v14534_v51  ;;  %28268 = vst [vmem:[#allocation96_spill] sm:$0xff] %v25955_v4  ;;  %28269 = vst [vmem:[#allocation97_spill] sm:$0xff] %v25957_v10  ;;  %v14573_v42 = vcombine.high %v21011_v28, %v21011_v28  ;;  %v21014_v4 = vld.sshfl [vmem:[%s22855_s26 + $0x64] sm:$0x33 pattern:$0x75316420] }
 0x2ba   : > { %v15138_v48 = vcombine.low %v15129_v45, %v15136_v2  ;;  %v15164_v59 = vrot.slane %v15154_v17, %v22877_v24  ;;  %v14580_v0 = vrot.slane %v21011_v28, %v22877_v24  ;;  %v14597_v25 = vcombine.high %v21012_v9, %v21012_v9  ;;  %v25962_v30 = vpop.f32.mrf.mxu0  ;;  %v25964_v56 = vpop.f32.mrf.mxu1 }
 0x2bb   : > { %v15156_v37 = vcombine.low %v14541_v57, %v14563_v41  ;;  %v21045_v15 = vcombine.high %v14556_v60, %v14563_v41  ;;  %v15171_v6 = vrot.slane %v15155_v27, %v22877_v24  ;;  %28270 = vst [vmem:[#allocation98_spill] sm:$0xff] %v25962_v30  ;;  %28271 = vst [vmem:[#allocation99_spill] sm:$0xff] %v25964_v56 }
 0x2bc   : > { %v15152_v51 = vrot.slane %v15138_v48, %v22877_v24  ;;  %v14587_v29 = vrot.slane %v14573_v42, %v22877_v24  ;;  %v14604_v2 = vrot.slane %v21012_v9, %v22877_v24  ;;  %v14619_v45 = vcombine.high %v21013_v22, %v21013_v22  ;;  %v25972_v41 = vpop.f32.mrf.mxu0  ;;  %v25974_v27 = vpop.f32.mrf.mxu1 }
 0x2bd   : > { %v15178_v28 = vrot.slane %v15156_v37, %v22877_v24  ;;  %v15185_v57 = vrot.slane %v21045_v15, %v22877_v24  ;;  %v15186_v60 = vcombine.low %v15164_v59, %v15171_v6  ;;  %v14611_v17 = vrot.slane %v14597_v25, %v22877_v24  ;;  %28272 = vst [vmem:[#allocation100_spill] sm:$0xff] %v25972_v41  ;;  %v21015_v59 = vld.sshfl [vmem:[%s22855_s26 + $0x68] sm:$0x11 pattern:$0x75316420] }
 0x2be   : > { %28273 = vst [vmem:[#allocation101_spill] sm:$0xff] %v25974_v27  ;;  %v15153_v10 = vcombine.low %v15145_v62, %v15152_v51  ;;  %v14626_v48 = vrot.slane %v21013_v22, %v22877_v24  ;;  %v14633_v42 = vrot.slane %v14619_v45, %v22877_v24  ;;  %v15203_v9 = vcombine.low %v14580_v0, %v14587_v29  ;;  %v25981_v6 = vpop.f32.mrf.mxu0  ;;  %v25983_v25 = vpop.f32.mrf.mxu1  ;;  %v21016_v51 = vld.sshfl [vmem:[%s22855_s26 + $0x6c] sm:$0x32 pattern:$0x75316420] }
 0x2bf   : > { %v15187_v56 = vcombine.low %v15178_v28, %v15185_v57  ;;  %v15194_v37 = vrot.slane %v15186_v60, %v22877_v24  ;;  %v21046_v30 = vcombine.high %v14580_v0, %v14587_v29  ;;  %v15205_v15 = vcombine.low %v14604_v2, %v14611_v17  ;;  %28274 = vst [vmem:[#allocation102_spill] sm:$0xff] %v25981_v6 }
 0x2c0   : > { %28275 = vst [vmem:[#allocation103_spill] sm:$0xff] %v25983_v25  ;;  %22152 = vmatprep.mubr.bf16.mxu0 %v15153_v10  ;;  %v14634_v27 = vcombine.high %v14626_v48, %v14626_v48  ;;  %v15213_v62 = vrot.slane %v15203_v9, %v22877_v24  ;;  %v14635_v22 = vcombine.high %v14633_v42, %v14633_v42  ;;  %v25990_v0 = vpop.f32.mrf.mxu0  ;;  %v25992_v29 = vpop.f32.mrf.mxu1 }
 0x2c1   : > { %v15201_v45 = vrot.slane %v15187_v56, %v22877_v24  ;;  %v15220_v41 = vrot.slane %v21046_v30, %v22877_v24  ;;  %v15227_v28 = vrot.slane %v15205_v15, %v22877_v24  ;;  %v14643_v57 = vcombine.high %v21014_v4, %v21014_v4  ;;  %28276 = vst [vmem:[#allocation104_spill] sm:$0xff] %v25990_v0 }
 0x2c2   : > { %28277 = vst [vmem:[#allocation105_spill] sm:$0xff] %v25992_v29  ;;  %v15206_v2 = vcombine.low %v14633_v42, %v14634_v27  ;;  %v14650_v60 = vrot.slane %v21014_v4, %v22877_v24  ;;  %v14667_v10 = vcombine.high %v21015_v59, %v21015_v59  ;;  %v14674_v17 = vrot.slane %v21015_v59, %v22877_v24  ;;  %v25997_v30 = vpop.f32.mrf.mxu0  ;;  %v25999_v15 = vpop.f32.mrf.mxu1  ;;  %v21017_v59 = vld.sshfl [vmem:[%s22855_s26 + $0x70] sm:$0x33 pattern:$0x75316420] }
 0x2c3   : > { %v15202_v48 = vcombine.low %v15194_v37, %v15201_v45  ;;  %v15235_v9 = vcombine.low %v15213_v62, %v15220_v41  ;;  %v14657_v56 = vrot.slane %v14643_v57, %v22877_v24  ;;  %v14689_v25 = vcombine.high %v21016_v51, %v21016_v51  ;;  %28278 = vst [vmem:[#allocation106_spill] sm:$0xff] %v25997_v30 }
 0x2c4   : > { %28279 = vst [vmem:[#allocation107_spill] sm:$0xff] %v25999_v15  ;;  %v15234_v0 = vrot.slane %v15206_v2, %v22877_v24  ;;  %v14658_v6 = vcombine.high %v14650_v60, %v14650_v60  ;;  %v14681_v27 = vrot.slane %v14667_v10, %v22877_v24  ;;  %v15252_v42 = vcombine.low %v14635_v22, %v14650_v60  ;;  %v26005_v41 = vpop.f32.mrf.mxu0  ;;  %v26007_v37 = vpop.f32.mrf.mxu1 }
 0x2c5   : > { %22153 = vmatmul.mubr.bf16.gmra.mxu0 %v15202_v48  ;;  %v14659_v4 = vcombine.high %v14657_v56, %v14657_v56  ;;  %v14703_v29 = vrot.slane %v14689_v25, %v22877_v24  ;;  %28280 = vst [vmem:[#allocation108_spill] sm:$0xff] %v26005_v41  ;;  %28281 = vst [vmem:[#allocation109_spill] sm:$0xff] %v26007_v37  ;;  %v15243_v45 = vrot.slane %v15235_v9, %v22877_v24 }
 0x2c6   : > { %v15236_v62 = vcombine.low %v15227_v28, %v15234_v0  ;;  %v15253_v57 = vcombine.low %v14657_v56, %v14658_v6  ;;  %v15262_v2 = vrot.slane %v15252_v42, %v22877_v24  ;;  %v14696_v22 = vrot.slane %v21016_v51, %v22877_v24  ;;  %v22007_v60 = vpop.f32.mrf.mxu0  ;;  %v22047_v10 = vpop.f32.mrf.mxu1  ;;  %v21019_v28 = vld.sshfl [vmem:[%s22855_s26 + $0x78] sm:$0x32 pattern:$0x75316420] }
 0x2c7   : > { %v15254_v15 = vcombine.low %v14659_v4, %v14674_v17  ;;  %v15255_v30 = vcombine.low %v14681_v27, %v14703_v29  ;;  %v14713_v41 = vcombine.high %v21017_v59, %v21017_v59  ;;  %v14720_v37 = vrot.slane %v21017_v59, %v22877_v24  ;;  %v21020_v42 = vld.sshfl [vmem:[%s22855_s26 + $0x7c] sm:$0x33 pattern:$0x75316420] }
 0x2c8   : > { %v15250_v25 = vrot.slane %v15236_v62, %v22877_v24  ;;  %v15269_v48 = vrot.slane %v15253_v57, %v22877_v24  ;;  %v21047_v9 = vcombine.high %v14696_v22, %v14703_v29  ;;  %v15304_v17 = vcombine.low %v25547_v3, %v25554_v58 }
 0x2c9   : > { %v15276_v0 = vrot.slane %v15254_v15, %v22877_v24  ;;  %v15283_v6 = vrot.slane %v15255_v30, %v22877_v24  ;;  %v14727_v27 = vrot.slane %v14713_v41, %v22877_v24  ;;  %v14759_v59 = vcombine.high %v21019_v28, %v21019_v28 }
 0x2ca   : > { %v15251_v56 = vcombine.low %v15243_v45, %v15250_v25  ;;  %v15284_v51 = vcombine.low %v15262_v2, %v15269_v48  ;;  %v15311_v62 = vrot.slane %v21047_v9, %v22877_v24  ;;  %v15332_v57 = vrot.slane %v15304_v17, %v22877_v24 }
 0x2cb   : > { %v15285_v4 = vcombine.low %v15276_v0, %v15283_v6  ;;  %v15302_v30 = vcombine.low %v14720_v37, %v14727_v27  ;;  %v21048_v29 = vcombine.high %v14720_v37, %v14727_v27  ;;  %v14766_v22 = vrot.slane %v21019_v28, %v22877_v24  ;;  %v21022_v37 = vld.sshfl [vmem:[%s22855_s26 + $0x84] sm:$0x32 pattern:$0x75316420] }
 0x2cc   : > { %22156 = vmatprep.mubr.bf16.mxu0 %v15251_v56  ;;  %v15292_v15 = vrot.slane %v15284_v51, %v22877_v24  ;;  %v14773_v58 = vrot.slane %v14759_v59, %v22877_v24  ;;  %v14783_v41 = vcombine.high %v21020_v42, %v21020_v42  ;;  %v14790_v45 = vrot.slane %v21020_v42, %v22877_v24 }
 0x2cd   : > { %v15299_v3 = vrot.slane %v15285_v4, %v22877_v24  ;;  %v15318_v2 = vrot.slane %v15302_v30, %v22877_v24  ;;  %v15325_v60 = vrot.slane %v21048_v29, %v22877_v24  ;;  %v14774_v10 = vcombine.high %v14766_v22, %v14766_v22 }
 0x2ce   : > { %v14775_v48 = vcombine.high %v14773_v58, %v14773_v58  ;;  %v14797_v0 = vrot.slane %v14783_v41, %v22877_v24  ;;  %v14798_v6 = vcombine.high %v14790_v45, %v14790_v45  ;;  %v14829_v30 = vcombine.high %v21022_v37, %v21022_v37 }
 0x2cf   : > { %v15300_v25 = vcombine.low %v15292_v15, %v15299_v3  ;;  %v15333_v9 = vcombine.low %v15311_v62, %v15318_v2  ;;  %v15334_v28 = vcombine.low %v15325_v60, %v15332_v57  ;;  %v15350_v17 = vcombine.low %v14773_v58, %v14774_v10 }
 0x2d0   : > { %v14799_v56 = vcombine.high %v14797_v0, %v14797_v0  ;;  %v15351_v51 = vcombine.low %v14775_v48, %v14790_v45  ;;  %v15352_v27 = vcombine.low %v14797_v0, %v14798_v6  ;;  %v14836_v62 = vrot.slane %v21022_v37, %v22877_v24  ;;  %v26045_v45 = vpop.f32.mrf.mxu0 }
 0x2d1   : > { %22157 = vmatmul.mubr.bf16.gmra.mxu0 %v15300_v25  ;;  %v15341_v42 = vrot.slane %v15333_v9, %v22877_v24  ;;  %v15348_v4 = vrot.slane %v15334_v28, %v22877_v24  ;;  %v15360_v59 = vrot.slane %v15350_v17, %v22877_v24  ;;  %v14843_v3 = vrot.slane %v14829_v30, %v22877_v24 }
 0x2d2   : > { %v15353_v15 = vcombine.low %v14799_v56, %v25629_v36  ;;  %v15367_v29 = vrot.slane %v15351_v51, %v22877_v24  ;;  %v15374_v22 = vrot.slane %v15352_v27, %v22877_v24  ;;  %v15401_v58 = vcombine.low %v25688_v63, %v25698_v35  ;;  %v26054_v9 = vpop.f32.mrf.mxu0 }
 0x2d3   : > { %v15349_v57 = vcombine.low %v15341_v42, %v15348_v4  ;;  %v21050_v41 = vcombine.high %v25688_v63, %v25698_v35  ;;  %v15399_v60 = vcombine.low %v25725_v26, %v14843_v3  ;;  %v21049_v10 = vcombine.high %v14836_v62, %v14843_v3  ;;  %v28290_v3 = vld [vmem:[#allocation42_spill] sm:$0xff] }
 0x2d4   : > { %v15381_v2 = vrot.slane %v15353_v15, %v22877_v24  ;;  %v15382_v36 = vcombine.low %v15360_v59, %v15367_v29  ;;  %v15423_v25 = vrot.slane %v15401_v58, %v22877_v24  ;;  %v15448_v26 = vcombine.low %v25782_v13, %v25795_v50  ;;  %v26061_v42 = vpop.f32.mrf.mxu0 }
 0x2d5   : > { %22160 = vmatprep.mubr.bf16.mxu0 %v15349_v57  ;;  %v15430_v48 = vrot.slane %v21050_v41, %v22877_v24  ;;  %v15409_v37 = vrot.slane %v15399_v60, %v22877_v24  ;;  %v15416_v63 = vrot.slane %v21049_v10, %v22877_v24  ;;  %v3506_v30 = vadd.f32 %v25229_v18, %v25227_v33  ;;  %v28292_v41 = vld [vmem:[#allocation61_spill] sm:$0xff]  ;;  %v28294_v60 = vld [vmem:[#allocation47_spill] sm:$0xff] }
 0x2d6   : > { %v15383_v0 = vcombine.low %v15374_v22, %v15381_v2  ;;  %v15390_v6 = vrot.slane %v15382_v36, %v22877_v24  ;;  %v15455_v4 = vrot.slane %v15448_v26, %v22877_v24  ;;  %v26066_v15 = vpop.f32.mrf.mxu0  ;;  %v3519_v13 = vadd.f32 %v25263_v19, %v25261_v54 }
 0x2d7   : > { %v15432_v35 = vcombine.low %v15423_v25, %v15430_v48  ;;  %v15431_v17 = vcombine.low %v15409_v37, %v15416_v63  ;;  %v3511_v50 = vadd.f32 %v25287_v16, %v25285_v23  ;;  %v3522_v29 = vadd.f32 %v25307_v52, %v25305_v34  ;;  %v28295_v25 = vld [vmem:[#allocation48_spill] sm:$0xff]  ;;  %v28297_v63 = vld [vmem:[#allocation50_spill] sm:$0xff] }
 0x2d8   : > { %v15397_v28 = vrot.slane %v15383_v0, %v22877_v24  ;;  %v15462_v22 = vrot.slane %v15455_v4, %v22877_v24  ;;  %v3535_v62 = vadd.f32 %v25349_v21, %v25347_v44  ;;  %v3527_v33 = vadd.f32 %v25369_v53, %v25367_v5  ;;  %v26093_v5 = vpop.f32.mrf.mxu0  ;;  %v28296_v0 = vld [vmem:[#allocation63_spill] sm:$0xff]  ;;  %v28301_v4 = vld [vmem:[#allocation54_spill] sm:$0xff] }
 0x2d9   : > { %v15446_v56 = vrot.slane %v15432_v35, %v22877_v24  ;;  %v15439_v27 = vrot.slane %v15431_v17, %v22877_v24  ;;  %v3538_v18 = vadd.f32 %v25383_v38, %v25381_v55  ;;  %v3551_v54 = vadd.f32 %v25416_v40, %v25414_v12  ;;  %v28282_v55 = vld [vmem:[#allocation24_spill] sm:$0xff]  ;;  %v28283_v12 = vld [vmem:[#allocation49_spill] sm:$0xff]  ;;  %v28299_v17 = vld [vmem:[#allocation83_spill] sm:$0xff] }
 0x2da   : > { %v15398_v51 = vcombine.low %v15390_v6, %v15397_v28  ;;  %v3543_v19 = vadd.f32 %v25437_v14, %v25435_v47  ;;  %v5098_v23 = vadd.f32 %v25618_v61, %v3506_v30  ;;  %v5101_v16 = vadd.f32 %v25641_v31, %v3519_v13  ;;  %v28284_v47 = vld [vmem:[#allocation25_spill] sm:$0xff]  ;;  %v28285_v14 = vld [vmem:[#allocation26_spill] sm:$0xff]  ;;  %v28287_v61 = vld [vmem:[#allocation55_spill] sm:$0xff]  ;;  %v26113_v37 = vpop.f32.mrf.mxu0 }
 0x2db   : > { %v15447_v59 = vcombine.low %v15439_v27, %v15446_v56  ;;  %v5099_v24 = vadd.f32 %v25655_v20, %v3511_v50  ;;  %v3554_v34 = vadd.f32 %v25444_v11, %v25442_v46  ;;  %v5102_v52 = vadd.f32 %v25666_v1, %v3522_v29  ;;  %v28286_v11 = vld [vmem:[#allocation53_spill] sm:$0xff]  ;;  %v28302_v30 = vld [vmem:[#allocation56_spill] sm:$0xff]  ;;  %v28303_v50 = vld [vmem:[#allocation58_spill] sm:$0xff] }
 0x2dc   : > { %22161 = vmatmul.mubr.bf16.gmra.mxu0 %v15398_v51  ;;  %v5105_v44 = vadd.f32 %v25690_v7, %v3535_v62  ;;  %v5103_v21 = vadd.f32 %v25704_v43, %v3527_v33  ;;  %v3567_v53 = vadd.f32 %v25476_v39, %v25474_v8  ;;  %v3559_v38 = vadd.f32 %v28282_v55, %v25489_v32  ;;  %v28288_v20 = vld [vmem:[#allocation57_spill] sm:$0xff]  ;;  %v28289_v43 = vld [vmem:[#allocation39_spill] sm:$0xff]  ;;  %v28293_v32 = vld [vmem:[#allocation44_spill] sm:$0xff]  ;;  %v10360_v33 = vpop.f32.mrf.mxu1 }
 0x2dd   : > { %22164 = vmatprep.mubr.bf16.mxu0 %v15447_v59  ;;  %v5106_v40 = vadd.f32 %v28283_v12, %v3538_v18  ;;  %v3562_v46 = vadd.f32 %v28285_v14, %v28284_v47  ;;  %v5109_v1 = vadd.f32 %v28286_v11, %v3551_v54  ;;  %v5107_v31 = vadd.f32 %v28287_v61, %v3543_v19  ;;  %v28291_v8 = vld [vmem:[#allocation43_spill] sm:$0xff]  ;;  %v28298_v28 = vld [vmem:[#allocation65_spill] sm:$0xff]  ;;  %v28305_v18 = vld [vmem:[#allocation62_spill] sm:$0xff]  ;;  %v26131_v47 = vpop.f32.mrf.mxu0 }
 0x2de   : > { %v5110_v7 = vadd.f32 %v28288_v20, %v3554_v34  ;;  %v6564_v57 = vadd.f32 %v28289_v43, %v5098_v23  ;;  %v6567_v58 = vadd.f32 %v28290_v3, %v5101_v16  ;;  %v6565_v39 = vadd.f32 %v28291_v8, %v5099_v24  ;;  %v28300_v51 = vld [vmem:[#allocation85_spill] sm:$0xff]  ;;  %v28306_v19 = vld [vmem:[#allocation84_spill] sm:$0xff]  ;;  %v28307_v16 = vld [vmem:[#allocation86_spill] sm:$0xff] }
 0x2df   : > { %v5113_v2 = vadd.f32 %v28292_v41, %v3567_v53  ;;  %v6568_v36 = vadd.f32 %v28293_v32, %v5102_v52  ;;  %v6571_v10 = vadd.f32 %v28294_v60, %v5105_v44  ;;  %v6569_v48 = vadd.f32 %v28295_v25, %v5103_v21  ;;  %v28308_v52 = vld [vmem:[#allocation64_spill] sm:$0xff]  ;;  %v28311_v12 = vld [vmem:[#allocation94_spill] sm:$0xff]  ;;  %v28313_v11 = vld [vmem:[#allocation91_spill] sm:$0xff]  ;;  %v26147_v32 = vpop.f32.mrf.mxu1 }
 0x2e0   : > { %v5111_v6 = vadd.f32 %v28296_v0, %v3559_v38  ;;  %v6572_v35 = vadd.f32 %v28297_v63, %v5106_v40  ;;  %v5112_v26 = vadd.f32 %v28298_v28, %v3562_v46  ;;  %v8839_v56 = vadd.f32 %v28299_v17, %v6567_v58  ;;  %v28309_v21 = vld [vmem:[#allocation88_spill] sm:$0xff]  ;;  %v28312_v14 = vld [vmem:[#allocation66_spill] sm:$0xff]  ;;  %v28317_v3 = vld [vmem:[#allocation93_spill] sm:$0xff] }
 0x2e1   : > { %v8837_v27 = vadd.f32 %v28300_v51, %v6565_v39  ;;  %v6575_v59 = vadd.f32 %v28301_v4, %v5109_v1  ;;  %v6573_v13 = vadd.f32 %v28302_v30, %v5107_v31  ;;  %v6576_v29 = vadd.f32 %v28303_v50, %v5110_v7  ;;  %v28310_v55 = vld [vmem:[#allocation92_spill] sm:$0xff]  ;;  %v28314_v61 = vld [vmem:[#allocation98_spill] sm:$0xff]  ;;  %v28318_v8 = vld [vmem:[#allocation95_spill] sm:$0xff] }
 0x2e2   : > { %v6579_v54 = vadd.f32 %v28305_v18, %v5113_v2  ;;  %v10381_v23 = vadd.f32 %v28306_v19, %v8839_v56  ;;  %v8843_v34 = vadd.f32 %v25929_v49, %v6571_v10  ;;  %v6577_v44 = vadd.f32 %v28308_v52, %v5111_v6  ;;  %v28315_v20 = vld [vmem:[#allocation100_spill] sm:$0xff]  ;;  %v28316_v49 = vld [vmem:[#allocation79_spill] sm:$0xff]  ;;  %v28319_v41 = vld [vmem:[#allocation102_spill] sm:$0xff] }
 0x2e3   : > { %v10379_v24 = vadd.f32 %v28307_v16, %v8837_v27  ;;  %v8841_v38 = vadd.f32 %v28310_v55, %v6569_v48  ;;  %v8844_v40 = vadd.f32 %v28311_v12, %v6572_v35  ;;  %v6578_v46 = vadd.f32 %v28312_v14, %v5112_v26  ;;  %v28321_v10 = vld [vmem:[#allocation101_spill] sm:$0xff]  ;;  %v28322_v48 = vld [vmem:[#allocation106_spill] sm:$0xff]  ;;  %v28323_v6 = vld [vmem:[#allocation103_spill] sm:$0xff]  ;;  %v22071_v26 = vpop.f32.mrf.mxu0 }
 0x2e4   : > { %22165 = vmatmul.mubr.bf16.gmra.mxu0 %v15462_v22  ;;  %v28304_v22 = vld [vmem:[#allocation87_spill] sm:$0xff]  ;;  %v26135_v1 = vadd.f32 %v28313_v11, %v8843_v34  ;;  %v8847_v31 = vadd.f32 %v28314_v61, %v6575_v59  ;;  %v8845_v7 = vadd.f32 %v28315_v20, %v6573_v13  ;;  %v8836_v43 = vadd.f32 %v28316_v49, %v6564_v57  ;;  %v28324_v63 = vld [vmem:[#allocation108_spill] sm:$0xff]  ;;  %v28327_v4 = vld [vmem:[#allocation109_spill] sm:$0xff]  ;;  %v26170_v13 = vpop.f32.mrf.mxu1 }
 0x2e5   : > { %v8840_v62 = vadd.f32 %v28304_v22, %v6568_v36  ;;  %v26141_v58 = vadd.f32 %v28317_v3, %v8841_v38  ;;  %v26144_v39 = vadd.f32 %v28318_v8, %v8844_v40  ;;  %v8848_v2 = vadd.f32 %v28319_v41, %v6576_v29  ;;  %v28320_v36 = vld [vmem:[#allocation99_spill] sm:$0xff]  ;;  %v28326_v51 = vld [vmem:[#allocation80_spill] sm:$0xff]  ;;  %v26174_v29 = vpop.f32.mrf.mxu0  ;;  %v28330_v38 = vld [vmem:[#allocation45_spill] sm:$0xff] }
 0x2e6   : > { %v26150_v60 = vadd.f32 %v28320_v36, %v8847_v31  ;;  %v26153_v25 = vadd.f32 %v28321_v10, %v8845_v7  ;;  %v8851_v0 = vadd.f32 %v28322_v48, %v6579_v54  ;;  %v8849_v35 = vadd.f32 %v28324_v63, %v6577_v44  ;;  %v28325_v17 = vld [vmem:[#allocation107_spill] sm:$0xff]  ;;  %v26176_v22 = vpop.f32.mrf.mxu1  ;;  %v28328_v44 = vld [vmem:[#allocation18_spill] sm:$0xff] }
 0x2e7   : > { %v10382_v53 = vadd.f32 %v28309_v21, %v8840_v62  ;;  %v26157_v57 = vadd.f32 %v28323_v6, %v8848_v2  ;;  %v8850_v28 = vadd.f32 %v26045_v45, %v6578_v46  ;;  %v10378_v27 = vadd.f32 %v28326_v51, %v8836_v43  ;;  %v28329_v21 = vld [vmem:[#allocation19_spill] sm:$0xff]  ;;  %v28331_v14 = vld [vmem:[#allocation46_spill] sm:$0xff]  ;;  %v22592_v6 = vld [vmem:[%s28163_s4 + $0xa8] sm:$0xff]  }
 0x2e8   : > { %v26162_v56 = vadd.f32 %v28325_v17, %v8851_v0  ;;  %v26166_v59 = vadd.f32 %v28327_v4, %v8849_v35  ;;  %v26178_v18 = vpop.f32.mrf.mxu1  ;;  %v3514_v55 = vadd.f32 %v28329_v21, %v28328_v44  ;;  %v22587_v61 = vld [vmem:[%s28163_s4 + $0x78] sm:$0xff]   ;;  %v22590_v31 = vld [vmem:[%s28163_s4 + $0xb0] sm:$0xff]   ;;  %v22591_v35 = vld [vmem:[%s28163_s4 + $0x68] sm:$0xff]  }
 0x2e9   : > { %v26168_v30 = vadd.f32 %v10360_v33, %v8850_v28  ;;  %v26172_v50 = vadd.f32 %v22071_v26, %v10378_v27  ;;  %22168 = vmatprep.subr.bf16.mxu1 %v22587_v61  ;;  %v28333_v49 = vld [vmem:[#allocation90_spill] sm:$0xff]  ;;  %v28337_v44 = vld [vmem:[#allocation52_spill] sm:$0xff] }
 0x2ea   : > { %v5100_v12 = vadd.f32 %v28330_v38, %v3514_v55  ;;  %22169 = vmatpush3.bf16.msra.mxu1 %v22587_v61  ;;  %v22588_v36 = vld [vmem:[%s28163_s4 + $0x70] sm:$0xff]   ;;  %v28338_v55 = vld [vmem:[#allocation96_spill] sm:$0xff] }
 0x2eb   : > { %22170 = vmatprep.subr.bf16.mxu1 %v22588_v36 }
 0x2ec   : > { %v6566_v46 = vadd.f32 %v28331_v14, %v5100_v12  ;;  %v22597_v12 = vld [vmem:[%s28163_s4 + $0x90] sm:$0xff]  }
 0x2ee   : > { %22171 = vmatpush3.bf16.msra.mxu1 %v22588_v36  ;;  %v22599_v36 = vld [vmem:[%s28163_s4 + $0x88] sm:$0xff]  }
 0x2ef   : > { %v26180_v52 = vpop.f32.mrf.mxu1  ;;  %22172 = vmatprep.subr.bf16.mxu1 %v22591_v35 }
 0x2f1   : > { %v26182_v33 = vpop.f32.mrf.mxu1 }
 0x2f2   : > { %22173 = vmatpush3.bf16.msra.mxu1 %v22591_v35 }
 0x2f3   : > { %v26187_v40 = vpop.f32.mrf.mxu1 }
 0x2f8   : > { %v22074_v45 = vpop.f32.mrf.mxu0 }
 0x2f9   : > { %v11847_v62 = vadd.f32 %v22074_v45, %v10381_v23  ;;  %v22589_v23 = vld [vmem:[%s28163_s4 + $0xb8] sm:$0xff]   ;;  %v22594_v45 = vld [vmem:[%s28163_s4 + $0xa0] sm:$0xff]  }
 0x2fa   : > { %v11775_v54 = vpop.f32.mrf.mxu0  ;;  %22232 = vmatprep.subr.bf16.mxu0 %v22589_v23 }
 0x2fb   : > { %v11845_v19 = vadd.f32 %v11775_v54, %v10379_v24  ;;  %v26193_v24 = vpop.f32.mrf.mxu1  ;;  %22233 = vmatpush3.bf16.msra.mxu0 %v22589_v23  ;;  %v28335_v54 = vld [vmem:[#allocation21_spill] sm:$0xff] }
 0x2fc   : > { %v22075_v16 = vpop.f32.mrf.mxu0  ;;  %22234 = vmatprep.subr.bf16.mxu0 %v22590_v31  ;;  %v28339_v23 = vld [vmem:[#allocation97_spill] sm:$0xff] }
 0x2fd   : > { %v11848_v34 = vadd.f32 %v22075_v16, %v10382_v53  ;;  %v28332_v53 = vld [vmem:[#allocation89_spill] sm:$0xff] }
 0x2fe   : > { %v8838_v11 = vadd.f32 %v28332_v53, %v6566_v46  ;;  %v11778_v7 = vpop.f32.mrf.mxu0 }
 0x2ff   : > { %22235 = vmatpush3.bf16.msra.mxu0 %v22590_v31 }
 0x300   : > { %v10380_v43 = vadd.f32 %v28333_v49, %v8838_v11  ;;  %22236 = vmatprep.subr.bf16.mxu0 %v22592_v6 }
 0x302   : > { %v11846_v2 = vadd.f32 %v11778_v7, %v10380_v43 }
 0x303   : > { %22237 = vmatpush3.bf16.msra.mxu0 %v22592_v6 }
 0x304   : > { %22238 = vmatprep.subr.bf16.mxu0 %v22594_v45 }
 0x307   : > { %22239 = vmatpush3.bf16.msra.mxu0 %v22594_v45  ;;  %v28342_v45 = vld [vmem:[#allocation59_spill] sm:$0xff] }
 0x30e   : > { %v22114_v20 = vpop.f32.mrf.mxu1 }
 0x30f   : > { %v26203_v3 = vadd.f32 %v22114_v20, %v11847_v62  ;;  %v22593_v62 = vld [vmem:[%s28163_s4 + $0x60] sm:$0xff]  }
 0x310   : > { %v14047_v8 = vpop.f32.mrf.mxu1  ;;  %22174 = vmatprep.subr.bf16.mxu1 %v22593_v62 }
 0x311   : > { %v26205_v41 = vadd.f32 %v14047_v8, %v11845_v19  ;;  %22175 = vmatpush3.bf16.msra.mxu1 %v22593_v62  ;;  %v28343_v62 = vld [vmem:[#allocation60_spill] sm:$0xff] }
 0x312   : > { %v22115_v10 = vpop.f32.mrf.mxu1 }
 0x313   : > { %v26210_v48 = vadd.f32 %v22115_v10, %v11848_v34  ;;  %v22596_v34 = vld [vmem:[%s28163_s4 + $0x58] sm:$0xff]  }
 0x314   : > { %v14050_v0 = vpop.f32.mrf.mxu1  ;;  %22176 = vmatprep.subr.bf16.mxu1 %v22596_v34 }
 0x315   : > { %v26215_v63 = vadd.f32 %v14050_v0, %v11846_v2  ;;  %22177 = vmatpush3.bf16.msra.mxu1 %v22596_v34  ;;  %v22598_v2 = vld [vmem:[%s28163_s4 + $0x50] sm:$0xff]  }
 0x316   : > { %v22078_v28 = vpop.f32.mrf.mxu0  ;;  %22178 = vmatprep.subr.bf16.mxu1 %v22598_v2 }
 0x317   : > { %v11851_v26 = vadd.f32 %v22078_v28, %v26135_v1  ;;  %v28334_v1 = vld [vmem:[#allocation20_spill] sm:$0xff]  ;;  %v22600_v28 = vld [vmem:[%s28163_s4 + $0x48] sm:$0xff]  }
 0x318   : > { %v11791_v17 = vpop.f32.mrf.mxu0  ;;  %v3530_v19 = vadd.f32 %v28335_v54, %v28334_v1  ;;  %v22602_v54 = vld [vmem:[%s28163_s4 + $0x40] sm:$0xff]  }
 0x319   : > { %v11849_v51 = vadd.f32 %v11791_v17, %v26141_v58  ;;  %v22595_v58 = vld [vmem:[%s28163_s4 + $0x98] sm:$0xff]   ;;  %22179 = vmatpush3.bf16.msra.mxu1 %v22598_v2  ;;  %v28346_v2 = vld [vmem:[#allocation4_spill] sm:$0xff] }
 0x31a   : > { %v22079_v27 = vpop.f32.mrf.mxu0  ;;  %22240 = vmatprep.subr.bf16.mxu0 %v22595_v58  ;;  %22180 = vmatprep.subr.bf16.mxu1 %v22600_v28 }
 0x31b   : > { %v11852_v4 = vadd.f32 %v22079_v27, %v26144_v39  ;;  %v28336_v39 = vld [vmem:[#allocation51_spill] sm:$0xff]  ;;  %22241 = vmatpush3.bf16.msra.mxu0 %v22595_v58 }
 0x31c   : > { %v5104_v16 = vadd.f32 %v28336_v39, %v3530_v19  ;;  %22242 = vmatprep.subr.bf16.mxu0 %v22597_v12  ;;  %v11794_v46 = vpop.f32.mrf.mxu0  ;;  %v28341_v27 = vld [vmem:[#allocation23_spill] sm:$0xff]  ;;  %v28344_v19 = vld [vmem:[#allocation104_spill] sm:$0xff] }
 0x31d   : > { %22181 = vmatpush3.bf16.msra.mxu1 %v22600_v28 }
 0x31e   : > { %v6570_v21 = vadd.f32 %v28337_v44, %v5104_v16  ;;  %22182 = vmatprep.subr.bf16.mxu1 %v22602_v54  ;;  %v28345_v16 = vld [vmem:[#allocation105_spill] sm:$0xff] }
 0x31f   : > { %22243 = vmatpush3.bf16.msra.mxu0 %v22597_v12 }
 0x320   : > { %v8842_v38 = vadd.f32 %v28338_v55, %v6570_v21  ;;  %22244 = vmatprep.subr.bf16.mxu0 %v22599_v36 }
 0x321   : > { %22183 = vmatpush3.bf16.msra.mxu1 %v22602_v54  ;;  %v28357_v54 = vld [vmem:[#allocation14_spill] sm:$0xff] }
 0x322   : > { %v10384_v53 = vadd.f32 %v28339_v23, %v8842_v38 }
 0x323   : > { %22245 = vmatpush3.bf16.msra.mxu0 %v22599_v36  ;;  %v28347_v36 = vld [vmem:[#allocation5_spill] sm:$0xff] }
 0x324   : > { %v11850_v20 = vadd.f32 %v11794_v46, %v10384_v53 }
 0x32e   : > { %v22118_v14 = vpop.f32.mrf.mxu1 }
 0x32f   : > { %v26244_v11 = vadd.f32 %v22118_v14, %v11851_v26  ;;  %v22601_v26 = vld [vmem:[%s28163_s4 + $0x80] sm:$0xff]  }
 0x330   : > { %v14063_v61 = vpop.f32.mrf.mxu1  ;;  %22246 = vmatprep.subr.bf16.mxu0 %v22601_v26 }
 0x331   : > { %v26246_v31 = vadd.f32 %v14063_v61, %v11849_v51  ;;  %22247 = vmatpush3.bf16.msra.mxu0 %v22601_v26  ;;  %v28350_v26 = vld [vmem:[#allocation27_spill] sm:$0xff] }
 0x332   : > { %v22119_v7 = vpop.f32.mrf.mxu1 }
 0x333   : > { %v26248_v49 = vadd.f32 %v22119_v7, %v11852_v4 }
 0x334   : > { %v14066_v43 = vpop.f32.mrf.mxu1 }
 0x335   : > { %v26250_v8 = vadd.f32 %v14066_v43, %v11850_v20 }
 0x337   : > { %v22082_v10 = vpop.f32.mrf.mxu0 }
 0x338   : > { %v11855_v0 = vadd.f32 %v22082_v10, %v26150_v60  ;;  %v28340_v60 = vld [vmem:[#allocation22_spill] sm:$0xff]  ;;  %v3487_v10 = vadd.f32 %v28347_v36, %v28346_v2  ;;  %v28366_v36 = vld [vmem:[#allocation37_spill] sm:$0xff] }
 0x339   : > { %v11807_v6 = vpop.f32.mrf.mxu0  ;;  %v3546_v4 = vadd.f32 %v28341_v27, %v28340_v60  ;;  %v28351_v60 = vld [vmem:[#allocation8_spill] sm:$0xff]  ;;  %v28352_v27 = vld [vmem:[#allocation9_spill] sm:$0xff] }
 0x33a   : > { %v11853_v35 = vadd.f32 %v11807_v6, %v26153_v25  ;;  %v28348_v6 = vld [vmem:[#allocation6_spill] sm:$0xff] }
 0x33b   : > { %v22083_v17 = vpop.f32.mrf.mxu0  ;;  %v5108_v25 = vadd.f32 %v28342_v45, %v3546_v4  ;;  %v3490_v4 = vadd.f32 %v28352_v27, %v28351_v60  ;;  %v28354_v45 = vld [vmem:[#allocation11_spill] sm:$0xff] }
 0x33c   : > { %v11856_v51 = vadd.f32 %v22083_v17, %v26157_v57  ;;  %v5093_v17 = vadd.f32 %v28350_v26, %v3487_v10  ;;  %v28368_v26 = vld [vmem:[#allocation30_spill] sm:$0xff]  ;;  %v28369_v27 = vld [vmem:[#allocation67_spill] sm:$0xff] }
 0x33d   : > { %v6574_v1 = vadd.f32 %v28343_v62, %v5108_v25  ;;  %v11810_v39 = vpop.f32.mrf.mxu0  ;;  %v28356_v62 = vld [vmem:[#allocation13_spill] sm:$0xff] }
 0x33f   : > { %v8846_v58 = vadd.f32 %v28344_v19, %v6574_v1  ;;  %v28358_v19 = vld [vmem:[#allocation15_spill] sm:$0xff] }
 0x341   : > { %v10388_v34 = vadd.f32 %v28345_v16, %v8846_v58  ;;  %v3495_v58 = vadd.f32 %v28358_v19, %v28357_v54  ;;  %v28360_v16 = vld [vmem:[#allocation16_spill] sm:$0xff] }
 0x343   : > { %v11854_v38 = vadd.f32 %v11810_v39, %v10388_v34  ;;  %v28361_v34 = vld [vmem:[#allocation17_spill] sm:$0xff]  ;;  %v5095_v10 = vadd.f32 %v28366_v36, %v3495_v58  ;;  %v28373_v58 = vld [vmem:[#allocation38_spill] sm:$0xff] }
 0x34c   : > { %v22122_v57 = vpop.f32.mrf.mxu1 }
 0x34d   : > { %v26276_v44 = vadd.f32 %v22122_v57, %v11855_v0  ;;  %v28359_v57 = vld [vmem:[#allocation29_spill] sm:$0xff] }
 0x34e   : > { %v14079_v21 = vpop.f32.mrf.mxu1 }
 0x34f   : > { %v26278_v55 = vadd.f32 %v14079_v21, %v11853_v35  ;;  %v28349_v35 = vld [vmem:[#allocation7_spill] sm:$0xff]  ;;  %v3498_v21 = vadd.f32 %v28361_v34, %v28360_v16  ;;  %v28375_v34 = vld [vmem:[#allocation41_spill] sm:$0xff] }
 0x350   : > { %v22123_v12 = vpop.f32.mrf.mxu1  ;;  %v3479_v28 = vadd.f32 %v28349_v35, %v28348_v6 }
 0x351   : > { %v26280_v14 = vadd.f32 %v22123_v12, %v11856_v51  ;;  %v28363_v12 = vld [vmem:[#allocation33_spill] sm:$0xff] }
 0x352   : > { %v14082_v46 = vpop.f32.mrf.mxu1  ;;  %v5091_v39 = vadd.f32 %v28359_v57, %v3479_v28  ;;  %v6561_v57 = vadd.f32 %v28373_v58, %v5095_v10  ;;  %v28381_v10 = vld [vmem:[#allocation81_spill] sm:$0xff]  ;;  %v28387_v58 = vld [vmem:[#allocation82_spill] sm:$0xff] }
 0x353   : > { %v26282_v53 = vadd.f32 %v14082_v46, %v11854_v38  ;;  %v28362_v38 = vld [vmem:[#allocation31_spill] sm:$0xff] }
 0x354   : > { %v22086_v23 = vpop.f32.mrf.mxu0  ;;  %v6557_v60 = vadd.f32 %v28368_v26, %v5091_v39 }
 0x355   : > { %v11859_v61 = vadd.f32 %v22086_v23, %v26162_v56  ;;  %v28353_v56 = vld [vmem:[#allocation10_spill] sm:$0xff]  ;;  %v28364_v23 = vld [vmem:[#allocation35_spill] sm:$0xff] }
 0x356   : > { %v11823_v20 = vpop.f32.mrf.mxu0  ;;  %v3482_v25 = vadd.f32 %v28354_v45, %v28353_v56  ;;  %v22604_v45 = vld [vmem:[%s28163_s4 + $0x38] sm:$0xff]  }
 0x357   : > { %v11857_v7 = vadd.f32 %v11823_v20, %v26166_v59  ;;  %v28355_v59 = vld [vmem:[#allocation12_spill] sm:$0xff]  ;;  %22200 = vmatprep.subr.bf16.mxu1 %v22604_v45  ;;  %v28384_v45 = vld [vmem:[#allocation74_spill] sm:$0xff] }
 0x358   : > { %v22087_v43 = vpop.f32.mrf.mxu0  ;;  %v3503_v1 = vadd.f32 %v28356_v62, %v28355_v59  ;;  %v5092_v46 = vadd.f32 %v28363_v12, %v3482_v25  ;;  %v28371_v59 = vld [vmem:[#allocation34_spill] sm:$0xff] }
 0x359   : > { %v28365_v43 = vld [vmem:[#allocation28_spill] sm:$0xff] }
 0x35a   : > { %v11826_v0 = vpop.f32.mrf.mxu0  ;;  %v5097_v20 = vadd.f32 %v28364_v23, %v3503_v1  ;;  %v6559_v2 = vadd.f32 %v28365_v43, %v5093_v17  ;;  %v28370_v17 = vld [vmem:[#allocation32_spill] sm:$0xff]  ;;  %v6558_v62 = vadd.f32 %v28371_v59, %v5092_v46  ;;  %v28377_v23 = vld [vmem:[#allocation73_spill] sm:$0xff] }
 0x35b   : > { %v26292_v51 = vadd.f32 %v11826_v0, %v26168_v30  ;;  %v5094_v30 = vadd.f32 %v28362_v38, %v3490_v4  ;;  %v28367_v0 = vld [vmem:[#allocation40_spill] sm:$0xff]  ;;  %v22603_v4 = vld [vmem:[%s28163_s4 + $0x138] sm:$0xff]  }
 0x35c   : > { %v5096_v6 = vadd.f32 %v28367_v0, %v3498_v21  ;;  %v8831_v28 = vadd.f32 %v28369_v27, %v6559_v2  ;;  %v28372_v1 = vld [vmem:[#allocation36_spill] sm:$0xff]  ;;  %22296 = vmatprep.subr.bf16.mxu0 %v22603_v4  ;;  %v28376_v38 = vld [vmem:[#allocation71_spill] sm:$0xff]  ;;  %v28380_v0 = vld [vmem:[#allocation77_spill] sm:$0xff] }
 0x35d   : > { %v6560_v25 = vadd.f32 %v28370_v17, %v5094_v30  ;;  %v6563_v54 = vadd.f32 %v28372_v1, %v5097_v20  ;;  %v8830_v30 = vadd.f32 %v28377_v23, %v6558_v62  ;;  %v28378_v46 = vld [vmem:[#allocation68_spill] sm:$0xff]  ;;  %v28379_v20 = vld [vmem:[#allocation75_spill] sm:$0xff] }
 0x35e   : > { %v6562_v21 = vadd.f32 %v28375_v34, %v5096_v6  ;;  %v10373_v2 = vadd.f32 %v28378_v46, %v8831_v28  ;;  %v28383_v6 = vld [vmem:[#allocation72_spill] sm:$0xff]  ;;  %v28386_v28 = vld [vmem:[#allocation78_spill] sm:$0xff] }
 0x35f   : > { %v22126_v35 = vpop.f32.mrf.mxu1  ;;  %v8832_v12 = vadd.f32 %v28376_v38, %v6560_v25  ;;  %v8835_v36 = vadd.f32 %v28379_v20, %v6563_v54  ;;  %v10372_v17 = vadd.f32 %v28384_v45, %v8830_v30  ;;  %v28385_v25 = vld [vmem:[#allocation76_spill] sm:$0xff]  ;;  %v22730_v54 = vmov 1983009808  }
 0x360   : > { %v26313_v56 = vadd.f32 %v22126_v35, %v11859_v61  ;;  %v28374_v61 = vld [vmem:[#allocation69_spill] sm:$0xff]  ;;  %v8833_v35 = vadd.f32 %v28380_v0, %v6561_v57  ;;  %v8834_v26 = vadd.f32 %v28381_v10, %v6562_v21  ;;  %v11839_v27 = vadd.f32 %v26054_v9, %v10373_v2 }
 0x361   : > { %v14095_v19 = vpop.f32.mrf.mxu1  ;;  %v8829_v39 = vadd.f32 %v28374_v61, %v6557_v60  ;;  %v28382_v60 = vld [vmem:[#allocation70_spill] sm:$0xff]  ;;  %v10374_v4 = vadd.f32 %v28383_v6, %v8832_v12  ;;  %v10377_v59 = vadd.f32 %v28385_v25, %v8835_v36  ;;  %v11838_v9 = vadd.f32 %v26093_v5, %v10372_v17 }
 0x362   : > { %v26326_v16 = vadd.f32 %v14095_v19, %v11857_v7  ;;  %v10375_v62 = vadd.f32 %v28386_v28, %v8833_v35  ;;  %v15782_v19 = vunpack.c.l.s4 %v22730_v54  ;;  %v10376_v57 = vadd.f32 %v28387_v58, %v8834_v26 }
 0x363   : > { %v22127_v43 = vpop.f32.mrf.mxu1  ;;  %v10371_v7 = vadd.f32 %v28382_v60, %v8829_v39  ;;  %v11840_v61 = vadd.f32 %v26066_v15, %v10374_v4  ;;  %v14111_v39 = vadd.f32 %v26147_v32, %v11839_v27  ;;  %v11843_v34 = vadd.f32 %v26113_v37, %v10377_v59  ;;  %v26364_v37 = vld [vmem:[%s28162_s3] ss:$0 sm:$0xff] }
 0x364   : > { %v11841_v21 = vadd.f32 %v26131_v47, %v10375_v62  ;;  %v11842_v38 = vadd.f32 %v26174_v29, %v10376_v57  ;;  %v15783_v30 = vunpack.c.0.s8 %v15782_v19  ;;  %v16163_v5 = vstv %s21061_s13  ;;  %v28388_v47 = vld [vmem:[#allocation3_spill] sm:$0xff]  ;;  %s20090_s13 = sshll.u32 %s28529_s14, 5 }
 0x365   : > { %v11837_v1 = vadd.f32 %v26061_v42, %v10371_v7  ;;  %v26356_v42 = vld [vmem:[%s28161_s2] ss:$0 sm:$0xff]  ;;  %v14112_v43 = vadd.f32 %v26176_v22, %v11840_v61  ;;  %v14110_v32 = vadd.f32 %v26178_v18, %v11838_v9  ;;  %v26367_v29 = vadd.s32 16, %v28388_v47  ;;  %v14098_v59 = vpop.f32.mrf.mxu1  ;;  %s27994_s14 = sadd.s32 %s20090_s13, %s20089_s27 }
 0x366   : > { %v26369_v2 = vadd.s32 1, %v16163_v5  ;;  %v26373_v20 = vadd.f32 %v26182_v33, %v11841_v21  ;;  %v26378_v18 = vadd.f32 %v26187_v40, %v26172_v50  ;;  %v26381_v0 = vadd.f32 %v26193_v24, %v11842_v38  ;;  %s20091_s12 = sshll.u32 %s27994_s14, 3 }
 0x367   : > { %v14109_v23 = vadd.f32 %v26170_v13, %v11837_v1  ;;  %v14115_v13 = vadd.f32 %v26180_v52, %v11843_v34  ;;  %vm16177_vm15 = vcmp.ge.s32.totalorder %v16163_v5, 0  ;;  %vm16187_vm0 = vcmp.lt.s32.totalorder %v16163_v5, 16  ;;  %s28031_s19 = scalar_lea.vmem %s28169_s10, %s20091_s12 }
 0x368   : > { %v26385_v52 = vsub.s32 %v15783_v30, %v28388_v47  ;;  %vm16242_vm1 = vcmp.le.s32.totalorder %v26367_v29, 16  ;;  %vm16178_vm2 = vcmp.ge.s32.totalorder %v26369_v2, 0  ;;  %vm16188_vm3 = vcmp.lt.s32.totalorder %v26369_v2, 16  ;;  %vm26393_vm4 = vmand %vm16177_vm15, %vm16187_vm0 }
 0x369   : > { %v26391_v40 = vadd.s32 2, %v16163_v5  ;;  %vm16207_vm5 = vcmp.ge.s32.totalorder %v28388_v47, 1  ;;  %v26400_v4 = vadd.s32 3, %v16163_v5  ;;  %v26402_v45 = vadd.s32 4, %v16163_v5  ;;  %vm16245_vm6 = vmand %vm26393_vm4, %vm16242_vm1 }
 0x36a   : > { %v26404_v17 = vadd.s32 5, %v16163_v5  ;;  %v26406_v25 = vadd.s32 6, %v16163_v5  ;;  %v26415_v58 = vadd.s32 7, %v16163_v5  ;;  %v26417_v57 = vadd.s32 9, %v16163_v5  ;;  %vm26440_vm9 = vmand %vm16178_vm2, %vm16188_vm3 }
 0x36b   : > { %v22146_v12 = vpop.f32.mrf.mxu0  ;;  %v26419_v61 = vadd.s32 8, %v16163_v5  ;;  %v26424_v38 = vadd.f32 %v14098_v59, %v26292_v51  ;;  %vm16179_vm7 = vcmp.ge.s32.totalorder %v26391_v40, 0  ;;  %vm16189_vm8 = vcmp.lt.s32.totalorder %v26391_v40, 16  ;;  %vm16213_vm10 = vmand %vm26440_vm9, %vm16207_vm5 }
 0x36c   : > { %v15653_v15 = vadd.f32 %v22146_v12, %v14111_v39  ;;  %vm26463_vm11 = vmand %vm26393_vm4, %vm16207_vm5  ;;  %vm16180_vm13 = vcmp.ge.s32.totalorder %v26400_v4, 0  ;;  %vm16190_vm14 = vcmp.lt.s32.totalorder %v26400_v4, 16  ;;  %vm16181_vm2 = vcmp.ge.s32.totalorder %v26402_v45, 0 }
 0x36d   : > { %v15557_v46 = vpop.f32.mrf.mxu0  ;;  %vm26485_vm12 = vmand %vm16179_vm7, %vm16189_vm8  ;;  %vm16191_vm3 = vcmp.lt.s32.totalorder %v26402_v45, 16 }
 0x36e   : > { %v15683_v22 = vmul.f32 %v26356_v42, %v15653_v15  ;;  %v15651_v36 = vadd.f32 %v15557_v46, %v14109_v23  ;;  %vm16251_vm15 = vmand %vm26485_vm12, %vm16242_vm1 }
 0x36f   : > { %v22147_v35 = vpop.f32.mrf.mxu0  ;;  %vm16248_vm0 = vmand %vm26440_vm9, %vm16242_vm1 }
 0x370   : > { %v15713_v10 = vadd.f32 %v26364_v37, %v15683_v22  ;;  %v15681_v33 = vmul.f32 %v26356_v42, %v15651_v36  ;;  %v15654_v26 = vadd.f32 %v22147_v35, %v14112_v43  ;;  %vm26563_vm7 = vmand %vm26485_vm12, %vm16207_vm5 }
 0x371   : > { %v15560_v50 = vpop.f32.mrf.mxu0  ;;  %vm26580_vm8 = vmand %vm16181_vm2, %vm16191_vm3 }
 0x372   : > { %v15736_v24 = vmax.f32 %v15713_v10, 0.0  ;;  %v15711_v7 = vadd.f32 %v26364_v37, %v15681_v33  ;;  %v15684_v27 = vmul.f32 %v26356_v42, %v15654_v26  ;;  %v15652_v6 = vadd.f32 %v15560_v50, %v14110_v32 }
 0x374   : > { %v15814_v28 = vcombine.high %v15736_v24, %v15736_v24  ;;  %v15821_v62 = vrot.slane %v15736_v24, %v26385_v52  ;;  %v15734_v1 = vmax.f32 %v15711_v7, 0.0  ;;  %v15714_v54 = vadd.f32 %v26364_v37, %v15684_v27 }
 0x375   : > { %v15682_v19 = vmul.f32 %v26356_v42, %v15652_v6 }
 0x376   : > { %v15828_v9 = vrot.slane %v15814_v28, %v26385_v52  ;;  %v15829_v39 = vcombine.high %v15821_v62, %v15821_v62  ;;  %v16313_v34 = vrot.slane %v15821_v62, %v26385_v52  ;;  %v15780_v21 = vcombine.high %v15734_v1, %v15734_v1 }
 0x377   : > { %v15787_v12 = vrot.slane %v15734_v1, %v26385_v52  ;;  %v15737_v23 = vmax.f32 %v15714_v54, 0.0  ;;  %v15712_v15 = vadd.f32 %v26364_v37, %v15682_v19 }
 0x378   : > { %v16314_v30 = vcombine.low %v15829_v39, %v15828_v9  ;;  %v16715_v43 = vsel %vm16245_vm6, %v16313_v34, 0.0  ;;  %v15794_v32 = vrot.slane %v15780_v21, %v26385_v52  ;;  %v15830_v5 = vcombine.high %v15828_v9, %v15828_v9  ;;  %v22150_v46 = vpop.f32.mrf.mxu0 }
 0x379   : > { %v21427_v22 = vpack.c.bf16 %v16715_v43, %v16715_v43  ;;  %v15795_v36 = vcombine.high %v15787_v12, %v15787_v12  ;;  %v15831_v35 = vcombine.high %v15737_v23, %v15737_v23  ;;  %v15838_v51 = vrot.slane %v15737_v23, %v26385_v52 }
 0x37a   : > { %v16322_v10 = vrot.slane %v16314_v30, %v26385_v52  ;;  %v15796_v33 = vcombine.high %v15794_v32, %v15794_v32  ;;  %v15735_v26 = vmax.f32 %v15712_v15, 0.0  ;;  %v15657_v50 = vadd.f32 %v22150_v46, %v14115_v13  ;;  %v15573_v24 = vpop.f32.mrf.mxu0 }
 0x37b   : > { %16875 = vst [vmem:[#allocation2 + $0x8] sm:$0x1] %v21427_v22  ;;  %v16273_v7 = vcombine.low %v15787_v12, %v15795_v36  ;;  %v26434_v27 = vrot.slane %v15831_v35, %v26385_v52  ;;  %v15846_v6 = vcombine.high %v15838_v51, %v15838_v51  ;;  %v16315_v28 = vcombine.low %v15830_v5, %v15838_v51 }
 0x37c   : > { %v16274_v62 = vcombine.low %v15794_v32, %v15796_v33  ;;  %v15797_v1 = vcombine.high %v15735_v26, %v15735_v26  ;;  %v15804_v13 = vrot.slane %v15735_v26, %v26385_v52  ;;  %v15687_v54 = vmul.f32 %v26356_v42, %v15657_v50  ;;  %v22151_v19 = vpop.f32.mrf.mxu0 }
 0x37d   : > { %v16281_v9 = vrot.slane %v16273_v7, %v26385_v52  ;;  %v16329_v39 = vrot.slane %v16315_v28, %v26385_v52  ;;  %v26449_v34 = vcombine.low %v15846_v6, %v26434_v27  ;;  %v15655_v2 = vadd.f32 %v15573_v24, %v26373_v20 }
 0x37e   : > { %v16288_v21 = vrot.slane %v16274_v62, %v26385_v52  ;;  %v15811_v12 = vrot.slane %v15797_v1, %v26385_v52  ;;  %v15812_v23 = vcombine.high %v15804_v13, %v15804_v13  ;;  %v15717_v15 = vadd.f32 %v26364_v37, %v15687_v54  ;;  %v15576_v30 = vpop.f32.mrf.mxu0 }
 0x37f   : > { %v16330_v20 = vcombine.low %v16322_v10, %v16329_v39  ;;  %v16339_v32 = vrot.slane %v26449_v34, %v26385_v52  ;;  %v15685_v5 = vmul.f32 %v26356_v42, %v15655_v2  ;;  %v15847_v46 = vcombine.high %v26434_v27, %v26434_v27 }
 0x380   : > { %v16289_v22 = vcombine.low %v16281_v9, %v16288_v21  ;;  %v15813_v36 = vcombine.high %v15811_v12, %v15811_v12  ;;  %v16290_v35 = vcombine.low %v15804_v13, %v15812_v23  ;;  %v15740_v51 = vmax.f32 %v15717_v15, 0.0 }
 0x381   : > { %v16716_v33 = vsel %vm16213_vm10, %v16330_v20, 0.0  ;;  %v15715_v26 = vadd.f32 %v26364_v37, %v15685_v5  ;;  %v15658_v50 = vadd.f32 %v22151_v19, %v26378_v18  ;;  %v15656_v24 = vadd.f32 %v15576_v30, %v26381_v0  ;;  %vm16257_vm10 = vmand %vm26580_vm8, %vm16242_vm1 }
 0x382   : > { %v16713_v10 = vsel %vm26463_vm11, %v16289_v22, 0.0  ;;  %v21428_v7 = vpack.c.bf16 %v16716_v33, %v16716_v33  ;;  %v16291_v6 = vcombine.low %v15811_v12, %v15813_v36  ;;  %v16298_v28 = vrot.slane %v16290_v35, %v26385_v52  ;;  %v26478_v62 = vld [vmem:[#allocation2 + $0x8] sm:$0x1] }
 0x383   : > { %v15882_v27 = vcombine.high %v15740_v51, %v15740_v51  ;;  %v15889_v1 = vrot.slane %v15740_v51, %v26385_v52  ;;  %v15738_v0 = vmax.f32 %v15715_v26, 0.0  ;;  %v15688_v13 = vmul.f32 %v26356_v42, %v15658_v50 }
 0x384   : > { %16876 = vst [vmem:[#allocation2 + $0xc] sm:$0xf] %v21428_v7  ;;  %v16305_v54 = vrot.slane %v16291_v6, %v26385_v52  ;;  %v15686_v19 = vmul.f32 %v26356_v42, %v15656_v24  ;;  %v17557_v9 = vrot.slane %v26478_v62, 5  ;;  %v16966_v40 = vshll.u32 %v26478_v62, 16  ;;  %v22605_v62 = vld [vmem:[%s28163_s4 + $0x130] sm:$0xff]  }
 0x385   : > { %v15896_v39 = vrot.slane %v15882_v27, %v26385_v52  ;;  %v15897_v2 = vcombine.high %v15889_v1, %v15889_v1  ;;  %v15848_v21 = vcombine.high %v15738_v0, %v15738_v0  ;;  %v15855_v12 = vrot.slane %v15738_v0, %v26385_v52  ;;  %v22154_v23 = vpop.f32.mrf.mxu0 }
 0x386   : > { %v16306_v15 = vcombine.low %v16298_v28, %v16305_v54  ;;  %v15718_v30 = vadd.f32 %v26364_v37, %v15688_v13  ;;  %v15716_v43 = vadd.f32 %v26364_v37, %v15686_v19  ;;  %v15661_v20 = vadd.f32 %v22154_v23, %v26203_v3 }
 0x387   : > { %v26505_v5 = vcombine.low %v15889_v1, %v15897_v2  ;;  %v16395_v22 = vrot.slane %v15896_v39, %v26385_v52  ;;  %v15862_v36 = vrot.slane %v15848_v21, %v26385_v52  ;;  %v15863_v35 = vcombine.high %v15855_v12, %v15855_v12  ;;  %v15589_v51 = vpop.f32.mrf.mxu0 }
 0x388   : > { %v16714_v33 = vsel %vm26393_vm4, %v16306_v15, 0.0  ;;  %v16332_v26 = vcombine.low %v15847_v46, %v15855_v12  ;;  %v15741_v50 = vmax.f32 %v15718_v30, 0.0  ;;  %v15898_v24 = vcombine.high %v15896_v39, %v15896_v39  ;;  %vm26537_vm4 = vmand %vm16180_vm13, %vm16190_vm14 }
 0x389   : > { %v21458_v7 = vpack.c.bf16 %v16714_v33, %v16713_v10  ;;  %v16387_v6 = vrot.slane %v26505_v5, %v26385_v52  ;;  %v16721_v28 = vsel %vm16251_vm15, %v16395_v22, 0.0  ;;  %v15864_v3 = vcombine.high %v15862_v36, %v15862_v36  ;;  %v22155_v27 = vpop.f32.mrf.mxu0  ;;  %vm16219_vm6 = vmand %vm26537_vm4, %vm16207_vm5 }
 0x38a   : > { %v21433_v1 = vpack.c.bf16 %v16721_v28, %v16721_v28  ;;  %v16346_v0 = vrot.slane %v16332_v26, %v26385_v52  ;;  %v16354_v60 = vrot.slane %v15863_v35, %v26385_v52  ;;  %v15899_v46 = vcombine.high %v15741_v50, %v15741_v50  ;;  %vm26661_vm15 = vmand %vm26580_vm8, %vm16207_vm5 }
 0x38b   : > { %21459 = vst [vmem:[#allocation2] sm:$0xff] %v21458_v7   ;;  %v16355_v13 = vcombine.low %v15862_v36, %v15864_v3  ;;  %v15906_v10 = vrot.slane %v15741_v50, %v26385_v52  ;;  %v15739_v54 = vmax.f32 %v15716_v43, 0.0  ;;  %v15691_v19 = vmul.f32 %v26356_v42, %v15661_v20  ;;  %v15592_v43 = vpop.f32.mrf.mxu0 }
 0x38c   : > { %16881 = vst [vmem:[#allocation2 + $0x20] sm:$0x1] %v21433_v1  ;;  %v16347_v39 = vcombine.low %v16339_v32, %v16346_v0  ;;  %v16718_v2 = vsel %vm16248_vm0, %v16354_v60, 0.0  ;;  %v15913_v21 = vrot.slane %v15899_v46, %v26385_v52  ;;  %v15659_v12 = vadd.f32 %v15589_v51, %v26205_v41 }
 0x38d   : > { %v16363_v23 = vrot.slane %v16355_v13, %v26385_v52  ;;  %v21430_v15 = vpack.c.bf16 %v16718_v2, %v16718_v2  ;;  %v15914_v30 = vcombine.high %v15906_v10, %v15906_v10  ;;  %v16396_v22 = vcombine.low %v15898_v24, %v15906_v10 }
 0x38e   : > { %v16717_v20 = vsel %vm26440_vm9, %v16347_v39, 0.0  ;;  %v15865_v34 = vcombine.high %v15739_v54, %v15739_v54  ;;  %v15872_v32 = vrot.slane %v15739_v54, %v26385_v52  ;;  %v15721_v36 = vadd.f32 %v26364_v37, %v15691_v19  ;;  %vm16254_vm9 = vmand %vm26537_vm4, %vm16242_vm1 }
 0x38f   : > { %v21429_v35 = vpack.c.bf16 %v16717_v20, %v16717_v20  ;;  %16878 = vst [vmem:[#allocation2 + $0x14] sm:$0x1] %v21430_v15  ;;  %v16397_v51 = vcombine.low %v15914_v30, %v15913_v21  ;;  %v16404_v33 = vrot.slane %v16396_v22, %v26385_v52  ;;  %v15689_v59 = vmul.f32 %v26356_v42, %v15659_v12 }
 0x390   : > { %v15879_v26 = vrot.slane %v15865_v34, %v26385_v52  ;;  %v15880_v50 = vcombine.high %v15872_v32, %v15872_v32  ;;  %v15744_v24 = vmax.f32 %v15721_v36, 0.0  ;;  %v15915_v7 = vcombine.high %v15913_v21, %v15913_v21 }
 0x391   : > { %16877 = vst [vmem:[#allocation2 + $0x10] sm:$0xf] %v21429_v35  ;;  %v16411_v28 = vrot.slane %v16397_v51, %v26385_v52  ;;  %v15719_v3 = vadd.f32 %v26364_v37, %v15689_v59  ;;  %v15662_v4 = vadd.f32 %v22155_v27, %v26210_v48  ;;  %v15660_v1 = vadd.f32 %v15592_v43, %v26215_v63  ;;  %v22158_v0 = vpop.f32.mrf.mxu0 }
 0x392   : > { %v15881_v60 = vcombine.high %v15879_v26, %v15879_v26  ;;  %v16356_v46 = vcombine.low %v15872_v32, %v15880_v50  ;;  %v15950_v13 = vcombine.high %v15744_v24, %v15744_v24  ;;  %v15957_v10 = vrot.slane %v15744_v24, %v26385_v52 }
 0x393   : > { %v16412_v54 = vcombine.low %v16404_v33, %v16411_v28  ;;  %v15742_v19 = vmax.f32 %v15719_v3, 0.0  ;;  %v15692_v39 = vmul.f32 %v26356_v42, %v15662_v4  ;;  %v15690_v2 = vmul.f32 %v26356_v42, %v15660_v1  ;;  %v26555_v48 = vpop.f32.mrf.mxu0 }
 0x394   : > { %v16370_v63 = vrot.slane %v16356_v46, %v26385_v52  ;;  %v16372_v27 = vcombine.low %v15879_v26, %v15881_v60  ;;  %v15964_v21 = vrot.slane %v15950_v13, %v26385_v52  ;;  %v15965_v12 = vcombine.high %v15957_v10, %v15957_v10 }
 0x395   : > { %v16722_v15 = vsel %vm16219_vm6, %v16412_v54, 0.0  ;;  %v15916_v22 = vcombine.high %v15742_v19, %v15742_v19  ;;  %v15923_v43 = vrot.slane %v15742_v19, %v26385_v52  ;;  %v15722_v20 = vadd.f32 %v26364_v37, %v15692_v39  ;;  %v22159_v34 = vpop.f32.mrf.mxu0 }
 0x396   : > { %v21434_v32 = vpack.c.bf16 %v16722_v15, %v16722_v15  ;;  %v16371_v36 = vcombine.low %v16363_v23, %v16370_v63  ;;  %v16380_v35 = vrot.slane %v16372_v27, %v26385_v52  ;;  %v15966_v51 = vcombine.high %v15964_v21, %v15964_v21 }
 0x397   : > { %v16454_v33 = vcombine.low %v15957_v10, %v15965_v12  ;;  %v15930_v59 = vrot.slane %v15916_v22, %v26385_v52  ;;  %v15931_v26 = vcombine.high %v15923_v43, %v15923_v43  ;;  %v16413_v50 = vcombine.low %v15915_v7, %v15923_v43 }
 0x398   : > { %16882 = vst [vmem:[#allocation2 + $0x24] sm:$0xf] %v21434_v32  ;;  %v16388_v24 = vcombine.low %v16380_v35, %v16387_v6  ;;  %v16719_v28 = vsel %vm26563_vm7, %v16371_v36, 0.0  ;;  %v16455_v3 = vcombine.low %v15964_v21, %v15966_v51  ;;  %v15745_v4 = vmax.f32 %v15722_v20, 0.0  ;;  %v15608_v6 = vpop.f32.mrf.mxu0 }
 0x399   : > { %v16462_v7 = vrot.slane %v16454_v33, %v26385_v52  ;;  %v15932_v1 = vcombine.high %v15930_v59, %v15930_v59  ;;  %v16414_v60 = vcombine.low %v15931_v26, %v15930_v59  ;;  %v16421_v5 = vrot.slane %v16413_v50, %v26385_v52 }
 0x39a   : > { %v16720_v46 = vsel %vm26485_vm12, %v16388_v24, 0.0  ;;  %v16469_v13 = vrot.slane %v16455_v3, %v26385_v52  ;;  %v15967_v45 = vcombine.high %v15745_v4, %v15745_v4  ;;  %v15974_v10 = vrot.slane %v15745_v4, %v26385_v52 }
 0x39b   : > { %v21463_v54 = vpack.c.bf16 %v16720_v46, %v16719_v28  ;;  %v16428_v19 = vrot.slane %v16414_v60, %v26385_v52  ;;  %v16436_v39 = vrot.slane %v15932_v1, %v26385_v52  ;;  %v15720_v18 = vadd.f32 %v26364_v37, %v15690_v2 }
 0x39c   : > { %v26601_v63 = vcombine.low %v16462_v7, %v16469_v13  ;;  %v26604_v27 = vrot.slane %v15967_v45, %v26385_v52  ;;  %v15982_v21 = vcombine.high %v15974_v10, %v15974_v10  ;;  %v16477_v12 = vrot.slane %v15974_v10, %v26385_v52  ;;  %v22162_v20 = vpop.f32.mrf.mxu0 }
 0x39d   : > { %21480 = vst [vmem:[#allocation2 + $0x18] sm:$0xff] %v21463_v54   ;;  %v16429_v15 = vcombine.low %v16421_v5, %v16428_v19  ;;  %v16724_v30 = vsel %vm16254_vm9, %v16436_v39, 0.0  ;;  %v15743_v22 = vmax.f32 %v15720_v18, 0.0  ;;  %v15665_v43 = vadd.f32 %v22158_v0, %v26244_v11 }
 0x39e   : > { %v21436_v32 = vpack.c.bf16 %v16724_v30, %v16724_v30  ;;  %v26609_v36 = vcombine.low %v15982_v21, %v26604_v27  ;;  %v16726_v2 = vsel %vm26580_vm8, %v26601_v63, 0.0  ;;  %v16727_v35 = vsel %vm16257_vm10, %v16477_v12, 0.0  ;;  %v15621_v0 = vpop.f32.mrf.mxu0 }
 0x39f   : > { %vm16183_vm11 = vcmp.ge.s32.totalorder %v26406_v25, 0  ;;  %vm16193_vm12 = vcmp.lt.s32.totalorder %v26406_v25, 16  ;;  %v16723_v51 = vsel %vm26537_vm4, %v16429_v15, 0.0  ;;  %v21439_v33 = vpack.c.bf16 %v16727_v35, %v16727_v35 }
 0x3a0   : > { %v15933_v59 = vcombine.high %v15743_v22, %v15743_v22  ;;  %v15940_v11 = vrot.slane %v15743_v22, %v26385_v52  ;;  %v21435_v26 = vpack.c.bf16 %v16723_v51, %v16723_v51  ;;  %16884 = vst [vmem:[#allocation2 + $0x2c] sm:$0x1] %v21436_v32  ;;  %v16486_v50 = vrot.slane %v26609_v36, %v26385_v52  ;;  %v26630_v1 = vpop.f32.mrf.mxu0  ;;  %vm26672_vm0 = vmand %vm16183_vm11, %vm16193_vm12 }
 0x3a1   : > { %v15695_v24 = vmul.f32 %v26356_v42, %v15665_v43  ;;  %v15663_v28 = vadd.f32 %v26555_v48, %v26246_v31  ;;  %vm16182_vm13 = vcmp.ge.s32.totalorder %v26404_v17, 0  ;;  %vm16192_vm14 = vcmp.lt.s32.totalorder %v26404_v17, 16  ;;  %16887 = vst [vmem:[#allocation2 + $0x38] sm:$0x1] %v21439_v33  ;;  %vm26702_vm3 = vmand %vm26672_vm0, %vm16242_vm1 }
 0x3a2   : > { %v15947_v41 = vrot.slane %v15933_v59, %v26385_v52  ;;  %v15948_v3 = vcombine.high %v15940_v11, %v15940_v11  ;;  %v15983_v4 = vcombine.high %v26604_v27, %v26604_v27  ;;  %v15666_v7 = vadd.f32 %v22159_v34, %v26248_v49  ;;  %16883 = vst [vmem:[#allocation2 + $0x28] sm:$0xf] %v21435_v26  ;;  %v26638_v54 = vpop.f32.mrf.mxu0  ;;  %vm26685_vm2 = vmand %vm16182_vm13, %vm16192_vm14 }
 0x3a3   : > { %v15725_v60 = vadd.f32 %v26364_v37, %v15695_v24  ;;  %v15693_v31 = vmul.f32 %v26356_v42, %v15663_v28  ;;  %v15664_v48 = vadd.f32 %v15608_v6, %v26250_v8  ;;  %v15669_v5 = vadd.f32 %v22162_v20, %v26276_v44  ;;  %vm16225_vm7 = vmand %vm26685_vm2, %vm16207_vm5 }
 0x3a4   : > { %v15949_v46 = vcombine.high %v15947_v41, %v15947_v41  ;;  %v16437_v13 = vcombine.low %v15940_v11, %v15948_v3  ;;  %v15696_v45 = vmul.f32 %v26356_v42, %v15666_v7  ;;  %v15667_v10 = vadd.f32 %v15621_v0, %v26278_v55  ;;  %v26646_v27 = vpop.f32.mrf.mxu0  ;;  %vm26731_vm10 = vmand %vm26685_vm2, %vm16242_vm1 }
 0x3a5   : > { %v15748_v49 = vmax.f32 %v15725_v60, 0.0  ;;  %v15723_v34 = vadd.f32 %v26364_v37, %v15693_v31  ;;  %v15694_v19 = vmul.f32 %v26356_v42, %v15664_v48  ;;  %v15699_v39 = vmul.f32 %v26356_v42, %v15669_v5  ;;  %vm26750_vm13 = vmand %vm26672_vm0, %vm16207_vm5 }
 0x3a6   : > { %v16438_v18 = vcombine.low %v15947_v41, %v15949_v46  ;;  %v16445_v8 = vrot.slane %v16437_v13, %v26385_v52  ;;  %v15726_v44 = vadd.f32 %v26364_v37, %v15696_v45  ;;  %v15697_v6 = vmul.f32 %v26356_v42, %v15667_v10  ;;  %v26655_v32 = vpop.f32.mrf.mxu0 }
 0x3a7   : > { %v16018_v21 = vcombine.high %v15748_v49, %v15748_v49  ;;  %v16025_v55 = vrot.slane %v15748_v49, %v26385_v52  ;;  %v15746_v12 = vmax.f32 %v15723_v34, 0.0  ;;  %v15724_v15 = vadd.f32 %v26364_v37, %v15694_v19 }
 0x3a8   : > { %v16452_v30 = vrot.slane %v16438_v18, %v26385_v52  ;;  %v15749_v22 = vmax.f32 %v15726_v44, 0.0  ;;  %v15729_v43 = vadd.f32 %v26364_v37, %v15699_v39  ;;  %v26653_v20 = vadd.f32 %v26364_v37, %v15697_v6  ;;  %v22167_v3 = vpop.f32.mrf.mxu0 }
 0x3a9   : > { %v16032_v51 = vrot.slane %v16018_v21, %v26385_v52  ;;  %v16033_v33 = vcombine.high %v16025_v55, %v16025_v55  ;;  %v15984_v59 = vcombine.high %v15746_v12, %v15746_v12  ;;  %v15991_v11 = vrot.slane %v15746_v12, %v26385_v52 }
 0x3aa   : > { %v16453_v0 = vcombine.low %v16445_v8, %v16452_v30  ;;  %v16035_v26 = vcombine.high %v15749_v22, %v15749_v22  ;;  %v16042_v24 = vrot.slane %v15749_v22, %v26385_v52  ;;  %v15747_v41 = vmax.f32 %v15724_v15, 0.0 }
 0x3ab   : > { %v16034_v7 = vcombine.high %v16032_v51, %v16032_v51  ;;  %v26676_v60 = vcombine.low %v16025_v55, %v16033_v33  ;;  %v15998_v31 = vrot.slane %v15984_v59, %v26385_v52  ;;  %v15999_v48 = vcombine.high %v15991_v11, %v15991_v11 }
 0x3ac   : > { %v16725_v5 = vsel %vm26661_vm15, %v16453_v0, 0.0  ;;  %v16479_v46 = vcombine.low %v15983_v4, %v15991_v11  ;;  %v26690_v13 = vrot.slane %v16035_v26, %v26385_v52  ;;  %v16050_v45 = vcombine.high %v16042_v24, %v16042_v24 }
 0x3ad   : > { %v21468_v10 = vpack.c.bf16 %v16726_v2, %v16725_v5  ;;  %v16534_v49 = vrot.slane %v26676_v60, %v26385_v52  ;;  %v16536_v34 = vcombine.low %v16032_v51, %v16034_v7  ;;  %v16495_v19 = vcombine.low %v15999_v48, %v15998_v31 }
 0x3ae   : > { %vm16185_vm4 = vcmp.ge.s32.totalorder %v26419_v61, 0  ;;  %vm16195_vm6 = vcmp.lt.s32.totalorder %v26419_v61, 16  ;;  %v16493_v23 = vrot.slane %v16479_v46, %v26385_v52  ;;  %v16537_v63 = vcombine.low %v16042_v24, %v16050_v45  ;;  %v22686_v61 = vld [vmem:[%s28162_s3] ss:$0 sm:$0xff] }
 0x3af   : > { %v16559_v2 = vrot.slane %v26690_v13, %v26385_v52  ;;  %v16000_v4 = vcombine.high %v15998_v31, %v15998_v31  ;;  %21481 = vst [vmem:[#allocation2 + $0x30] sm:$0xff] %v21468_v10   ;;  %v16544_v39 = vrot.slane %v16536_v34, %v26385_v52  ;;  %v16503_v18 = vrot.slane %v16495_v19, %v26385_v52 }
 0x3b0   : > { %v16001_v8 = vcombine.high %v15747_v41, %v15747_v41  ;;  %v16008_v44 = vrot.slane %v15747_v41, %v26385_v52  ;;  %vm16184_vm8 = vcmp.ge.s32.totalorder %v26415_v58, 0  ;;  %vm16194_vm9 = vcmp.lt.s32.totalorder %v26415_v58, 16 }
 0x3b1   : > { %v16494_v6 = vcombine.low %v16486_v50, %v16493_v23  ;;  %v16551_v21 = vrot.slane %v16537_v63, %v26385_v52  ;;  %v16733_v55 = vsel %vm26702_vm3, %v16559_v2, 0.0  ;;  %v15752_v12 = vmax.f32 %v15729_v43, 0.0 }
 0x3b2   : > { %v21445_v15 = vpack.c.bf16 %v16733_v55, %v16733_v55  ;;  %v16015_v30 = vrot.slane %v16001_v8, %v26385_v52  ;;  %v16016_v22 = vcombine.high %v16008_v44, %v16008_v44  ;;  %v16496_v35 = vcombine.low %v16000_v4, %v16008_v44 }
 0x3b3   : > { %v16728_v51 = vsel %vm16225_vm7, %v16494_v6, 0.0  ;;  %v16552_v33 = vcombine.low %v16544_v39, %v16551_v21  ;;  %v16086_v50 = vcombine.high %v15752_v12, %v15752_v12  ;;  %v16093_v59 = vrot.slane %v15752_v12, %v26385_v52  ;;  %v17525_v21 = vld [vmem:[#allocation2] sm:$0xe] }
 0x3b4   : > { %vm17549_vm11 = vcmask 1042432   ;;  %vm17550_vm12 = vcmask 1046532   ;;  %v21440_v43 = vpack.c.bf16 %v16728_v51, %v16728_v51  ;;  %16893 = vst [vmem:[#allocation2 + $0x50] sm:$0x1] %v21445_v15  ;;  %v16017_v11 = vcombine.high %v16015_v30, %v16015_v30 }
 0x3b5   : > { %v16510_v0 = vrot.slane %v16496_v35, %v26385_v52  ;;  %v16518_v26 = vrot.slane %v16016_v22, %v26385_v52  ;;  %v16732_v24 = vsel %vm26672_vm0, %v16552_v33, 0.0  ;;  %v16100_v41 = vrot.slane %v16086_v50, %v26385_v52  ;;  %vm26768_vm0 = vmand %vm16185_vm4, %vm16195_vm6 }
 0x3b6   : > { %v16101_v3 = vcombine.high %v16093_v59, %v16093_v59  ;;  %v15750_v7 = vmax.f32 %v26653_v20, 0.0  ;;  %16888 = vst [vmem:[#allocation2 + $0x3c] sm:$0xf] %v21440_v43  ;;  %v16519_v48 = vcombine.low %v16015_v30, %v16017_v11  ;;  %v16051_v46 = vcombine.high %v26690_v13, %v26690_v13  ;;  %vm26797_vm3 = vmand %vm26768_vm0, %vm16207_vm5 }
 0x3b7   : > { %v16511_v31 = vcombine.low %v16503_v18, %v16510_v0  ;;  %v16730_v5 = vsel %vm26731_vm10, %v16518_v26, 0.0  ;;  %v16102_v10 = vcombine.high %v16100_v41, %v16100_v41  ;;  %v15670_v13 = vadd.f32 %v26630_v1, %v26280_v14  ;;  %vm26812_vm4 = vmor %vm17549_vm11, %vm17550_vm12 }
 0x3b8   : > { %v21442_v45 = vpack.c.bf16 %v16730_v5, %v16730_v5  ;;  %v16601_v34 = vcombine.low %v16093_v59, %v16101_v3  ;;  %v16052_v19 = vcombine.high %v15750_v7, %v15750_v7  ;;  %v16527_v20 = vrot.slane %v16519_v48, %v26385_v52 }
 0x3b9   : > { %v16729_v23 = vsel %vm26685_vm2, %v16511_v31, 0.0  ;;  %v16059_v63 = vrot.slane %v15750_v7, %v26385_v52  ;;  %vm16186_vm14 = vcmp.ge.s32.totalorder %v26417_v57, 0  ;;  %vm16196_vm15 = vcmp.lt.s32.totalorder %v26417_v57, 16  ;;  %vm26781_vm2 = vmand %vm16184_vm8, %vm16194_vm9 }
 0x3ba   : > { %v21441_v2 = vpack.c.bf16 %v16729_v23, %v16729_v23  ;;  %16890 = vst [vmem:[#allocation2 + $0x44] sm:$0x1] %v21442_v45  ;;  %v16602_v28 = vcombine.low %v16100_v41, %v16102_v10  ;;  %v16609_v4 = vrot.slane %v16601_v34, %v26385_v52  ;;  %v16066_v39 = vrot.slane %v16052_v19, %v26385_v52  ;;  %vm16231_vm6 = vmand %vm26781_vm2, %vm16207_vm5 }
 0x3bb   : > { %v16535_v14 = vcombine.low %v16527_v20, %v16534_v49  ;;  %v16067_v1 = vcombine.high %v16059_v63, %v16059_v63  ;;  %v16560_v18 = vcombine.low %v16051_v46, %v16059_v63  ;;  %v15700_v8 = vmul.f32 %v26356_v42, %v15670_v13  ;;  %vm26840_vm7 = vmand %vm16186_vm14, %vm16196_vm15 }
 0x3bc   : > { %16889 = vst [vmem:[#allocation2 + $0x40] sm:$0xf] %v21441_v2  ;;  %v16616_v44 = vrot.slane %v16602_v28, %v26385_v52  ;;  %v15668_v6 = vadd.f32 %v26638_v54, %v26282_v53  ;;  %v16068_v60 = vcombine.high %v16066_v39, %v16066_v39  ;;  %v15673_v49 = vadd.f32 %v26646_v27, %v26313_v56  ;;  %v26801_v53 = vld [vmem:[#allocation2 + $0x4] sm:$0xf]  ;;  %vm26856_vm8 = vmand %vm26840_vm7, %vm16242_vm1 }
 0x3bd   : > { %v16731_v55 = vsel %vm26750_vm13, %v16535_v14, 0.0  ;;  %v16561_v12 = vcombine.low %v16067_v1, %v16066_v39  ;;  %v16568_v15 = vrot.slane %v16560_v18, %v26385_v52  ;;  %v15730_v58 = vadd.f32 %v26364_v37, %v15700_v8  ;;  %vm16269_vm9 = vmand %vm26768_vm0, %vm16242_vm1 }
 0x3be   : > { %v21473_v56 = vpack.c.bf16 %v16732_v24, %v16731_v55  ;;  %v26803_v54 = vcombine.low %v16609_v4, %v16616_v44  ;;  %v15698_v27 = vmul.f32 %v26356_v42, %v15668_v6  ;;  %v15703_v22 = vmul.f32 %v26356_v42, %v15673_v49  ;;  %vm26872_vm10 = vmand %vm26781_vm2, %vm16242_vm1 }
 0x3bf   : > { %v16575_v35 = vrot.slane %v16561_v12, %v26385_v52  ;;  %v15753_v51 = vmax.f32 %v15730_v58, 0.0  ;;  %v15671_v33 = vadd.f32 %v26655_v32, %v26326_v16  ;;  %v21140_v50 = vrot.slane %v17525_v21, 9  ;;  %v15640_v58 = vpop.f32.mrf.mxu0  ;;  %vm26961_vm13 = vmand %vm26840_vm7, %vm16207_vm5 }
 0x3c0   : > { %21482 = vst [vmem:[#allocation2 + $0x48] sm:$0xff] %v21473_v56   ;;  %v15728_v59 = vadd.f32 %v26364_v37, %v15698_v27  ;;  %v15733_v43 = vadd.f32 %v26364_v37, %v15703_v22  ;;  %v16737_v16 = vsel %vm26797_vm3, %v26803_v54, 0.0  ;;  %v17554_v32 = vrot.slane %v26801_v53, 5 }
 0x3c1   : > { %v16576_v11 = vcombine.low %v16568_v15, %v16575_v35  ;;  %v16103_v0 = vcombine.high %v15753_v51, %v15753_v51  ;;  %v16110_v26 = vrot.slane %v15753_v51, %v26385_v52  ;;  %v15701_v24 = vmul.f32 %v26356_v42, %v15671_v33 }
 0x3c2   : > { %v15751_v41 = vmax.f32 %v15728_v59, 0.0  ;;  %v15756_v3 = vmax.f32 %v15733_v43, 0.0  ;;  %v17555_v7 = vsel %vm26812_vm4, %v21140_v50, %v17554_v32  ;;  %v17556_v31 = vrot.slane %v17554_v32, 4  ;;  %v17526_v59 = vld [vmem:[#allocation2 + $0xc] sm:$0xe] }
 0x3c3   : > { %v16734_v48 = vsel %vm16231_vm6, %v16576_v11, 0.0  ;;  %v16117_v5 = vrot.slane %v16103_v0, %v26385_v52  ;;  %v16118_v46 = vcombine.high %v16110_v26, %v16110_v26  ;;  %v15731_v45 = vadd.f32 %v26364_v37, %v15701_v24  ;;  %v26887_v43 = vld [vmem:[#allocation2] sm:$0xf]  ;;  %v26892_v24 = vld [vmem:[#allocation2 + $0x10] sm:$0xf] }
 0x3c4   : > { %v21446_v10 = vpack.c.bf16 %v16734_v48, %v16734_v48  ;;  %v16069_v34 = vcombine.high %v15751_v41, %v15751_v41  ;;  %v16076_v19 = vrot.slane %v15751_v41, %v26385_v52  ;;  %v26834_v17 = vrot.slane %v15756_v3, %v26385_v52  ;;  %v26894_v41 = vld [vmem:[#allocation2 + $0x14] sm:$0x1] }
 0x3c5   : > { %v16119_v23 = vcombine.high %v16117_v5, %v16117_v5  ;;  %v16618_v63 = vcombine.low %v16110_v26, %v16118_v46  ;;  %v15754_v13 = vmax.f32 %v15731_v45, 0.0  ;;  %v17558_v37 = vsel %vm26812_vm4, %v17556_v31, %v17557_v9 }
 0x3c6   : > { %16894 = vst [vmem:[#allocation2 + $0x54] sm:$0xf] %v21446_v10  ;;  %v16083_v2 = vrot.slane %v16069_v34, %v26385_v52  ;;  %v16084_v28 = vcombine.high %v16076_v19, %v16076_v19  ;;  %v16577_v4 = vcombine.low %v16068_v60, %v16076_v19  ;;  %v16161_v57 = vcombine.high %v26834_v17, %v26834_v17 }
 0x3c7   : > { %v16619_v39 = vcombine.low %v16117_v5, %v16119_v23  ;;  %v16626_v14 = vrot.slane %v16618_v63, %v26385_v52  ;;  %v16120_v9 = vcombine.high %v15754_v13, %v15754_v13  ;;  %v16127_v18 = vrot.slane %v15754_v13, %v26385_v52  ;;  %v26918_v23 = vld [vmem:[#allocation2 + $0xc] sm:$0xf] }
 0x3c8   : > { %v16085_v8 = vcombine.high %v16083_v2, %v16083_v2  ;;  %v16578_v44 = vcombine.low %v16084_v28, %v16083_v2  ;;  %v16585_v6 = vrot.slane %v16577_v4, %v26385_v52  ;;  %v16682_v60 = vrot.slane %v16161_v57, %v26385_v52 }
 0x3c9   : > { %v16633_v49 = vrot.slane %v16619_v39, %v26385_v52  ;;  %v26877_v55 = vrot.slane %v16120_v9, %v26385_v52  ;;  %v16135_v12 = vcombine.high %v16127_v18, %v16127_v18  ;;  %v16641_v15 = vrot.slane %v16127_v18, %v26385_v52 }
 0x3ca   : > { %v16592_v56 = vrot.slane %v16578_v44, %v26385_v52  ;;  %v16600_v27 = vrot.slane %v16085_v8, %v26385_v52  ;;  %v16742_v29 = vsel %vm26856_vm8, %v16682_v60, 0.0  ;;  %v21164_v22 = vcombine.low %v17555_v7, %v17558_v37 }
 0x3cb   : > { %v16634_v35 = vcombine.low %v16626_v14, %v16633_v49  ;;  %v21454_v51 = vpack.c.bf16 %v16742_v29, %v16742_v29  ;;  %v26885_v33 = vcombine.low %v16135_v12, %v26877_v55  ;;  %v16739_v50 = vsel %vm16269_vm9, %v16641_v15, 0.0 }
 0x3cc   : > { %v16593_v32 = vcombine.low %v16585_v6, %v16592_v56  ;;  %v16736_v11 = vsel %vm26872_vm10, %v16600_v27, 0.0  ;;  %v21451_v0 = vpack.c.bf16 %v16739_v50, %v16739_v50  ;;  %22248 = vmatprep.mubr.bf16.mxu0 %v21164_v22  ;;  %v15672_v26 = vadd.f32 %v15640_v58, %v26424_v38  ;;  %v22687_v50 = vld [vmem:[%s28163_s4 + $0x138] sm:$0xff]  }
 0x3cd   : > { %vm16943_vm1 = vsmask.f32 3328  ;;  %vm16944_vm11 = vsmask.f32 7440  ;;  %v21448_v3 = vpack.c.bf16 %v16736_v11, %v16736_v11  ;;  %16902 = vst [vmem:[#allocation2 + $0x74] sm:$0x1] %v21454_v51  ;;  %v16650_v7 = vrot.slane %v26885_v33, %v26385_v52 }
 0x3ce   : > { %v16738_v31 = vsel %vm26768_vm0, %v16634_v35, 0.0  ;;  %v16136_v48 = vcombine.high %v26877_v55, %v26877_v55  ;;  %v16735_v38 = vsel %vm26781_vm2, %v16593_v32, 0.0  ;;  %16899 = vst [vmem:[#allocation2 + $0x68] sm:$0x1] %v21451_v0  ;;  %v15702_v46 = vmul.f32 %v26356_v42, %v15672_v26  ;;  %vm26938_vm12 = vmor %vm16943_vm1, %vm16944_vm11  ;;  %v22607_v32 = vld [vmem:[%s28163_s4 + $0x128] sm:$0xff]  }
 0x3cf   : > { %v21478_v5 = vpack.c.bf16 %v16738_v31, %v16737_v16  ;;  %v21141_v45 = vrot.slane %v17526_v59, 9  ;;  %v21447_v10 = vpack.c.bf16 %v16735_v38, %v16735_v38  ;;  %16896 = vst [vmem:[#allocation2 + $0x5c] sm:$0x1] %v21448_v3  ;;  %v17561_v25 = vrot.slane %v26892_v24, 5  ;;  %v26947_v59 = vld [vmem:[#allocation2 + $0x20] sm:$0x1] }
 0x3d0   : > { %v17564_v34 = vrot.slane %v26894_v41, 5  ;;  %v16947_v19 = vshrl.u32 %v26887_v43, 16  ;;  %v15732_v30 = vadd.f32 %v22686_v61, %v15702_v46  ;;  %v16950_v54 = vshll.u32 %v26887_v43, 16  ;;  %v26955_v31 = vld [vmem:[#allocation2 + $0x1c] sm:$0xf] }
 0x3d1   : > { %21483 = vst [vmem:[#allocation2 + $0x60] sm:$0xff] %v21478_v5   ;;  %v16956_v16 = vshll.u32 %v26801_v53, 16  ;;  %v16960_v42 = vshrl.u32 %v26801_v53, 16  ;;  %16895 = vst [vmem:[#allocation2 + $0x58] sm:$0xf] %v21447_v10  ;;  %v17562_v63 = vsel %vm26812_vm4, %v21141_v45, %v17561_v25  ;;  %v17563_v13 = vrot.slane %v17561_v25, 4 }
 0x3d2   : > { %v16949_v37 = vrot.slane %v16947_v19, 4  ;;  %v16968_v2 = vrot.slane %v16966_v40, 5  ;;  %v15755_v28 = vmax.f32 %v15732_v30, 0.0  ;;  %v16952_v4 = vrot.slane %v16950_v54, 5  ;;  %v26967_v25 = vld [vmem:[#allocation2 + $0x2c] sm:$0x1] }
 0x3d3   : > { %v16958_v57 = vrot.slane %v16956_v16, 5  ;;  %v16962_v39 = vrot.slane %v16960_v42, 4  ;;  %v17565_v14 = vsel %vm26812_vm4, %v17563_v13, %v17564_v34  ;;  %v16971_v1 = vshrl.u32 %v26918_v23, 16  ;;  %v26969_v34 = vld [vmem:[#allocation2 + $0x18] sm:$0xf] }
 0x3d4   : > { %v16974_v9 = vshll.u32 %v26918_v23, 16  ;;  %v16980_v18 = vshll.u32 %v26892_v24, 16  ;;  %v16137_v8 = vcombine.high %v15755_v28, %v15755_v28  ;;  %v16144_v44 = vrot.slane %v15755_v28, %v26385_v52  ;;  %v26981_v13 = vld [vmem:[#allocation2 + $0x28] sm:$0xf] }
 0x3d5   : > { %v21165_v6 = vcombine.low %v17562_v63, %v17565_v14  ;;  %v16953_v60 = vor.u32 %v16952_v4, %v16949_v37  ;;  %v16963_v40 = vor.u32 %v16962_v39, %v16958_v57  ;;  %v16973_v49 = vrot.slane %v16971_v1, 4 }
 0x3d6   : > { %v16976_v21 = vrot.slane %v16974_v9, 5  ;;  %v26933_v55 = vrot.slane %v16980_v18, 5  ;;  %v16151_v12 = vrot.slane %v16137_v8, %v26385_v52  ;;  %v16152_v15 = vcombine.high %v16144_v44, %v16144_v44 }
 0x3d7   : > { %v16643_v58 = vcombine.low %v16136_v48, %v16144_v44  ;;  %22249 = vmatmul.mubr.bf16.vlgmr.msra.gmra.mxu0 %v21165_v6  ;;  %v16954_v56 = vrot.slane %v16953_v60, 4  ;;  %v16964_v29 = vrot.slane %v16963_v40, 4  ;;  %v16984_v35 = vshrl.u32 %v26892_v24, 16  ;;  %v17528_v48 = vld [vmem:[#allocation2 + $0x24] sm:$0xe] }
 0x3d8   : > { %v16977_v22 = vor.u32 %v16976_v21, %v16973_v49  ;;  %v16990_v51 = vshll.u32 %v26894_v41, 16  ;;  %22297 = vmatpush3.bf16.msra.mxu0 %v22687_v50  ;;  %v16153_v11 = vcombine.high %v16151_v12, %v16151_v12  ;;  %v16659_v26 = vcombine.low %v16152_v15, %v16151_v12  ;;  %v17527_v41 = vld [vmem:[#allocation2 + $0x18] sm:$0xe]  ;;  %v27001_v60 = vld [vmem:[#allocation2 + $0x24] sm:$0xf]  ;;  %v22608_v50 = vld [vmem:[%s28163_s4 + $0x28] sm:$0xff]  }
 0x3d9   : > { %v16657_v0 = vrot.slane %v16643_v58, %v26385_v52  ;;  %v16959_v3 = vsel %vm26938_vm12, %v16954_v56, %v16958_v57  ;;  %22298 = vmatprep.subr.bf16.mxu0 %v22605_v62  ;;  %v16969_v5 = vsel %vm26938_vm12, %v16964_v29, %v16968_v2  ;;  %v16986_v45 = vrot.slane %v16984_v35, 4  ;;  %v22609_v2 = vld [vmem:[%s28163_s4 + $0x120] sm:$0xff]   ;;  %v22611_v12 = vld [vmem:[%s28163_s4 + $0x118] sm:$0xff]  }
 0x3da   : > { %v16978_v46 = vrot.slane %v16977_v22, 4  ;;  %v16992_v10 = vrot.slane %v16990_v51, 5  ;;  %v16660_v19 = vcombine.low %v16153_v11, %v26834_v17  ;;  %v16667_v61 = vrot.slane %v16659_v26, %v26385_v52  ;;  %v22688_v11 = vld [vmem:[%s28163_s4 + $0x38] sm:$0xff]  }
 0x3db   : > { %v16658_v47 = vcombine.low %v16650_v7, %v16657_v0  ;;  %v21108_v30 = vcombine.low %v16959_v3, %v16969_v5  ;;  %v16987_v16 = vor.u32 %v16986_v45, %v26933_v55  ;;  %v21142_v42 = vrot.slane %v17527_v41, 9  ;;  %v27026_v3 = vld [vmem:[#allocation2 + $0x34] sm:$0xf]  ;;  %v17529_v41 = vld [vmem:[#allocation2 + $0x30] sm:$0xe] }
 0x3dc   : > { %v16983_v54 = vsel %vm26938_vm12, %v16978_v46, %v26933_v55  ;;  %v17568_v63 = vrot.slane %v26955_v31, 5  ;;  %22299 = vmatpush3.bf16.msra.mxu0 %v22605_v62  ;;  %v16674_v33 = vrot.slane %v16660_v19, %v26385_v52  ;;  %v17571_v7 = vrot.slane %v26947_v59, 5  ;;  %v22606_v55 = vld [vmem:[%s28163_s4 + $0x30] sm:$0xff]   ;;  %v27028_v45 = vld [vmem:[#allocation2 + $0x38] sm:$0x1] }
 0x3dd   : > { %v16740_v17 = vsel %vm26961_vm13, %v16658_v47, 0.0  ;;  %22184 = vmatprep.mubr.bf16.mxu1 %v21108_v30  ;;  %v21143_v37 = vrot.slane %v17528_v48, 9  ;;  %22300 = vmatprep.subr.bf16.mxu0 %v22607_v32  ;;  %v16988_v4 = vrot.slane %v16987_v16, 4  ;;  %v17575_v52 = vrot.slane %v26981_v13, 5 }
 0x3de   : > { %v21452_v28 = vpack.c.bf16 %v16740_v17, %v16740_v17  ;;  %v17569_v57 = vsel %vm26812_vm4, %v21142_v42, %v17568_v63  ;;  %v17570_v39 = vrot.slane %v17568_v63, 4  ;;  %v16675_v14 = vcombine.low %v16667_v61, %v16674_v33 }
 0x3df   : > { %v17578_v1 = vrot.slane %v26967_v25, 5  ;;  %v16995_v9 = vshrl.u32 %v26969_v34, 16  ;;  %v16993_v18 = vsel %vm26938_vm12, %v16988_v4, %v16992_v10  ;;  %v16998_v44 = vshll.u32 %v26969_v34, 16  ;;  %v22613_v10 = vld [vmem:[%s28163_s4 + $0x110] sm:$0xff]  }
 0x3e0   : > { %16900 = vst [vmem:[#allocation2 + $0x6c] sm:$0xf] %v21452_v28  ;;  %v17572_v8 = vsel %vm26812_vm4, %v17570_v39, %v17571_v7  ;;  %v17004_v6 = vshll.u32 %v26955_v31, 16  ;;  %22301 = vmatpush3.bf16.msra.mxu0 %v22607_v32  ;;  %v16741_v62 = vsel %vm26840_vm7, %v16675_v14, 0.0  ;;  %v21109_v40 = vcombine.low %v16983_v54, %v16993_v18  ;;  %v27034_v54 = vld [vmem:[#allocation2 + $0x30] sm:$0xf] }
 0x3e1   : > { %v21166_v49 = vcombine.low %v17569_v57, %v17572_v8  ;;  %v17576_v21 = vsel %vm26812_vm4, %v21143_v37, %v17575_v52  ;;  %22302 = vmatprep.subr.bf16.mxu0 %v22609_v2  ;;  %v21453_v15 = vpack.c.bf16 %v16741_v62, %v16741_v62  ;;  %v17577_v58 = vrot.slane %v17575_v52, 4  ;;  %v22615_v14 = vld [vmem:[%s28163_s4 + $0x108] sm:$0xff]   ;;  %v17530_v8 = vld [vmem:[#allocation2 + $0x3c] sm:$0xe] }
 0x3e2   : > { %v16997_v56 = vrot.slane %v16995_v9, 4  ;;  %v17000_v29 = vrot.slane %v16998_v44, 5  ;;  %22185 = vmatmul.mubr.bf16.vlgmr.msra.gmra.mxu1 %v21109_v40  ;;  %v17006_v20 = vrot.slane %v17004_v6, 5  ;;  %v17008_v22 = vshrl.u32 %v26955_v31, 16 }
 0x3e3   : > { %22252 = vmatprep.mubr.bf16.mxu0 %v21166_v49  ;;  %v17014_v35 = vshll.u32 %v26947_v59, 16  ;;  %v17019_v51 = vshrl.u32 %v27001_v60, 16  ;;  %16901 = vst [vmem:[#allocation2 + $0x70] sm:$0xf] %v21453_v15  ;;  %v17579_v32 = vsel %vm26812_vm4, %v17577_v58, %v17578_v1  ;;  %22201 = vmatpush3.bf16.msra.mxu1 %v22688_v11  ;;  %v17022_v26 = vshll.u32 %v27001_v60, 16 }
 0x3e4   : > { %v17001_v0 = vor.u32 %v17000_v29, %v16997_v56  ;;  %v17028_v59 = vshll.u32 %v26981_v13, 16  ;;  %22303 = vmatpush3.bf16.msra.mxu0 %v22609_v2  ;;  %v21167_v48 = vcombine.low %v17576_v21, %v17579_v32  ;;  %v17010_v38 = vrot.slane %v17008_v22, 4  ;;  %22202 = vmatprep.subr.bf16.mxu1 %v22606_v55  ;;  %v27057_v49 = vld [vmem:[#allocation2 + $0x40] sm:$0xf]  ;;  %v16940_v58 = vld [vmem:[#allocation2 + $0x44] sm:$0x1] }
 0x3e5   : > { %v17016_v5 = vrot.slane %v17014_v35, 5  ;;  %v17021_v46 = vrot.slane %v17019_v51, 4  ;;  %22304 = vmatprep.subr.bf16.mxu0 %v22611_v12  ;;  %v17024_v19 = vrot.slane %v17022_v26, 5  ;;  %v17032_v30 = vshrl.u32 %v26981_v13, 16  ;;  %v22612_v56 = vld [vmem:[%s28163_s4 + $0x18] sm:$0xff]   ;;  %v22617_v26 = vld [vmem:[%s28163_s4 + $0x100] sm:$0xff]  }
 0x3e6   : > { %v17002_v47 = vrot.slane %v17001_v0, 4  ;;  %v17030_v61 = vrot.slane %v17028_v59, 5  ;;  %22253 = vmatmul.mubr.bf16.gmra.mxu0 %v21167_v48  ;;  %v17011_v16 = vor.u32 %v17010_v38, %v17006_v20  ;;  %v17038_v42 = vshll.u32 %v26967_v25, 16  ;;  %v22610_v25 = vld [vmem:[%s28163_s4 + $0x20] sm:$0xff]   ;;  %v27064_v51 = vld [vmem:[#allocation2 + $0x3c] sm:$0xf] }
 0x3e7   : > { %v21144_v63 = vrot.slane %v17529_v41, 9  ;;  %v17582_v33 = vrot.slane %v27026_v3, 5  ;;  %v17025_v7 = vor.u32 %v17024_v19, %v17021_v46  ;;  %v17034_v37 = vrot.slane %v17032_v30, 4  ;;  %22203 = vmatpush3.bf16.msra.mxu1 %v22606_v55  ;;  %v22614_v19 = vld [vmem:[%s28163_s4 + $0x10] sm:$0xff]  }
 0x3e8   : > { %v17007_v17 = vsel %vm26938_vm12, %v17002_v47, %v17006_v20  ;;  %v17585_v2 = vrot.slane %v27028_v45, 5  ;;  %22305 = vmatpush3.bf16.msra.mxu0 %v22611_v12  ;;  %v17012_v28 = vrot.slane %v17011_v16, 4  ;;  %v17040_v4 = vrot.slane %v17038_v42, 5  ;;  %22204 = vmatprep.subr.bf16.mxu1 %v22608_v50 }
 0x3e9   : > { %v17583_v57 = vsel %vm26812_vm4, %v21144_v63, %v17582_v33  ;;  %v17584_v39 = vrot.slane %v17582_v33, 4  ;;  %22306 = vmatprep.subr.bf16.mxu0 %v22613_v10  ;;  %v17026_v52 = vrot.slane %v17025_v7, 4  ;;  %v17035_v1 = vor.u32 %v17034_v37, %v17030_v61  ;;  %v27083_v63 = vld [vmem:[#allocation2 + $0x4c] sm:$0xf] }
 0x3ea   : > { %v17043_v9 = vshrl.u32 %v27034_v54, 16  ;;  %v17046_v18 = vshll.u32 %v27034_v54, 16  ;;  %v17017_v44 = vsel %vm26938_vm12, %v17012_v28, %v17016_v5  ;;  %v17052_v62 = vshll.u32 %v27026_v3, 16  ;;  %v27091_v28 = vld [vmem:[%s28163_s4 + $0x1b8] sm:$0xff]  }
 0x3eb   : > { %v17586_v6 = vsel %vm26812_vm4, %v17584_v39, %v17585_v2  ;;  %v17056_v40 = vshrl.u32 %v27026_v3, 16  ;;  %v21110_v21 = vcombine.low %v17007_v17, %v17017_v44  ;;  %v17031_v55 = vsel %vm26938_vm12, %v17026_v52, %v17030_v61  ;;  %22205 = vmatpush3.bf16.msra.mxu1 %v22608_v50  ;;  %v17531_v2 = vld [vmem:[#allocation2 + $0x48] sm:$0xe] }
 0x3ec   : > { %v17036_v12 = vrot.slane %v17035_v1, 4  ;;  %v21168_v15 = vcombine.low %v17583_v57, %v17586_v6  ;;  %22307 = vmatpush3.bf16.msra.mxu0 %v22613_v10  ;;  %v17045_v29 = vrot.slane %v17043_v9, 4  ;;  %v17048_v20 = vrot.slane %v17046_v18, 5  ;;  %22206 = vmatprep.subr.bf16.mxu1 %v22610_v25 }
 0x3ed   : > { %v17054_v22 = vrot.slane %v17052_v62, 5  ;;  %v17058_v35 = vrot.slane %v17056_v40, 4  ;;  %22308 = vmatprep.subr.bf16.mxu0 %v22615_v14  ;;  %22188 = vmatprep.mubr.bf16.mxu1 %v21110_v21  ;;  %v17062_v50 = vshll.u32 %v27028_v45, 16  ;;  %v21145_v11 = vrot.slane %v17530_v8, 9  ;;  %v27076_v45 = vld [vmem:[#allocation2 + $0x50] sm:$0x1] }
 0x3ee   : > { %v17041_v32 = vsel %vm26938_vm12, %v17036_v12, %v17040_v4  ;;  %22256 = vmatprep.mubr.bf16.mxu0 %v21168_v15  ;;  %v17589_v0 = vrot.slane %v27057_v49, 5  ;;  %v17049_v41 = vor.u32 %v17048_v20, %v17045_v29  ;;  %v17592_v38 = vrot.slane %v16940_v58, 5  ;;  %v22616_v40 = vld [vmem:[%s28163_s4 + $0x8] sm:$0xff]  }
 0x3ef   : > { %v21111_v59 = vcombine.low %v17031_v55, %v17041_v32  ;;  %v17059_v48 = vor.u32 %v17058_v35, %v17054_v22  ;;  %v17064_v5 = vrot.slane %v17062_v50, 5  ;;  %22207 = vmatpush3.bf16.msra.mxu1 %v22610_v25  ;;  %v17067_v47 = vshrl.u32 %v27064_v51, 16  ;;  %v22619_v35 = vld [vmem:[%s28163_s4] sm:$0xff]  }
 0x3f0   : > { %v17590_v46 = vsel %vm26812_vm4, %v21145_v11, %v17589_v0  ;;  %v17591_v10 = vrot.slane %v17589_v0, 4  ;;  %22309 = vmatpush3.bf16.msra.mxu0 %v22615_v14  ;;  %v17050_v61 = vrot.slane %v17049_v41, 4  ;;  %v17070_v16 = vshll.u32 %v27064_v51, 16  ;;  %22208 = vmatprep.subr.bf16.mxu1 %v22612_v56  ;;  %v27097_v14 = vld [vmem:[#allocation2 + $0x48] sm:$0xf] }
 0x3f1   : > { %22189 = vmatmul.mubr.bf16.gmra.mxu1 %v21111_v59  ;;  %v17060_v30 = vrot.slane %v17059_v48, 4  ;;  %v17076_v42 = vshll.u32 %v27057_v49, 16  ;;  %v17069_v17 = vrot.slane %v17067_v47, 4  ;;  %v17080_v7 = vshrl.u32 %v27057_v49, 16  ;;  %22310 = vmatprep.subr.bf16.mxu0 %v22617_v26 }
 0x3f2   : > { %v17593_v33 = vsel %vm26812_vm4, %v17591_v10, %v17592_v38  ;;  %v17086_v37 = vshll.u32 %v16940_v58, 16  ;;  %v17055_v4 = vsel %vm26938_vm12, %v17050_v61, %v17054_v22  ;;  %v17072_v25 = vrot.slane %v17070_v16, 5  ;;  %v17532_v22 = vld [vmem:[#allocation2 + $0x54] sm:$0xe]  ;;  %v27123_v16 = vld [vmem:[#allocation2 + $0x10] sm:$0xf] }
 0x3f3   : > { %v17065_v57 = vsel %vm26938_vm12, %v17060_v30, %v17064_v5  ;;  %v21169_v39 = vcombine.low %v17590_v46, %v17593_v33  ;;  %v17078_v1 = vrot.slane %v17076_v42, 5  ;;  %v17082_v9 = vrot.slane %v17080_v7, 4  ;;  %22209 = vmatpush3.bf16.msra.mxu1 %v22612_v56  ;;  %v16942_v5 = vld [vmem:[#allocation2 + $0x5c] sm:$0x1]  ;;  %v18061_v46 = vld [vmem:[#allocation2 + $0xc] sm:$0xf] }
 0x3f4   : > { %v21112_v52 = vcombine.low %v17055_v4, %v17065_v57  ;;  %v17088_v18 = vrot.slane %v17086_v37, 5  ;;  %22311 = vmatpush3.bf16.msra.mxu0 %v22617_v26  ;;  %v17073_v8 = vor.u32 %v17072_v25, %v17069_v17  ;;  %v21146_v44 = vrot.slane %v17531_v2, 9  ;;  %22210 = vmatprep.subr.bf16.mxu1 %v22614_v19  ;;  %v27114_v26 = vld [vmem:[#allocation2 + $0x58] sm:$0xf] }
 0x3f5   : > { %22257 = vmatmul.mubr.bf16.gmra.mxu0 %v21169_v39  ;;  %v17596_v6 = vrot.slane %v27083_v63, 5  ;;  %v17599_v62 = vrot.slane %v27076_v45, 5  ;;  %v17083_v21 = vor.u32 %v17082_v9, %v17078_v1  ;;  %v17091_v55 = vshrl.u32 %v27097_v14, 16  ;;  %22360 = vmatprep.subr.bf16.mxu0 %v27091_v28 }
 0x3f6   : > { %22192 = vmatprep.mubr.bf16.mxu1 %v21112_v52  ;;  %v17094_v12 = vshll.u32 %v27097_v14, 16  ;;  %v17100_v15 = vshll.u32 %v27083_v63, 16  ;;  %v17074_v58 = vrot.slane %v17073_v8, 4  ;;  %v17104_v20 = vshrl.u32 %v27083_v63, 16 }
 0x3f7   : > { %v17597_v56 = vsel %vm26812_vm4, %v21146_v44, %v17596_v6  ;;  %v17598_v29 = vrot.slane %v17596_v6, 4  ;;  %v17084_v32 = vrot.slane %v17083_v21, 4  ;;  %v17093_v50 = vrot.slane %v17091_v55, 4  ;;  %22211 = vmatpush3.bf16.msra.mxu1 %v22614_v19  ;;  %v27139_v6 = vld [vmem:[#allocation2 + $0x54] sm:$0xf] }
 0x3f8   : > { %v17096_v11 = vrot.slane %v17094_v12, 5  ;;  %v17102_v0 = vrot.slane %v17100_v15, 5  ;;  %v17079_v59 = vsel %vm26938_vm12, %v17074_v58, %v17078_v1  ;;  %v17106_v48 = vrot.slane %v17104_v20, 4  ;;  %22212 = vmatprep.subr.bf16.mxu1 %v22616_v40  ;;  %v27134_v1 = vld [vmem:[%s28163_s4 + $0xf8] sm:$0xff]  }
 0x3f9   : > { %v17600_v41 = vsel %vm26812_vm4, %v17598_v29, %v17599_v62  ;;  %v17110_v38 = vshll.u32 %v27076_v45, 16  ;;  %v17089_v10 = vsel %vm26938_vm12, %v17084_v32, %v17088_v18  ;;  %v21147_v30 = vrot.slane %v17532_v22, 9  ;;  %v27126_v45 = vld [vmem:[#allocation2 + $0x14] sm:$0x1] }
 0x3fa   : > { %v21170_v47 = vcombine.low %v17597_v56, %v17600_v41  ;;  %v17097_v61 = vor.u32 %v17096_v11, %v17093_v50  ;;  %v21113_v19 = vcombine.low %v17079_v59, %v17089_v10  ;;  %v17107_v42 = vor.u32 %v17106_v48, %v17102_v0  ;;  %v18064_v50 = vld [vmem:[#allocation2 + $0x18] sm:$0xf]  ;;  %v27151_v48 = vld [vmem:[#allocation2 + $0x1c] sm:$0xf] }
 0x3fb   : > { %v17112_v33 = vrot.slane %v17110_v38, 5  ;;  %v17603_v17 = vrot.slane %v27114_v26, 5  ;;  %v17606_v37 = vrot.slane %v16942_v5, 5  ;;  %v18086_v2 = vshrl.u32 %v18061_v46, 16  ;;  %22213 = vmatpush3.bf16.msra.mxu1 %v22616_v40 }
 0x3fc   : > { %22260 = vmatprep.mubr.bf16.mxu0 %v21170_v47  ;;  %v17098_v7 = vrot.slane %v17097_v61, 4  ;;  %v18089_v4 = vshll.u32 %v18061_v46, 16  ;;  %22193 = vmatmul.mubr.bf16.gmra.mxu1 %v21113_v19  ;;  %v17108_v57 = vrot.slane %v17107_v42, 4  ;;  %v18095_v52 = vshll.u32 %v27123_v16, 16  ;;  %v27155_v47 = vld [vmem:[#allocation2 + $0x20] sm:$0x1] }
 0x3fd   : > { %v17604_v39 = vsel %vm26812_vm4, %v21147_v30, %v17603_v17  ;;  %v17605_v25 = vrot.slane %v17603_v17, 4  ;;  %22214 = vmatprep.subr.bf16.mxu1 %v22619_v35  ;;  %v18088_v18 = vrot.slane %v18086_v2, 4  ;;  %v18099_v44 = vshrl.u32 %v27123_v16, 16 }
 0x3fe   : > { %v17103_v9 = vsel %vm26938_vm12, %v17098_v7, %v17102_v0  ;;  %v18091_v8 = vrot.slane %v18089_v4, 5  ;;  %v17113_v62 = vsel %vm26938_vm12, %v17108_v57, %v17112_v33  ;;  %v18097_v21 = vrot.slane %v18095_v52, 5 }
 0x3ff   : > { %v17607_v40 = vsel %vm26812_vm4, %v17605_v25, %v17606_v37  ;;  %v18105_v55 = vshll.u32 %v27126_v45, 16  ;;  %v21114_v12 = vcombine.low %v17103_v9, %v17113_v62  ;;  %v18101_v56 = vrot.slane %v18099_v44, 4  ;;  %22215 = vmatpush3.bf16.msra.mxu1 %v22619_v35  ;;  %v27164_v9 = vld [vmem:[#allocation2 + $0x28] sm:$0xf] }
 0x400   : > { %v21171_v15 = vcombine.low %v17604_v39, %v17607_v40  ;;  %v18092_v58 = vor.u32 %v18091_v8, %v18088_v18  ;;  %v17115_v20 = vshrl.u32 %v27139_v6, 16  ;;  %v17118_v22 = vshll.u32 %v27139_v6, 16  ;;  %22264 = vmatprep.subr.bf16.mxu1 %v27134_v1 }
 0x401   : > { %v18107_v29 = vrot.slane %v18105_v55, 5  ;;  %v17124_v32 = vshll.u32 %v27114_v26, 16  ;;  %22196 = vmatprep.mubr.bf16.mxu1 %v21114_v12  ;;  %v18102_v0 = vor.u32 %v18101_v56, %v18097_v21  ;;  %v17128_v59 = vshrl.u32 %v27114_v26, 16  ;;  %v27168_v55 = vld [vmem:[#allocation2 + $0x2c] sm:$0x1] }
 0x402   : > { %22261 = vmatmul.mubr.bf16.gmra.mxu0 %v21171_v15  ;;  %v18093_v11 = vrot.slane %v18092_v58, 4  ;;  %v17134_v41 = vshll.u32 %v16942_v5, 16  ;;  %v17117_v35 = vrot.slane %v17115_v20, 4  ;;  %v17120_v38 = vrot.slane %v17118_v22, 5 }
 0x403   : > { %v17126_v46 = vrot.slane %v17124_v32, 5  ;;  %v21124_v10 = vcombine.low %v26887_v43, %v26801_v53  ;;  %v18103_v30 = vrot.slane %v18102_v0, 4  ;;  %v17130_v19 = vrot.slane %v17128_v59, 4  ;;  %v18067_v43 = vld [vmem:[#allocation2 + $0x24] sm:$0xf] }
 0x404   : > { %v18098_v61 = vsel %vm26938_vm12, %v18093_v11, %v18097_v21  ;;  %v17136_v42 = vrot.slane %v17134_v41, 5  ;;  %v17121_v33 = vor.u32 %v17120_v38, %v17117_v35  ;;  %v18110_v17 = vshrl.u32 %v18064_v50, 16  ;;  %v18070_v0 = vld [vmem:[#allocation2 + $0x30] sm:$0xf] }
 0x405   : > { %v18113_v7 = vshll.u32 %v18064_v50, 16  ;;  %v18119_v5 = vshll.u32 %v27151_v48, 16  ;;  %v18108_v37 = vsel %vm26938_vm12, %v18103_v30, %v18107_v29  ;;  %v17131_v2 = vor.u32 %v17130_v19, %v17126_v46 }
 0x406   : > { %v18123_v4 = vshrl.u32 %v27151_v48, 16  ;;  %v18129_v53 = vshll.u32 %v27155_v47, 16  ;;  %v21228_v57 = vcombine.low %v18098_v61, %v18108_v37  ;;  %v17122_v39 = vrot.slane %v17121_v33, 4  ;;  %v27183_v33 = vld [vmem:[#allocation2 + $0x38] sm:$0x1] }
 0x407   : > { %v18112_v25 = vrot.slane %v18110_v17, 4  ;;  %v18115_v52 = vrot.slane %v18113_v7, 5  ;;  %v17132_v18 = vrot.slane %v17131_v2, 4  ;;  %v18121_v8 = vrot.slane %v18119_v5, 5  ;;  %v18073_v2 = vld [vmem:[#allocation2 + $0x3c] sm:$0xf] }
 0x408   : > { %v18125_v44 = vrot.slane %v18123_v4, 4  ;;  %v18131_v62 = vrot.slane %v18129_v53, 5  ;;  %22312 = vmatprep.mubr.bf16.mxu0 %v21228_v57  ;;  %v17127_v40 = vsel %vm26938_vm12, %v17122_v39, %v17126_v46  ;;  %v18134_v12 = vshrl.u32 %v18067_v43, 16  ;;  %v27175_v46 = vld [vmem:[#allocation2 + $0x34] sm:$0xf] }
 0x409   : > { %v18116_v21 = vor.u32 %v18115_v52, %v18112_v25  ;;  %v18137_v15 = vshll.u32 %v18067_v43, 16  ;;  %v17137_v58 = vsel %vm26938_vm12, %v17132_v18, %v17136_v42  ;;  %v18143_v29 = vshll.u32 %v27164_v9, 16  ;;  %v22623_v43 = vld [vmem:[%s28163_s4 + $0x1b0] sm:$0xff]   ;;  %v27193_v39 = vld [vmem:[#allocation2 + $0x40] sm:$0xf] }
 0x40a   : > { %v18126_v56 = vor.u32 %v18125_v44, %v18121_v8  ;;  %v18147_v20 = vshrl.u32 %v27164_v9, 16  ;;  %v21115_v22 = vcombine.low %v17127_v40, %v17137_v58  ;;  %v18136_v50 = vrot.slane %v18134_v12, 4  ;;  %v22625_v58 = vld [vmem:[%s28163_s4 + $0xf0] sm:$0xff]  }
 0x40b   : > { %v18117_v32 = vrot.slane %v18116_v21, 4  ;;  %v18139_v11 = vrot.slane %v18137_v15, 5  ;;  %v18145_v41 = vrot.slane %v18143_v29, 5  ;;  %v18153_v38 = vshll.u32 %v27168_v55, 16 }
 0x40c   : > { %v18127_v59 = vrot.slane %v18126_v56, 4  ;;  %v18149_v35 = vrot.slane %v18147_v20, 4  ;;  %22197 = vmatmul.mubr.bf16.gmra.mxu1 %v21115_v22  ;;  %v21125_v19 = vcombine.low %v26918_v23, %v26892_v24  ;;  %v21126_v42 = vcombine.low %v26969_v34, %v26955_v31  ;;  %v18076_v22 = vld [vmem:[#allocation2 + $0x48] sm:$0xf] }
 0x40d   : > { %v18122_v61 = vsel %vm26938_vm12, %v18117_v32, %v18121_v8  ;;  %v18140_v30 = vor.u32 %v18139_v11, %v18136_v50  ;;  %22216 = vmatprep.mubr.bf16.mxu1 %v21124_v10  ;;  %v18155_v5 = vrot.slane %v18153_v38, 5  ;;  %v18158_v37 = vshrl.u32 %v18070_v0, 16  ;;  %v27197_v8 = vld [vmem:[#allocation2 + $0x44] sm:$0x1]  ;;  %v22626_v50 = vld [vmem:[%s28163_s4 + $0x1a8] sm:$0xff]  }
 0x40e   : > { %v18132_v17 = vsel %vm26938_vm12, %v18127_v59, %v18131_v62  ;;  %v18150_v7 = vor.u32 %v18149_v35, %v18145_v41  ;;  %v18161_v24 = vshll.u32 %v18070_v0, 16  ;;  %v18167_v23 = vshll.u32 %v27175_v46, 16  ;;  %v27211_v59 = vld [vmem:[#allocation2 + $0x4c] sm:$0xf] }
 0x40f   : > { %v21229_v4 = vcombine.low %v18122_v61, %v18132_v17  ;;  %v18141_v53 = vrot.slane %v18140_v30, 4  ;;  %v18160_v34 = vrot.slane %v18158_v37, 4  ;;  %v18171_v10 = vshrl.u32 %v27175_v46, 16  ;;  %v22628_v37 = vld [vmem:[%s28163_s4 + $0xe8] sm:$0xff]  }
 0x410   : > { %v18151_v31 = vrot.slane %v18150_v7, 4  ;;  %v18177_v57 = vshll.u32 %v27183_v33, 16  ;;  %v18163_v52 = vrot.slane %v18161_v24, 5  ;;  %v18169_v18 = vrot.slane %v18167_v23, 5  ;;  %v22629_v23 = vld [vmem:[%s28163_s4 + $0x1a0] sm:$0xff]  }
 0x411   : > { %22313 = vmatmul.mubr.bf16.vlgmr.msra.gmra.mxu0 %v21229_v4  ;;  %v18146_v25 = vsel %vm26938_vm12, %v18141_v53, %v18145_v41  ;;  %v18182_v44 = vshrl.u32 %v18073_v2, 16  ;;  %v18173_v40 = vrot.slane %v18171_v10, 4  ;;  %v18185_v12 = vshll.u32 %v18073_v2, 16  ;;  %v18079_v53 = vld [vmem:[#allocation2 + $0x54] sm:$0xf] }
 0x412   : > { %v18156_v62 = vsel %vm26938_vm12, %v18151_v31, %v18155_v5  ;;  %22361 = vmatpush3.bf16.msra.mxu0 %v27091_v28  ;;  %v18179_v21 = vrot.slane %v18177_v57, 5  ;;  %v18164_v56 = vor.u32 %v18163_v52, %v18160_v34  ;;  %v18191_v20 = vshll.u32 %v27193_v39, 16 }
 0x413   : > { %v21230_v15 = vcombine.low %v18146_v25, %v18156_v62  ;;  %22362 = vmatprep.subr.bf16.mxu0 %v22623_v43  ;;  %v18184_v29 = vrot.slane %v18182_v44, 4  ;;  %v18174_v32 = vor.u32 %v18173_v40, %v18169_v18  ;;  %v18187_v28 = vrot.slane %v18185_v12, 5  ;;  %v22631_v44 = vld [vmem:[%s28163_s4 + $0xe0] sm:$0xff]   ;;  %v27240_v40 = vld [vmem:[#allocation2 + $0x5c] sm:$0x1] }
 0x414   : > { %v18195_v11 = vshrl.u32 %v27193_v39, 16  ;;  %v18201_v0 = vshll.u32 %v27197_v8, 16  ;;  %22217 = vmatmul.mubr.bf16.vlgmr.msra.gmra.mxu1 %v21125_v19  ;;  %v18165_v41 = vrot.slane %v18164_v56, 4  ;;  %v18193_v35 = vrot.slane %v18191_v20, 5 }
 0x415   : > { %22316 = vmatprep.mubr.bf16.mxu0 %v21230_v15  ;;  %v21127_v38 = vcombine.low %v27001_v60, %v26981_v13  ;;  %v21128_v61 = vcombine.low %v27034_v54, %v27026_v3  ;;  %22220 = vmatprep.mubr.bf16.mxu1 %v21126_v42  ;;  %v18175_v30 = vrot.slane %v18174_v32, 4  ;;  %v18188_v17 = vor.u32 %v18187_v28, %v18184_v29  ;;  %v27223_v13 = vld [vmem:[#allocation2 + $0x50] sm:$0x1] }
 0x416   : > { %22265 = vmatpush3.bf16.msra.mxu1 %v27134_v1  ;;  %v18197_v7 = vrot.slane %v18195_v11, 4  ;;  %v18203_v5 = vrot.slane %v18201_v0, 5  ;;  %22363 = vmatpush3.bf16.msra.mxu0 %v22623_v43  ;;  %v18170_v19 = vsel %vm26938_vm12, %v18165_v41, %v18169_v18  ;;  %v18206_v60 = vshrl.u32 %v18076_v22, 16  ;;  %v27229_v43 = vld [vmem:[#allocation2 + $0x58] sm:$0xf] }
 0x417   : > { %22266 = vmatprep.subr.bf16.mxu1 %v22625_v58  ;;  %v18209_v3 = vshll.u32 %v18076_v22, 16  ;;  %v18215_v54 = vshll.u32 %v27211_v59, 16  ;;  %v18180_v1 = vsel %vm26938_vm12, %v18175_v30, %v18179_v21  ;;  %22364 = vmatprep.subr.bf16.mxu0 %v22626_v50  ;;  %v18189_v42 = vrot.slane %v18188_v17, 4  ;;  %v18082_v22 = vld [vmem:[#allocation2 + $0x60] sm:$0xf]  ;;  %v22632_v11 = vld [vmem:[%s28163_s4 + $0x198] sm:$0xff]  }
 0x418   : > { %v18198_v2 = vor.u32 %v18197_v7, %v18193_v35  ;;  %v18219_v4 = vshrl.u32 %v27211_v59, 16  ;;  %v21231_v24 = vcombine.low %v18170_v19, %v18180_v1  ;;  %v18208_v31 = vrot.slane %v18206_v60, 4  ;;  %v27255_v19 = vld [vmem:[#allocation2 + $0x64] sm:$0xf] }
 0x419   : > { %v18211_v34 = vrot.slane %v18209_v3, 5  ;;  %v18217_v10 = vrot.slane %v18215_v54, 5  ;;  %v18194_v57 = vsel %vm26938_vm12, %v18189_v42, %v18193_v35  ;;  %v18225_v18 = vshll.u32 %v27223_v13, 16  ;;  %v27259_v3 = vld [vmem:[#allocation2 + $0x68] sm:$0x1]  ;;  %v22635_v42 = vld [vmem:[%s28163_s4 + $0x190] sm:$0xff]  }
 0x41a   : > { %22267 = vmatpush3.bf16.msra.mxu1 %v22625_v58  ;;  %v18199_v25 = vrot.slane %v18198_v2, 4  ;;  %v18221_v52 = vrot.slane %v18219_v4, 4  ;;  %22317 = vmatmul.mubr.bf16.gmra.mxu0 %v21231_v24  ;;  %v18230_v21 = vshrl.u32 %v18079_v53, 16  ;;  %v18233_v12 = vshll.u32 %v18079_v53, 16 }
 0x41b   : > { %22268 = vmatprep.subr.bf16.mxu1 %v22628_v37  ;;  %v18212_v62 = vor.u32 %v18211_v34, %v18208_v31  ;;  %v18239_v15 = vshll.u32 %v27229_v43, 16  ;;  %22365 = vmatpush3.bf16.msra.mxu0 %v22626_v50  ;;  %v18227_v29 = vrot.slane %v18225_v18, 5  ;;  %v18243_v20 = vshrl.u32 %v27229_v43, 16 }
 0x41c   : > { %v18204_v58 = vsel %vm26938_vm12, %v18199_v25, %v18203_v5  ;;  %v18222_v56 = vor.u32 %v18221_v52, %v18217_v10  ;;  %22221 = vmatmul.mubr.bf16.gmra.mxu1 %v21127_v38  ;;  %22366 = vmatprep.subr.bf16.mxu0 %v22629_v23  ;;  %v18232_v0 = vrot.slane %v18230_v21, 4  ;;  %v18235_v41 = vrot.slane %v18233_v12, 5  ;;  %v22634_v5 = vld [vmem:[%s28163_s4 + $0xd8] sm:$0xff]   ;;  %v18487_v21 = vld [vmem:[#allocation2 + $0xc] sm:$0xe] }
 0x41d   : > { %v21232_v32 = vcombine.low %v18194_v57, %v18204_v58  ;;  %v18213_v28 = vrot.slane %v18212_v62, 4  ;;  %22224 = vmatprep.mubr.bf16.mxu1 %v21128_v61  ;;  %v18241_v30 = vrot.slane %v18239_v15, 5  ;;  %v18245_v50 = vrot.slane %v18243_v20, 4  ;;  %v22637_v57 = vld [vmem:[%s28163_s4 + $0xd0] sm:$0xff]  }
 0x41e   : > { %22269 = vmatpush3.bf16.msra.mxu1 %v22628_v37  ;;  %v18223_v35 = vrot.slane %v18222_v56, 4  ;;  %v18249_v17 = vshll.u32 %v27240_v40, 16  ;;  %v18236_v7 = vor.u32 %v18235_v41, %v18232_v0  ;;  %v18254_v60 = vshrl.u32 %v18082_v22, 16  ;;  %v18488_v0 = vld [vmem:[#allocation2 + $0x18] sm:$0xe]  ;;  %v22642_v41 = vld [vmem:[%s28163_s4 + $0x180] sm:$0xff]  }
 0x41f   : > { %22320 = vmatprep.mubr.bf16.mxu0 %v21232_v32  ;;  %22270 = vmatprep.subr.bf16.mxu1 %v22631_v44  ;;  %v18218_v38 = vsel %vm26938_vm12, %v18213_v28, %v18217_v10  ;;  %v18246_v37 = vor.u32 %v18245_v50, %v18241_v30  ;;  %v18257_v4 = vshll.u32 %v18082_v22, 16  ;;  %v18267_v31 = vshrl.u32 %v27255_v19, 16 }
 0x420   : > { %22367 = vmatpush3.bf16.msra.mxu0 %v22629_v23  ;;  %v18228_v61 = vsel %vm26938_vm12, %v18223_v35, %v18227_v29  ;;  %v18237_v1 = vrot.slane %v18236_v7, 4  ;;  %v18256_v2 = vrot.slane %v18254_v60, 4  ;;  %v18251_v24 = vrot.slane %v18249_v17, 5  ;;  %v22641_v29 = vld [vmem:[%s28163_s4 + $0xc8] sm:$0xff]   ;;  %v22644_v7 = vld [vmem:[%s28163_s4 + $0xc0] sm:$0xff]  }
 0x421   : > { %v21233_v54 = vcombine.low %v18218_v38, %v18228_v61  ;;  %22368 = vmatprep.subr.bf16.mxu0 %v22632_v11  ;;  %v18247_v53 = vrot.slane %v18246_v37, 4  ;;  %v18263_v23 = vshll.u32 %v27255_v19, 16  ;;  %v21129_v34 = vcombine.low %v27064_v51, %v27057_v49  ;;  %v22639_v38 = vld [vmem:[#allocation2 + $0x18] sm:$0xff]   ;;  %v18489_v61 = vld [vmem:[#allocation2 + $0x24] sm:$0xe]  ;;  %v22643_v37 = vld [vmem:[#allocation2 + $0xc] sm:$0xff]  }
 0x422   : > { %22271 = vmatpush3.bf16.msra.mxu1 %v22631_v44  ;;  %v21130_v10 = vcombine.low %v27097_v14, %v27083_v63  ;;  %v18259_v25 = vrot.slane %v18257_v4, 5  ;;  %v18273_v52 = vshll.u32 %v27259_v3, 16  ;;  %v18242_v18 = vsel %vm26938_vm12, %v18237_v1, %v18241_v30  ;;  %v22638_v14 = vld [vmem:[%s28163_s4 + $0x188] sm:$0xff]  }
 0x423   : > { %22321 = vmatmul.mubr.bf16.gmra.mxu0 %v21233_v54  ;;  %22272 = vmatprep.subr.bf16.mxu1 %v22634_v5  ;;  %v18252_v44 = vsel %vm26938_vm12, %v18247_v53, %v18251_v24  ;;  %v18265_v62 = vrot.slane %v18263_v23, 5  ;;  %v18269_v49 = vrot.slane %v18267_v31, 4  ;;  %v18521_v15 = vrot.slane %v27123_v16, 5  ;;  %v18490_v53 = vld [vmem:[#allocation2 + $0x30] sm:$0xe] }
 0x424   : > { %22369 = vmatpush3.bf16.msra.mxu0 %v22632_v11  ;;  %v21234_v51 = vcombine.low %v18242_v18, %v18252_v44  ;;  %22225 = vmatmul.mubr.bf16.gmra.mxu1 %v21129_v34  ;;  %v18260_v63 = vor.u32 %v18259_v25, %v18256_v2  ;;  %v18275_v56 = vrot.slane %v18273_v52, 5  ;;  %v21244_v22 = vrot.slane %v18487_v21, 9  ;;  %v22645_v34 = vld [vmem:[#allocation2 + $0x24] sm:$0xff]   ;;  %v22647_v52 = vld [vmem:[#allocation2 + $0x30] sm:$0xff]   ;;  %v18491_v18 = vld [vmem:[#allocation2 + $0x3c] sm:$0xe] }
 0x425   : > { %22370 = vmatprep.subr.bf16.mxu0 %v22635_v42  ;;  %22228 = vmatprep.mubr.bf16.mxu1 %v21130_v10  ;;  %v18270_v12 = vor.u32 %v18269_v49, %v18265_v62  ;;  %v18523_v32 = vrot.slane %v18521_v15, 4  ;;  %v18524_v28 = vrot.slane %v27126_v45, 5  ;;  %v21131_v50 = vcombine.low %v27139_v6, %v27114_v26  ;;  %v27312_v26 = vld [vmem:[%s28163_s4 + $0x238] sm:$0xff]   ;;  %v18492_v21 = vld [vmem:[#allocation2 + $0x48] sm:$0xe] }
 0x426   : > { %22273 = vmatpush3.bf16.msra.mxu1 %v22634_v5  ;;  %22324 = vmatprep.mubr.bf16.mxu0 %v21234_v51  ;;  %v18261_v58 = vrot.slane %v18260_v63, 4  ;;  %v27295_v35 = vsel %vm26812_vm4, %v21244_v22, %v18521_v15  ;;  %v21245_v5 = vrot.slane %v18488_v0, 9  ;;  %v18528_v60 = vrot.slane %v27151_v48, 5  ;;  %v22649_v48 = vld [vmem:[%s28163_s4 + $0x178] sm:$0xff]  }
 0x427   : > { %22274 = vmatprep.subr.bf16.mxu1 %v22637_v57  ;;  %v18271_v20 = vrot.slane %v18270_v12, 4  ;;  %v27299_v45 = vsel %vm26812_vm4, %v18523_v32, %v18524_v28  ;;  %v18531_v54 = vrot.slane %v27155_v47, 5  ;;  %v18535_v1 = vrot.slane %v27164_v9, 5  ;;  %v22648_v44 = vld [vmem:[#allocation2 + $0x18] sm:$0xff]   ;;  %v27361_v12 = vld [vmem:[%s28163_s4 + $0x228] sm:$0xff]  }
 0x428   : > { %22371 = vmatpush3.bf16.msra.mxu0 %v22635_v42  ;;  %v18266_v11 = vsel %vm26938_vm12, %v18261_v58, %v18265_v62  ;;  %v21268_v17 = vcombine.low %v27295_v35, %v27299_v45  ;;  %v18530_v6 = vrot.slane %v18528_v60, 4  ;;  %v21246_v42 = vrot.slane %v18489_v61, 9  ;;  %v22652_v62 = vld [vmem:[%s28163_s4 + $0x170] sm:$0xff]  }
 0x429   : > { %22372 = vmatprep.subr.bf16.mxu0 %v22638_v14  ;;  %v18276_v16 = vsel %vm26938_vm12, %v18271_v20, %v18275_v56  ;;  %v27321_v2 = vsel %vm26812_vm4, %v21245_v5, %v18528_v60  ;;  %v18537_v47 = vrot.slane %v18535_v1, 4  ;;  %v18538_v9 = vrot.slane %v27168_v55, 5  ;;  %v27342_v55 = vld [vmem:[%s28163_s4 + $0x230] sm:$0xff]   ;;  %v22657_v20 = vld [vmem:[%s28163_s4 + $0x168] sm:$0xff]  }
 0x42a   : > { %22275 = vmatpush3.bf16.msra.mxu1 %v22637_v57  ;;  %v21235_v30 = vcombine.low %v18266_v11, %v18276_v16  ;;  %v27325_v4 = vsel %vm26812_vm4, %v18530_v6, %v18531_v54  ;;  %v27333_v23 = vsel %vm26812_vm4, %v21246_v42, %v18535_v1  ;;  %v21247_v57 = vrot.slane %v18490_v53, 9  ;;  %v18494_v11 = vld [vmem:[#allocation2 + $0x60] sm:$0xe]  ;;  %v27411_v1 = vld [vmem:[#allocation2 + $0x1c] sm:$0xf] }
 0x42b   : > { %22276 = vmatprep.subr.bf16.mxu1 %v22641_v29  ;;  %v21269_v24 = vcombine.low %v27321_v2, %v27325_v4  ;;  %v27337_v31 = vsel %vm26812_vm4, %v18537_v47, %v18538_v9  ;;  %v18542_v25 = vrot.slane %v27175_v46, 5  ;;  %v18545_v51 = vrot.slane %v27183_v33, 5  ;;  %v22660_v6 = vld [vmem:[%s28163_s4 + $0x160] sm:$0xff]   ;;  %v27424_v53 = vld [vmem:[%s28163_s4 + $0x218] sm:$0xff]   ;;  %v22677_v4 = vld [vmem:[%s28163_s4 + $0x1e8] sm:$0xff]  }
 0x42c   : > { %22373 = vmatpush3.bf16.msra.mxu0 %v22638_v14  ;;  %22229 = vmatmul.mubr.bf16.gmra.mxu1 %v21131_v50  ;;  %v21270_v10 = vcombine.low %v27333_v23, %v27337_v31  ;;  %v18549_v63 = vrot.slane %v27193_v39, 5  ;;  %v22651_v14 = vld [vmem:[#allocation2 + $0x24] sm:$0xff]   ;;  %v21248_v39 = vrot.slane %v18491_v18, 9  ;;  %v18552_v58 = vrot.slane %v27197_v8, 5 }
 0x42d   : > { %22325 = vmatmul.mubr.bf16.gmra.mxu0 %v21235_v30  ;;  %22374 = vmatprep.subr.bf16.mxu0 %v22642_v41  ;;  %v18544_v49 = vrot.slane %v18542_v25, 4  ;;  %v27355_v46 = vsel %vm26812_vm4, %v21247_v57, %v18542_v25  ;;  %v21249_v8 = vrot.slane %v18492_v21, 9  ;;  %v18556_v28 = vrot.slane %v27211_v59, 5  ;;  %v27390_v30 = vld [vmem:[%s28163_s4 + $0x220] sm:$0xff]   ;;  %v22665_v25 = vld [vmem:[%s28163_s4 + $0x158] sm:$0xff]   ;;  %v22668_v21 = vld [vmem:[%s28163_s4 + $0x150] sm:$0xff]  }
 0x42e   : > { %22376 = vmatprep.mubr.bf16.mxu0 %v22639_v38  ;;  %22277 = vmatpush3.bf16.msra.mxu1 %v22641_v29  ;;  %v18551_v15 = vrot.slane %v18549_v63, 4  ;;  %v18493_v29 = vld [vmem:[#allocation2 + $0x54] sm:$0xe]  ;;  %v27375_v22 = vsel %vm26812_vm4, %v21248_v39, %v18549_v63  ;;  %v18563_v16 = vrot.slane %v27229_v43, 5  ;;  %v18559_v38 = vrot.slane %v27223_v13, 5 }
 0x42f   : > { %22280 = vmatprep.mubr.bf16.mxu1 %v22643_v37  ;;  %22278 = vmatprep.subr.bf16.mxu1 %v22644_v7  ;;  %v27365_v33 = vsel %vm26812_vm4, %v18544_v49, %v18545_v51  ;;  %v18558_v50 = vrot.slane %v18556_v28, 4  ;;  %v21250_v59 = vrot.slane %v18493_v29, 9  ;;  %v18566_v60 = vrot.slane %v27240_v40, 5  ;;  %v22656_v37 = vld [vmem:[#allocation2 + $0x30] sm:$0xff]   ;;  %v22663_v49 = vld [vmem:[#allocation2 + $0x60] sm:$0xff]  }
 0x430   : > { %22375 = vmatpush3.bf16.msra.mxu0 %v22642_v41  ;;  %v21271_v56 = vcombine.low %v27355_v46, %v27365_v33  ;;  %v27379_v32 = vsel %vm26812_vm4, %v18551_v15, %v18552_v58  ;;  %v22653_v41 = vld [vmem:[#allocation2 + $0x3c] sm:$0xff]   ;;  %v18565_v5 = vrot.slane %v18563_v16, 4  ;;  %v21251_v61 = vrot.slane %v18494_v11, 9  ;;  %v19454_v63 = vld [vmem:[#allocation2 + $0x18] sm:$0xe] }
 0x431   : > { %22424 = vmatprep.subr.bf16.mxu0 %v27312_v26  ;;  %v21272_v0 = vcombine.low %v27375_v22, %v27379_v32  ;;  %v18570_v43 = vrot.slane %v27255_v19, 5  ;;  %v27400_v54 = vsel %vm26812_vm4, %v21249_v8, %v18556_v28  ;;  %v27404_v13 = vsel %vm26812_vm4, %v18558_v50, %v18559_v38  ;;  %v22659_v19 = vld [vmem:[#allocation2 + $0x3c] sm:$0xff]   ;;  %v27454_v15 = vld [vmem:[#allocation2 + $0x28] sm:$0xf]  ;;  %v22667_v58 = vld [vmem:[#allocation2 + $0x54] sm:$0xff]  }
 0x432   : > { %22279 = vmatpush3.bf16.msra.mxu1 %v22644_v7  ;;  %v22655_v7 = vld [vmem:[#allocation2 + $0x48] sm:$0xff]   ;;  %v27408_v40 = vsel %vm26812_vm4, %v21250_v59, %v18563_v16  ;;  %v21273_v42 = vcombine.low %v27400_v54, %v27404_v13  ;;  %v18573_v9 = vrot.slane %v27259_v3, 5  ;;  %v27449_v51 = vld [vmem:[#allocation2 + $0x20] sm:$0x1]  ;;  %v27457_v29 = vld [vmem:[#allocation2 + $0x34] sm:$0xf] }
 0x433   : > { %22328 = vmatprep.subr.bf16.mxu1 %v22649_v48  ;;  %v18572_v47 = vrot.slane %v18570_v43, 4  ;;  %v27430_v57 = vsel %vm26812_vm4, %v21251_v61, %v18570_v43  ;;  %v21348_v8 = vrot.slane %v19454_v63, 9  ;;  %v19491_v28 = vrot.slane %v27449_v51, 5  ;;  %v22669_v38 = vld [vmem:[#allocation2 + $0x6c] sm:$0xff]   ;;  %v22679_v33 = vld [vmem:[%s28163_s4 + $0x1d8] sm:$0xff]  }
 0x434   : > { %v19495_v11 = vrot.slane %v27454_v15, 5  ;;  %v19502_v50 = vrot.slane %v27457_v29, 5  ;;  %v19114_v22 = vshrl.u32 %v27457_v29, 16 }
 0x435   : > { %22377 = vmatmul.mubr.bf16.vlgmr.msra.gmra.mxu0 %v22645_v34  ;;  %22281 = vmatmul.mubr.bf16.vlgmr.msra.gmra.mxu1 %v22648_v44  ;;  %v27434_v3 = vsel %vm26812_vm4, %v18572_v47, %v18573_v9  ;;  %v22661_v44 = vld [vmem:[#allocation2 + $0x54] sm:$0xff]   ;;  %v22674_v47 = vld [vmem:[%s28163_s4 + $0x140] sm:$0xff]  }
 0x436   : > { %22380 = vmatprep.mubr.bf16.mxu0 %v22647_v52  ;;  %22425 = vmatpush3.bf16.msra.mxu0 %v27312_v26  ;;  %v19488_v52 = vrot.slane %v27411_v1, 5  ;;  %v21275_v18 = vcombine.low %v27430_v57, %v27434_v3  ;;  %v19497_v43 = vrot.slane %v19495_v11, 4  ;;  %v19504_v9 = vrot.slane %v19502_v50, 4 }
 0x437   : > { %22426 = vmatprep.subr.bf16.mxu0 %v27342_v55  ;;  %22284 = vmatprep.mubr.bf16.mxu1 %v22651_v14  ;;  %v22664_v14 = vld [vmem:[#allocation2 + $0x48] sm:$0xff]  }
 0x438   : > { %22329 = vmatpush3.bf16.msra.mxu1 %v22649_v48  ;;  %v27417_v48 = vsel %vm26812_vm4, %v18565_v5, %v18566_v60  ;;  %v19490_v39 = vrot.slane %v19488_v52, 4  ;;  %v19489_v59 = vsel %vm26812_vm4, %v21348_v8, %v19488_v52  ;;  %v27482_v5 = vld [vmem:[#allocation2 + $0x2c] sm:$0x1]  ;;  %v19455_v60 = vld [vmem:[#allocation2 + $0x24] sm:$0xe]  ;;  %v22675_v8 = vld [vmem:[%s28163_s4 + $0x1f8] sm:$0xff]  }
 0x439   : > { %22330 = vmatprep.subr.bf16.mxu1 %v22652_v62  ;;  %v21274_v34 = vcombine.low %v27408_v40, %v27417_v48  ;;  %v19498_v52 = vrot.slane %v27482_v5, 5 }
 0x43a   : > { %22427 = vmatpush3.bf16.msra.mxu0 %v27342_v55  ;;  %v19492_v16 = vsel %vm26812_vm4, %v19490_v39, %v19491_v28 }
 0x43b   : > { %22428 = vmatprep.subr.bf16.mxu0 %v27361_v12  ;;  %v21372_v61 = vcombine.low %v19489_v59, %v19492_v16  ;;  %v27514_v16 = vld [vmem:[#allocation2 + $0x44] sm:$0x1] }
 0x43c   : > { %22331 = vmatpush3.bf16.msra.mxu1 %v22652_v62  ;;  %v27447_v62 = vld [vmem:[%s28163_s4 + $0x210] sm:$0xff]  }
 0x43d   : > { %22381 = vmatmul.mubr.bf16.gmra.mxu0 %v22653_v41  ;;  %22332 = vmatprep.subr.bf16.mxu1 %v22657_v20  ;;  %v22672_v41 = vld [vmem:[%s28163_s4 + $0x148] sm:$0xff]  }
 0x43e   : > { %22384 = vmatprep.mubr.bf16.mxu0 %v22655_v7  ;;  %22429 = vmatpush3.bf16.msra.mxu0 %v27361_v12  ;;  %v27480_v7 = vld [vmem:[%s28163_s4 + $0x200] sm:$0xff]  }
 0x43f   : > { %22285 = vmatmul.mubr.bf16.gmra.mxu1 %v22656_v37  ;;  %22430 = vmatprep.subr.bf16.mxu0 %v27390_v30  ;;  %v27484_v37 = vld [vmem:[#allocation2 + $0x38] sm:$0x1] }
 0x440   : > { %22288 = vmatprep.mubr.bf16.mxu1 %v22659_v19  ;;  %22333 = vmatpush3.bf16.msra.mxu1 %v22657_v20  ;;  %v27463_v20 = vld [vmem:[%s28163_s4 + $0x208] sm:$0xff]   ;;  %v22671_v19 = vld [vmem:[#allocation2 + $0x60] sm:$0xff]   ;;  %v19505_v63 = vrot.slane %v27484_v37, 5 }
 0x441   : > { %22334 = vmatprep.subr.bf16.mxu1 %v22660_v6 }
 0x442   : > { %22431 = vmatpush3.bf16.msra.mxu0 %v27390_v30 }
 0x443   : > { %22432 = vmatprep.subr.bf16.mxu0 %v27424_v53 }
 0x444   : > { %22335 = vmatpush3.bf16.msra.mxu1 %v22660_v6  ;;  %v19456_v6 = vld [vmem:[#allocation2 + $0x30] sm:$0xe] }
 0x445   : > { %22385 = vmatmul.mubr.bf16.gmra.mxu0 %v22661_v44  ;;  %22336 = vmatprep.subr.bf16.mxu1 %v22665_v25  ;;  %v27493_v44 = vld [vmem:[#allocation2 + $0x4c] sm:$0xf] }
 0x446   : > { %22388 = vmatprep.mubr.bf16.mxu0 %v22663_v49  ;;  %22433 = vmatpush3.bf16.msra.mxu0 %v27424_v53  ;;  %v21350_v49 = vrot.slane %v19456_v6, 9  ;;  %v19516_v28 = vrot.slane %v27493_v44, 5  ;;  %v19457_v6 = vld [vmem:[#allocation2 + $0x3c] sm:$0xe] }
 0x447   : > { %22289 = vmatmul.mubr.bf16.gmra.mxu1 %v22664_v14  ;;  %22434 = vmatprep.subr.bf16.mxu0 %v27447_v62  ;;  %v21349_v14 = vrot.slane %v19455_v60, 9 }
 0x448   : > { %22292 = vmatprep.mubr.bf16.mxu1 %v22667_v58  ;;  %22337 = vmatpush3.bf16.msra.mxu1 %v22665_v25  ;;  %v27489_v25 = vld [vmem:[#allocation2 + $0x40] sm:$0xf]  ;;  %v19506_v58 = vsel %vm26812_vm4, %v19504_v9, %v19505_v63 }
 0x449   : > { %22338 = vmatprep.subr.bf16.mxu1 %v22668_v21  ;;  %v19509_v39 = vrot.slane %v27489_v25, 5  ;;  %v19496_v35 = vsel %vm26812_vm4, %v21349_v14, %v19495_v11  ;;  %v22676_v11 = vld [vmem:[%s28163_s4 + $0x1f0] sm:$0xff]   ;;  %v21351_v14 = vrot.slane %v19457_v6, 9  ;;  %v19031_v6 = vld [vmem:[#allocation2 + $0x24] sm:$0xf]  ;;  %v19138_v40 = vshrl.u32 %v27489_v25, 16 }
 0x44a   : > { %22435 = vmatpush3.bf16.msra.mxu0 %v27447_v62 }
 0x44b   : > { %22436 = vmatprep.subr.bf16.mxu0 %v27463_v20  ;;  %v19511_v60 = vrot.slane %v19509_v39, 4  ;;  %v19510_v23 = vsel %vm26812_vm4, %v21351_v14, %v19509_v39  ;;  %v22678_v39 = vld [vmem:[%s28163_s4 + $0x1e0] sm:$0xff]   ;;  %v19090_v14 = vshrl.u32 %v27454_v15, 16 }
 0x44c   : > { %22339 = vmatpush3.bf16.msra.mxu1 %v22668_v21  ;;  %v19499_v21 = vsel %vm26812_vm4, %v19497_v43, %v19498_v52  ;;  %v19458_v43 = vld [vmem:[#allocation2 + $0x48] sm:$0xe] }
 0x44d   : > { %22389 = vmatmul.mubr.bf16.gmra.mxu0 %v22669_v38  ;;  %22340 = vmatprep.subr.bf16.mxu1 %v22672_v41  ;;  %v21373_v45 = vcombine.low %v19496_v35, %v19499_v21  ;;  %v19028_v38 = vld [vmem:[#allocation2 + $0x18] sm:$0xf]  ;;  %v19066_v35 = vshrl.u32 %v27411_v1, 16 }
 0x44e   : > { %22437 = vmatpush3.bf16.msra.mxu0 %v27463_v20  ;;  %22440 = vmatprep.mubr.bf16.mxu0 %v21372_v61  ;;  %v27518_v61 = vld [vmem:[#allocation2 + $0x50] sm:$0x1]  ;;  %v19056_v63 = vshll.u32 %v19028_v38, 16 }
 0x44f   : > { %22293 = vmatmul.mubr.bf16.gmra.mxu1 %v22671_v19  ;;  %22438 = vmatprep.subr.bf16.mxu0 %v27480_v7  ;;  %v19518_v19 = vrot.slane %v19516_v28, 4  ;;  %v19519_v52 = vrot.slane %v27518_v61, 5 }
 0x450   : > { %22341 = vmatpush3.bf16.msra.mxu1 %v22672_v41  ;;  %22344 = vmatprep.mubr.bf16.mxu1 %v21268_v17  ;;  %v19503_v17 = vsel %vm26812_vm4, %v21350_v49, %v19502_v50  ;;  %v27516_v41 = vld [vmem:[#allocation2 + $0x58] sm:$0xf]  ;;  %v19512_v50 = vrot.slane %v27514_v16, 5  ;;  %v19053_v49 = vshrl.u32 %v19028_v38, 16 }
 0x451   : > { %22342 = vmatprep.subr.bf16.mxu1 %v22674_v47  ;;  %v21374_v59 = vcombine.low %v19503_v17, %v19506_v58  ;;  %v19523_v9 = vrot.slane %v27516_v41, 5  ;;  %v19062_v58 = vshll.u32 %v27411_v1, 16  ;;  %v19520_v2 = vsel %vm26812_vm4, %v19518_v19, %v19519_v52  ;;  %v19034_v19 = vld [vmem:[#allocation2 + $0x30] sm:$0xf] }
 0x452   : > { %22439 = vmatpush3.bf16.msra.mxu0 %v27480_v7  ;;  %v19513_v21 = vsel %vm26812_vm4, %v19511_v60, %v19512_v50  ;;  %v19055_v1 = vrot.slane %v19053_v49, 4  ;;  %v19058_v17 = vrot.slane %v19056_v63, 5  ;;  %v19080_v52 = vshll.u32 %v19031_v6, 16 }
 0x453   : > { %v19525_v31 = vrot.slane %v19523_v9, 4  ;;  %v27548_v60 = vrot.slane %v19062_v58, 5  ;;  %v19086_v49 = vshll.u32 %v27454_v15, 16  ;;  %v19104_v58 = vshll.u32 %v19034_v19, 16 }
 0x454   : > { %22343 = vmatpush3.bf16.msra.mxu1 %v22674_v47  ;;  %v21352_v47 = vrot.slane %v19458_v43, 9  ;;  %v19068_v43 = vrot.slane %v19066_v35, 4  ;;  %v19082_v15 = vrot.slane %v19080_v52, 5  ;;  %v19120_v52 = vshll.u32 %v27484_v37, 16 }
 0x455   : > { %22441 = vmatmul.mubr.bf16.vlgmr.msra.gmra.mxu0 %v21373_v45  ;;  %22392 = vmatprep.subr.bf16.mxu1 %v22675_v8  ;;  %v19459_v45 = vld [vmem:[#allocation2 + $0x54] sm:$0xe] }
 0x456   : > { %22444 = vmatprep.mubr.bf16.mxu0 %v21374_v59  ;;  %v19069_v63 = vor.u32 %v19068_v43, %v27548_v60  ;;  %v19040_v43 = vld [vmem:[#allocation2 + $0x48] sm:$0xf] }
 0x457   : > { %22345 = vmatmul.mubr.bf16.vlgmr.msra.gmra.mxu1 %v21269_v24  ;;  %v27541_v24 = vld [vmem:[#allocation2 + $0x5c] sm:$0x1]  ;;  %v19149_v48 = vshrl.u32 %v19040_v43, 16 }
 0x458   : > { %22348 = vmatprep.mubr.bf16.mxu1 %v21270_v10  ;;  %22393 = vmatpush3.bf16.msra.mxu1 %v22675_v8  ;;  %v21375_v10 = vcombine.low %v19510_v23, %v19513_v21  ;;  %v19517_v8 = vsel %vm26812_vm4, %v21352_v47, %v19516_v28  ;;  %v19526_v59 = vrot.slane %v27541_v24, 5  ;;  %v21353_v28 = vrot.slane %v19459_v45, 9 }
 0x459   : > { %22394 = vmatprep.subr.bf16.mxu1 %v22676_v11  ;;  %v21376_v38 = vcombine.low %v19517_v8, %v19520_v2  ;;  %v19077_v47 = vshrl.u32 %v19031_v6, 16  ;;  %v19101_v21 = vshrl.u32 %v19034_v19, 16  ;;  %v19070_v23 = vrot.slane %v19069_v63, 4  ;;  %v22680_v8 = vld [vmem:[%s28163_s4 + $0x1d0] sm:$0xff]  }
 0x45a   : > { %v19527_v50 = vsel %vm26812_vm4, %v19525_v31, %v19526_v59  ;;  %v19524_v46 = vsel %vm26812_vm4, %v21353_v28, %v19523_v9  ;;  %v19092_v31 = vrot.slane %v19090_v14, 4  ;;  %v19116_v45 = vrot.slane %v19114_v22, 4 }
 0x45b   : > { %v21377_v32 = vcombine.low %v19524_v46, %v19527_v50  ;;  %v19079_v2 = vrot.slane %v19077_v47, 4  ;;  %v19103_v9 = vrot.slane %v19101_v21, 4  ;;  %v19096_v59 = vshll.u32 %v27482_v5, 16 }
 0x45c   : > { %22395 = vmatpush3.bf16.msra.mxu1 %v22676_v11  ;;  %v19059_v11 = vor.u32 %v19058_v17, %v19055_v1  ;;  %v19134_v19 = vshll.u32 %v27489_v25, 16  ;;  %v19158_v28 = vshll.u32 %v27493_v44, 16  ;;  %v19162_v50 = vshrl.u32 %v27493_v44, 16  ;;  %v22682_v25 = vld [vmem:[%s28163_s4 + $0x1c0] sm:$0xff]  }
 0x45d   : > { %22445 = vmatmul.mubr.bf16.gmra.mxu0 %v21375_v10  ;;  %22396 = vmatprep.subr.bf16.mxu1 %v22677_v4  ;;  %v19106_v10 = vrot.slane %v19104_v58, 5  ;;  %v19098_v47 = vrot.slane %v19096_v59, 5  ;;  %v19151_v44 = vrot.slane %v19149_v48, 4  ;;  %v19144_v59 = vshll.u32 %v27514_v16, 16 }
 0x45e   : > { %22448 = vmatprep.mubr.bf16.mxu0 %v21376_v38  ;;  %v19060_v35 = vrot.slane %v19059_v11, 4  ;;  %v19083_v38 = vor.u32 %v19082_v15, %v19079_v2  ;;  %v19164_v37 = vrot.slane %v19162_v50, 4  ;;  %v19046_v15 = vld [vmem:[#allocation2 + $0x60] sm:$0xf]  ;;  %v27632_v50 = vld [vmem:[#allocation2 + $0x70] sm:$0xf] }
 0x45f   : > { %22349 = vmatmul.mubr.bf16.gmra.mxu1 %v21271_v56  ;;  %v19110_v56 = vshll.u32 %v27457_v29, 16  ;;  %v19107_v54 = vor.u32 %v19106_v10, %v19103_v9  ;;  %v19043_v9 = vld [vmem:[#allocation2 + $0x54] sm:$0xf]  ;;  %v19146_v16 = vrot.slane %v19144_v59, 5 }
 0x460   : > { %22352 = vmatprep.mubr.bf16.mxu1 %v21272_v0  ;;  %22397 = vmatpush3.bf16.msra.mxu1 %v22677_v4  ;;  %v19072_v0 = vshll.u32 %v27449_v51, 16  ;;  %v27572_v4 = vrot.slane %v19086_v49, 5  ;;  %v19037_v51 = vld [vmem:[#allocation2 + $0x3c] sm:$0xf]  ;;  %v19065_v17 = vsel %vm26938_vm12, %v19060_v35, %v27548_v60  ;;  %v19084_v11 = vrot.slane %v19083_v38, 4 }
 0x461   : > { %22398 = vmatprep.subr.bf16.mxu1 %v22678_v39  ;;  %v27577_v29 = vrot.slane %v19110_v56, 5  ;;  %v19125_v13 = vshrl.u32 %v19037_v51, 16  ;;  %v19128_v60 = vshll.u32 %v19037_v51, 16  ;;  %v19108_v14 = vrot.slane %v19107_v54, 4 }
 0x462   : > { %v19074_v1 = vrot.slane %v19072_v0, 5  ;;  %v19140_v56 = vrot.slane %v19138_v40, 4  ;;  %v19122_v0 = vrot.slane %v19120_v52, 5  ;;  %v19089_v35 = vsel %vm26938_vm12, %v19084_v11, %v27572_v4 }
 0x463   : > { %v19117_v5 = vor.u32 %v19116_v45, %v27577_v29  ;;  %v19127_v21 = vrot.slane %v19125_v13, 4  ;;  %v19130_v46 = vrot.slane %v19128_v60, 5  ;;  %v19186_v45 = vshrl.u32 %v27516_v41, 16 }
 0x464   : > { %22399 = vmatpush3.bf16.msra.mxu1 %v22678_v39  ;;  %v19075_v6 = vsel %vm26938_vm12, %v19070_v23, %v19074_v1  ;;  %v19093_v39 = vor.u32 %v19092_v31, %v27572_v4  ;;  %v27616_v23 = vld [vmem:[#allocation2 + $0x64] sm:$0xf]  ;;  %v19113_v31 = vsel %vm26938_vm12, %v19108_v14, %v27577_v29  ;;  %v19197_v51 = vshrl.u32 %v19046_v15, 16 }
 0x465   : > { %22449 = vmatmul.mubr.bf16.gmra.mxu0 %v21377_v32  ;;  %22400 = vmatprep.subr.bf16.mxu1 %v22679_v33  ;;  %v21332_v49 = vcombine.low %v19065_v17, %v19075_v6  ;;  %v19118_v58 = vrot.slane %v19117_v5, 4  ;;  %v27606_v32 = vrot.slane %v19158_v28, 5  ;;  %v19131_v3 = vor.u32 %v19130_v46, %v19127_v21  ;;  %v19048_v21 = vld [vmem:[#allocation2 + $0x68] sm:$0x1] }
 0x466   : > { %v19094_v63 = vrot.slane %v19093_v39, 4  ;;  %v19200_v1 = vshll.u32 %v19046_v15, 16  ;;  %v19206_v17 = vshll.u32 %v27616_v23, 16  ;;  %v19210_v29 = vshrl.u32 %v27616_v23, 16 }
 0x467   : > { %22353 = vmatmul.mubr.bf16.gmra.mxu1 %v21273_v42  ;;  %v22681_v42 = vld [vmem:[%s28163_s4 + $0x1c8] sm:$0xff]   ;;  %v19123_v57 = vsel %vm26938_vm12, %v19118_v58, %v19122_v0  ;;  %v19165_v4 = vor.u32 %v19164_v37, %v27606_v32  ;;  %v19176_v6 = vshll.u32 %v19043_v9, 16  ;;  %v19132_v54 = vrot.slane %v19131_v3, 4 }
 0x468   : > { %22356 = vmatprep.mubr.bf16.mxu1 %v21274_v34  ;;  %22401 = vmatpush3.bf16.msra.mxu1 %v22679_v33  ;;  %v19152_v34 = vshll.u32 %v19040_v43, 16  ;;  %v27604_v33 = vrot.slane %v19134_v19, 5  ;;  %v19099_v2 = vsel %vm26938_vm12, %v19094_v63, %v19098_v47  ;;  %v19173_v43 = vshrl.u32 %v19043_v9, 16 }
 0x469   : > { %22402 = vmatprep.subr.bf16.mxu1 %v22680_v8  ;;  %v21333_v38 = vcombine.low %v19089_v35, %v19099_v2  ;;  %v21334_v39 = vcombine.low %v19113_v31, %v19123_v57  ;;  %v19166_v5 = vrot.slane %v19165_v4, 4  ;;  %v19188_v19 = vrot.slane %v19186_v45, 4 }
 0x46a   : > { %v19154_v22 = vrot.slane %v19152_v34, 5  ;;  %v19199_v40 = vrot.slane %v19197_v51, 4  ;;  %v19202_v48 = vrot.slane %v19200_v1, 5  ;;  %v19208_v34 = vrot.slane %v19206_v17, 5 }
 0x46b   : > { %v19212_v28 = vrot.slane %v19210_v29, 4  ;;  %v19175_v11 = vrot.slane %v19173_v43, 4  ;;  %v19178_v47 = vrot.slane %v19176_v6, 5  ;;  %v19216_v2 = vshll.u32 %v19048_v21, 16 }
 0x46c   : > { %22403 = vmatpush3.bf16.msra.mxu1 %v22680_v8  ;;  %v19155_v10 = vor.u32 %v19154_v22, %v19151_v44  ;;  %v19182_v8 = vshll.u32 %v27516_v41, 16  ;;  %v19192_v22 = vshll.u32 %v27541_v24, 16 }
 0x46d   : > { %22404 = vmatprep.subr.bf16.mxu1 %v22681_v42  ;;  %v19179_v44 = vor.u32 %v19178_v47, %v19175_v11  ;;  %v19218_v4 = vrot.slane %v19216_v2, 5 }
 0x46e   : > { %v19156_v41 = vrot.slane %v19155_v10, 4  ;;  %v19184_v60 = vrot.slane %v19182_v8, 5  ;;  %v19194_v9 = vrot.slane %v19192_v22, 5  ;;  %v19051_v8 = vld [vmem:[#allocation2 + $0x74] sm:$0x1] }
 0x46f   : > { %22357 = vmatmul.mubr.bf16.gmra.mxu1 %v21275_v18  ;;  %v19141_v18 = vor.u32 %v19140_v56, %v27604_v33  ;;  %v19203_v56 = vor.u32 %v19202_v48, %v19199_v40  ;;  %v19240_v59 = vshll.u32 %v19051_v8, 16  ;;  %v19540_v11 = vrot.slane %v19051_v8, 5 }
 0x470   : > { %22405 = vmatpush3.bf16.msra.mxu1 %v22681_v42  ;;  %22408 = vmatprep.mubr.bf16.mxu1 %v21332_v49  ;;  %v19168_v42 = vshll.u32 %v27518_v61, 16  ;;  %v19137_v61 = vsel %vm26938_vm12, %v19132_v54, %v27604_v33  ;;  %v19049_v49 = vld [vmem:[#allocation2 + $0x6c] sm:$0xf]  ;;  %v19189_v14 = vor.u32 %v19188_v19, %v19184_v60  ;;  %v19161_v58 = vsel %vm26938_vm12, %v19156_v41, %v27606_v32  ;;  %v19460_v54 = vld [vmem:[#allocation2 + $0x60] sm:$0xe] }
 0x471   : > { %22406 = vmatprep.subr.bf16.mxu1 %v22682_v25  ;;  %v19142_v13 = vrot.slane %v19141_v18, 4  ;;  %v19213_v33 = vor.u32 %v19212_v28, %v19208_v34  ;;  %v19221_v37 = vshrl.u32 %v19049_v49, 16  ;;  %v19224_v0 = vshll.u32 %v19049_v49, 16 }
 0x472   : > { %v19170_v52 = vrot.slane %v19168_v42, 5  ;;  %v19190_v31 = vrot.slane %v19189_v14, 4  ;;  %v19204_v3 = vrot.slane %v19203_v56, 4  ;;  %v19533_v41 = vrot.slane %v19048_v21, 5 }
 0x473   : > { %v19147_v63 = vsel %vm26938_vm12, %v19142_v13, %v19146_v16  ;;  %v19214_v18 = vrot.slane %v19213_v33, 4  ;;  %v19223_v10 = vrot.slane %v19221_v37, 4  ;;  %v19226_v24 = vrot.slane %v19224_v0, 5  ;;  %v19461_v16 = vld [vmem:[#allocation2 + $0x6c] sm:$0xe] }
 0x474   : > { %22407 = vmatpush3.bf16.msra.mxu1 %v22682_v25  ;;  %v19230_v25 = vshll.u32 %v27632_v50, 16  ;;  %v19171_v46 = vsel %vm26938_vm12, %v19166_v5, %v19170_v52  ;;  %v21335_v35 = vcombine.low %v19137_v61, %v19147_v63  ;;  %v19195_v45 = vsel %vm26938_vm12, %v19190_v31, %v19194_v9 }
 0x475   : > { %22456 = vmatprep.subr.bf16.mxu1 %v27312_v26  ;;  %v21336_v15 = vcombine.low %v19161_v58, %v19171_v46  ;;  %v19209_v1 = vsel %vm26938_vm12, %v19204_v3, %v19208_v34  ;;  %v19219_v17 = vsel %vm26938_vm12, %v19214_v18, %v19218_v4 }
 0x476   : > { %v19232_v57 = vrot.slane %v19230_v25, 5  ;;  %v21338_v6 = vcombine.low %v19209_v1, %v19219_v17 }
 0x477   : > { %22409 = vmatmul.mubr.bf16.vlgmr.msra.gmra.mxu1 %v21333_v38  ;;  %v19227_v38 = vor.u32 %v19226_v24, %v19223_v10 }
 0x478   : > { %22412 = vmatprep.mubr.bf16.mxu1 %v21334_v39  ;;  %22464 = vmatpush3.bf16.msra.mxu1 %v27312_v26  ;;  %v19234_v26 = vshrl.u32 %v27632_v50, 16 }
 0x479   : > { %22457 = vmatprep.subr.bf16.mxu1 %v27342_v55  ;;  %v19228_v42 = vrot.slane %v19227_v38, 4 }
 0x47a   : > { %v19236_v32 = vrot.slane %v19234_v26, 4 }
 0x47b   : > { %v19233_v40 = vsel %vm26938_vm12, %v19228_v42, %v19232_v57 }
 0x47c   : > { %22465 = vmatpush3.bf16.msra.mxu1 %v27342_v55  ;;  %v19180_v55 = vrot.slane %v19179_v44, 4  ;;  %v19237_v51 = vor.u32 %v19236_v32, %v19232_v57 }
 0x47d   : > { %22458 = vmatprep.subr.bf16.mxu1 %v27361_v12 }
 0x47e   : > { %v19185_v29 = vsel %vm26938_vm12, %v19180_v55, %v19184_v60  ;;  %v19238_v39 = vrot.slane %v19237_v51, 4  ;;  %v19537_v60 = vrot.slane %v27632_v50, 5 }
 0x47f   : > { %22413 = vmatmul.mubr.bf16.gmra.mxu1 %v21335_v35  ;;  %v21337_v43 = vcombine.low %v19185_v29, %v19195_v45 }
 0x480   : > { %22416 = vmatprep.mubr.bf16.mxu1 %v21336_v15  ;;  %22466 = vmatpush3.bf16.msra.mxu1 %v27361_v12  ;;  %v19530_v12 = vrot.slane %v27616_v23, 5  ;;  %v19242_v23 = vrot.slane %v19240_v59, 5  ;;  %v19539_v34 = vrot.slane %v19537_v60, 4 }
 0x481   : > { %22459 = vmatprep.subr.bf16.mxu1 %v27390_v30 }
 0x482   : > { %v19532_v13 = vrot.slane %v19530_v12, 4  ;;  %v19243_v5 = vsel %vm26938_vm12, %v19238_v39, %v19242_v23  ;;  %v19541_v27 = vsel %vm26812_vm4, %v19539_v34, %v19540_v11 }
 0x484   : > { %22467 = vmatpush3.bf16.msra.mxu1 %v27390_v30  ;;  %v21354_v30 = vrot.slane %v19460_v54, 9  ;;  %v19534_v19 = vsel %vm26812_vm4, %v19532_v13, %v19533_v41 }
 0x485   : > { %22460 = vmatprep.subr.bf16.mxu1 %v27424_v53 }
 0x486   : > { %v19531_v48 = vsel %vm26812_vm4, %v21354_v30, %v19530_v12 }
 0x487   : > { %22417 = vmatmul.mubr.bf16.gmra.mxu1 %v21337_v43  ;;  %v21378_v28 = vcombine.low %v19531_v48, %v19534_v19 }
 0x488   : > { %22420 = vmatprep.mubr.bf16.mxu1 %v21338_v6  ;;  %22468 = vmatpush3.bf16.msra.mxu1 %v27424_v53  ;;  %v21339_v53 = vcombine.low %v19233_v40, %v19243_v5 }
 0x489   : > { %22461 = vmatprep.subr.bf16.mxu1 %v27447_v62 }
 0x48c   : > { %22469 = vmatpush3.bf16.msra.mxu1 %v27447_v62  ;;  %v21355_v62 = vrot.slane %v19461_v16, 9 }
 0x48d   : > { %22462 = vmatprep.subr.bf16.mxu1 %v27463_v20 }
 0x48e   : > { %v19538_v50 = vsel %vm26812_vm4, %v21355_v62, %v19537_v60 }
 0x48f   : > { %22421 = vmatmul.mubr.bf16.gmra.mxu1 %v21339_v53  ;;  %v21379_v47 = vcombine.low %v19538_v50, %v19541_v27 }
 0x490   : > { %22470 = vmatpush3.bf16.msra.mxu1 %v27463_v20  ;;  %22452 = vmatprep.mubr.bf16.mxu1 %v21378_v28 }
 0x491   : > { %22463 = vmatprep.subr.bf16.mxu1 %v27480_v7 }
 0x494   : > { %22471 = vmatpush3.bf16.msra.mxu1 %v27480_v7 }
 0x497   : > { %22453 = vmatmul.mubr.bf16.vlgmr.msra.gmra.mxu1 %v21379_v47  ;;  %v22250_v61 = vpop.f32.mrf.mxu0 }
 0x499   : > { %v17739_v52 = vpop.f32.mrf.mxu0 }
 0x49b   : > { %v22251_v49 = vpop.f32.mrf.mxu0 }
 0x49d   : > { %v17742_v14 = vpop.f32.mrf.mxu0 }
 0x4a2   : > { %v22186_v63 = vpop.f32.mrf.mxu1 }
 0x4a4   : > { %v17269_v20 = vpop.f32.mrf.mxu1 }
 0x4a6   : > { %v22254_v21 = vpop.f32.mrf.mxu0  ;;  %v22187_v25 = vpop.f32.mrf.mxu1 }
 0x4a8   : > { %v17755_v26 = vpop.f32.mrf.mxu0  ;;  %v17272_v58 = vpop.f32.mrf.mxu1 }
 0x4aa   : > { %v22255_v46 = vpop.f32.mrf.mxu0 }
 0x4ac   : > { %v17758_v33 = vpop.f32.mrf.mxu0 }
 0x4b1   : > { %v22190_v56 = vpop.f32.mrf.mxu1 }
 0x4b3   : > { %v17285_v44 = vpop.f32.mrf.mxu1 }
 0x4b5   : > { %v22258_v7 = vpop.f32.mrf.mxu0  ;;  %v22191_v37 = vpop.f32.mrf.mxu1 }
 0x4b7   : > { %v17771_v22 = vpop.f32.mrf.mxu0  ;;  %v17288_v35 = vpop.f32.mrf.mxu1 }
 0x4b9   : > { %v22259_v0 = vpop.f32.mrf.mxu0 }
 0x4bb   : > { %v17774_v15 = vpop.f32.mrf.mxu0 }
 0x4bc   : > { %v22194_v2 = vpop.f32.mrf.mxu1 }
 0x4be   : > { %v17301_v57 = vpop.f32.mrf.mxu1 }
 0x4c0   : > { %v22195_v3 = vpop.f32.mrf.mxu1 }
 0x4c2   : > { %v27684_v31 = vpop.f32.mrf.mxu0  ;;  %v17304_v55 = vpop.f32.mrf.mxu1 }
 0x4c4   : > { %v27686_v32 = vpop.f32.mrf.mxu0 }
 0x4c6   : > { %v27688_v18 = vpop.f32.mrf.mxu0 }
 0x4c8   : > { %v27690_v10 = vpop.f32.mrf.mxu0 }
 0x4cc   : > { %v22198_v9 = vpop.f32.mrf.mxu1 }
 0x4ce   : > { %v17317_v24 = vpop.f32.mrf.mxu1 }
 0x4d0   : > { %v22199_v4 = vpop.f32.mrf.mxu1 }
 0x4d1   : > { %v27692_v8 = vpop.f32.mrf.mxu0 }
 0x4d2   : > { %v17320_v45 = vpop.f32.mrf.mxu1 }
 0x4d3   : > { %v27694_v51 = vpop.f32.mrf.mxu0 }
 0x4d4   : > { %v22218_v1 = vpop.f32.mrf.mxu1 }
 0x4d5   : > { %v27696_v17 = vpop.f32.mrf.mxu0  ;;  %v17471_v12 = vadd.f32 %v22218_v1, %v22186_v63 }
 0x4d6   : > { %v17462_v29 = vpop.f32.mrf.mxu1 }
 0x4d7   : > { %v27698_v38 = vpop.f32.mrf.mxu0  ;;  %v17463_v59 = vadd.f32 %v17462_v29, %v17269_v20  ;;  %v27700_v43 = vadd.f32 %v22250_v61, %v17471_v12 }
 0x4d8   : > { %v22219_v6 = vpop.f32.mrf.mxu1 }
 0x4d9   : > { %v17474_v39 = vadd.f32 %v22219_v6, %v22187_v25  ;;  %v27702_v54 = vadd.f32 %v17739_v52, %v17463_v59 }
 0x4da   : > { %v27704_v13 = vpop.f32.mrf.mxu0  ;;  %v17465_v42 = vpop.f32.mrf.mxu1 }
 0x4db   : > { %v17466_v23 = vadd.f32 %v17465_v42, %v17272_v58  ;;  %v27706_v30 = vadd.f32 %v22251_v49, %v17474_v39 }
 0x4dc   : > { %v27708_v41 = vpop.f32.mrf.mxu0  ;;  %v22222_v5 = vpop.f32.mrf.mxu1 }
 0x4dd   : > { %v17487_v60 = vadd.f32 %v22222_v5, %v22190_v56  ;;  %v27710_v19 = vadd.f32 %v17742_v14, %v17466_v23 }
 0x4de   : > { %v27712_v40 = vpop.f32.mrf.mxu0  ;;  %v17478_v53 = vpop.f32.mrf.mxu1 }
 0x4df   : > { %v17479_v48 = vadd.f32 %v17478_v53, %v17285_v44  ;;  %v27714_v34 = vadd.f32 %v22254_v21, %v17487_v60 }
 0x4e0   : > { %v27716_v28 = vpop.f32.mrf.mxu0  ;;  %v22223_v16 = vpop.f32.mrf.mxu1 }
 0x4e1   : > { %v17490_v11 = vadd.f32 %v22223_v16, %v22191_v37  ;;  %v27718_v62 = vadd.f32 %v17755_v26, %v17479_v48 }
 0x4e2   : > { %v17481_v50 = vpop.f32.mrf.mxu1 }
 0x4e3   : > { %v27720_v27 = vpop.f32.mrf.mxu0  ;;  %v17482_v47 = vadd.f32 %v17481_v50, %v17288_v35  ;;  %v27722_v61 = vadd.f32 %v22255_v46, %v17490_v11 }
 0x4e4   : > { %28433 = vst [vmem:[#allocation24_spill] sm:$0xff] %v27720_v27  ;;  %v22226_v49 = vpop.f32.mrf.mxu1 }
 0x4e5   : > { %v27724_v52 = vpop.f32.mrf.mxu0  ;;  %v17503_v63 = vadd.f32 %v22226_v49, %v22194_v2  ;;  %v27726_v14 = vadd.f32 %v17758_v33, %v17482_v47 }
 0x4e6   : > { %28434 = vst [vmem:[#allocation49_spill] sm:$0xff] %v27724_v52  ;;  %v17494_v21 = vpop.f32.mrf.mxu1  ;;  %v21396_v52 = vld [vmem:[%s22855_s26 + $0x30] sm:$0xe] }
 0x4e7   : > { %v27728_v20 = vpop.f32.mrf.mxu0  ;;  %v17495_v25 = vadd.f32 %v17494_v21, %v17301_v57  ;;  %v27730_v58 = vadd.f32 %v22258_v7, %v17503_v63 }
 0x4e8   : > { %28435 = vst [vmem:[#allocation25_spill] sm:$0xff] %v27728_v20  ;;  %v22227_v56 = vpop.f32.mrf.mxu1 }
 0x4e9   : > { %v27732_v26 = vpop.f32.mrf.mxu0  ;;  %v17506_v44 = vadd.f32 %v22227_v56, %v22195_v3  ;;  %v27734_v37 = vadd.f32 %v17771_v22, %v17495_v25 }
 0x4ea   : > { %28436 = vst [vmem:[#allocation26_spill] sm:$0xff] %v27732_v26  ;;  %v17497_v46 = vpop.f32.mrf.mxu1 }
 0x4eb   : > { %v17498_v35 = vadd.f32 %v17497_v46, %v17304_v55  ;;  %v27736_v1 = vadd.f32 %v22259_v0, %v17506_v44 }
 0x4ec   : > { %v22230_v33 = vpop.f32.mrf.mxu1 }
 0x4ed   : > { %v27738_v12 = vpop.f32.mrf.mxu0  ;;  %v17519_v2 = vadd.f32 %v22230_v33, %v22198_v9  ;;  %v27740_v29 = vadd.f32 %v17774_v15, %v17498_v35 }
 0x4ee   : > { %28437 = vst [vmem:[#allocation53_spill] sm:$0xff] %v27738_v12  ;;  %v17510_v7 = vpop.f32.mrf.mxu1 }
 0x4ef   : > { %28438 = vst [vmem:[#allocation55_spill] sm:$0xff] %v27740_v29  ;;  %v27742_v59 = vpop.f32.mrf.mxu0  ;;  %v17511_v57 = vadd.f32 %v17510_v7, %v17317_v24  ;;  %v27745_v6 = vadd.f32 %v27684_v31, %v17519_v2 }
 0x4f0   : > { %28439 = vst [vmem:[#allocation57_spill] sm:$0xff] %v27742_v59  ;;  %v22231_v22 = vpop.f32.mrf.mxu1 }
 0x4f1   : > { %28440 = vst [vmem:[#allocation39_spill] sm:$0xff] %v27745_v6  ;;  %v27747_v3 = vpop.f32.mrf.mxu0  ;;  %v17522_v39 = vadd.f32 %v22231_v22, %v22199_v4  ;;  %v27750_v0 = vadd.f32 %v27686_v32, %v17511_v57  ;;  %v21399_v6 = vld [vmem:[%s22855_s26 + $0x3c] sm:$0xe] }
 0x4f2   : > { %28441 = vst [vmem:[#allocation42_spill] sm:$0xff] %v27747_v3  ;;  %v17513_v42 = vpop.f32.mrf.mxu1 }
 0x4f3   : > { %28442 = vst [vmem:[#allocation43_spill] sm:$0xff] %v27750_v0  ;;  %v27752_v55 = vpop.f32.mrf.mxu0  ;;  %v17514_v9 = vadd.f32 %v17513_v42, %v17320_v45  ;;  %v27755_v15 = vadd.f32 %v27688_v18, %v17522_v39 }
 0x4f4   : > { %28443 = vst [vmem:[#allocation61_spill] sm:$0xff] %v27752_v55 }
 0x4f5   : > { %28444 = vst [vmem:[#allocation44_spill] sm:$0xff] %v27755_v15  ;;  %v27757_v23 = vpop.f32.mrf.mxu0  ;;  %v27760_v24 = vadd.f32 %v27690_v10, %v17514_v9  ;;  %v27764_v5 = vpop.f32.mrf.mxu1  ;;  %v21394_v15 = vld [vmem:[%s22855_s26 + $0x28] sm:$0xf] }
 0x4f7   : > { %28445 = vst [vmem:[#allocation47_spill] sm:$0xff] %v27760_v24  ;;  %v27762_v31 = vpop.f32.mrf.mxu0  ;;  %v27768_v32 = vpop.f32.mrf.mxu1 }
 0x4f9   : > { %v27766_v4 = vpop.f32.mrf.mxu0  ;;  %v27772_v53 = vpop.f32.mrf.mxu1 }
 0x4fb   : > { %v27770_v60 = vpop.f32.mrf.mxu0  ;;  %v27776_v18 = vpop.f32.mrf.mxu1 }
 0x4fc   : > { %28446 = vst [vmem:[#allocation48_spill] sm:$0xff] %v27770_v60 }
 0x4fd   : > { %v27774_v45 = vpop.f32.mrf.mxu0 }
 0x4fe   : > { %28447 = vst [vmem:[#allocation63_spill] sm:$0xff] %v27774_v45  ;;  %v21397_v45 = vld [vmem:[%s22855_s26 + $0x34] sm:$0xf] }
 0x4ff   : > { %v27778_v48 = vpop.f32.mrf.mxu0  ;;  %v27780_v10 = vpop.f32.mrf.mxu1 }
 0x500   : > { %28448 = vst [vmem:[#allocation50_spill] sm:$0xff] %v27778_v48  ;;  %v21400_v48 = vld [vmem:[%s22855_s26 + $0x40] sm:$0xf] }
 0x501   : > { %v27782_v16 = vpop.f32.mrf.mxu0  ;;  %v27784_v11 = vpop.f32.mrf.mxu1 }
 0x502   : > { %28449 = vst [vmem:[#allocation65_spill] sm:$0xff] %v27782_v16 }
 0x503   : > { %v27786_v50 = vpop.f32.mrf.mxu0  ;;  %v27788_v47 = vpop.f32.mrf.mxu1 }
 0x504   : > { %28450 = vst [vmem:[#allocation83_spill] sm:$0xff] %v27786_v50 }
 0x505   : > { %v27790_v49 = vpop.f32.mrf.mxu0  ;;  %v27792_v63 = vpop.f32.mrf.mxu1 }
 0x506   : > { %28451 = vst [vmem:[#allocation85_spill] sm:$0xff] %v27790_v49 }
 0x507   : > { %v27794_v21 = vpop.f32.mrf.mxu1  ;;  %v27796_v25 = vpop.f32.mrf.mxu0 }
 0x508   : > { %28452 = vst [vmem:[#allocation54_spill] sm:$0xff] %v27796_v25 }
 0x509   : > { %v27798_v56 = vpop.f32.mrf.mxu1  ;;  %v27802_v46 = vpop.f32.mrf.mxu0 }
 0x50a   : > { %28453 = vst [vmem:[#allocation56_spill] sm:$0xff] %v27802_v46  ;;  %v21391_v46 = vld [vmem:[%s22855_s26 + $0x1c] sm:$0xf] }
 0x50b   : > { %v27800_v44 = vpop.f32.mrf.mxu1  ;;  %v27808_v2 = vpop.f32.mrf.mxu0  ;;  %v19848_v26 = vrot.slane %v21391_v46, 5 }
 0x50c   : > { %28456 = vst [vmem:[#allocation62_spill] sm:$0xff] %v27808_v2 }
 0x50d   : > { %v27804_v35 = vpop.f32.mrf.mxu1  ;;  %v27814_v22 = vpop.f32.mrf.mxu0  ;;  %v19850_v46 = vrot.slane %v19848_v26, 4 }
 0x50e   : > { %28454 = vst [vmem:[#allocation58_spill] sm:$0xff] %v27804_v35  ;;  %28459 = vst [vmem:[#allocation64_spill] sm:$0xff] %v27814_v22 }
 0x50f   : > { %v27806_v33 = vpop.f32.mrf.mxu1  ;;  %v27820_v9 = vpop.f32.mrf.mxu0 }
 0x510   : > { %28455 = vst [vmem:[#allocation87_spill] sm:$0xff] %v27806_v33  ;;  %28461 = vst [vmem:[#allocation92_spill] sm:$0xff] %v27820_v9  ;;  %v21390_v9 = vld [vmem:[%s22855_s26 + $0x18] sm:$0xe]  ;;  %v21392_v33 = vld [vmem:[%s22855_s26 + $0x20] sm:$0x1] }
 0x511   : > { %v27810_v7 = vpop.f32.mrf.mxu1  ;;  %v27826_v59 = vpop.f32.mrf.mxu0  ;;  %v21414_v49 = vrot.slane %v21390_v9, 9  ;;  %v19869_v9 = vrot.slane %v21400_v48, 5  ;;  %v19851_v29 = vrot.slane %v21392_v33, 5  ;;  %v21406_v48 = vld [vmem:[%s22855_s26 + $0x58] sm:$0xf] }
 0x512   : > { %28457 = vst [vmem:[#allocation84_spill] sm:$0xff] %v27810_v7  ;;  %28462 = vst [vmem:[#allocation94_spill] sm:$0xff] %v27826_v59  ;;  %v21395_v59 = vld [vmem:[%s22855_s26 + $0x2c] sm:$0x1] }
 0x513   : > { %v27812_v57 = vpop.f32.mrf.mxu1  ;;  %v19858_v16 = vrot.slane %v21395_v59, 5  ;;  %v27866_v59 = vsel %vm26812_vm4, %v21414_v49, %v19848_v26  ;;  %v18047_v26 = vadd.f32 %v27764_v5, %v27700_v43  ;;  %v27891_v43 = vsel %vm26812_vm4, %v19850_v46, %v19851_v29 }
 0x514   : > { %28458 = vst [vmem:[#allocation86_spill] sm:$0xff] %v27812_v57  ;;  %v27832_v57 = vpop.f32.mrf.mxu0  ;;  %v19883_v29 = vrot.slane %v21406_v48, 5  ;;  %v18048_v46 = vadd.f32 %v27772_v53, %v27706_v30  ;;  %v18046_v48 = vadd.f32 %v27776_v18, %v27710_v19 }
 0x515   : > { %v27816_v39 = vpop.f32.mrf.mxu1  ;;  %28463 = vst [vmem:[#allocation66_spill] sm:$0xff] %v27832_v57  ;;  %v19855_v57 = vrot.slane %v21394_v15, 5  ;;  %v21401_v15 = vld [vmem:[%s22855_s26 + $0x44] sm:$0x1] }
 0x516   : > { %28460 = vst [vmem:[#allocation88_spill] sm:$0xff] %v27816_v39  ;;  %v21393_v39 = vld [vmem:[%s22855_s26 + $0x24] sm:$0xe]  ;;  %v27843_v7 = vpop.f32.mrf.mxu0  ;;  %v18474_v18 = vadd.f32 %v27696_v17, %v18048_v46 }
 0x517   : > { %v27818_v42 = vpop.f32.mrf.mxu1  ;;  %v21415_v0 = vrot.slane %v21393_v39, 9  ;;  %v19857_v50 = vrot.slane %v19855_v57, 4 }
 0x519   : > { %v27822_v55 = vpop.f32.mrf.mxu1  ;;  %v27858_v39 = vsel %vm26812_vm4, %v21415_v0, %v19855_v57  ;;  %v27870_v35 = vsel %vm26812_vm4, %v19857_v50, %v19858_v16  ;;  %v21417_v0 = vrot.slane %v21399_v6, 9  ;;  %v21416_v57 = vrot.slane %v21396_v52, 9  ;;  %v21403_v16 = vld [vmem:[%s22855_s26 + $0x4c] sm:$0xf]  ;;  %v21407_v52 = vld [vmem:[%s22855_s26 + $0x5c] sm:$0x1] }
 0x51a   : > { %28470 = vst [vmem:[#allocation102_spill] sm:$0xff] %v27870_v35 }
 0x51b   : > { %v27824_v3 = vpop.f32.mrf.mxu1  ;;  %v27895_v5 = vsel %vm26812_vm4, %v21417_v0, %v19869_v9 }
 0x51c   : > { %v18772_v46 = vadd.f32 %v27824_v3, %v18474_v18 }
 0x51d   : > { %v27828_v24 = vpop.f32.mrf.mxu1 }
 0x51f   : > { %v27830_v2 = vpop.f32.mrf.mxu1 }
 0x521   : > { %v27834_v22 = vpop.f32.mrf.mxu1 }
 0x522   : > { %28464 = vst [vmem:[#allocation91_spill] sm:$0xff] %v27834_v22  ;;  %v21398_v22 = vld [vmem:[%s22855_s26 + $0x38] sm:$0x1] }
 0x523   : > { %v27840_v12 = vpop.f32.mrf.mxu1  ;;  %v19865_v49 = vrot.slane %v21398_v22, 5  ;;  %v18045_v22 = vadd.f32 %v27768_v32, %v27702_v54  ;;  %v19876_v32 = vrot.slane %v21403_v16, 5 }
 0x524   : > { %28465 = vst [vmem:[#allocation98_spill] sm:$0xff] %v27840_v12  ;;  %v27854_v12 = vpop.f32.mrf.mxu0 }
 0x525   : > { %v27845_v25 = vpop.f32.mrf.mxu1  ;;  %28468 = vst [vmem:[#allocation93_spill] sm:$0xff] %v27854_v12  ;;  %v19872_v12 = vrot.slane %v21401_v15, 5  ;;  %v21405_v15 = vld [vmem:[%s22855_s26 + $0x54] sm:$0xe]  ;;  %v18471_v30 = vadd.f32 %v27694_v51, %v18045_v22  ;;  %v18051_v22 = vadd.f32 %v27780_v10, %v27714_v34  ;;  %v18472_v34 = vadd.f32 %v27698_v38, %v18046_v48 }
 0x526   : > { %28466 = vst [vmem:[#allocation100_spill] sm:$0xff] %v27845_v25  ;;  %v21419_v0 = vrot.slane %v21405_v15, 9  ;;  %v19015_v48 = vadd.f32 %v27766_v4, %v18772_v46 }
 0x527   : > { %v27849_v20 = vpop.f32.mrf.mxu1  ;;  %v18769_v19 = vadd.f32 %v27822_v55, %v18471_v30  ;;  %v18049_v55 = vadd.f32 %v27784_v11, %v27718_v62  ;;  %v18050_v62 = vadd.f32 %v27792_v63, %v27726_v14  ;;  %v18055_v11 = vadd.f32 %v27794_v21, %v27730_v58  ;;  %v27988_v21 = vld [vmem:[%s28164_s5] ss:$0 sm:$0xff] }
 0x528   : > { %28467 = vst [vmem:[#allocation79_spill] sm:$0xff] %v27849_v20  ;;  %v19862_v20 = vrot.slane %v21397_v45, 5  ;;  %v27876_v45 = vpop.f32.mrf.mxu0  ;;  %v18053_v14 = vadd.f32 %v27798_v56, %v27734_v37  ;;  %v18477_v58 = vadd.f32 %v27704_v13, %v18051_v22  ;;  %v18056_v13 = vadd.f32 %v27800_v44, %v27736_v1  ;;  %v28474_v56 = vld [vmem:[#allocation24_spill] sm:$0xff] }
 0x529   : > { %v27862_v25 = vpop.f32.mrf.mxu1  ;;  %v18475_v63 = vadd.f32 %v27708_v41, %v18049_v55  ;;  %v18476_v37 = vadd.f32 %v27716_v28, %v18050_v62  ;;  %v28476_v1 = vld [vmem:[#allocation48_spill] sm:$0xff]  ;;  %v28477_v55 = vld [vmem:[#allocation55_spill] sm:$0xff]  ;;  %v28481_v62 = vld [vmem:[#allocation49_spill] sm:$0xff] }
 0x52a   : > { %28469 = vst [vmem:[#allocation95_spill] sm:$0xff] %v27862_v25  ;;  %v19871_v25 = vrot.slane %v19869_v9, 4  ;;  %v19864_v27 = vrot.slane %v19862_v20, 4  ;;  %v27899_v6 = vsel %vm26812_vm4, %v21416_v57, %v19862_v20  ;;  %v18473_v20 = vadd.f32 %v27692_v8, %v18047_v26  ;;  %v27917_v9 = vpop.f32.mrf.mxu0  ;;  %v28479_v28 = vld [vmem:[#allocation91_spill] sm:$0xff] }
 0x52b   : > { %v27872_v60 = vpop.f32.mrf.mxu1  ;;  %v19919_v8 = vunpack.c.l.bf16 %v27891_v43  ;;  %v19924_v26 = vunpack.c.l.bf16 %v27895_v5  ;;  %v18775_v41 = vadd.f32 %v27830_v2, %v18477_v58  ;;  %v28478_v2 = vld [vmem:[#allocation58_spill] sm:$0xff]  ;;  %v18773_v46 = vadd.f32 %v28479_v28, %v18475_v63 }
 0x52c   : > { %28471 = vst [vmem:[#allocation99_spill] sm:$0xff] %v27872_v60  ;;  %v21402_v60 = vld [vmem:[%s22855_s26 + $0x48] sm:$0xe]  ;;  %v27907_v35 = vsel %vm26812_vm4, %v19871_v25, %v19872_v12  ;;  %v27911_v54 = vsel %vm26812_vm4, %v19864_v27, %v19865_v49  ;;  %v19885_v25 = vrot.slane %v19883_v29, 4  ;;  %v19878_v27 = vrot.slane %v19876_v32, 4  ;;  %v27939_v51 = vpop.f32.mrf.mxu0 }
 0x52d   : > { %v27880_v50 = vpop.f32.mrf.mxu1  ;;  %v21418_v57 = vrot.slane %v21402_v60, 9  ;;  %v18771_v16 = vadd.f32 %v27818_v42, %v18473_v20  ;;  %v19922_v60 = vunpack.c.l.bf16 %v27899_v6  ;;  %v19925_v15 = vunpack.c.l.bf16 %v27907_v35 }
 0x52e   : > { %28472 = vst [vmem:[#allocation101_spill] sm:$0xff] %v27880_v50  ;;  %v21404_v50 = vld [vmem:[%s22855_s26 + $0x50] sm:$0x1]  ;;  %v27943_v42 = vsel %vm26812_vm4, %v21419_v0, %v19883_v29  ;;  %v27977_v3 = vpop.f32.mrf.mxu0 }
 0x52f   : > { %v27903_v33 = vpop.f32.mrf.mxu1  ;;  %v19879_v49 = vrot.slane %v21404_v50, 5  ;;  %v27947_v50 = vsel %vm26812_vm4, %v21418_v57, %v19876_v32  ;;  %v18052_v32 = vadd.f32 %v27788_v47, %v27722_v61  ;;  %v19014_v10 = vadd.f32 %v27757_v23, %v18771_v16 }
 0x530   : > { %28473 = vst [vmem:[#allocation106_spill] sm:$0xff] %v27903_v33  ;;  %v19886_v33 = vrot.slane %v21407_v52, 5  ;;  %v19923_v52 = vunpack.c.l.bf16 %v27911_v54  ;;  %v19928_v0 = vunpack.c.l.bf16 %v27943_v42  ;;  %v19926_v57 = vunpack.c.l.bf16 %v27947_v50  ;;  %v22447_v30 = vpop.f32.mrf.mxu0 }
 0x531   : > { %v27919_v12 = vpop.f32.mrf.mxu1  ;;  %v27961_v29 = vsel %vm26812_vm4, %v19878_v27, %v19879_v49  ;;  %v18770_v61 = vadd.f32 %v27828_v24, %v18472_v34  ;;  %v19012_v23 = vadd.f32 %v27762_v31, %v18769_v19  ;;  %v18478_v27 = vadd.f32 %v27712_v40, %v18052_v32  ;;  %v28004_v40 = vld [vmem:[%s28165_s6] ss:$0 sm:$0xff]  ;;  %v28475_v19 = vld [vmem:[#allocation93_spill] sm:$0xff]  ;;  %v28480_v34 = vld [vmem:[#allocation98_spill] sm:$0xff] }
 0x532   : > { %v27957_v17 = vsel %vm26812_vm4, %v19885_v25, %v19886_v33  ;;  %v19927_v25 = vunpack.c.l.bf16 %v27961_v29  ;;  %v18481_v16 = vadd.f32 %v28474_v56, %v18055_v11  ;;  %v18054_v32 = vadd.f32 %v28478_v2, %v28477_v55 }
 0x533   : > { %v27926_v53 = vpop.f32.mrf.mxu1  ;;  %v19929_v47 = vunpack.c.l.bf16 %v27957_v17  ;;  %v19013_v44 = vadd.f32 %v28476_v1, %v18770_v61  ;;  %v18479_v11 = vadd.f32 %v28481_v62, %v18053_v14  ;;  %v28483_v61 = vld [vmem:[#allocation87_spill] sm:$0xff]  ;;  %v19692_v14 = vpop.f32.mrf.mxu0  ;;  %v28487_v55 = vunpack.c.l.bf16 %v27858_v39  ;;  %v28490_v39 = vld [vmem:[#allocation65_spill] sm:$0xff] }
 0x535   : > { %v27953_v20 = vpop.f32.mrf.mxu1 }
 0x537   : > { %v22410_v33 = vpop.f32.mrf.mxu1 }
 0x538   : > { %v19440_v38 = vadd.f32 %v22410_v33, %v19014_v10  ;;  %v18776_v10 = vadd.f32 %v28480_v34, %v18478_v27 }
 0x539   : > { %v19375_v24 = vpop.f32.mrf.mxu1 }
 0x53a   : > { %v19738_v31 = vadd.f32 %v27843_v7, %v19440_v38  ;;  %v19438_v49 = vadd.f32 %v19375_v24, %v19012_v23  ;;  %v19019_v34 = vadd.f32 %v28490_v39, %v18776_v10 }
 0x53b   : > { %v22411_v7 = vpop.f32.mrf.mxu1 }
 0x53c   : > { %v19761_v4 = vmul.f32 %v27988_v21, %v19738_v31  ;;  %v19736_v18 = vadd.f32 %v28475_v19, %v19438_v49  ;;  %v19441_v22 = vadd.f32 %v22411_v7, %v19015_v48  ;;  %v28482_v31 = vld [vmem:[#allocation39_spill] sm:$0xff]  ;;  %v28484_v48 = vld [vmem:[#allocation100_spill] sm:$0xff]  ;;  %v28485_v7 = vld [vmem:[#allocation25_spill] sm:$0xff] }
 0x53d   : > { %v19378_v33 = vpop.f32.mrf.mxu1  ;;  %v18059_v49 = vadd.f32 %v28483_v61, %v28482_v31  ;;  %v18774_v56 = vadd.f32 %v28484_v48, %v18476_v37  ;;  %v18482_v63 = vadd.f32 %v28485_v7, %v18056_v13  ;;  %v28486_v19 = vld [vmem:[#allocation63_spill] sm:$0xff]  ;;  %v22450_v7 = vpop.f32.mrf.mxu0 }
 0x53e   : > { %v19784_v38 = vadd.f32 %v28004_v40, %v19761_v4  ;;  %v19759_v23 = vmul.f32 %v27988_v21, %v19736_v18  ;;  %v19739_v58 = vadd.f32 %v27876_v45, %v19441_v22  ;;  %v19439_v24 = vadd.f32 %v19378_v33, %v19013_v44  ;;  %v28488_v37 = vld [vmem:[#allocation79_spill] sm:$0xff]  ;;  %v28489_v22 = vld [vmem:[#allocation50_spill] sm:$0xff] }
 0x53f   : > { %v19018_v27 = vadd.f32 %v28486_v19, %v18775_v41  ;;  %v22414_v1 = vpop.f32.mrf.mxu1  ;;  %v18779_v13 = vadd.f32 %v28488_v37, %v18481_v16  ;;  %v19016_v44 = vadd.f32 %v28489_v22, %v18773_v46  ;;  %v28491_v33 = vunpack.c.l.bf16 %v27866_v59  ;;  %v28493_v48 = vld [vmem:[#allocation83_spill] sm:$0xff]  ;;  %v28494_v19 = vld [vmem:[#allocation102_spill] sm:$0xff] }
 0x540   : > { %v19936_v2 = vadd.f32 %v28487_v55, %v19784_v38  ;;  %v19782_v4 = vadd.f32 %v28004_v40, %v19759_v23  ;;  %v19762_v18 = vmul.f32 %v27988_v21, %v19739_v58  ;;  %v19737_v45 = vadd.f32 %v27917_v9, %v19439_v24  ;;  %v28492_v58 = vld [vmem:[#allocation95_spill] sm:$0xff] }
 0x541   : > { %v19444_v41 = vadd.f32 %v22414_v1, %v19018_v27  ;;  %v19391_v28 = vpop.f32.mrf.mxu1  ;;  %v18777_v24 = vadd.f32 %v28492_v58, %v18479_v11  ;;  %v19017_v46 = vadd.f32 %v28493_v48, %v18774_v56  ;;  %v28495_v27 = vunpack.c.l.bf16 %v28494_v19  ;;  %v28503_v19 = vld [vmem:[#allocation53_spill] sm:$0xff] }
 0x542   : > { %v19952_v62 = vmax.f32 %v19936_v2, 0.0  ;;  %v19934_v38 = vadd.f32 %v28491_v33, %v19782_v4  ;;  %v19785_v9 = vadd.f32 %v28004_v40, %v19762_v18  ;;  %v19760_v23 = vmul.f32 %v27988_v21, %v19737_v45  ;;  %v28496_v2 = vld [vmem:[#allocation26_spill] sm:$0xff]  ;;  %v28497_v45 = vld [vmem:[#allocation85_spill] sm:$0xff] }
 0x543   : > { %v19742_v31 = vadd.f32 %v27939_v51, %v19444_v41  ;;  %v19442_v16 = vadd.f32 %v19391_v28, %v19016_v44  ;;  %v22415_v61 = vpop.f32.mrf.mxu1  ;;  %v18480_v4 = vadd.f32 %v28496_v2, %v18054_v32  ;;  %v19022_v37 = vadd.f32 %v28497_v45, %v18779_v13  ;;  %v28498_v28 = vld [vmem:[#allocation99_spill] sm:$0xff]  ;;  %v28499_v33 = vld [vmem:[#allocation54_spill] sm:$0xff] }
 0x544   : > { %19968 = vst [vmem:[%s28031_s19 + $0x10] sm:$0xff] %v19952_v62  ;;  %v19950_v10 = vmax.f32 %v19934_v38, 0.0  ;;  %v19937_v59 = vadd.f32 %v28495_v27, %v19785_v9  ;;  %v19783_v1 = vadd.f32 %v28004_v40, %v19760_v23  ;;  %v19445_v55 = vadd.f32 %v22415_v61, %v19019_v34  ;;  %v19705_v38 = vpop.f32.mrf.mxu0 }
 0x545   : > { %v19765_v11 = vmul.f32 %v27988_v21, %v19742_v31  ;;  %v19740_v51 = vadd.f32 %v27977_v3, %v19442_v16  ;;  %v19394_v18 = vpop.f32.mrf.mxu1  ;;  %v18780_v39 = vadd.f32 %v28498_v28, %v18482_v63  ;;  %v19020_v3 = vadd.f32 %v28499_v33, %v18777_v24  ;;  %v28502_v31 = vld [vmem:[#allocation101_spill] sm:$0xff] }
 0x546   : > { %19966 = vst [vmem:[%s28031_s19] sm:$0xff] %v19950_v10  ;;  %v19953_v56 = vmax.f32 %v19937_v59, 0.0  ;;  %v19935_v41 = vadd.f32 %v19919_v8, %v19783_v1  ;;  %v19743_v22 = vadd.f32 %v22447_v30, %v19445_v55  ;;  %v19443_v44 = vadd.f32 %v19394_v18, %v19017_v46  ;;  %v28500_v8 = vld [vmem:[#allocation43_spill] sm:$0xff]  ;;  %v28501_v30 = vld [vmem:[#allocation84_spill] sm:$0xff]  ;;  %v22451_v2 = vpop.f32.mrf.mxu0  ;;  %v28506_v18 = vld [vmem:[#allocation86_spill] sm:$0xff] }
 0x547   : > { %v19788_v32 = vadd.f32 %v28004_v40, %v19765_v11  ;;  %v19763_v34 = vmul.f32 %v27988_v21, %v19740_v51  ;;  %v22418_v62 = vpop.f32.mrf.mxu1  ;;  %v18057_v58 = vadd.f32 %v28501_v30, %v28500_v8  ;;  %v18778_v63 = vadd.f32 %v28502_v31, %v18480_v4  ;;  %v28504_v55 = vld [vmem:[#allocation56_spill] sm:$0xff]  ;;  %v21411_v28 = vld [vmem:[%s22855_s26 + $0x6c] sm:$0xe] }
 0x548   : > { %19969 = vst [vmem:[%s28031_s19 + $0x18] sm:$0xff] %v19953_v56  ;;  %v19951_v13 = vmax.f32 %v19935_v41, 0.0  ;;  %v19766_v9 = vmul.f32 %v27988_v21, %v19743_v22  ;;  %v19741_v23 = vadd.f32 %v19692_v14, %v19443_v44  ;;  %v19448_v43 = vadd.f32 %v22418_v62, %v19022_v37  ;;  %v28507_v37 = vld [vmem:[#allocation62_spill] sm:$0xff]  ;;  %v28510_v33 = vld [vmem:[#allocation57_spill] sm:$0xff]  ;;  %v19708_v54 = vpop.f32.mrf.mxu0  ;;  %v21408_v31 = vld [vmem:[%s22855_s26 + $0x60] sm:$0xe] }
 0x549   : > { %v19940_v16 = vadd.f32 %v19924_v26, %v19788_v32  ;;  %v19786_v61 = vadd.f32 %v28004_v40, %v19763_v34  ;;  %v19407_v48 = vpop.f32.mrf.mxu1  ;;  %v18485_v27 = vadd.f32 %v28503_v19, %v18059_v49  ;;  %v19023_v5 = vadd.f32 %v28504_v55, %v18780_v39  ;;  %v28505_v49 = vld [vmem:[#allocation44_spill] sm:$0xff]  ;;  %v21412_v39 = vld [vmem:[%s22855_s26 + $0x70] sm:$0xf]  ;;  %v28508_v32 = vld [vmem:[#allocation47_spill] sm:$0xff] }
 0x54a   : > { %19967 = vst [vmem:[%s28031_s19 + $0x8] sm:$0xff] %v19951_v13  ;;  %v19789_v24 = vadd.f32 %v28004_v40, %v19766_v9  ;;  %v19764_v46 = vmul.f32 %v27988_v21, %v19741_v23  ;;  %v19746_v10 = vadd.f32 %v22450_v7, %v19448_v43  ;;  %v19446_v14 = vadd.f32 %v19407_v48, %v19020_v3  ;;  %v28509_v34 = vld [vmem:[#allocation88_spill] sm:$0xff] }
 0x54b   : > { %v19956_v59 = vmax.f32 %v19940_v16, 0.0  ;;  %v19938_v1 = vadd.f32 %v19922_v60, %v19786_v61  ;;  %v22419_v26 = vpop.f32.mrf.mxu1  ;;  %v18060_v45 = vadd.f32 %v28506_v18, %v28505_v49  ;;  %v19021_v56 = vadd.f32 %v28507_v37, %v18778_v63  ;;  %v21409_v63 = vld [vmem:[%s22855_s26 + $0x64] sm:$0xf] }
 0x54c   : > { %v19941_v4 = vadd.f32 %v19925_v15, %v19789_v24  ;;  %v19787_v11 = vadd.f32 %v28004_v40, %v19764_v46  ;;  %v19769_v7 = vmul.f32 %v27988_v21, %v19746_v10  ;;  %v19744_v51 = vadd.f32 %v19705_v38, %v19446_v14  ;;  %v28512_v10 = vld [vmem:[#allocation42_spill] sm:$0xff] }
 0x54d   : > { %19972 = vst [vmem:[%s28031_s19 + $0x30] sm:$0xff] %v19956_v59  ;;  %v19954_v6 = vmax.f32 %v19938_v1, 0.0  ;;  %v19449_v60 = vadd.f32 %v22419_v26, %v19023_v5  ;;  %v19410_v41 = vpop.f32.mrf.mxu1  ;;  %v18058_v62 = vadd.f32 %v28509_v34, %v28508_v32  ;;  %v18483_v3 = vadd.f32 %v28510_v33, %v18057_v58 }
 0x54e   : > { %v19957_v22 = vmax.f32 %v19941_v4, 0.0  ;;  %v19939_v35 = vadd.f32 %v19923_v52, %v19787_v11  ;;  %v19792_v15 = vadd.f32 %v28004_v40, %v19769_v7  ;;  %v19767_v44 = vmul.f32 %v27988_v21, %v19744_v51  ;;  %v28511_v52 = vld [vmem:[#allocation106_spill] sm:$0xff]  ;;  %v28514_v11 = vld [vmem:[#allocation64_spill] sm:$0xff]  ;;  %v21410_v51 = vld [vmem:[%s22855_s26 + $0x68] sm:$0x1] }
 0x54f   : > { %19970 = vst [vmem:[%s28031_s19 + $0x20] sm:$0xff] %v19954_v6  ;;  %v19747_v38 = vadd.f32 %v22451_v2, %v19449_v60  ;;  %v19447_v13 = vadd.f32 %v19410_v41, %v19021_v56  ;;  %v22422_v9 = vpop.f32.mrf.mxu1  ;;  %v18783_v23 = vadd.f32 %v28511_v52, %v18485_v27  ;;  %v21421_v48 = vrot.slane %v21411_v28, 9  ;;  %v28515_v60 = vld [vmem:[#allocation92_spill] sm:$0xff] }
 0x550   : > { %19973 = vst [vmem:[%s28031_s19 + $0x38] sm:$0xff] %v19957_v22  ;;  %v19955_v43 = vmax.f32 %v19939_v35, 0.0  ;;  %v19944_v8 = vadd.f32 %v19928_v0, %v19792_v15  ;;  %v19790_v30 = vadd.f32 %v28004_v40, %v19767_v44  ;;  %v19897_v24 = vrot.slane %v21412_v39, 5  ;;  %v21413_v0 = vld [vmem:[%s22855_s26 + $0x74] sm:$0x1] }
 0x551   : > { %v19770_v58 = vmul.f32 %v27988_v21, %v19747_v38  ;;  %v19745_v16 = vadd.f32 %v19708_v54, %v19447_v13  ;;  %v19423_v61 = vpop.f32.mrf.mxu1  ;;  %v18781_v46 = vadd.f32 %v27919_v12, %v18483_v3  ;;  %v18486_v14 = vadd.f32 %v28512_v10, %v18060_v45  ;;  %v28513_v12 = vld [vmem:[#allocation61_spill] sm:$0xff]  ;;  %v28516_v44 = vld [vmem:[#allocation94_spill] sm:$0xff] }
 0x552   : > { %19971 = vst [vmem:[%s28031_s19 + $0x28] sm:$0xff] %v19955_v43  ;;  %v19960_v19 = vmax.f32 %v19944_v8, 0.0  ;;  %v19942_v42 = vadd.f32 %v19926_v57, %v19790_v30  ;;  %v21420_v55 = vrot.slane %v21408_v31, 9  ;;  %v19890_v5 = vrot.slane %v21409_v63, 5 }
 0x553   : > { %v19793_v27 = vadd.f32 %v28004_v40, %v19770_v58  ;;  %v19768_v59 = vmul.f32 %v27988_v21, %v19745_v16  ;;  %v22423_v1 = vpop.f32.mrf.mxu1  ;;  %v18784_v26 = vadd.f32 %v27926_v53, %v18486_v14  ;;  %v18484_v2 = vadd.f32 %v28513_v12, %v18058_v62 }
 0x554   : > { %19976 = vst [vmem:[%s28031_s19 + $0x50] sm:$0xff] %v19960_v19  ;;  %v19958_v4 = vmax.f32 %v19942_v42, 0.0  ;;  %v19026_v7 = vadd.f32 %v28514_v11, %v18783_v23  ;;  %v19899_v18 = vrot.slane %v19897_v24, 4  ;;  %v19900_v45 = vrot.slane %v21413_v0, 5 }
 0x555   : > { %v19945_v50 = vadd.f32 %v19929_v47, %v19793_v27  ;;  %v19791_v57 = vadd.f32 %v28004_v40, %v19768_v59  ;;  %v19426_v49 = vpop.f32.mrf.mxu1  ;;  %v18782_v6 = vadd.f32 %v27953_v20, %v18484_v2  ;;  %v19024_v37 = vadd.f32 %v28515_v60, %v18781_v46 }
 0x556   : > { %19974 = vst [vmem:[%s28031_s19 + $0x40] sm:$0xff] %v19958_v4  ;;  %v19452_v53 = vadd.f32 %v22422_v9, %v19026_v7  ;;  %v19898_v56 = vsel %vm26812_vm4, %v21421_v48, %v19897_v24  ;;  %v19892_v22 = vrot.slane %v19890_v5, 4  ;;  %v19893_v35 = vrot.slane %v21410_v51, 5 }
 0x557   : > { %v19961_v41 = vmax.f32 %v19945_v50, 0.0  ;;  %v19943_v17 = vadd.f32 %v19927_v25, %v19791_v57  ;;  %v22454_v47 = vpop.f32.mrf.mxu1  ;;  %v19450_v15 = vadd.f32 %v19423_v61, %v19024_v37  ;;  %v19027_v28 = vadd.f32 %v28516_v44, %v18784_v26  ;;  %v28517_v25 = vld [vmem:[#allocation66_spill] sm:$0xff] }
 0x558   : > { %v19750_v39 = vadd.f32 %v22454_v47, %v19452_v53  ;;  %v19891_v20 = vsel %vm26812_vm4, %v21420_v55, %v19890_v5  ;;  %v19932_v34 = vunpack.c.l.bf16 %v19898_v56  ;;  %v19901_v33 = vsel %vm26812_vm4, %v19899_v18, %v19900_v45 }
 0x559   : > { %19977 = vst [vmem:[%s28031_s19 + $0x58] sm:$0xff] %v19961_v41  ;;  %v19959_v32 = vmax.f32 %v19943_v17, 0.0  ;;  %v19721_v62 = vpop.f32.mrf.mxu1  ;;  %v19453_v29 = vadd.f32 %v22423_v1, %v19027_v28  ;;  %v19025_v3 = vadd.f32 %v28517_v25, %v18782_v6  ;;  %v19930_v9 = vunpack.c.l.bf16 %v19891_v20 }
 0x55a   : > { %v19773_v38 = vmul.f32 %v27988_v21, %v19750_v39  ;;  %v19748_v13 = vadd.f32 %v19721_v62, %v19450_v15  ;;  %v19894_v52 = vsel %vm26812_vm4, %v19892_v22, %v19893_v35  ;;  %v19933_v31 = vunpack.c.l.bf16 %v19901_v33 }
 0x55b   : > { %19975 = vst [vmem:[%s28031_s19 + $0x48] sm:$0xff] %v19959_v32  ;;  %v22455_v54 = vpop.f32.mrf.mxu1  ;;  %v19451_v23 = vadd.f32 %v19426_v49, %v19025_v3  ;;  %v19931_v36 = vunpack.c.l.bf16 %v19894_v52 }
 0x55c   : > { %v19796_v43 = vadd.f32 %v28004_v40, %v19773_v38  ;;  %v19771_v8 = vmul.f32 %v27988_v21, %v19748_v13  ;;  %v19751_v30 = vadd.f32 %v22455_v54, %v19453_v29 }
 0x55d   : > { %v19724_v63 = vpop.f32.mrf.mxu1 }
 0x55e   : > { %v19948_v58 = vadd.f32 %v19932_v34, %v19796_v43  ;;  %v19794_v16 = vadd.f32 %v28004_v40, %v19771_v8  ;;  %v19774_v61 = vmul.f32 %v27988_v21, %v19751_v30  ;;  %v19749_v48 = vadd.f32 %v19724_v63, %v19451_v23 }
 0x560   : > { %v19964_v24 = vmax.f32 %v19948_v58, 0.0  ;;  %v19946_v46 = vadd.f32 %v19930_v9, %v19794_v16  ;;  %v19797_v10 = vadd.f32 %v28004_v40, %v19774_v61  ;;  %v19772_v14 = vmul.f32 %v27988_v21, %v19749_v48 }
 0x562   : > { %19980 = vst [vmem:[%s28031_s19 + $0x70] sm:$0xff] %v19964_v24  ;;  %v19962_v19 = vmax.f32 %v19946_v46, 0.0  ;;  %v19949_v42 = vadd.f32 %v19933_v31, %v19797_v10  ;;  %v19795_v0 = vadd.f32 %v28004_v40, %v19772_v14 }
 0x564   : > { %19978 = vst [vmem:[%s28031_s19 + $0x60] sm:$0xff] %v19962_v19  ;;  %v19965_v27 = vmax.f32 %v19949_v42, 0.0  ;;  %v19947_v59 = vadd.f32 %v19931_v36, %v19795_v0 }
 0x566   : > { %19981 = vst [vmem:[%s28031_s19 + $0x78] sm:$0xff] %v19965_v27  ;;  %v19963_v1 = vmax.f32 %v19947_v59, 0.0 }
 0x568   : > { %19979 = vst [vmem:[%s28031_s19 + $0x68] sm:$0xff] %v19963_v1 }
 0x569 PF: > { %s20_s17 = sadd.s32 1, %s22727_s17   ;;  %s28518_s13 = smov %s22719_s15 }
 0x56a   : > { %p17_p7 = scmp.ge.s32.totalorder %s20_s17, 6   ;;  %s28519_s14 = smov %s22723_s16 }
 0x56b   : > { %s28520_s15 = smov %s28523_s7  ;;  %s28521_s16 = smov %s28527_s8 }
 0x56c   :  { %19 = sbr.rel (!%p17_p7) target bundleno = 3 (0x3), region = 111 }

</bundles_post_ra>
